<compile_context>
chip_gen: v5e
topology: v5e:2x2
jax: 0.10.0
libtpu: 0.0.40
codegen_flags: <defaults>
</compile_context>

<pallas_src>
import jax
import jax.numpy as jnp
import numpy as np
from jax.experimental import pallas as pl
from jax.experimental.pallas import tpu as pltpu


def _make_kernel(coord_lo, coord_hi, resolution):
    # Bake the (static) coordinate range / resolution in as Python scalars so
    # nothing is captured as a traced array constant.
    lo = [float(v) for v in coord_lo]
    hi = [float(v) for v in coord_hi]
    res = [float(v) for v in resolution]

    def kernel(pos_ref, colf_ref, voxT_ref, out_ref):
        pos = pos_ref[...]        # [4, TN]  f32 rows: t, x, y, z (lane-dense)
        colf = colf_ref[...]      # [V_pad, 4] f32 grid coords (-2.0 on padding)

        # --- convert_to_voxel_coordinate + in-range mask on [1, TN] rows ----
        ps = []
        mask = None
        for d in range(4):
            x = pos[d:d + 1, :]                              # [1, TN]
            n = (x - lo[d]) * (1.0 / (hi[d] - lo[d]))        # normalized coord
            inb = (n >= 0.0) & (n < 1.0)
            mask = inb if mask is None else (mask & inb)
            ps.append(n * res[d])                            # voxel-space coord

        # Fold the mask into the t axis only: an impossible coordinate makes
        # every t-axis tent weight zero, which zeroes the whole column of W.
        ps[0] = jnp.where(mask, ps[0], -10.0)                # [1, TN]

        # --- factored tent-filter weight build: W[v, n] is the quadrilinear
        # weight of voxel row v for point n (nonzero only on the 16 corners).
        #   relu(1 - |c - p|) == 1 - frac   at c == floor(p)
        #                     == frac       at c == floor(p) + 1
        #                     == 0          elsewhere (and on padding rows).
        W = None
        for d in range(4):
            f = jnp.maximum(1.0 - jnp.abs(colf[:, d:d + 1] - ps[d]), 0.0)
            W = f if W is None else W * f                    # [V_pad, TN] f32

        # --- gather + blend with one MXU matmul; lane-dense [C, TN] output ---
        out_ref[...] = jnp.dot(voxT_ref[...], W,
                               preferred_element_type=jnp.float32)

    return kernel


def dynamic_nerf_forward(positions, voxel, coord_range, resolution, tile_n=256):
    """positions: [N,4] f32; voxel: [Rt+1,Rx+1,Ry+1,Rz+1,C] f32 -> [N,C] f32."""
    N = positions.shape[0]
    res = tuple(int(r) for r in resolution)
    dims = tuple(r + 1 for r in res)
    C = voxel.shape[-1]
    V = int(np.prod(dims))
    V_pad = ((V + 127) // 128) * 128        # lane/sublane aligned table rows

    assert N % tile_n == 0, "pad N to a multiple of tile_n"

    # Voxel table stored lane-dense as [C, V_pad], zero-padded (padded rows can
    # never receive weight anyway — see the -2.0 coordinate padding below).
    vox_T = jnp.transpose(voxel.reshape(V, C))                       # [C, V]
    vox_T = jnp.pad(vox_T, ((0, 0), (0, V_pad - V)))                 # [C, V_pad]

    # Static per-row (t, x, y, z) coordinates of the flattened voxel table,
    # as float32 so the kernel needs no int->float conversion.
    grids = np.meshgrid(*(np.arange(d) for d in dims), indexing="ij")
    cols = np.stack([g.ravel() for g in grids], axis=1).astype(np.float32)
    cols = np.concatenate(
        [cols, np.full((V_pad - V, 4), -2.0, dtype=np.float32)], axis=0
    )                                                                # [V_pad, 4]
    cols = jnp.asarray(cols)

    pos_T = jnp.transpose(positions)                                 # [4, N]

    kernel = _make_kernel(coord_range[0], coord_range[1], res)

    cost = pl.CostEstimate(
        flops=int(2 * N * V_pad * C + 19 * N * V_pad),
        transcendentals=0,
        bytes_accessed=int(4 * (4 * N + 4 * V_pad + C * V_pad + C * N)),
    )

    out_cn = pl.pallas_call(
        kernel,
        out_shape=jax.ShapeDtypeStruct((C, N), jnp.float32),
        grid_spec=pltpu.PrefetchScalarGridSpec(
            num_scalar_prefetch=0,
            grid=(N // tile_n,),
            in_specs=[
                pl.BlockSpec((4, tile_n), lambda i: (0, i)),     # positions^T tile
                pl.BlockSpec((V_pad, 4), lambda i: (0, 0)),      # grid coords (f32)
                # constant index_map -> fetched once and kept resident
                pl.BlockSpec((C, V_pad), lambda i: (0, 0)),      # voxel table^T
            ],
            out_specs=pl.BlockSpec((C, tile_n), lambda i: (0, i)),
        ),
        compiler_params=pltpu.CompilerParams(
            dimension_semantics=("parallel",),
            vmem_limit_bytes=32 * 1024 * 1024,
        ),
        cost_estimate=cost,
    )(pos_T, cols, vox_T)

    return jnp.transpose(out_cn)                                     # [N, C]


def reference_forward(positions, voxel, coord_range, resolution):
    """Pure-JAX reference of the PyTorch forward (mask-as-zero instead of scatter)."""
    lo = jnp.asarray(coord_range[0], jnp.float32)[None, :]
    hi = jnp.asarray(coord_range[1], jnp.float32)[None, :]
    res = jnp.asarray(resolution, jnp.float32)[None, :]
    p = (positions - lo) / (hi - lo)
    mask = jnp.all((p >= 0.0) & (p < 1.0), axis=1)
    p = p * res
    idx_f = jnp.floor(p)
    idx = jnp.clip(idx_f, 0.0, res - 1.0).astype(jnp.int32)
    frac = p - idx_f

    dims = voxel.shape[:-1]
    C = voxel.shape[-1]
    V = int(np.prod(dims))
    strides = np.array([dims[1] * dims[2] * dims[3],
                        dims[2] * dims[3], dims[3], 1], np.int32)
    vox_flat = voxel.reshape(V, C)
    base = jnp.sum(idx * jnp.asarray(strides)[None, :], axis=1)

    w = [(1.0 - frac[:, d], frac[:, d]) for d in range(4)]
    out = jnp.zeros((positions.shape[0], C), jnp.float32)
    for dt in (0, 1):
        for dx in (0, 1):
            for dy in (0, 1):
                for dz in (0, 1):
                    off = int(dt * strides[0] + dx * strides[1] +
                              dy * strides[2] + dz * strides[3])
                    wgt = w[0][dt] * w[1][dx] * w[2][dy] * w[3][dz]
                    out = out + wgt[:, None] * vox_flat[base + off]
    return out * mask[:, None].astype(jnp.float32)


if __name__ == "__main__":
    key = jax.random.PRNGKey(0)
    k_vox, k_pos = jax.random.split(key)

    resolution = (4, 4, 4, 4)            # -> voxel grid (5,5,5,5,C), V = 625
    channels = 8
    N = 512                              # 2 grid steps of 256 -> both v7x TCs busy
    coord_range = np.array([[0.0, 0.0, 0.0, 0.0],
                            [1.0, 1.0, 1.0, 1.0]], np.float32)

    dims = tuple(r + 1 for r in resolution)
    voxel = jax.random.normal(k_vox, dims + (channels,), dtype=jnp.float32)
    # some points fall outside the coord range so the mask path is exercised
    positions = jax.random.uniform(k_pos, (N, 4), dtype=jnp.float32,
                                   minval=-0.1, maxval=1.1)

    out = dynamic_nerf_forward(positions, voxel, coord_range, resolution,
                               tile_n=256)
    out = jax.block_until_ready(out)

    ref = reference_forward(positions, voxel, coord_range, resolution)
    np.testing.assert_allclose(np.asarray(out), np.asarray(ref),
                               rtol=2e-2, atol=2e-2)
    print("KERNEL_OK")
</pallas_src>

<mosaic_0001>
module attributes {stable_mosaic.version = 11 : i64} {
  func.func @kernel(%arg0: i32, %arg1: memref<4x256xf32, #tpu.memory_space<vmem>>, %arg2: memref<640x4xf32, #tpu.memory_space<vmem>>, %arg3: memref<8x640xf32, #tpu.memory_space<vmem>>, %arg4: memref<8x256xf32, #tpu.memory_space<vmem>>) attributes {dimension_semantics = [#tpu.dimension_semantics<parallel>], iteration_bounds = array<i64: 2>, scalar_prefetch = 0 : i64, scratch_operands = 0 : i64, tpu.core_type = #tpu.core_type<tc>, window_params = [{transform_indices = @transform_0, window_bounds = array<i64: 4, 256>}, {pipeline_mode = #tpu.pipeline_mode<synchronous>, transform_indices = @transform_1, window_bounds = array<i64: 640, 4>}, {pipeline_mode = #tpu.pipeline_mode<synchronous>, transform_indices = @transform_2, window_bounds = array<i64: 8, 640>}, {transform_indices = @transform_3, window_bounds = array<i64: 8, 256>}]} {
    %c0 = arith.constant 0 : index
    %c0_0 = arith.constant 0 : index
    %0 = vector.load %arg1[%c0, %c0_0] : memref<4x256xf32, #tpu.memory_space<vmem>>, vector<4x256xf32>
    %c0_1 = arith.constant 0 : index
    %c0_2 = arith.constant 0 : index
    %1 = vector.load %arg2[%c0_1, %c0_2] : memref<640x4xf32, #tpu.memory_space<vmem>>, vector<640x4xf32>
    %2 = vector.extract_strided_slice %0 {offsets = [0, 0], sizes = [1, 256], strides = [1, 1]} : vector<4x256xf32> to vector<1x256xf32>
    %cst = arith.constant 0.000000e+00 : f32
    %3 = vector.broadcast %cst : f32 to vector<1x256xf32>
    %4 = arith.subf %2, %3 : vector<1x256xf32>
    %cst_3 = arith.constant 1.000000e+00 : f32
    %5 = vector.broadcast %cst_3 : f32 to vector<1x256xf32>
    %6 = arith.mulf %4, %5 : vector<1x256xf32>
    %cst_4 = arith.constant 0.000000e+00 : f32
    %7 = vector.broadcast %cst_4 : f32 to vector<1x256xf32>
    %8 = arith.cmpf oge, %6, %7 : vector<1x256xf32>
    %cst_5 = arith.constant 1.000000e+00 : f32
    %9 = vector.broadcast %cst_5 : f32 to vector<1x256xf32>
    %10 = arith.cmpf olt, %6, %9 : vector<1x256xf32>
    %11 = arith.andi %8, %10 : vector<1x256xi1>
    %cst_6 = arith.constant 4.000000e+00 : f32
    %12 = vector.broadcast %cst_6 : f32 to vector<1x256xf32>
    %13 = arith.mulf %6, %12 : vector<1x256xf32>
    %14 = vector.extract_strided_slice %0 {offsets = [1, 0], sizes = [1, 256], strides = [1, 1]} : vector<4x256xf32> to vector<1x256xf32>
    %cst_7 = arith.constant 0.000000e+00 : f32
    %15 = vector.broadcast %cst_7 : f32 to vector<1x256xf32>
    %16 = arith.subf %14, %15 : vector<1x256xf32>
    %cst_8 = arith.constant 1.000000e+00 : f32
    %17 = vector.broadcast %cst_8 : f32 to vector<1x256xf32>
    %18 = arith.mulf %16, %17 : vector<1x256xf32>
    %cst_9 = arith.constant 0.000000e+00 : f32
    %19 = vector.broadcast %cst_9 : f32 to vector<1x256xf32>
    %20 = arith.cmpf oge, %18, %19 : vector<1x256xf32>
    %cst_10 = arith.constant 1.000000e+00 : f32
    %21 = vector.broadcast %cst_10 : f32 to vector<1x256xf32>
    %22 = arith.cmpf olt, %18, %21 : vector<1x256xf32>
    %23 = arith.andi %20, %22 : vector<1x256xi1>
    %24 = arith.andi %11, %23 : vector<1x256xi1>
    %cst_11 = arith.constant 4.000000e+00 : f32
    %25 = vector.broadcast %cst_11 : f32 to vector<1x256xf32>
    %26 = arith.mulf %18, %25 : vector<1x256xf32>
    %27 = vector.extract_strided_slice %0 {offsets = [2, 0], sizes = [1, 256], strides = [1, 1]} : vector<4x256xf32> to vector<1x256xf32>
    %cst_12 = arith.constant 0.000000e+00 : f32
    %28 = vector.broadcast %cst_12 : f32 to vector<1x256xf32>
    %29 = arith.subf %27, %28 : vector<1x256xf32>
    %cst_13 = arith.constant 1.000000e+00 : f32
    %30 = vector.broadcast %cst_13 : f32 to vector<1x256xf32>
    %31 = arith.mulf %29, %30 : vector<1x256xf32>
    %cst_14 = arith.constant 0.000000e+00 : f32
    %32 = vector.broadcast %cst_14 : f32 to vector<1x256xf32>
    %33 = arith.cmpf oge, %31, %32 : vector<1x256xf32>
    %cst_15 = arith.constant 1.000000e+00 : f32
    %34 = vector.broadcast %cst_15 : f32 to vector<1x256xf32>
    %35 = arith.cmpf olt, %31, %34 : vector<1x256xf32>
    %36 = arith.andi %33, %35 : vector<1x256xi1>
    %37 = arith.andi %24, %36 : vector<1x256xi1>
    %cst_16 = arith.constant 4.000000e+00 : f32
    %38 = vector.broadcast %cst_16 : f32 to vector<1x256xf32>
    %39 = arith.mulf %31, %38 : vector<1x256xf32>
    %40 = vector.extract_strided_slice %0 {offsets = [3, 0], sizes = [1, 256], strides = [1, 1]} : vector<4x256xf32> to vector<1x256xf32>
    %cst_17 = arith.constant 0.000000e+00 : f32
    %41 = vector.broadcast %cst_17 : f32 to vector<1x256xf32>
    %42 = arith.subf %40, %41 : vector<1x256xf32>
    %cst_18 = arith.constant 1.000000e+00 : f32
    %43 = vector.broadcast %cst_18 : f32 to vector<1x256xf32>
    %44 = arith.mulf %42, %43 : vector<1x256xf32>
    %cst_19 = arith.constant 0.000000e+00 : f32
    %45 = vector.broadcast %cst_19 : f32 to vector<1x256xf32>
    %46 = arith.cmpf oge, %44, %45 : vector<1x256xf32>
    %cst_20 = arith.constant 1.000000e+00 : f32
    %47 = vector.broadcast %cst_20 : f32 to vector<1x256xf32>
    %48 = arith.cmpf olt, %44, %47 : vector<1x256xf32>
    %49 = arith.andi %46, %48 : vector<1x256xi1>
    %50 = arith.andi %37, %49 : vector<1x256xi1>
    %cst_21 = arith.constant 4.000000e+00 : f32
    %51 = vector.broadcast %cst_21 : f32 to vector<1x256xf32>
    %52 = arith.mulf %44, %51 : vector<1x256xf32>
    %cst_22 = arith.constant -1.000000e+01 : f32
    %53 = vector.broadcast %cst_22 : f32 to vector<1x256xf32>
    %54 = arith.select %50, %13, %53 : vector<1x256xi1>, vector<1x256xf32>
    %55 = vector.extract_strided_slice %1 {offsets = [0, 0], sizes = [640, 1], strides = [1, 1]} : vector<640x4xf32> to vector<640x1xf32>
    %56 = vector.broadcast %55 : vector<640x1xf32> to vector<640x256xf32>
    %57 = vector.broadcast %54 : vector<1x256xf32> to vector<640x256xf32>
    %58 = arith.subf %56, %57 : vector<640x256xf32>
    %59 = math.absf %58 : vector<640x256xf32>
    %cst_23 = arith.constant 1.000000e+00 : f32
    %60 = vector.broadcast %cst_23 : f32 to vector<640x256xf32>
    %61 = arith.subf %60, %59 : vector<640x256xf32>
    %cst_24 = arith.constant 0.000000e+00 : f32
    %62 = vector.broadcast %cst_24 : f32 to vector<640x256xf32>
    %63 = arith.maximumf %61, %62 : vector<640x256xf32>
    %64 = vector.extract_strided_slice %1 {offsets = [0, 1], sizes = [640, 1], strides = [1, 1]} : vector<640x4xf32> to vector<640x1xf32>
    %65 = vector.broadcast %64 : vector<640x1xf32> to vector<640x256xf32>
    %66 = vector.broadcast %26 : vector<1x256xf32> to vector<640x256xf32>
    %67 = arith.subf %65, %66 : vector<640x256xf32>
    %68 = math.absf %67 : vector<640x256xf32>
    %cst_25 = arith.constant 1.000000e+00 : f32
    %69 = vector.broadcast %cst_25 : f32 to vector<640x256xf32>
    %70 = arith.subf %69, %68 : vector<640x256xf32>
    %cst_26 = arith.constant 0.000000e+00 : f32
    %71 = vector.broadcast %cst_26 : f32 to vector<640x256xf32>
    %72 = arith.maximumf %70, %71 : vector<640x256xf32>
    %73 = arith.mulf %63, %72 : vector<640x256xf32>
    %74 = vector.extract_strided_slice %1 {offsets = [0, 2], sizes = [640, 1], strides = [1, 1]} : vector<640x4xf32> to vector<640x1xf32>
    %75 = vector.broadcast %74 : vector<640x1xf32> to vector<640x256xf32>
    %76 = vector.broadcast %39 : vector<1x256xf32> to vector<640x256xf32>
    %77 = arith.subf %75, %76 : vector<640x256xf32>
    %78 = math.absf %77 : vector<640x256xf32>
    %cst_27 = arith.constant 1.000000e+00 : f32
    %79 = vector.broadcast %cst_27 : f32 to vector<640x256xf32>
    %80 = arith.subf %79, %78 : vector<640x256xf32>
    %cst_28 = arith.constant 0.000000e+00 : f32
    %81 = vector.broadcast %cst_28 : f32 to vector<640x256xf32>
    %82 = arith.maximumf %80, %81 : vector<640x256xf32>
    %83 = arith.mulf %73, %82 : vector<640x256xf32>
    %84 = vector.extract_strided_slice %1 {offsets = [0, 3], sizes = [640, 1], strides = [1, 1]} : vector<640x4xf32> to vector<640x1xf32>
    %85 = vector.broadcast %84 : vector<640x1xf32> to vector<640x256xf32>
    %86 = vector.broadcast %52 : vector<1x256xf32> to vector<640x256xf32>
    %87 = arith.subf %85, %86 : vector<640x256xf32>
    %88 = math.absf %87 : vector<640x256xf32>
    %cst_29 = arith.constant 1.000000e+00 : f32
    %89 = vector.broadcast %cst_29 : f32 to vector<640x256xf32>
    %90 = arith.subf %89, %88 : vector<640x256xf32>
    %cst_30 = arith.constant 0.000000e+00 : f32
    %91 = vector.broadcast %cst_30 : f32 to vector<640x256xf32>
    %92 = arith.maximumf %90, %91 : vector<640x256xf32>
    %93 = arith.mulf %83, %92 : vector<640x256xf32>
    %c0_31 = arith.constant 0 : index
    %c0_32 = arith.constant 0 : index
    %94 = vector.load %arg3[%c0_31, %c0_32] : memref<8x640xf32, #tpu.memory_space<vmem>>, vector<8x640xf32>
    %cst_33 = arith.constant dense<0.000000e+00> : vector<8x256xf32>
    %95 = tpu.matmul %94, %93, %cst_33 {dimension_numbers = #tpu.dot_dimension_numbers<[1], [0], [0], [1], [0, 0, 1, 1], [], []>} : vector<8x640xf32>, vector<640x256xf32>, vector<8x256xf32> -> vector<8x256xf32>
    %c0_34 = arith.constant 0 : index
    %c0_35 = arith.constant 0 : index
    %96 = vector.load %arg4[%c0_34, %c0_35] : memref<8x256xf32, #tpu.memory_space<vmem>>, vector<8x256xf32>
    tpu.vector_store %arg4[%c0_34, %c0_35], %95 {strides = array<i32>} : memref<8x256xf32, #tpu.memory_space<vmem>>, vector<8x256xf32>,
    return
  }
  func.func @transform_0(%arg0: i32) -> (i32, i32) {
    %c0_i32 = arith.constant 0 : i32
    %c0_i32_0 = arith.constant 0 : i32
    return %c0_i32, %arg0 : i32, i32
  }
  func.func @transform_1(%arg0: i32) -> (i32, i32) {
    %c0_i32 = arith.constant 0 : i32
    %c0_i32_0 = arith.constant 0 : i32
    %c0_i32_1 = arith.constant 0 : i32
    return %c0_i32, %c0_i32_0 : i32, i32
  }
  func.func @transform_2(%arg0: i32) -> (i32, i32) {
    %c0_i32 = arith.constant 0 : i32
    %c0_i32_0 = arith.constant 0 : i32
    %c0_i32_1 = arith.constant 0 : i32
    return %c0_i32, %c0_i32_0 : i32, i32
  }
  func.func @transform_3(%arg0: i32) -> (i32, i32) {
    %c0_i32 = arith.constant 0 : i32
    %c0_i32_0 = arith.constant 0 : i32
    return %c0_i32, %arg0 : i32, i32
  }
}

</mosaic_0001>

<bundles_post_ra>
// kernel: tpu_custom_call.1
= control target key start
LH: loop header
LB: loop body
LE: loop exit
PB: predicated region body
PF: predicated region fallthrough
CT: control target
= control target key end

     0   :  { %8 = vsyncpa [#allocation3], 0  ;;  %s9982_s0 = inlined_call_operand.vmem [shape: f32[4,512], index: 0, kind: input, shape index: {}]   ;;  %s9983_s1 = inlined_call_operand.vmem [shape: f32[640,4], index: 1, kind: input, shape index: {}]   ;;  %s9984_s2 = inlined_call_operand.vmem [shape: f32[8,640], index: 2, kind: input, shape index: {}]   ;;  %s9985_s3 = inlined_call_operand.hbm [shape: f32[8,512], index: 3, kind: output, shape index: {}]  }
   0x1   :  { %10 = vsyncpa [#allocation3 + $0x1], 0  ;;  %s5340_s12 = smov 0   ;;  %s5342_s13 = smov 0  }
   0x2   :  { %s5344_s14 = smov 0   ;;  %s5346_s15 = smov 0  }
   0x3 LB: > { %s5361_s16 = sadd.s32 4294967295, %s5314_s15   ;;  %s4980_s17 = sadd.s32 4294967294, %s5314_s15   ;;  %s5314_s15 = sphi %s5346_s15, %s11159_s15   ;;  %s5310_s14 = sphi %s5344_s14, %s11158_s14   ;;  %s5306_s13 = sphi %s5342_s13, %s11157_s13   ;;  %s5302_s12 = sphi %s5340_s12, %s11156_s12  }
   0x4   : > { %s5365_s18 = sadd.s32 1, %s5314_s15   ;;  %s91_s19 = sadd.s32 1, %s5310_s14 }
   0x5   : > { %s88_s20 = ssub.s32 %s5314_s15, %s5365_s18  ;;  %p101_p0 = scmp.ne.s32.totalorder %s5310_s14, %s5306_s13 }
   0x6   : > { %p89_p1 = scmp.eq.s32.totalorder %s88_s20, 0  ;;  %p102_p2 = scmp.eq.s32.totalorder %s5361_s16, 1 }
   0x7   : > { %p107_p3 = scmp.ne.s32.totalorder %s5306_s13, %s5302_s12  ;;  %p108_p4 = scmp.eq.s32.totalorder %s4980_s17, 1 }
   0x8   : > { %s5376_s21 = scalar_select %p89_p1, %s5310_s14, %s91_s19  }
   0x9   : > { %p5378_p5 = por %p102_p2, %p101_p0  ;;  %p5382_p6 = por %p108_p4, %p107_p3 }
   0xa   : > { %p4983_p7 = scmp.ge.s32.totalorder %s5314_s15, 1  ;;  %p141_p8 = scmp.lt.s32.totalorder %s5314_s15, 3 }
   0xc   : > { %p142_p9 = pnand %p4983_p7, %p141_p8 }
   0xe   : > { %145 = sbr.rel (%p142_p9) target bundleno = 1177 (0x499), region = 32 }
  0x13   : > { %v5391_v0 = vld [vmem:[%s9983_s1 + $0x20] sm:$0xff]  ;;  %v5396_v1 = vld [vmem:[%s9983_s1 + $0x10] sm:$0xff]  ;;  %v9986_v3 = vmov 0   ;;  %v5412_v4 = vld [vmem:[%s9983_s1 + $0x28] sm:$0xff]  ;;  %s4985_s24 = sshll.u32 %s5361_s16, 1  ;;  %s162_s26 = sand.u32 1, %s5306_s13  }
  0x14   : > { %v5401_v2 = vld [vmem:[%s9983_s1] sm:$0xff]  ;;  %5041 = vset.pattern.permute.xlu2 %v9986_v3  ;;  %5040 = vset.pattern.permute.xlu1 %v9986_v3  ;;  %v5417_v5 = vld [vmem:[%s9983_s1 + $0x18] sm:$0xff]  ;;  %v5422_v6 = vld [vmem:[%s9983_s1 + $0x8] sm:$0xff]  ;;  %p166_p10 = scmp.lt.s32.totalorder %s4985_s24, 3  ;;  %s4995_s28 = sshll.u32 %s5361_s16, 4 }
  0x15   : > { %5039 = vset.pattern.permute.xlu0 %v9986_v3  ;;  %293 = vperm.xlu2 %5041, %v5391_v0   ;;  %v5430_v7 = vld [vmem:[%s9983_s1 + $0x40] sm:$0xff]  ;;  %v5435_v8 = vld [vmem:[%s9983_s1 + $0x38] sm:$0xff]  ;;  %v5440_v9 = vld [vmem:[%s9983_s1 + $0x30] sm:$0xff]  ;;  %s4916_s4 = scalar_lea.hbm %s9985_s3, %s4995_s28  ;;  %s4905_s7 = scalar_lea.sflag [#allocation3], %s162_s26 }
  0x16   : > { %283 = vperm.xlu1 %5040, %v5396_v1   ;;  %273 = vperm.xlu0 %5039, %v5401_v2   ;;  %v5448_v10 = vld [vmem:[%s9983_s1 + $0x58] sm:$0xff]  ;;  %v5453_v11 = vld [vmem:[%s9983_s1 + $0x50] sm:$0xff]  ;;  %v5458_v12 = vld [vmem:[%s9983_s1 + $0x48] sm:$0xff]  ;;  %s11161_s24 = smov (!%p166_p10, %s4985_s24), 3  ;;  %s4920_s6 = sshll.u32 %s4916_s4, 4  ;;  %s4921_s6 = int_to_ptr.hbm [resolvable:$true] %s4920_s6 }
  0x17   : > { %v5466_v13 = vld [vmem:[%s9983_s1 + $0x70] sm:$0xff]  ;;  %v5471_v14 = vld [vmem:[%s9983_s1 + $0x68] sm:$0xff]  ;;  %v5476_v15 = vld [vmem:[%s9983_s1 + $0x60] sm:$0xff]  ;;  %s4986_s10 = sshll.u32 %s11161_s24, 2  ;;  %s4984_s24 = sshll.u32 %s162_s26, 4 }
  0x18   : > { %v5484_v16 = vld [vmem:[%s9983_s1 + $0x88] sm:$0xff]  ;;  %v5489_v17 = vld [vmem:[%s9983_s1 + $0x80] sm:$0xff]  ;;  %v5494_v18 = vld [vmem:[%s9983_s1 + $0x78] sm:$0xff]  ;;  %s169_s19 = scalar_lea.vmem %s9982_s0, %s4986_s10  ;;  %s164_s27 = scalar_lea.vmem [#allocation2], %s4984_s24 }
  0x19   : > { %v5502_v19 = vld [vmem:[%s9983_s1 + $0xa0] sm:$0xff]  ;;  %v5507_v20 = vld [vmem:[%s9983_s1 + $0x98] sm:$0xff]  ;;  %v5512_v21 = vld [vmem:[%s9983_s1 + $0x90] sm:$0xff]  ;;  %s4918_s5 = sshll.u32 %s164_s27, 4  ;;  %s5266_s8 = sshra.s32 %s4921_s6, 4  ;;  %s4919_s5 = int_to_ptr.vmem [resolvable:$true] %s4918_s5  ;;  %s5267_s8 = int_to_ptr.hbm [resolvable:$true] %s5266_s8 }
  0x1a   : > { %v5520_v22 = vld [vmem:[%s9983_s1 + $0xb8] sm:$0xff]  ;;  %v5525_v23 = vld [vmem:[%s9983_s1 + $0xb0] sm:$0xff]  ;;  %v5530_v24 = vld [vmem:[%s9983_s1 + $0xa8] sm:$0xff]  ;;  %s5268_s16 = scalar_lea.hbm %s5267_s8, 16  ;;  %s5272_s11 = scalar_lea.hbm %s9985_s3, 32 }
  0x1b   : > { %v5538_v25 = vld [vmem:[%s9983_s1 + $0xd0] sm:$0xff]  ;;  %v5543_v26 = vld [vmem:[%s9983_s1 + $0xc8] sm:$0xff]  ;;  %v5548_v27 = vld [vmem:[%s9983_s1 + $0xc0] sm:$0xff]  ;;  %p5269_p11 = scmp.ne.s32.totalorder %s5267_s8, %s5268_s16  ;;  %p5273_p0 = scmp.lt.s32.totalorder %s5267_s8, %s9985_s3 }
  0x1c   : > { %v5556_v28 = vld [vmem:[%s9983_s1 + $0xe8] sm:$0xff]  ;;  %v5561_v29 = vld [vmem:[%s9983_s1 + $0xe0] sm:$0xff]  ;;  %v5566_v30 = vld [vmem:[%s9983_s1 + $0xd8] sm:$0xff]  ;;  %p5274_p1 = scmp.lt.s32.totalorder %s5272_s11, %s5268_s16 }
  0x1d   : > { %298 = vperm.xlu2 %5041, %v5412_v4   ;;  %10075 = vst [vmem:[#allocation5_spill] sm:$0xff] %v5556_v28  ;;  %v5574_v31 = vld [vmem:[%s9983_s1 + $0x100] sm:$0xff]  ;;  %v5579_v32 = vld [vmem:[%s9983_s1 + $0xf8] sm:$0xff]  ;;  %v5584_v33 = vld [vmem:[%s9983_s1 + $0xf0] sm:$0xff]  ;;  %p5270_p12 = pnand %p5269_p11, %p5378_p5 }
  0x1e   : > { %288 = vperm.xlu1 %5040, %v5417_v5   ;;  %278 = vperm.xlu0 %5039, %v5422_v6   ;;  %10076 = vst [vmem:[#allocation6_spill] sm:$0xff] %v5561_v29  ;;  %v5592_v34 = vld [vmem:[%s9983_s1 + $0x118] sm:$0xff]  ;;  %v5597_v35 = vld [vmem:[%s9983_s1 + $0x110] sm:$0xff]  ;;  %v5602_v36 = vld [vmem:[%s9983_s1 + $0x108] sm:$0xff]  ;;  %p5275_p2 = por %p5274_p1, %p5273_p0 }
  0x1f   : > { %10077 = vst [vmem:[#allocation7_spill] sm:$0xff] %v5574_v31  ;;  %v211_v38 = vld [vmem:[%s9983_s1 + $0x130] sm:$0xff]  ;;  %v5615_v39 = vld [vmem:[%s9983_s1 + $0x128] sm:$0xff]  ;;  %v5620_v40 = vld [vmem:[%s9983_s1 + $0x120] sm:$0xff]  ;;  %p5271_p13 = pneg %p5270_p12 }
  0x20   : > { %10078 = vst [vmem:[#allocation8_spill] sm:$0xff] %v5579_v32  ;;  %v214_v42 = vld [vmem:[%s9983_s1 + $0x148] sm:$0xff]  ;;  %v213_v43 = vld [vmem:[%s9983_s1 + $0x140] sm:$0xff]  ;;  %v5635_v44 = vld [vmem:[%s9983_s1 + $0x138] sm:$0xff] }
  0x21   : > { %10079 = vst [vmem:[#allocation9_spill] sm:$0xff] %v5584_v33  ;;  %v217_v46 = vld [vmem:[%s9983_s1 + $0x160] sm:$0xff]  ;;  %v216_v47 = vld [vmem:[%s9983_s1 + $0x158] sm:$0xff]  ;;  %v215_v48 = vld [vmem:[%s9983_s1 + $0x150] sm:$0xff]  ;;  %p5276_p3 = pnand %p5275_p2, %p5271_p13 }
  0x22   : > { %10080 = vst [vmem:[#allocation10_spill] sm:$0xff] %v5592_v34  ;;  %v220_v52 = vld [vmem:[%s9983_s1 + $0x178] sm:$0xff]  ;;  %v219_v53 = vld [vmem:[%s9983_s1 + $0x170] sm:$0xff]  ;;  %v218_v54 = vld [vmem:[%s9983_s1 + $0x168] sm:$0xff] }
  0x23   : > { %10081 = vst [vmem:[#allocation11_spill] sm:$0xff] %v5597_v35  ;;  %v223_v58 = vld [vmem:[%s9983_s1 + $0x190] sm:$0xff]  ;;  %v222_v59 = vld [vmem:[%s9983_s1 + $0x188] sm:$0xff]  ;;  %v221_v60 = vld [vmem:[%s9983_s1 + $0x180] sm:$0xff] }
  0x24   : > { %10082 = vst [vmem:[#allocation12_spill] sm:$0xff] %v5602_v36  ;;  %v235_v3 = vld [vmem:[%s9983_s1 + $0x1f0] sm:$0xff] }
  0x25   : > { %313 = vperm.xlu2 %5041, %v5430_v7   ;;  %10083 = vst [vmem:[#allocation13_spill] sm:$0xff] %v5615_v39 }
  0x26   : > { %308 = vperm.xlu1 %5040, %v5435_v8   ;;  %303 = vperm.xlu0 %5039, %v5440_v9   ;;  %10084 = vst [vmem:[#allocation14_spill] sm:$0xff] %v5620_v40 }
  0x27   : > { %10085 = vst [vmem:[#allocation15_spill] sm:$0xff] %v5635_v44 }
  0x2d   : > { %328 = vperm.xlu2 %5041, %v5448_v10  }
  0x2e   : > { %323 = vperm.xlu1 %5040, %v5453_v11   ;;  %318 = vperm.xlu0 %5039, %v5458_v12  }
  0x35   : > { %343 = vperm.xlu2 %5041, %v5466_v13  }
  0x36   : > { %338 = vperm.xlu1 %5040, %v5471_v14   ;;  %333 = vperm.xlu0 %5039, %v5476_v15  }
  0x3d   : > { %358 = vperm.xlu2 %5041, %v5484_v16  }
  0x3e   : > { %353 = vperm.xlu1 %5040, %v5489_v17   ;;  %348 = vperm.xlu0 %5039, %v5494_v18  }
  0x45   : > { %373 = vperm.xlu2 %5041, %v5502_v19  }
  0x46   : > { %368 = vperm.xlu1 %5040, %v5507_v20   ;;  %363 = vperm.xlu0 %5039, %v5512_v21  }
  0x4d   : > { %388 = vperm.xlu2 %5041, %v5520_v22  }
  0x4e   : > { %383 = vperm.xlu1 %5040, %v5525_v23   ;;  %378 = vperm.xlu0 %5039, %v5530_v24  }
  0x55   : > { %403 = vperm.xlu2 %5041, %v5538_v25  }
  0x56   : > { %398 = vperm.xlu1 %5040, %v5543_v26   ;;  %393 = vperm.xlu0 %5039, %v5548_v27  }
  0x5d   : > { %418 = vperm.xlu2 %5041, %v5556_v28  }
  0x5e   : > { %413 = vperm.xlu1 %5040, %v5561_v29   ;;  %408 = vperm.xlu0 %5039, %v5566_v30  }
  0x65   : > { %433 = vperm.xlu2 %5041, %v5574_v31   ;;  %v240_v31 = vld [vmem:[%s9983_s1 + $0x218] sm:$0xff] }
  0x66   : > { %428 = vperm.xlu1 %5040, %v5579_v32   ;;  %423 = vperm.xlu0 %5039, %v5584_v33   ;;  %v10104_v33 = vmov 0  }
  0x6d   : > { %448 = vperm.xlu2 %5041, %v5592_v34   ;;  %v237_v34 = vld [vmem:[%s9983_s1 + $0x200] sm:$0xff] }
  0x6e   : > { %443 = vperm.xlu1 %5040, %v5597_v35   ;;  %438 = vperm.xlu0 %5039, %v5602_v36   ;;  %v241_v36 = vld [vmem:[%s9983_s1 + $0x220] sm:$0xff] }
  0x6f   : > { %v5607_v37 = vpop.permute.xlu2 %293 }
  0x75   : > { %463 = vperm.xlu2 %5041, %v211_v38   ;;  %v226_v38 = vld [vmem:[%s9983_s1 + $0x1a8] sm:$0xff] }
  0x76   : > { %458 = vperm.xlu1 %5040, %v5615_v39   ;;  %453 = vperm.xlu0 %5039, %v5620_v40   ;;  %v238_v40 = vld [vmem:[%s9983_s1 + $0x208] sm:$0xff] }
  0x77   : > { %v5624_v41 = vpop.permute.xlu2 %298 }
  0x7d   : > { %478 = vperm.xlu2 %5041, %v214_v42   ;;  %v225_v42 = vld [vmem:[%s9983_s1 + $0x1a0] sm:$0xff] }
  0x7e   : > { %473 = vperm.xlu1 %5040, %v213_v43   ;;  %468 = vperm.xlu0 %5039, %v5635_v44   ;;  %v224_v43 = vld [vmem:[%s9983_s1 + $0x198] sm:$0xff]  ;;  %v234_v44 = vld [vmem:[%s9983_s1 + $0x1e8] sm:$0xff] }
  0x7f   : > { %v5638_v45 = vpop.permute.xlu2 %313 }
  0x85   : > { %493 = vperm.xlu2 %5041, %v217_v46  }
  0x86   : > { %488 = vperm.xlu1 %5040, %v216_v47   ;;  %483 = vperm.xlu0 %5039, %v215_v48  }
  0x87   : > { %v5649_v49 = vpop.permute.xlu2 %328 }
  0x88   : > { %v5651_v50 = vpop.permute.xlu1 %283  ;;  %v5653_v51 = vpop.permute.xlu0 %273 }
  0x8d   : > { %508 = vperm.xlu2 %5041, %v220_v52   ;;  %v229_v52 = vld [vmem:[%s9983_s1 + $0x1c0] sm:$0xff] }
  0x8e   : > { %503 = vperm.xlu1 %5040, %v219_v53   ;;  %498 = vperm.xlu0 %5039, %v218_v54   ;;  %v228_v53 = vld [vmem:[%s9983_s1 + $0x1b8] sm:$0xff]  ;;  %v227_v54 = vld [vmem:[%s9983_s1 + $0x1b0] sm:$0xff] }
  0x8f   : > { %v5664_v55 = vpop.permute.xlu2 %343 }
  0x90   : > { %v5666_v56 = vpop.permute.xlu1 %288  ;;  %v5668_v57 = vpop.permute.xlu0 %278 }
  0x95   : > { %523 = vperm.xlu2 %5041, %v223_v58  }
  0x96   : > { %518 = vperm.xlu1 %5040, %v222_v59   ;;  %513 = vperm.xlu0 %5039, %v221_v60  }
  0x97   : > { %v5679_v61 = vpop.permute.xlu2 %358 }
  0x98   : > { %v5681_v62 = vpop.permute.xlu1 %308  ;;  %v5683_v63 = vpop.permute.xlu0 %303 }
  0x9d   : > { %538 = vperm.xlu2 %5041, %v226_v38   ;;  %v232_v38 = vld [vmem:[%s9983_s1 + $0x1d8] sm:$0xff] }
  0x9e   : > { %533 = vperm.xlu1 %5040, %v225_v42   ;;  %528 = vperm.xlu0 %5039, %v224_v43   ;;  %v231_v42 = vld [vmem:[%s9983_s1 + $0x1d0] sm:$0xff]  ;;  %v230_v43 = vld [vmem:[%s9983_s1 + $0x1c8] sm:$0xff] }
  0x9f   : > { %v5694_v46 = vpop.permute.xlu2 %373 }
  0xa0   : > { %v5696_v47 = vpop.permute.xlu1 %323  ;;  %v5698_v48 = vpop.permute.xlu0 %318 }
  0xa5   : > { %553 = vperm.xlu2 %5041, %v229_v52  }
  0xa6   : > { %548 = vperm.xlu1 %5040, %v228_v53   ;;  %543 = vperm.xlu0 %5039, %v227_v54  }
  0xa7   : > { %v5709_v58 = vpop.permute.xlu2 %388 }
  0xa8   : > { %v5711_v59 = vpop.permute.xlu1 %338  ;;  %v5713_v60 = vpop.permute.xlu0 %333 }
  0xad   : > { %568 = vperm.xlu2 %5041, %v232_v38   ;;  %v233_v38 = vld [vmem:[%s9983_s1 + $0x1e0] sm:$0xff] }
  0xae   : > { %563 = vperm.xlu1 %5040, %v231_v42   ;;  %558 = vperm.xlu0 %5039, %v230_v43  }
  0xaf   : > { %v5724_v52 = vpop.permute.xlu2 %403 }
  0xb0   : > { %v5726_v53 = vpop.permute.xlu1 %353  ;;  %v5728_v54 = vpop.permute.xlu0 %348 }
  0xb5   : > { %583 = vperm.xlu2 %5041, %v235_v3   ;;  %v236_v3 = vld [vmem:[%s9983_s1 + $0x1f8] sm:$0xff] }
  0xb6   : > { %578 = vperm.xlu1 %5040, %v234_v44   ;;  %573 = vperm.xlu0 %5039, %v233_v38  }
  0xb7   : > { %v5739_v42 = vpop.permute.xlu2 %418 }
  0xb8   : > { %v5741_v43 = vpop.permute.xlu1 %368  ;;  %v5743_v39 = vpop.permute.xlu0 %363 }
  0xbd   : > { %598 = vperm.xlu2 %5041, %v238_v40   ;;  %v239_v40 = vld [vmem:[%s9983_s1 + $0x210] sm:$0xff] }
  0xbe   : > { %593 = vperm.xlu1 %5040, %v237_v34   ;;  %588 = vperm.xlu0 %5039, %v236_v3  }
  0xbf   : > { %v5754_v44 = vpop.permute.xlu2 %433 }
  0xc0   : > { %v5756_v38 = vpop.permute.xlu1 %383  ;;  %v5758_v35 = vpop.permute.xlu0 %378 }
  0xc1   : > { %10086 = vst [vmem:[#allocation16_spill] sm:$0xff] %v5756_v38  ;;  %v243_v38 = vld [vmem:[%s9983_s1 + $0x230] sm:$0xff] }
  0xc2   : > { %10087 = vst [vmem:[#allocation17_spill] sm:$0xff] %v5758_v35  ;;  %v244_v35 = vld [vmem:[%s9983_s1 + $0x238] sm:$0xff] }
  0xc5   : > { %613 = vperm.xlu2 %5041, %v241_v36   ;;  %v242_v36 = vld [vmem:[%s9983_s1 + $0x228] sm:$0xff] }
  0xc6   : > { %608 = vperm.xlu1 %5040, %v240_v31   ;;  %603 = vperm.xlu0 %5039, %v239_v40  }
  0xc7   : > { %v5769_v34 = vpop.permute.xlu2 %448 }
  0xc8   : > { %10088 = vst [vmem:[#allocation18_spill] sm:$0xff] %v5769_v34  ;;  %v5771_v3 = vpop.permute.xlu1 %398  ;;  %v5773_v32 = vpop.permute.xlu0 %393  ;;  %v246_v34 = vld [vmem:[%s9983_s1 + $0x248] sm:$0xff] }
  0xc9   : > { %10089 = vst [vmem:[#allocation19_spill] sm:$0xff] %v5771_v3  ;;  %v247_v3 = vld [vmem:[%s9983_s1 + $0x250] sm:$0xff] }
  0xca   : > { %10090 = vst [vmem:[#allocation20_spill] sm:$0xff] %v5773_v32 }
  0xcd   : > { %628 = vperm.xlu2 %5041, %v244_v35   ;;  %v245_v35 = vld [vmem:[%s9983_s1 + $0x240] sm:$0xff] }
  0xce   : > { %623 = vperm.xlu1 %5040, %v243_v38   ;;  %618 = vperm.xlu0 %5039, %v242_v36  }
  0xcf   : > { %v5784_v31 = vpop.permute.xlu2 %463 }
  0xd0   : > { %10091 = vst [vmem:[#allocation21_spill] sm:$0xff] %v5784_v31  ;;  %v5786_v40 = vpop.permute.xlu1 %413  ;;  %v5788_v32 = vpop.permute.xlu0 %408  ;;  %v249_v31 = vld [vmem:[%s9983_s1 + $0x260] sm:$0xff] }
  0xd1   : > { %10092 = vst [vmem:[#allocation22_spill] sm:$0xff] %v5786_v40  ;;  %v250_v40 = vld [vmem:[%s9983_s1 + $0x268] sm:$0xff] }
  0xd2   : > { %10093 = vst [vmem:[#allocation23_spill] sm:$0xff] %v5788_v32 }
  0xd5   : > { %643 = vperm.xlu2 %5041, %v247_v3  }
  0xd6   : > { %638 = vperm.xlu1 %5040, %v246_v34   ;;  %633 = vperm.xlu0 %5039, %v245_v35   ;;  %v248_v34 = vld [vmem:[%s9983_s1 + $0x258] sm:$0xff] }
  0xd7   : > { %v5800_v38 = vpop.permute.xlu2 %478 }
  0xd8   : > { %10094 = vst [vmem:[#allocation24_spill] sm:$0xff] %v5800_v38  ;;  %v5802_v36 = vpop.permute.xlu1 %428  ;;  %v5804_v32 = vpop.permute.xlu0 %423  ;;  %v252_v38 = vld [vmem:[%s9983_s1 + $0x278] sm:$0xff] }
  0xd9   : > { %10095 = vst [vmem:[#allocation25_spill] sm:$0xff] %v5802_v36  ;;  %v172_v36 = vld [vmem:[%s169_s19] sm:$0xff] }
  0xda   : > { %10096 = vst [vmem:[#allocation26_spill] sm:$0xff] %v5804_v32  ;;  %vm253_vm0 = vcmp.ge.f32.partialorder %v172_v36, 0.0  ;;  %vm254_vm1 = vcmp.lt.f32.partialorder %v172_v36, 1.0 }
  0xdb   : > { %vm5833_vm2 = vmand %vm253_vm0, %vm254_vm1 }
  0xdc   : > { %v257_v28 = vsel %vm5833_vm2, 1, %v10104_v33 }
  0xdd   : > { %658 = vperm.xlu2 %5041, %v250_v40   ;;  %v5317_v40 = vmov 1   ;;  %v4987_v29 = vrot.slane %v257_v28, 9 }
  0xde   : > { %653 = vperm.xlu1 %5040, %v249_v31   ;;  %648 = vperm.xlu0 %5039, %v248_v34   ;;  %v251_v31 = vld [vmem:[%s9983_s1 + $0x270] sm:$0xff] }
  0xdf   : > { %v5818_v3 = vpop.permute.xlu2 %493  ;;  %vm260_vm3 = vcmp.ne.s32.totalorder %v4987_v29, 0  ;;  %v256_v29 = vmul.f32 4.0, %v172_v36 }
  0xe0   : > { %10097 = vst [vmem:[#allocation27_spill] sm:$0xff] %v5818_v3  ;;  %v5820_v35 = vpop.permute.xlu1 %443  ;;  %v5822_v32 = vpop.permute.xlu0 %438  ;;  %vm261_vm4 = vmand %vm5833_vm2, %vm260_vm3 }
  0xe1   : > { %10098 = vst [vmem:[#allocation28_spill] sm:$0xff] %v5820_v35 }
  0xe2   : > { %10099 = vst [vmem:[#allocation29_spill] sm:$0xff] %v5822_v32 }
  0xe5   : > { %5042 = vset.pattern.permute.xlu2 %v5317_v40 }
  0xe6   : > { %668 = vperm.xlu1 %5040, %v252_v38   ;;  %663 = vperm.xlu0 %5039, %v251_v31  }
  0xe7   : > { %1319 = vperm.xlu2 %5042, %v5401_v2   ;;  %v5831_v34 = vpop.permute.xlu2 %508 }
  0xe8   : > { %v5837_v35 = vpop.permute.xlu1 %458  ;;  %v5839_v3 = vpop.permute.xlu0 %453 }
  0xe9   : > { %10102 = vst [vmem:[#allocation30_spill] sm:$0xff] %v5837_v35  ;;  %v4989_v35 = vrot.slane %v257_v28, 11 }
  0xea   : > { %10103 = vst [vmem:[#allocation31_spill] sm:$0xff] %v5839_v3  ;;  %v4988_v3 = vrot.slane %v257_v28, 10 }
  0xeb   : > { %vm268_vm7 = vcmp.ne.s32.totalorder %v4989_v35, 0 }
  0xec   : > { %vm264_vm5 = vcmp.ne.s32.totalorder %v4988_v3, 0 }
  0xed   : > { %vm265_vm6 = vmand %vm261_vm4, %vm264_vm5 }
  0xee   : > { %5044 = vset.pattern.permute.xlu1 %v5317_v40  ;;  %5043 = vset.pattern.permute.xlu0 %v5317_v40  ;;  %vm269_vm8 = vmand %vm265_vm6, %vm268_vm7 }
  0xef   : > { %1327 = vperm.xlu1 %5044, %v5396_v1   ;;  %1331 = vperm.xlu2 %5042, %v5417_v5   ;;  %v5846_v2 = vpop.permute.xlu2 %523  ;;  %v270_v28 = vsel %vm269_vm8, %v256_v29, -10.0 }
  0xf0   : > { %1323 = vperm.xlu0 %5043, %v5422_v6   ;;  %v5849_v38 = vpop.permute.xlu1 %473  ;;  %v5851_v31 = vpop.permute.xlu0 %468  ;;  %v673_v33 = vperm.slane %v270_v28, 4 }
  0xf1   : > { %10105 = vst [vmem:[#allocation32_spill] sm:$0xff] %v5849_v38 }
  0xf2   : > { %10106 = vst [vmem:[#allocation33_spill] sm:$0xff] %v5851_v31  ;;  %v5875_v35 = vperm.slane %v673_v33, 0  ;;  %v1640_v33 = vperm.slane %v256_v29, 5 }
  0xf4   : > { %10113 = vst [vmem:[#allocation40_spill] sm:$0xff] %v5875_v35 }
  0xf7   : > { %1335 = vperm.xlu1 %5044, %v5391_v0   ;;  %1339 = vperm.xlu2 %5042, %v5412_v4   ;;  %v5857_v1 = vpop.permute.xlu2 %538 }
  0xf8   : > { %10107 = vst [vmem:[#allocation34_spill] sm:$0xff] %v5857_v1  ;;  %1343 = vperm.xlu0 %5043, %v5440_v9   ;;  %v5860_v5 = vpop.permute.xlu1 %488  ;;  %v5862_v6 = vpop.permute.xlu0 %483  ;;  %v672_v9 = vperm.slane %v270_v28, 0  ;;  %v1639_v28 = vperm.slane %v256_v29, 1 }
  0xf9   : > { %10108 = vst [vmem:[#allocation35_spill] sm:$0xff] %v5860_v5  ;;  %v5902_v5 = vperm.slane %v1640_v33, 1 }
  0xfa   : > { %10109 = vst [vmem:[#allocation36_spill] sm:$0xff] %v5862_v6  ;;  %v5873_v3 = vperm.slane %v672_v9, 0 }
  0xfb   : > { %10117 = vst [vmem:[#allocation44_spill] sm:$0xff] %v5902_v5 }
  0xfc   : > { %v686_v36 = vsub.f32 %v5607_v37, %v5873_v3  ;;  %v688_v9 = vsub.f32 %v5624_v41, %v5873_v3  ;;  %v700_v6 = vsub.f32 %v5649_v49, %v5873_v3 }
  0xff   : > { %1347 = vperm.xlu1 %5044, %v5435_v8   ;;  %1351 = vperm.xlu2 %5042, %v5430_v7   ;;  %v5866_v0 = vpop.permute.xlu2 %553  ;;  %v687_v8 = vsub.f32 %v5607_v37, %v5875_v35  ;;  %v2766_v37 = vperm.slane %v256_v29, 6 }
 0x100   : > { %10110 = vst [vmem:[#allocation37_spill] sm:$0xff] %v5866_v0  ;;  %1355 = vperm.xlu0 %5043, %v5458_v12   ;;  %v5869_v4 = vpop.permute.xlu1 %503  ;;  %v5871_v32 = vpop.permute.xlu0 %498  ;;  %v848_v0 = vand.u32 2147483647, %v688_v9 }
 0x101   : > { %10111 = vst [vmem:[#allocation38_spill] sm:$0xff] %v5869_v4  ;;  %v847_v4 = vand.u32 2147483647, %v687_v8  ;;  %v5914_v9 = vperm.slane %v2766_v37, 2 }
 0x102   : > { %10112 = vst [vmem:[#allocation39_spill] sm:$0xff] %v5871_v32  ;;  %v846_v32 = vand.u32 2147483647, %v686_v36  ;;  %v701_v36 = vsub.f32 %v5649_v49, %v5875_v35  ;;  %v683_v49 = vsub.f32 %v5651_v50, %v5875_v35 }
 0x103   : > { %10119 = vst [vmem:[#allocation46_spill] sm:$0xff] %v5914_v9 }
 0x104   : > { %v1006_v8 = vsub.f32 1.0, %v846_v32 }
 0x106   : > { %v5931_v9 = vmax.f32 %v1006_v8, 0.0 }
 0x107   : > { %1359 = vperm.xlu1 %5044, %v5453_v11   ;;  %1363 = vperm.xlu2 %5042, %v5448_v10   ;;  %v5881_v7 = vpop.permute.xlu2 %568  ;;  %v689_v11 = vsub.f32 %v5624_v41, %v5875_v35  ;;  %v2765_v10 = vperm.slane %v256_v29, 2  ;;  %v3892_v41 = vperm.slane %v256_v29, 7 }
 0x108   : > { %10114 = vst [vmem:[#allocation41_spill] sm:$0xff] %v5881_v7  ;;  %1367 = vperm.xlu0 %5043, %v5476_v15   ;;  %v5886_v12 = vpop.permute.xlu1 %518  ;;  %v5888_v40 = vpop.permute.xlu0 %513  ;;  %v694_v7 = vsub.f32 %v5638_v45, %v5873_v3  ;;  %v695_v15 = vsub.f32 %v5638_v45, %v5875_v35  ;;  %v682_v45 = vsub.f32 %v5651_v50, %v5873_v3 }
 0x109   : > { %10115 = vst [vmem:[#allocation42_spill] sm:$0xff] %v5886_v12  ;;  %v5898_v12 = vperm.slane %v1639_v28, 1  ;;  %v849_v1 = vand.u32 2147483647, %v689_v11  ;;  %v5906_v31 = vperm.slane %v2765_v10, 2  ;;  %v5927_v37 = vperm.slane %v3892_v41, 3 }
 0x10a   : > { %10116 = vst [vmem:[#allocation43_spill] sm:$0xff] %v5888_v40  ;;  %v3891_v40 = vperm.slane %v256_v29, 3  ;;  %v854_v38 = vand.u32 2147483647, %v694_v7  ;;  %v1007_v29 = vsub.f32 1.0, %v847_v4  ;;  %v679_v50 = vsub.f32 %v5653_v51, %v5875_v35 }
 0x10b   : > { %10118 = vst [vmem:[#allocation45_spill] sm:$0xff] %v5906_v31  ;;  %v855_v33 = vand.u32 2147483647, %v695_v15  ;;  %v860_v10 = vand.u32 2147483647, %v700_v6  ;;  %v1009_v4 = vsub.f32 1.0, %v849_v1  ;;  %v707_v41 = vsub.f32 %v5664_v55, %v5875_v35 }
 0x10c   : > { %v5923_v11 = vperm.slane %v3891_v40, 3  ;;  %10123 = vst [vmem:[#allocation50_spill] sm:$0xff] %v5927_v37  ;;  %v861_v15 = vand.u32 2147483647, %v701_v36  ;;  %v842_v31 = vand.u32 2147483647, %v682_v45  ;;  %v706_v40 = vsub.f32 %v5664_v55, %v5873_v3 }
 0x10d   : > { %10124 = vst [vmem:[#allocation51_spill] sm:$0xff] %v5931_v9  ;;  %v1015_v6 = vsub.f32 1.0, %v855_v33  ;;  %v1020_v1 = vsub.f32 1.0, %v860_v10  ;;  %v5943_v8 = vmax.f32 %v1009_v4, 0.0  ;;  %v839_v45 = vand.u32 2147483647, %v679_v50 }
 0x10e   : > { %10122 = vst [vmem:[#allocation49_spill] sm:$0xff] %v5923_v11  ;;  %v5935_v11 = vmax.f32 %v1007_v29, 0.0  ;;  %v685_v29 = vsub.f32 %v5666_v56, %v5875_v35  ;;  %v1002_v33 = vsub.f32 1.0, %v842_v31  ;;  %v680_v55 = vsub.f32 %v5668_v57, %v5873_v3 }
 0x10f   : > { %1371 = vperm.xlu1 %5044, %v5471_v14   ;;  %1375 = vperm.xlu2 %5042, %v5466_v13   ;;  %v5912_v28 = vpop.permute.xlu2 %583  ;;  %v1008_v14 = vsub.f32 1.0, %v848_v0  ;;  %v678_v13 = vsub.f32 %v5653_v51, %v5873_v3  ;;  %v843_v0 = vand.u32 2147483647, %v683_v49  ;;  %v684_v51 = vsub.f32 %v5666_v56, %v5873_v3  ;;  %10127 = vst [vmem:[#allocation54_spill] sm:$0xff] %v5943_v8 }
 0x110   : > { %1379 = vperm.xlu0 %5043, %v5494_v18   ;;  %v5919_v32 = vpop.permute.xlu1 %533  ;;  %v5921_v7 = vpop.permute.xlu0 %528  ;;  %v1014_v18 = vsub.f32 1.0, %v854_v38  ;;  %10125 = vst [vmem:[#allocation52_spill] sm:$0xff] %v5935_v11  ;;  %v1021_v38 = vsub.f32 1.0, %v861_v15  ;;  %v866_v49 = vand.u32 2147483647, %v706_v40  ;;  %v5955_v10 = vmax.f32 %v1015_v6, 0.0 }
 0x111   : > { %10120 = vst [vmem:[#allocation47_spill] sm:$0xff] %v5919_v32  ;;  %v5939_v37 = vmax.f32 %v1008_v14, 0.0  ;;  %v838_v36 = vand.u32 2147483647, %v678_v13  ;;  %v1003_v13 = vsub.f32 1.0, %v843_v0  ;;  %v681_v56 = vsub.f32 %v5668_v57, %v5875_v35 }
 0x112   : > { %10121 = vst [vmem:[#allocation48_spill] sm:$0xff] %v5921_v7  ;;  %v5947_v11 = vmax.f32 %v1014_v18, 0.0  ;;  %v867_v4 = vand.u32 2147483647, %v707_v41  ;;  %v5964_v50 = vmax.f32 %v1020_v1, 0.0  ;;  %v5968_v40 = vmax.f32 %v1021_v38, 0.0 }
 0x113   : > { %10126 = vst [vmem:[#allocation53_spill] sm:$0xff] %v5939_v37  ;;  %v844_v18 = vand.u32 2147483647, %v684_v51  ;;  %v999_v6 = vsub.f32 1.0, %v839_v45  ;;  %v845_v0 = vand.u32 2147483647, %v685_v29  ;;  %v713_v57 = vsub.f32 %v5679_v61, %v5875_v35 }
 0x114   : > { %10128 = vst [vmem:[#allocation55_spill] sm:$0xff] %v5947_v11  ;;  %v5972_v41 = vmax.f32 %v1002_v33, 0.0  ;;  %v840_v9 = vand.u32 2147483647, %v680_v55  ;;  %v692_v1 = vsub.f32 %v5681_v62, %v5873_v3  ;;  %v841_v51 = vand.u32 2147483647, %v681_v56 }
 0x115   : > { %10129 = vst [vmem:[#allocation56_spill] sm:$0xff] %v5955_v10  ;;  %v693_v38 = vsub.f32 %v5681_v62, %v5875_v35  ;;  %v1004_v45 = vsub.f32 1.0, %v844_v18  ;;  %v5984_v33 = vmax.f32 %v999_v6, 0.0  ;;  %v873_v55 = vand.u32 2147483647, %v713_v57  ;;  %v10203_v10 = vld [vmem:[#allocation27_spill] sm:$0xff] }
 0x116   : > { %10130 = vst [vmem:[#allocation57_spill] sm:$0xff] %v5964_v50  ;;  %v5976_v50 = vmax.f32 %v1003_v13, 0.0  ;;  %v691_v13 = vsub.f32 %v5683_v63, %v5875_v35  ;;  %v852_v56 = vand.u32 2147483647, %v692_v1  ;;  %v718_v62 = vsub.f32 %v5694_v46, %v5873_v3 }
 0x117   : > { %1383 = vperm.xlu1 %5044, %v5489_v17   ;;  %1387 = vperm.xlu2 %5042, %v5484_v16   ;;  %v5953_v14 = vpop.permute.xlu2 %598  ;;  %v998_v17 = vsub.f32 1.0, %v838_v36  ;;  %v712_v16 = vsub.f32 %v5679_v61, %v5873_v3  ;;  %10131 = vst [vmem:[#allocation58_spill] sm:$0xff] %v5968_v40  ;;  %v1027_v36 = vsub.f32 1.0, %v867_v4  ;;  %v690_v61 = vsub.f32 %v5683_v63, %v5873_v3 }
 0x118   : > { %1391 = vperm.xlu0 %5043, %v5512_v21   ;;  %v5960_v31 = vpop.permute.xlu1 %548  ;;  %v5962_v15 = vpop.permute.xlu0 %543  ;;  %10132 = vst [vmem:[#allocation59_spill] sm:$0xff] %v5972_v41  ;;  %v1026_v21 = vsub.f32 1.0, %v866_v49  ;;  %v1005_v49 = vsub.f32 1.0, %v845_v0  ;;  %v1000_v4 = vsub.f32 1.0, %v840_v9  ;;  %v853_v6 = vand.u32 2147483647, %v693_v38 }
 0x119   : > { %10133 = vst [vmem:[#allocation60_spill] sm:$0xff] %v5976_v50  ;;  %v5980_v40 = vmax.f32 %v998_v17, 0.0  ;;  %v872_v29 = vand.u32 2147483647, %v712_v16  ;;  %v5996_v18 = vmax.f32 %v1027_v36, 0.0  ;;  %v1001_v16 = vsub.f32 1.0, %v841_v51 }
 0x11a   : > { %v5988_v50 = vmax.f32 %v1026_v21, 0.0  ;;  %v719_v63 = vsub.f32 %v5694_v46, %v5875_v35  ;;  %v6005_v57 = vmax.f32 %v1004_v45, 0.0  ;;  %v850_v21 = vand.u32 2147483647, %v690_v61 }
 0x11b   : > { %10135 = vst [vmem:[#allocation62_spill] sm:$0xff] %v5996_v18  ;;  %v6009_v1 = vmax.f32 %v1005_v49, 0.0  ;;  %v1033_v36 = vsub.f32 1.0, %v873_v55  ;;  %v851_v51 = vand.u32 2147483647, %v691_v13  ;;  %v699_v46 = vsub.f32 %v5696_v47, %v5875_v35 }
 0x11c   : > { %10134 = vst [vmem:[#allocation61_spill] sm:$0xff] %v5988_v50  ;;  %v6013_v38 = vmax.f32 %v1000_v4, 0.0  ;;  %v878_v18 = vand.u32 2147483647, %v718_v62  ;;  %v696_v45 = vsub.f32 %v5698_v48, %v5873_v3  ;;  %v6017_v50 = vmax.f32 %v1001_v16, 0.0 }
 0x11d   : > { %10136 = vst [vmem:[#allocation63_spill] sm:$0xff] %v6005_v57  ;;  %v879_v61 = vand.u32 2147483647, %v719_v63  ;;  %v697_v49 = vsub.f32 %v5698_v48, %v5875_v35  ;;  %v1010_v55 = vsub.f32 1.0, %v850_v21  ;;  %v6025_v4 = vmax.f32 %v1033_v36, 0.0 }
 0x11e   : > { %10137 = vst [vmem:[#allocation64_spill] sm:$0xff] %v6009_v1  ;;  %v859_v62 = vand.u32 2147483647, %v699_v46  ;;  %v725_v16 = vsub.f32 %v5709_v58, %v5875_v35  ;;  %v856_v63 = vand.u32 2147483647, %v696_v45  ;;  %v704_v48 = vsub.f32 %v5711_v59, %v5873_v3 }
 0x11f   : > { %1395 = vperm.xlu1 %5044, %v5507_v20   ;;  %1399 = vperm.xlu2 %5042, %v5502_v19   ;;  %v5994_v17 = vpop.permute.xlu2 %613  ;;  %v1032_v20 = vsub.f32 1.0, %v872_v29  ;;  %v698_v19 = vsub.f32 %v5696_v47, %v5873_v3  ;;  %10138 = vst [vmem:[#allocation65_spill] sm:$0xff] %v6013_v38  ;;  %v1013_v29 = vsub.f32 1.0, %v853_v6  ;;  %v724_v47 = vsub.f32 %v5709_v58, %v5873_v3 }
 0x120   : > { %1403 = vperm.xlu0 %5043, %v5530_v24   ;;  %v6001_v9 = vpop.permute.xlu1 %563  ;;  %v6003_v0 = vpop.permute.xlu0 %558  ;;  %v1012_v24 = vsub.f32 1.0, %v852_v56  ;;  %10139 = vst [vmem:[#allocation66_spill] sm:$0xff] %v6017_v50  ;;  %v1011_v56 = vsub.f32 1.0, %v851_v51  ;;  %v1038_v6 = vsub.f32 1.0, %v878_v18  ;;  %v857_v36 = vand.u32 2147483647, %v697_v49 }
 0x121   : > { %v6021_v41 = vmax.f32 %v1032_v20, 0.0  ;;  %v858_v13 = vand.u32 2147483647, %v698_v19  ;;  %10141 = vst [vmem:[#allocation68_spill] sm:$0xff] %v6025_v4  ;;  %v6037_v21 = vmax.f32 %v1013_v29, 0.0  ;;  %v1039_v19 = vsub.f32 1.0, %v879_v61 }
 0x122   : > { %v6029_v50 = vmax.f32 %v1012_v24, 0.0  ;;  %v705_v58 = vsub.f32 %v5711_v59, %v5875_v35  ;;  %v6046_v46 = vmax.f32 %v1010_v55, 0.0  ;;  %v884_v24 = vand.u32 2147483647, %v724_v47 }
 0x123   : > { %10140 = vst [vmem:[#allocation67_spill] sm:$0xff] %v6021_v41  ;;  %v6050_v45 = vmax.f32 %v1011_v56, 0.0  ;;  %v1019_v29 = vsub.f32 1.0, %v859_v62  ;;  %v885_v61 = vand.u32 2147483647, %v725_v16  ;;  %v703_v59 = vsub.f32 %v5713_v60, %v5875_v35 }
 0x124   : > { %10142 = vst [vmem:[#allocation69_spill] sm:$0xff] %v6029_v50  ;;  %v6054_v49 = vmax.f32 %v1038_v6, 0.0  ;;  %v864_v4 = vand.u32 2147483647, %v704_v48  ;;  %v730_v55 = vsub.f32 %v5724_v52, %v5873_v3  ;;  %v865_v47 = vand.u32 2147483647, %v705_v58 }
 0x125   : > { %10143 = vst [vmem:[#allocation70_spill] sm:$0xff] %v6037_v21  ;;  %v6058_v21 = vmax.f32 %v1039_v19, 0.0  ;;  %v731_v56 = vsub.f32 %v5724_v52, %v5875_v35  ;;  %v1044_v62 = vsub.f32 1.0, %v884_v24  ;;  %v1045_v6 = vsub.f32 1.0, %v885_v61 }
 0x126   : > { %10144 = vst [vmem:[#allocation71_spill] sm:$0xff] %v6046_v46  ;;  %v711_v48 = vsub.f32 %v5726_v53, %v5875_v35  ;;  %v708_v19 = vsub.f32 %v5728_v54, %v5873_v3  ;;  %v1024_v52 = vsub.f32 1.0, %v864_v4  ;;  %v1025_v61 = vsub.f32 1.0, %v865_v47 }
 0x127   : > { %1407 = vperm.xlu1 %5044, %v5525_v23   ;;  %1411 = vperm.xlu2 %5042, %v5520_v22   ;;  %v6035_v20 = vpop.permute.xlu2 %628  ;;  %v1018_v23 = vsub.f32 1.0, %v858_v13  ;;  %v702_v22 = vsub.f32 %v5713_v60, %v5873_v3  ;;  %10145 = vst [vmem:[#allocation72_spill] sm:$0xff] %v6050_v45  ;;  %v1017_v13 = vsub.f32 1.0, %v857_v36  ;;  %v710_v60 = vsub.f32 %v5726_v53, %v5873_v3 }
 0x128   : > { %1415 = vperm.xlu0 %5043, %v5548_v27   ;;  %v6042_v18 = vpop.permute.xlu1 %578  ;;  %v6044_v51 = vpop.permute.xlu0 %573  ;;  %10146 = vst [vmem:[#allocation73_spill] sm:$0xff] %v6054_v49  ;;  %v1016_v27 = vsub.f32 1.0, %v856_v63  ;;  %v863_v63 = vand.u32 2147483647, %v703_v59  ;;  %v6070_v36 = vmax.f32 %v1019_v29, 0.0  ;;  %v709_v53 = vsub.f32 %v5728_v54, %v5875_v35 }
 0x129   : > { %10147 = vst [vmem:[#allocation74_spill] sm:$0xff] %v6058_v21  ;;  %v6062_v41 = vmax.f32 %v1018_v23, 0.0  ;;  %v862_v16 = vand.u32 2147483647, %v702_v22  ;;  %v890_v23 = vand.u32 2147483647, %v730_v55  ;;  %v766_v11 = vsub.f32 %v10203_v10, %v5873_v3 }
 0x12a   : > { %10149 = vst [vmem:[#allocation76_spill] sm:$0xff] %v6070_v36  ;;  %v6072_v58 = vmax.f32 %v1016_v27, 0.0  ;;  %v6078_v22 = vmax.f32 %v1017_v13, 0.0  ;;  %v891_v59 = vand.u32 2147483647, %v731_v56  ;;  %v6087_v4 = vmax.f32 %v1044_v62, 0.0 }
 0x12b   : > { %10148 = vst [vmem:[#allocation75_spill] sm:$0xff] %v6062_v41  ;;  %v870_v55 = vand.u32 2147483647, %v710_v60  ;;  %v6091_v13 = vmax.f32 %v1045_v6, 0.0  ;;  %v1023_v47 = vsub.f32 1.0, %v863_v63  ;;  %v6093_v36 = vmax.f32 %v1024_v52, 0.0 }
 0x12c   : > { %10150 = vst [vmem:[#allocation77_spill] sm:$0xff] %v6072_v58  ;;  %v871_v56 = vand.u32 2147483647, %v711_v48  ;;  %v868_v21 = vand.u32 2147483647, %v708_v19  ;;  %v1050_v54 = vsub.f32 1.0, %v890_v23  ;;  %v716_v62 = vsub.f32 %v5741_v43, %v5873_v3 }
 0x12d   : > { %10151 = vst [vmem:[#allocation78_spill] sm:$0xff] %v6078_v22  ;;  %v869_v60 = vand.u32 2147483647, %v709_v53  ;;  %v717_v6 = vsub.f32 %v5741_v43, %v5875_v35  ;;  %v1030_v63 = vsub.f32 1.0, %v870_v55  ;;  %v714_v19 = vsub.f32 %v5743_v39, %v5873_v3  ;;  %v10160_v55 = vld [vmem:[#allocation5_spill] sm:$0xff] }
 0x12e   : > { %10152 = vst [vmem:[#allocation79_spill] sm:$0xff] %v6087_v4  ;;  %v6099_v4 = vmax.f32 %v1025_v61, 0.0  ;;  %v6107_v52 = vmax.f32 %v1023_v47, 0.0  ;;  %v1028_v23 = vsub.f32 1.0, %v868_v21  ;;  %v715_v61 = vsub.f32 %v5743_v39, %v5875_v35 }
 0x12f   : > { %1419 = vperm.xlu1 %5044, %v5543_v26   ;;  %1423 = vperm.xlu2 %5042, %v5538_v25   ;;  %v6076_v24 = vpop.permute.xlu2 %643  ;;  %v1022_v26 = vsub.f32 1.0, %v862_v16  ;;  %v736_v25 = vsub.f32 %v5739_v42, %v5873_v3  ;;  %10153 = vst [vmem:[#allocation80_spill] sm:$0xff] %v6091_v13  ;;  %v1051_v16 = vsub.f32 1.0, %v891_v59  ;;  %v876_v53 = vand.u32 2147483647, %v716_v62 }
 0x130   : > { %1427 = vperm.xlu0 %5043, %v5566_v30   ;;  %v6083_v29 = vpop.permute.xlu1 %593  ;;  %v6085_v27 = vpop.permute.xlu0 %588  ;;  %10154 = vst [vmem:[#allocation81_spill] sm:$0xff] %v6093_v36  ;;  %v737_v30 = vsub.f32 %v5739_v42, %v5875_v35  ;;  %v1031_v42 = vsub.f32 1.0, %v871_v56  ;;  %v742_v43 = vsub.f32 %v5754_v44, %v5873_v3  ;;  %v1029_v56 = vsub.f32 1.0, %v869_v60 }
 0x131   : > { %10155 = vst [vmem:[#allocation82_spill] sm:$0xff] %v6099_v4  ;;  %v6103_v13 = vmax.f32 %v1022_v26, 0.0  ;;  %v896_v48 = vand.u32 2147483647, %v736_v25  ;;  %v6111_v4 = vmax.f32 %v1050_v54, 0.0  ;;  %v10159_v26 = vld [vmem:[#allocation6_spill] sm:$0xff]  ;;  %v743_v39 = vsub.f32 %v5754_v44, %v5875_v35 }
 0x132   : > { %10157 = vst [vmem:[#allocation84_spill] sm:$0xff] %v6107_v52  ;;  %v897_v59 = vand.u32 2147483647, %v737_v30  ;;  %v6119_v47 = vmax.f32 %v1051_v16, 0.0  ;;  %v877_v21 = vand.u32 2147483647, %v717_v6 }
 0x133   : > { %10156 = vst [vmem:[#allocation83_spill] sm:$0xff] %v6103_v13  ;;  %v10162_v54 = vld [vmem:[#allocation9_spill] sm:$0xff]  ;;  %v874_v36 = vand.u32 2147483647, %v714_v19  ;;  %v6132_v16 = vmax.f32 %v1031_v42, 0.0  ;;  %v1036_v41 = vsub.f32 1.0, %v876_v53 }
 0x134   : > { %10158 = vst [vmem:[#allocation85_spill] sm:$0xff] %v6111_v4  ;;  %v6128_v4 = vmax.f32 %v1030_v63, 0.0  ;;  %v875_v60 = vand.u32 2147483647, %v715_v61  ;;  %v10166_v44 = vld [vmem:[#allocation17_spill] sm:$0xff]  ;;  %v1057_v49 = vsub.f32 1.0, %v897_v59 }
 0x135   : > { %10161 = vst [vmem:[#allocation6_spill] sm:$0xff] %v6119_v47  ;;  %v6138_v47 = vmax.f32 %v1028_v23, 0.0  ;;  %v902_v63 = vand.u32 2147483647, %v742_v43  ;;  %v903_v19 = vand.u32 2147483647, %v743_v39  ;;  %v721_v42 = vsub.f32 %v10166_v44, %v5875_v35 }
 0x136   : > { %10163 = vst [vmem:[#allocation5_spill] sm:$0xff] %v6128_v4  ;;  %v6140_v4 = vmax.f32 %v1029_v56, 0.0  ;;  %v1034_v61 = vsub.f32 1.0, %v874_v36  ;;  %v1035_v50 = vsub.f32 1.0, %v875_v60  ;;  %v6150_v53 = vmax.f32 %v1057_v49, 0.0  ;;  %v10175_v36 = vld [vmem:[#allocation7_spill] sm:$0xff] }
 0x137   : > { %1431 = vperm.xlu1 %5044, %v10159_v26   ;;  %1435 = vperm.xlu2 %5042, %v10160_v55   ;;  %v6117_v25 = vpop.permute.xlu2 %658  ;;  %v1056_v26 = vsub.f32 1.0, %v896_v48  ;;  %v10164_v55 = vld [vmem:[#allocation16_spill] sm:$0xff]  ;;  %10165 = vst [vmem:[#allocation9_spill] sm:$0xff] %v6132_v16  ;;  %v1037_v48 = vsub.f32 1.0, %v877_v21  ;;  %v6152_v43 = vmax.f32 %v1036_v41, 0.0  ;;  %v1062_v56 = vsub.f32 1.0, %v902_v63 }
 0x138   : > { %1439 = vperm.xlu0 %5043, %v10162_v54   ;;  %v6124_v30 = vpop.permute.xlu1 %608  ;;  %v6126_v62 = vpop.permute.xlu0 %603  ;;  %v722_v52 = vsub.f32 %v10164_v55, %v5873_v3  ;;  %v723_v6 = vsub.f32 %v10164_v55, %v5875_v35  ;;  %v720_v54 = vsub.f32 %v10166_v44, %v5873_v3  ;;  %10167 = vst [vmem:[#allocation16_spill] sm:$0xff] %v6138_v47  ;;  %v10170_v55 = vld [vmem:[#allocation18_spill] sm:$0xff]  ;;  %v10173_v21 = vld [vmem:[#allocation19_spill] sm:$0xff]  ;;  %v1063_v60 = vsub.f32 1.0, %v903_v19 }
 0x139   : > { %10168 = vst [vmem:[#allocation17_spill] sm:$0xff] %v6140_v4  ;;  %v6144_v16 = vmax.f32 %v1056_v26, 0.0  ;;  %v748_v22 = vsub.f32 %v10170_v55, %v5873_v3  ;;  %v749_v59 = vsub.f32 %v10170_v55, %v5875_v35  ;;  %v728_v39 = vsub.f32 %v10173_v21, %v5873_v3  ;;  %v10174_v26 = vld [vmem:[#allocation8_spill] sm:$0xff] }
 0x13a   : > { %v882_v13 = vand.u32 2147483647, %v722_v52  ;;  %v883_v23 = vand.u32 2147483647, %v723_v6  ;;  %v880_v47 = vand.u32 2147483647, %v720_v54  ;;  %v729_v44 = vsub.f32 %v10173_v21, %v5875_v35 }
 0x13b   : > { %10169 = vst [vmem:[#allocation86_spill] sm:$0xff] %v6144_v16  ;;  %v6158_v52 = vmax.f32 %v1037_v48, 0.0  ;;  %v881_v6 = vand.u32 2147483647, %v721_v42  ;;  %v10177_v54 = vld [vmem:[#allocation12_spill] sm:$0xff]  ;;  %v6167_v63 = vmax.f32 %v1034_v61, 0.0 }
 0x13c   : > { %10171 = vst [vmem:[#allocation18_spill] sm:$0xff] %v6150_v53  ;;  %v1042_v55 = vsub.f32 1.0, %v882_v13  ;;  %v908_v53 = vand.u32 2147483647, %v748_v22  ;;  %v6173_v19 = vmax.f32 %v1035_v50, 0.0  ;;  %v1043_v42 = vsub.f32 1.0, %v883_v23 }
 0x13d   : > { %10172 = vst [vmem:[#allocation87_spill] sm:$0xff] %v6152_v43  ;;  %v909_v21 = vand.u32 2147483647, %v749_v59  ;;  %v6175_v43 = vmax.f32 %v1062_v56, 0.0  ;;  %v10182_v61 = vld [vmem:[#allocation21_spill] sm:$0xff]  ;;  %v6181_v22 = vmax.f32 %v1063_v60, 0.0 }
 0x13e   : > { %10176 = vst [vmem:[#allocation19_spill] sm:$0xff] %v6158_v52  ;;  %v1040_v52 = vsub.f32 1.0, %v880_v47  ;;  %v754_v13 = vsub.f32 %v10182_v61, %v5873_v3  ;;  %v889_v4 = vand.u32 2147483647, %v729_v44  ;;  %v755_v50 = vsub.f32 %v10182_v61, %v5875_v35  ;;  %v10185_v59 = vld [vmem:[#allocation22_spill] sm:$0xff]  ;;  %v10187_v60 = vld [vmem:[#allocation23_spill] sm:$0xff] }
 0x13f   : > { %1443 = vperm.xlu1 %5044, %v10174_v26   ;;  %1447 = vperm.xlu2 %5042, %v10175_v36   ;;  %10178 = vst [vmem:[#allocation8_spill] sm:$0xff] %v6167_v63  ;;  %v10179_v26 = vld [vmem:[#allocation20_spill] sm:$0xff]  ;;  %v1041_v63 = vsub.f32 1.0, %v881_v6  ;;  %v1068_v47 = vsub.f32 1.0, %v908_v53  ;;  %v734_v56 = vsub.f32 %v10185_v59, %v5873_v3  ;;  %v732_v6 = vsub.f32 %v10187_v60, %v5873_v3  ;;  %v10190_v53 = vld [vmem:[#allocation10_spill] sm:$0xff] }
 0x140   : > { %1451 = vperm.xlu0 %5043, %v10177_v54   ;;  %v6163_v49 = vpop.permute.xlu1 %623  ;;  %v6165_v41 = vpop.permute.xlu0 %618  ;;  %v726_v36 = vsub.f32 %v10179_v26, %v5873_v3  ;;  %10180 = vst [vmem:[#allocation7_spill] sm:$0xff] %v6173_v19  ;;  %v888_v54 = vand.u32 2147483647, %v728_v39  ;;  %v727_v16 = vsub.f32 %v10179_v26, %v5875_v35  ;;  %v6185_v19 = vmax.f32 %v1042_v55, 0.0 }
 0x141   : > { %v6171_v48 = vpop.permute.xlu2 %1319  ;;  %10181 = vst [vmem:[#allocation12_spill] sm:$0xff] %v6175_v43  ;;  %v6189_v39 = vmax.f32 %v1043_v42, 0.0  ;;  %v1069_v26 = vsub.f32 1.0, %v909_v21  ;;  %v735_v43 = vsub.f32 %v10185_v59, %v5875_v35  ;;  %v6195_v44 = vmax.f32 %v1040_v52, 0.0  ;;  %v10192_v59 = vld [vmem:[#allocation14_spill] sm:$0xff] }
 0x142   : > { %10183 = vst [vmem:[#allocation20_spill] sm:$0xff] %v6181_v22  ;;  %v886_v23 = vand.u32 2147483647, %v726_v36  ;;  %v1048_v22 = vsub.f32 1.0, %v888_v54  ;;  %v887_v61 = vand.u32 2147483647, %v727_v16  ;;  %v733_v21 = vsub.f32 %v10187_v60, %v5875_v35 }
 0x143   : > { %10184 = vst [vmem:[#allocation21_spill] sm:$0xff] %v6185_v19  ;;  %v914_v55 = vand.u32 2147483647, %v754_v13  ;;  %v10189_v19 = vld [vmem:[#allocation11_spill] sm:$0xff]  ;;  %v6199_v36 = vmax.f32 %v1041_v63, 0.0  ;;  %v1049_v42 = vsub.f32 1.0, %v889_v4 }
 0x144   : > { %10186 = vst [vmem:[#allocation22_spill] sm:$0xff] %v6189_v39  ;;  %v915_v39 = vand.u32 2147483647, %v755_v50  ;;  %v6208_v54 = vmax.f32 %v1068_v47, 0.0  ;;  %v1046_v16 = vsub.f32 1.0, %v886_v23  ;;  %v6214_v4 = vmax.f32 %v1069_v26, 0.0 }
 0x145   : > { %10188 = vst [vmem:[#allocation23_spill] sm:$0xff] %v6195_v44  ;;  %v894_v13 = vand.u32 2147483647, %v734_v56  ;;  %v895_v50 = vand.u32 2147483647, %v735_v43  ;;  %v1047_v44 = vsub.f32 1.0, %v887_v61 }
 0x146   : > { %10191 = vst [vmem:[#allocation11_spill] sm:$0xff] %v6199_v36  ;;  %v892_v36 = vand.u32 2147483647, %v732_v6  ;;  %v1074_v45 = vsub.f32 1.0, %v914_v55  ;;  %v10197_v47 = vld [vmem:[#allocation25_spill] sm:$0xff]  ;;  %v1075_v56 = vsub.f32 1.0, %v915_v39 }
 0x147   : > { %1455 = vperm.xlu1 %5044, %v10189_v19   ;;  %1459 = vperm.xlu2 %5042, %v10190_v53   ;;  %10193 = vst [vmem:[#allocation10_spill] sm:$0xff] %v6208_v54  ;;  %v10194_v19 = vld [vmem:[#allocation24_spill] sm:$0xff]  ;;  %v740_v23 = vsub.f32 %v10197_v47, %v5873_v3  ;;  %v893_v54 = vand.u32 2147483647, %v733_v21  ;;  %v741_v46 = vsub.f32 %v10197_v47, %v5875_v35  ;;  %v10198_v26 = vld [vmem:[#allocation26_spill] sm:$0xff]  ;;  %v6226_v43 = vmax.f32 %v1049_v42, 0.0 }
 0x148   : > { %1463 = vperm.xlu0 %5043, %v10192_v59   ;;  %v6204_v58 = vpop.permute.xlu1 %638  ;;  %v6206_v52 = vpop.permute.xlu0 %633  ;;  %v760_v53 = vsub.f32 %v10194_v19, %v5873_v3  ;;  %10195 = vst [vmem:[#allocation14_spill] sm:$0xff] %v6214_v4  ;;  %v761_v60 = vsub.f32 %v10194_v19, %v5875_v35  ;;  %v6218_v59 = vmax.f32 %v1048_v22, 0.0  ;;  %v738_v4 = vsub.f32 %v10198_v26, %v5873_v3  ;;  %v10204_v42 = vld [vmem:[#allocation13_spill] sm:$0xff] }
 0x149   : > { %v6212_v63 = vpop.permute.xlu2 %1331  ;;  %10199 = vst [vmem:[#allocation25_spill] sm:$0xff] %v6226_v43  ;;  %v1054_v6 = vsub.f32 1.0, %v894_v13  ;;  %v739_v22 = vsub.f32 %v10198_v26, %v5875_v35  ;;  %v6230_v61 = vmax.f32 %v1046_v16, 0.0  ;;  %v1055_v55 = vsub.f32 1.0, %v895_v50  ;;  %v5051_v13 = vld [vmem:[%s9983_s1 + $0x130] sm:$0xff] }
 0x14a   : > { %10196 = vst [vmem:[#allocation24_spill] sm:$0xff] %v6218_v59  ;;  %v920_v38 = vand.u32 2147483647, %v760_v53  ;;  %v1052_v19 = vsub.f32 1.0, %v892_v36  ;;  %v921_v59 = vand.u32 2147483647, %v761_v60 }
 0x14b   : > { %10200 = vst [vmem:[#allocation26_spill] sm:$0xff] %v6230_v61  ;;  %v6232_v39 = vmax.f32 %v1047_v44, 0.0  ;;  %v6234_v21 = vmax.f32 %v1074_v45, 0.0  ;;  %v900_v47 = vand.u32 2147483647, %v740_v23  ;;  %v6242_v16 = vmax.f32 %v1075_v56, 0.0 }
 0x14c   : > { %v1053_v53 = vsub.f32 1.0, %v893_v54  ;;  %v901_v36 = vand.u32 2147483647, %v741_v46  ;;  %v898_v50 = vand.u32 2147483647, %v738_v4  ;;  %v10206_v44 = vld [vmem:[#allocation15_spill] sm:$0xff] }
 0x14d   : > { %10201 = vst [vmem:[#allocation88_spill] sm:$0xff] %v6232_v39  ;;  %v6249_v23 = vmax.f32 %v1054_v6, 0.0  ;;  %v1080_v26 = vsub.f32 1.0, %v920_v38  ;;  %v6255_v56 = vmax.f32 %v1055_v55, 0.0  ;;  %v6257_v54 = vmax.f32 %v1052_v19, 0.0  ;;  %v10210_v4 = vld [vmem:[#allocation28_spill] sm:$0xff] }
 0x14e   : > { %10202 = vst [vmem:[#allocation89_spill] sm:$0xff] %v6234_v21  ;;  %v767_v21 = vsub.f32 %v10203_v10, %v5875_v35  ;;  %v1081_v46 = vsub.f32 1.0, %v921_v59  ;;  %v747_v6 = vsub.f32 %v10210_v4, %v5875_v35  ;;  %v10211_v38 = vld [vmem:[#allocation29_spill] sm:$0xff]  ;;  %v1061_v10 = vsub.f32 1.0, %v901_v36 }
 0x14f   : > { %1467 = vperm.xlu1 %5044, %v10204_v42   ;;  %1471 = vperm.xlu2 %5042, %v5051_v13   ;;  %10205 = vst [vmem:[#allocation27_spill] sm:$0xff] %v6242_v16  ;;  %v899_v42 = vand.u32 2147483647, %v739_v22  ;;  %v746_v13 = vsub.f32 %v10210_v4, %v5873_v3  ;;  %v926_v16 = vand.u32 2147483647, %v766_v11  ;;  %v744_v22 = vsub.f32 %v10211_v38, %v5873_v3 }
 0x150   : > { %1475 = vperm.xlu0 %5043, %v10206_v44   ;;  %v6245_v45 = vpop.permute.xlu1 %653  ;;  %v6247_v60 = vpop.permute.xlu0 %648  ;;  %10207 = vst [vmem:[#allocation13_spill] sm:$0xff] %v6249_v23  ;;  %v1060_v44 = vsub.f32 1.0, %v900_v47  ;;  %v6265_v23 = vmax.f32 %v1053_v53, 0.0  ;;  %v1058_v39 = vsub.f32 1.0, %v898_v50  ;;  %v745_v55 = vsub.f32 %v10211_v38, %v5875_v35  ;;  %v10215_v53 = vld [vmem:[#allocation30_spill] sm:$0xff] }
 0x151   : > { %v6253_v43 = vpop.permute.xlu2 %1339  ;;  %10208 = vst [vmem:[#allocation15_spill] sm:$0xff] %v6255_v56  ;;  %v6269_v19 = vmax.f32 %v1080_v26, 0.0  ;;  %v1059_v59 = vsub.f32 1.0, %v899_v42  ;;  %v927_v56 = vand.u32 2147483647, %v767_v21  ;;  %v772_v11 = vsub.f32 %v5831_v34, %v5873_v3  ;;  %v5052_v21 = vld [vmem:[%s9983_s1 + $0x140] sm:$0xff] }
 0x152   : > { %10209 = vst [vmem:[#allocation90_spill] sm:$0xff] %v6257_v54  ;;  %v6273_v47 = vmax.f32 %v1081_v46, 0.0  ;;  %v906_v4 = vand.u32 2147483647, %v746_v13  ;;  %v773_v54 = vsub.f32 %v5831_v34, %v5875_v35  ;;  %v752_v36 = vsub.f32 %v10215_v53, %v5873_v3  ;;  %v5053_v42 = vld [vmem:[%s9983_s1 + $0x148] sm:$0xff] }
 0x153   : > { %10212 = vst [vmem:[#allocation28_spill] sm:$0xff] %v6265_v23  ;;  %v6279_v50 = vmax.f32 %v1060_v44, 0.0  ;;  %v1086_v23 = vsub.f32 1.0, %v926_v16  ;;  %v907_v38 = vand.u32 2147483647, %v747_v6  ;;  %v6287_v46 = vmax.f32 %v1061_v10, 0.0 }
 0x154   : > { %10213 = vst [vmem:[#allocation29_spill] sm:$0xff] %v6269_v19  ;;  %v904_v26 = vand.u32 2147483647, %v744_v22  ;;  %v905_v34 = vand.u32 2147483647, %v745_v55  ;;  %v753_v13 = vsub.f32 %v10215_v53, %v5875_v35  ;;  %v10218_v16 = vld [vmem:[#allocation31_spill] sm:$0xff] }
 0x155   : > { %10214 = vst [vmem:[#allocation91_spill] sm:$0xff] %v6273_v47  ;;  %v750_v44 = vsub.f32 %v10218_v16, %v5873_v3  ;;  %v5054_v6 = vld [vmem:[%s9983_s1 + $0x150] sm:$0xff]  ;;  %v6300_v47 = vmax.f32 %v1058_v39, 0.0  ;;  %v6302_v10 = vmax.f32 %v1059_v59, 0.0  ;;  %v1087_v55 = vsub.f32 1.0, %v927_v56  ;;  %v10223_v56 = vld [vmem:[#allocation32_spill] sm:$0xff] }
 0x156   : > { %10216 = vst [vmem:[#allocation30_spill] sm:$0xff] %v6279_v50  ;;  %v1066_v53 = vsub.f32 1.0, %v906_v4  ;;  %v933_v19 = vand.u32 2147483647, %v773_v54  ;;  %v912_v50 = vand.u32 2147483647, %v752_v36  ;;  %v751_v61 = vsub.f32 %v10218_v16, %v5875_v35 }
 0x157   : > { %1479 = vperm.xlu1 %5044, %v5052_v21   ;;  %1483 = vperm.xlu2 %5042, %v5053_v42   ;;  %10217 = vst [vmem:[#allocation92_spill] sm:$0xff] %v6287_v46  ;;  %v932_v42 = vand.u32 2147483647, %v772_v11  ;;  %v6308_v8 = vmax.f32 %v1086_v23, 0.0  ;;  %v1064_v37 = vsub.f32 1.0, %v904_v26  ;;  %v778_v39 = vsub.f32 %v5846_v2, %v5873_v3  ;;  %v10225_v23 = vld [vmem:[#allocation33_spill] sm:$0xff] }
 0x158   : > { %1487 = vperm.xlu0 %5043, %v5054_v6   ;;  %v6296_v22 = vpop.permute.xlu1 %668  ;;  %v6298_v21 = vpop.permute.xlu0 %663  ;;  %10220 = vst [vmem:[#allocation93_spill] sm:$0xff] %v6300_v47  ;;  %v1067_v6 = vsub.f32 1.0, %v907_v38  ;;  %v1065_v47 = vsub.f32 1.0, %v905_v34  ;;  %v913_v59 = vand.u32 2147483647, %v753_v13  ;;  %v758_v11 = vsub.f32 %v10223_v56, %v5873_v3 }
 0x159   : > { %10219 = vst [vmem:[#allocation31_spill] sm:$0xff] %v6298_v21  ;;  %v6304_v46 = vpop.permute.xlu2 %1351  ;;  %v6314_v21 = vmax.f32 %v1087_v55, 0.0  ;;  %v1092_v54 = vsub.f32 1.0, %v932_v42  ;;  %v759_v4 = vsub.f32 %v10223_v56, %v5875_v35  ;;  %v756_v36 = vsub.f32 %v10225_v23, %v5873_v3  ;;  %v5055_v42 = vld [vmem:[%s9983_s1 + $0x158] sm:$0xff] }
 0x15a   : > { %10221 = vst [vmem:[#allocation94_spill] sm:$0xff] %v6302_v10  ;;  %v910_v10 = vand.u32 2147483647, %v750_v44  ;;  %v6320_v38 = vmax.f32 %v1066_v53, 0.0  ;;  %v1093_v26 = vsub.f32 1.0, %v933_v19  ;;  %v1072_v16 = vsub.f32 1.0, %v912_v50 }
 0x15b   : > { %10222 = vst [vmem:[#allocation95_spill] sm:$0xff] %v6308_v8  ;;  %v911_v8 = vand.u32 2147483647, %v751_v61  ;;  %v6322_v34 = vmax.f32 %v1067_v6, 0.0  ;;  %v6324_v13 = vmax.f32 %v1064_v37, 0.0  ;;  %v757_v55 = vsub.f32 %v10225_v23, %v5875_v35  ;;  %v5056_v53 = vld [vmem:[%s9983_s1 + $0x160] sm:$0xff] }
 0x15c   : > { %10224 = vst [vmem:[#allocation32_spill] sm:$0xff] %v6314_v21  ;;  %v938_v44 = vand.u32 2147483647, %v778_v39  ;;  %v6334_v19 = vmax.f32 %v1065_v47, 0.0  ;;  %v1073_v61 = vsub.f32 1.0, %v913_v59  ;;  %v1070_v50 = vsub.f32 1.0, %v910_v10 }
 0x15d   : > { %10226 = vst [vmem:[#allocation33_spill] sm:$0xff] %v6320_v38  ;;  %v918_v37 = vand.u32 2147483647, %v758_v11  ;;  %v5057_v6 = vld [vmem:[%s9983_s1 + $0x168] sm:$0xff]  ;;  %v6339_v39 = vmax.f32 %v1092_v54, 0.0  ;;  %v6347_v47 = vmax.f32 %v1093_v26, 0.0  ;;  %v779_v11 = vsub.f32 %v5846_v2, %v5875_v35 }
 0x15e   : > { %10227 = vst [vmem:[#allocation96_spill] sm:$0xff] %v6322_v34  ;;  %v919_v56 = vand.u32 2147483647, %v759_v4  ;;  %v916_v23 = vand.u32 2147483647, %v756_v36  ;;  %v6349_v10 = vmax.f32 %v1072_v16, 0.0 }
 0x15f   : > { %10228 = vst [vmem:[#allocation97_spill] sm:$0xff] %v6324_v13  ;;  %1491 = vperm.xlu1 %5044, %v5055_v42   ;;  %1495 = vperm.xlu2 %5042, %v5056_v53   ;;  %v10231_v42 = vld [vmem:[#allocation34_spill] sm:$0xff]  ;;  %v1071_v59 = vsub.f32 1.0, %v911_v8  ;;  %v1098_v54 = vsub.f32 1.0, %v938_v44  ;;  %v917_v4 = vand.u32 2147483647, %v757_v55 }
 0x160   : > { %10229 = vst [vmem:[#allocation98_spill] sm:$0xff] %v6334_v19  ;;  %1499 = vperm.xlu0 %5043, %v5057_v6   ;;  %v784_v34 = vsub.f32 %v10231_v42, %v5873_v3  ;;  %v10237_v36 = vld [vmem:[#allocation35_spill] sm:$0xff]  ;;  %v6359_v19 = vmax.f32 %v1073_v61, 0.0  ;;  %v1078_v26 = vsub.f32 1.0, %v918_v37  ;;  %v10239_v16 = vld [vmem:[#allocation36_spill] sm:$0xff]  ;;  %v6365_v2 = vmax.f32 %v1070_v50, 0.0 }
 0x161   : > { %10230 = vst [vmem:[#allocation99_spill] sm:$0xff] %v6339_v39  ;;  %v6343_v21 = vpop.permute.xlu1 %1327  ;;  %v6345_v53 = vpop.permute.xlu2 %1363  ;;  %v764_v39 = vsub.f32 %v10237_v36, %v5873_v3  ;;  %v765_v38 = vsub.f32 %v10237_v36, %v5875_v35  ;;  %v763_v8 = vsub.f32 %v10239_v16, %v5875_v35  ;;  %v1076_v44 = vsub.f32 1.0, %v916_v23  ;;  %v10243_v36 = vld [vmem:[#allocation37_spill] sm:$0xff]  ;;  %v5058_v50 = vld [vmem:[%s9983_s1 + $0x170] sm:$0xff] }
 0x162   : > { %10232 = vst [vmem:[#allocation100_spill] sm:$0xff] %v6343_v21  ;;  %v6353_v6 = vpop.permute.xlu0 %1323  ;;  %v944_v55 = vand.u32 2147483647, %v784_v34  ;;  %v6367_v13 = vmax.f32 %v1071_v59, 0.0  ;;  %v790_v61 = vsub.f32 %v10243_v36, %v5873_v3  ;;  %v791_v37 = vsub.f32 %v10243_v36, %v5875_v35  ;;  %v5059_v34 = vld [vmem:[%s9983_s1 + $0x178] sm:$0xff] }
 0x163   : > { %10233 = vst [vmem:[#allocation101_spill] sm:$0xff] %v6345_v53  ;;  %v1077_v21 = vsub.f32 1.0, %v917_v4  ;;  %v924_v53 = vand.u32 2147483647, %v764_v39  ;;  %v923_v59 = vand.u32 2147483647, %v763_v8 }
 0x164   : > { %10234 = vst [vmem:[#allocation102_spill] sm:$0xff] %v6347_v47  ;;  %v762_v47 = vsub.f32 %v10239_v16, %v5873_v3  ;;  %v925_v16 = vand.u32 2147483647, %v765_v38  ;;  %v5060_v38 = vld [vmem:[%s9983_s1 + $0x180] sm:$0xff]  ;;  %v6392_v4 = vmax.f32 %v1076_v44, 0.0  ;;  %v1104_v36 = vsub.f32 1.0, %v944_v55 }
 0x165   : > { %10235 = vst [vmem:[#allocation103_spill] sm:$0xff] %v6349_v10  ;;  %v1079_v10 = vsub.f32 1.0, %v919_v56  ;;  %v6383_v56 = vmax.f32 %v1078_v26, 0.0  ;;  %v950_v8 = vand.u32 2147483647, %v790_v61  ;;  %v6406_v44 = vmax.f32 %v1077_v21, 0.0 }
 0x166   : > { %10236 = vst [vmem:[#allocation104_spill] sm:$0xff] %v6353_v6  ;;  %v6369_v6 = vand.u32 2147483647, %v779_v11  ;;  %v922_v23 = vand.u32 2147483647, %v762_v47  ;;  %v10246_v11 = vld [vmem:[#allocation38_spill] sm:$0xff] }
 0x167   : > { %10238 = vst [vmem:[#allocation35_spill] sm:$0xff] %v6359_v19  ;;  %v6375_v19 = vmax.f32 %v1098_v54, 0.0  ;;  %1503 = vperm.xlu1 %5044, %v5058_v50   ;;  %1507 = vperm.xlu2 %5042, %v5059_v34   ;;  %v770_v54 = vsub.f32 %v10246_v11, %v5873_v3  ;;  %v6390_v39 = vmax.f32 %v1079_v10, 0.0  ;;  %v771_v50 = vsub.f32 %v10246_v11, %v5875_v35  ;;  %v10254_v11 = vld [vmem:[#allocation41_spill] sm:$0xff]  ;;  %v10256_v21 = vld [vmem:[#allocation42_spill] sm:$0xff] }
 0x168   : > { %10240 = vst [vmem:[#allocation36_spill] sm:$0xff] %v6365_v2  ;;  %1511 = vperm.xlu0 %5043, %v5060_v38   ;;  %v951_v34 = vand.u32 2147483647, %v791_v37  ;;  %v1084_v55 = vsub.f32 1.0, %v924_v53  ;;  %v1082_v61 = vsub.f32 1.0, %v922_v23  ;;  %v1083_v37 = vsub.f32 1.0, %v923_v59 }
 0x169   : > { %10241 = vst [vmem:[#allocation105_spill] sm:$0xff] %v6367_v13  ;;  %v6396_v26 = vpop.permute.xlu1 %1335  ;;  %v6398_v47 = vpop.permute.xlu2 %1375  ;;  %v930_v13 = vand.u32 2147483647, %v770_v54  ;;  %v6412_v2 = vmax.f32 %v1104_v36, 0.0  ;;  %v1110_v53 = vsub.f32 1.0, %v950_v8  ;;  %v10259_v59 = vld [vmem:[#allocation43_spill] sm:$0xff] }
 0x16a   : > { %10242 = vst [vmem:[#allocation106_spill] sm:$0xff] %v6369_v6  ;;  %v10251_v6 = vld [vmem:[#allocation39_spill] sm:$0xff]  ;;  %v6404_v10 = vpop.permute.xlu0 %1343  ;;  %v6418_v1 = vmax.f32 %v1084_v55, 0.0  ;;  %v774_v54 = vsub.f32 %v10259_v59, %v5873_v3  ;;  %v5061_v36 = vld [vmem:[%s9983_s1 + $0x188] sm:$0xff]  ;;  %v6432_v8 = vmax.f32 %v1083_v37, 0.0 }
 0x16b   : > { %10244 = vst [vmem:[#allocation37_spill] sm:$0xff] %v6375_v19  ;;  %v768_v19 = vsub.f32 %v10251_v6, %v5873_v3  ;;  %v769_v38 = vsub.f32 %v10251_v6, %v5875_v35  ;;  %v797_v6 = vsub.f32 %v10254_v11, %v5875_v35  ;;  %v6445_v37 = vmax.f32 %v1110_v53, 0.0 }
 0x16c   : > { %10245 = vst [vmem:[#allocation107_spill] sm:$0xff] %v6383_v56  ;;  %v796_v56 = vsub.f32 %v10254_v11, %v5873_v3  ;;  %v808_v53 = vsub.f32 %v5953_v14, %v5873_v3 }
 0x16d   : > { %10247 = vst [vmem:[#allocation38_spill] sm:$0xff] %v6390_v39  ;;  %v1085_v39 = vsub.f32 1.0, %v925_v16  ;;  %v1111_v16 = vsub.f32 1.0, %v951_v34  ;;  %v5063_v34 = vld [vmem:[%s9983_s1 + $0x198] sm:$0xff]  ;;  %v957_v55 = vand.u32 2147483647, %v797_v6 }
 0x16e   : > { %10248 = vst [vmem:[#allocation108_spill] sm:$0xff] %v6392_v4  ;;  %v956_v23 = vand.u32 2147483647, %v796_v56  ;;  %v802_v56 = vsub.f32 %v5912_v28, %v5873_v3 }
 0x16f   : > { %10249 = vst [vmem:[#allocation109_spill] sm:$0xff] %v6396_v26  ;;  %v931_v26 = vand.u32 2147483647, %v771_v50  ;;  %v6420_v57 = vmax.f32 %v1085_v39, 0.0  ;;  %1515 = vperm.xlu1 %5044, %v5061_v36   ;;  %v5062_v50 = vld [vmem:[%s9983_s1 + $0x190] sm:$0xff]  ;;  %v1090_v39 = vsub.f32 1.0, %v930_v13  ;;  %v803_v36 = vsub.f32 %v5912_v28, %v5875_v35 }
 0x170   : > { %10250 = vst [vmem:[#allocation110_spill] sm:$0xff] %v6398_v47  ;;  %v929_v47 = vand.u32 2147483647, %v769_v38  ;;  %1519 = vperm.xlu2 %5042, %v5062_v50   ;;  %1523 = vperm.xlu0 %5043, %v5063_v34   ;;  %v6447_v13 = vmax.f32 %v1111_v16, 0.0  ;;  %v1116_v42 = vsub.f32 1.0, %v956_v23  ;;  %v780_v28 = vsub.f32 %v5921_v7, %v5873_v3 }
 0x171   : > { %10252 = vst [vmem:[#allocation39_spill] sm:$0xff] %v6404_v10  ;;  %v928_v10 = vand.u32 2147483647, %v768_v19  ;;  %v6430_v19 = vmax.f32 %v1082_v61, 0.0  ;;  %v1091_v38 = vsub.f32 1.0, %v931_v26  ;;  %v6441_v50 = vpop.permute.xlu1 %1347  ;;  %v6443_v61 = vpop.permute.xlu2 %1387  ;;  %v782_v26 = vsub.f32 %v5919_v32, %v5873_v3 }
 0x172   : > { %10253 = vst [vmem:[#allocation111_spill] sm:$0xff] %v6406_v44  ;;  %v776_v44 = vsub.f32 %v10256_v21, %v5873_v3  ;;  %v1089_v59 = vsub.f32 1.0, %v929_v47  ;;  %v6449_v21 = vpop.permute.xlu0 %1355  ;;  %v934_v34 = vand.u32 2147483647, %v774_v54  ;;  %v962_v6 = vand.u32 2147483647, %v802_v56 }
 0x173   : > { %10255 = vst [vmem:[#allocation41_spill] sm:$0xff] %v6412_v2  ;;  %v1088_v4 = vsub.f32 1.0, %v928_v10  ;;  %v809_v10 = vsub.f32 %v5953_v14, %v5875_v35  ;;  %v6461_v47 = vmax.f32 %v1091_v38, 0.0  ;;  %v1117_v16 = vsub.f32 1.0, %v957_v55  ;;  %v5064_v38 = vld [vmem:[%s9983_s1 + $0x1a0] sm:$0xff] }
 0x174   : > { %10257 = vst [vmem:[#allocation112_spill] sm:$0xff] %v6418_v1  ;;  %v936_v11 = vand.u32 2147483647, %v776_v44  ;;  %v6455_v44 = vmax.f32 %v1090_v39, 0.0  ;;  %v963_v54 = vand.u32 2147483647, %v803_v36  ;;  %v788_v39 = vsub.f32 %v5960_v31, %v5873_v3 }
 0x175   : > { %10258 = vst [vmem:[#allocation113_spill] sm:$0xff] %v6420_v57  ;;  %v6465_v57 = vmax.f32 %v1089_v59, 0.0  ;;  %v789_v56 = vsub.f32 %v5960_v31, %v5875_v35  ;;  %v6471_v7 = vmax.f32 %v1116_v42, 0.0  ;;  %v940_v14 = vand.u32 2147483647, %v780_v28  ;;  %v5066_v42 = vld [vmem:[%s9983_s1 + $0x1b0] sm:$0xff] }
 0x176   : > { %10260 = vst [vmem:[#allocation114_spill] sm:$0xff] %v6432_v8  ;;  %v1096_v23 = vsub.f32 1.0, %v936_v11  ;;  %v1122_v59 = vsub.f32 1.0, %v962_v6  ;;  %v968_v55 = vand.u32 2147483647, %v808_v53  ;;  %v786_v31 = vsub.f32 %v5962_v15, %v5873_v3  ;;  %v10375_v8 = vld [vmem:[#allocation70_spill] sm:$0xff] }
 0x177   : > { %10261 = vst [vmem:[#allocation115_spill] sm:$0xff] %v6445_v37  ;;  %v6463_v37 = vmax.f32 %v1088_v4, 0.0  ;;  %1527 = vperm.xlu1 %5044, %v5064_v38   ;;  %v5065_v4 = vld [vmem:[%s9983_s1 + $0x1a8] sm:$0xff]  ;;  %v969_v11 = vand.u32 2147483647, %v809_v10  ;;  %v6484_v36 = vmax.f32 %v1117_v16, 0.0  ;;  %v787_v28 = vsub.f32 %v5962_v15, %v5875_v35 }
 0x178   : > { %10262 = vst [vmem:[#allocation116_spill] sm:$0xff] %v6447_v13  ;;  %v942_v13 = vand.u32 2147483647, %v782_v26  ;;  %1531 = vperm.xlu2 %5042, %v5065_v4   ;;  %1535 = vperm.xlu0 %5043, %v5066_v42   ;;  %v1123_v26 = vsub.f32 1.0, %v963_v54  ;;  %v948_v53 = vand.u32 2147483647, %v788_v39  ;;  %v814_v4 = vsub.f32 %v5994_v17, %v5873_v3 }
 0x179   : > { %10263 = vst [vmem:[#allocation117_spill] sm:$0xff] %v6455_v44  ;;  %v1094_v44 = vsub.f32 1.0, %v934_v34  ;;  %v6486_v34 = vmax.f32 %v1096_v23, 0.0  ;;  %v6490_v38 = vpop.permute.xlu1 %1359  ;;  %v6492_v6 = vpop.permute.xlu2 %1399  ;;  %v949_v10 = vand.u32 2147483647, %v789_v56  ;;  %v815_v42 = vsub.f32 %v5994_v17, %v5875_v35 }
 0x17a   : > { %10264 = vst [vmem:[#allocation118_spill] sm:$0xff] %v6461_v47  ;;  %v6498_v16 = vpop.permute.xlu0 %1367  ;;  %v1102_v54 = vsub.f32 1.0, %v942_v13  ;;  %v794_v15 = vsub.f32 %v6001_v9, %v5873_v3  ;;  %v1129_v39 = vsub.f32 1.0, %v969_v11  ;;  %v946_v56 = vand.u32 2147483647, %v786_v31  ;;  %v5067_v31 = vld [vmem:[%s9983_s1 + $0x1b8] sm:$0xff] }
 0x17b   : > { %10265 = vst [vmem:[#allocation119_spill] sm:$0xff] %v6463_v37  ;;  %v6500_v23 = vmax.f32 %v1094_v44, 0.0  ;;  %v6506_v47 = vmax.f32 %v1123_v26, 0.0  ;;  %v795_v17 = vsub.f32 %v6001_v9, %v5875_v35  ;;  %v792_v44 = vsub.f32 %v6003_v0, %v5873_v3  ;;  %v5068_v9 = vld [vmem:[%s9983_s1 + $0x1c0] sm:$0xff] }
 0x17c   : > { %10266 = vst [vmem:[#allocation120_spill] sm:$0xff] %v6465_v57  ;;  %v947_v57 = vand.u32 2147483647, %v787_v28  ;;  %v1109_v13 = vsub.f32 1.0, %v949_v10  ;;  %v975_v2 = vand.u32 2147483647, %v815_v42  ;;  %v793_v11 = vsub.f32 %v6003_v0, %v5875_v35 }
 0x17d   : > { %10267 = vst [vmem:[#allocation121_spill] sm:$0xff] %v6471_v7  ;;  %v6504_v7 = vmax.f32 %v1122_v59, 0.0  ;;  %v6512_v1 = vmax.f32 %v1102_v54, 0.0  ;;  %v6526_v28 = vmax.f32 %v1129_v39, 0.0  ;;  %v5069_v0 = vld [vmem:[%s9983_s1 + $0x1c8] sm:$0xff]  ;;  %v821_v54 = vsub.f32 %v6035_v20, %v5875_v35 }
 0x17e   : > { %10268 = vst [vmem:[#allocation122_spill] sm:$0xff] %v6484_v36  ;;  %v1128_v36 = vsub.f32 1.0, %v968_v55  ;;  %v954_v55 = vand.u32 2147483647, %v794_v15  ;;  %v1107_v10 = vsub.f32 1.0, %v947_v57  ;;  %v800_v57 = vsub.f32 %v6042_v18, %v5873_v3 }
 0x17f   : > { %10269 = vst [vmem:[#allocation123_spill] sm:$0xff] %v6486_v34  ;;  %v1100_v34 = vsub.f32 1.0, %v940_v14  ;;  %v974_v14 = vand.u32 2147483647, %v814_v4  ;;  %1539 = vperm.xlu1 %5044, %v5067_v31   ;;  %v955_v4 = vand.u32 2147483647, %v795_v17 }
 0x180   : > { %10270 = vst [vmem:[#allocation124_spill] sm:$0xff] %v6500_v23  ;;  %v1108_v23 = vsub.f32 1.0, %v948_v53  ;;  %1543 = vperm.xlu2 %5042, %v5068_v9   ;;  %v6524_v26 = vmax.f32 %v1128_v36, 0.0  ;;  %v820_v53 = vsub.f32 %v6035_v20, %v5873_v3  ;;  %1547 = vperm.xlu0 %5043, %v5069_v0   ;;  %v952_v42 = vand.u32 2147483647, %v792_v44 }
 0x181   : > { %10271 = vst [vmem:[#allocation125_spill] sm:$0xff] %v6504_v7  ;;  %v6514_v59 = vmax.f32 %v1100_v34, 0.0  ;;  %v1106_v34 = vsub.f32 1.0, %v946_v56  ;;  %v6535_v15 = vpop.permute.xlu1 %1371  ;;  %v6537_v36 = vpop.permute.xlu2 %1411  ;;  %v6541_v56 = vmax.f32 %v1109_v13, 0.0  ;;  %v1134_v31 = vsub.f32 1.0, %v974_v14 }
 0x182   : > { %10272 = vst [vmem:[#allocation126_spill] sm:$0xff] %v6506_v47  ;;  %v6539_v39 = vmax.f32 %v1108_v23, 0.0  ;;  %v1135_v9 = vsub.f32 1.0, %v975_v2  ;;  %v953_v0 = vand.u32 2147483647, %v793_v11  ;;  %v801_v20 = vsub.f32 %v6042_v18, %v5875_v35 }
 0x183   : > { %10273 = vst [vmem:[#allocation127_spill] sm:$0xff] %v6512_v1  ;;  %v6549_v17 = vmax.f32 %v1106_v34, 0.0  ;;  %v980_v44 = vand.u32 2147483647, %v820_v53  ;;  %v798_v23 = vsub.f32 %v6044_v51, %v5873_v3  ;;  %v799_v13 = vsub.f32 %v6044_v51, %v5875_v35 }
 0x184   : > { %10274 = vst [vmem:[#allocation128_spill] sm:$0xff] %v6514_v59  ;;  %v6555_v2 = vmax.f32 %v1107_v10, 0.0  ;;  %v1115_v14 = vsub.f32 1.0, %v955_v4  ;;  %v981_v11 = vand.u32 2147483647, %v821_v54  ;;  %v826_v18 = vsub.f32 %v6076_v24, %v5873_v3  ;;  %v5070_v10 = vld [vmem:[%s9983_s1 + $0x1d0] sm:$0xff] }
 0x185   : > { %10275 = vst [vmem:[#allocation129_spill] sm:$0xff] %v6524_v26  ;;  %v6543_v26 = vpop.permute.xlu0 %1379  ;;  %v827_v34 = vsub.f32 %v6076_v24, %v5875_v35  ;;  %v1113_v1 = vsub.f32 1.0, %v953_v0  ;;  %v961_v51 = vand.u32 2147483647, %v801_v20  ;;  %v5071_v4 = vld [vmem:[%s9983_s1 + $0x1d8] sm:$0xff]  ;;  %v806_v24 = vsub.f32 %v6083_v29, %v5873_v3 }
 0x186   : > { %10276 = vst [vmem:[#allocation130_spill] sm:$0xff] %v6526_v28  ;;  %v1114_v28 = vsub.f32 1.0, %v954_v55  ;;  %v1112_v55 = vsub.f32 1.0, %v952_v42  ;;  %v1140_v42 = vsub.f32 1.0, %v980_v44  ;;  %v958_v54 = vand.u32 2147483647, %v798_v23 }
 0x187   : > { %10277 = vst [vmem:[#allocation131_spill] sm:$0xff] %v6539_v39  ;;  %v6557_v39 = vmax.f32 %v1134_v31, 0.0  ;;  %1551 = vperm.xlu1 %5044, %v5070_v10   ;;  %v959_v31 = vand.u32 2147483647, %v799_v13  ;;  %v1141_v0 = vsub.f32 1.0, %v981_v11  ;;  %v804_v20 = vsub.f32 %v6085_v27, %v5873_v3 }
 0x188   : > { %10278 = vst [vmem:[#allocation132_spill] sm:$0xff] %v6541_v56  ;;  %v6559_v56 = vmax.f32 %v1135_v9, 0.0  ;;  %v6565_v53 = vmax.f32 %v1114_v28, 0.0  ;;  %1555 = vperm.xlu2 %5042, %v5071_v4   ;;  %v5072_v28 = vld [vmem:[%s9983_s1 + $0x1e0] sm:$0xff]  ;;  %v6578_v9 = vmax.f32 %v1115_v14, 0.0  ;;  %v6588_v13 = vmax.f32 %v1112_v55, 0.0 }
 0x189   : > { %10279 = vst [vmem:[#allocation133_spill] sm:$0xff] %v6549_v17  ;;  %v960_v17 = vand.u32 2147483647, %v800_v57  ;;  %1559 = vperm.xlu0 %5043, %v5072_v28   ;;  %v807_v57 = vsub.f32 %v6083_v29, %v5875_v35  ;;  %v6584_v44 = vpop.permute.xlu1 %1383  ;;  %v6586_v23 = vpop.permute.xlu2 %1423  ;;  %v986_v10 = vand.u32 2147483647, %v826_v18  ;;  %v805_v28 = vsub.f32 %v6085_v27, %v5875_v35 }
 0x18a   : > { %10280 = vst [vmem:[#allocation134_spill] sm:$0xff] %v6555_v2  ;;  %v987_v4 = vand.u32 2147483647, %v827_v34  ;;  %v6594_v11 = vmax.f32 %v1113_v1, 0.0  ;;  %v1121_v29 = vsub.f32 1.0, %v961_v51  ;;  %v1119_v7 = vsub.f32 1.0, %v959_v31 }
 0x18b   : > { %10281 = vst [vmem:[#allocation135_spill] sm:$0xff] %v6557_v39  ;;  %v1120_v39 = vsub.f32 1.0, %v960_v17  ;;  %v966_v55 = vand.u32 2147483647, %v806_v24  ;;  %v967_v18 = vand.u32 2147483647, %v807_v57  ;;  %v833_v27 = vsub.f32 %v6117_v25, %v5875_v35 }
 0x18c   : > { %10282 = vst [vmem:[#allocation136_spill] sm:$0xff] %v6559_v56  ;;  %v6598_v56 = vmax.f32 %v1140_v42, 0.0  ;;  %v964_v34 = vand.u32 2147483647, %v804_v20  ;;  %v1146_v2 = vsub.f32 1.0, %v986_v10  ;;  %v1147_v1 = vsub.f32 1.0, %v987_v4 }
 0x18d   : > { %10283 = vst [vmem:[#allocation137_spill] sm:$0xff] %v6565_v53  ;;  %v6592_v14 = vpop.permute.xlu0 %1391  ;;  %v832_v53 = vsub.f32 %v6117_v25, %v5873_v3  ;;  %v812_v17 = vsub.f32 %v6124_v30, %v5873_v3  ;;  %v6606_v51 = vmax.f32 %v1120_v39, 0.0  ;;  %v810_v31 = vsub.f32 %v6126_v62, %v5873_v3  ;;  %v5073_v24 = vld [vmem:[%s9983_s1 + $0x1e8] sm:$0xff]  ;;  %v5074_v25 = vld [vmem:[%s9983_s1 + $0x1f0] sm:$0xff]  ;;  %v5075_v57 = vld [vmem:[%s9983_s1 + $0x1f8] sm:$0xff] }
 0x18e   : > { %10284 = vst [vmem:[#allocation138_spill] sm:$0xff] %v6578_v9  ;;  %v1118_v9 = vsub.f32 1.0, %v958_v54  ;;  %v813_v54 = vsub.f32 %v6124_v30, %v5875_v35  ;;  %v1126_v30 = vsub.f32 1.0, %v966_v55  ;;  %v1127_v20 = vsub.f32 1.0, %v967_v18 }
 0x18f   : > { %10285 = vst [vmem:[#allocation139_spill] sm:$0xff] %v6588_v13  ;;  %v6600_v13 = vmax.f32 %v1141_v0, 0.0  ;;  %v992_v42 = vand.u32 2147483647, %v832_v53  ;;  %1563 = vperm.xlu1 %5044, %v5073_v24   ;;  %v6618_v0 = vmax.f32 %v1121_v29, 0.0  ;;  %v6622_v53 = vmax.f32 %v1119_v7, 0.0 }
 0x190   : > { %10286 = vst [vmem:[#allocation140_spill] sm:$0xff] %v6594_v11  ;;  %v965_v11 = vand.u32 2147483647, %v805_v28  ;;  %1567 = vperm.xlu2 %5042, %v5074_v25   ;;  %v6620_v39 = vmax.f32 %v1118_v9, 0.0  ;;  %v1124_v10 = vsub.f32 1.0, %v964_v34  ;;  %v811_v28 = vsub.f32 %v6126_v62, %v5875_v35 }
 0x191   : > { %10287 = vst [vmem:[#allocation141_spill] sm:$0xff] %v6598_v56  ;;  %1571 = vperm.xlu0 %5043, %v5075_v57   ;;  %v993_v4 = vand.u32 2147483647, %v833_v27  ;;  %v6629_v24 = vpop.permute.xlu1 %1395  ;;  %v6631_v29 = vpop.permute.xlu2 %1435  ;;  %v6633_v9 = vmax.f32 %v1146_v2, 0.0  ;;  %v6635_v7 = vmax.f32 %v1147_v1, 0.0  ;;  %v818_v34 = vsub.f32 %v6163_v49, %v5873_v3 }
 0x192   : > { %10288 = vst [vmem:[#allocation142_spill] sm:$0xff] %v6600_v13  ;;  %v1125_v55 = vsub.f32 1.0, %v965_v11  ;;  %v972_v25 = vand.u32 2147483647, %v812_v17  ;;  %v973_v57 = vand.u32 2147483647, %v813_v54  ;;  %v819_v62 = vsub.f32 %v6163_v49, %v5875_v35 }
 0x193   : > { %10289 = vst [vmem:[#allocation143_spill] sm:$0xff] %v6606_v51  ;;  %v1152_v51 = vsub.f32 1.0, %v992_v42  ;;  %v970_v18 = vand.u32 2147483647, %v810_v31  ;;  %v6641_v27 = vmax.f32 %v1126_v30, 0.0  ;;  %v1645_v2 = vsub.f32 %v6171_v48, %v5898_v12 }
 0x194   : > { %10290 = vst [vmem:[#allocation144_spill] sm:$0xff] %v6618_v0  ;;  %v1646_v11 = vsub.f32 %v6171_v48, %v5902_v5  ;;  %v6649_v1 = vmax.f32 %v1127_v20, 0.0  ;;  %v6651_v17 = vmax.f32 %v1124_v10, 0.0  ;;  %v1153_v42 = vsub.f32 1.0, %v993_v4  ;;  %v5076_v20 = vld [vmem:[%s9983_s1 + $0x200] sm:$0xff]  ;;  %v5077_v10 = vld [vmem:[%s9983_s1 + $0x208] sm:$0xff] }
 0x195   : > { %10291 = vst [vmem:[#allocation145_spill] sm:$0xff] %v6620_v39  ;;  %v6637_v56 = vpop.permute.xlu0 %1403  ;;  %v971_v54 = vand.u32 2147483647, %v811_v28  ;;  %v6653_v31 = vmax.f32 %v1125_v55, 0.0  ;;  %v816_v30 = vsub.f32 %v6165_v41, %v5873_v3  ;;  %v817_v49 = vsub.f32 %v6165_v41, %v5875_v35  ;;  %v5078_v55 = vld [vmem:[%s9983_s1 + $0x210] sm:$0xff] }
 0x196   : > { %10292 = vst [vmem:[#allocation146_spill] sm:$0xff] %v6622_v53  ;;  %v1130_v13 = vsub.f32 1.0, %v970_v18  ;;  %v978_v48 = vand.u32 2147483647, %v818_v34  ;;  %v979_v28 = vand.u32 2147483647, %v819_v62  ;;  %v1651_v18 = vsub.f32 %v6212_v63, %v5898_v12 }
 0x197   : > { %10293 = vst [vmem:[#allocation147_spill] sm:$0xff] %v6633_v9  ;;  %v1132_v9 = vsub.f32 1.0, %v972_v25  ;;  %1575 = vperm.xlu1 %5044, %v5076_v20   ;;  %v1805_v41 = vand.u32 2147483647, %v1645_v2  ;;  %v6672_v25 = vmax.f32 %v1153_v42, 0.0  ;;  %v1652_v34 = vsub.f32 %v6212_v63, %v5902_v5 }
 0x198   : > { %10294 = vst [vmem:[#allocation148_spill] sm:$0xff] %v6635_v7  ;;  %v1133_v7 = vsub.f32 1.0, %v973_v57  ;;  %1579 = vperm.xlu2 %5042, %v5077_v10   ;;  %v1131_v57 = vsub.f32 1.0, %v971_v54  ;;  %v976_v62 = vand.u32 2147483647, %v816_v30  ;;  %v825_v42 = vsub.f32 %v6204_v58, %v5875_v35 }
 0x199   : > { %10295 = vst [vmem:[#allocation149_spill] sm:$0xff] %v6641_v27  ;;  %v6659_v27 = vmax.f32 %v1152_v51, 0.0  ;;  %v1806_v51 = vand.u32 2147483647, %v1646_v11  ;;  %1583 = vperm.xlu0 %5043, %v5078_v55   ;;  %v6678_v20 = vpop.permute.xlu1 %1407  ;;  %v6680_v10 = vpop.permute.xlu2 %1447  ;;  %v977_v2 = vand.u32 2147483647, %v817_v49  ;;  %v824_v11 = vsub.f32 %v6204_v58, %v5873_v3 }
 0x19a   : > { %10296 = vst [vmem:[#allocation150_spill] sm:$0xff] %v6649_v1  ;;  %v6688_v54 = vmax.f32 %v1132_v9, 0.0  ;;  %v6690_v4 = vmax.f32 %v1133_v7, 0.0  ;;  %v1138_v32 = vsub.f32 1.0, %v978_v48  ;;  %v822_v63 = vsub.f32 %v6206_v52, %v5873_v3 }
 0x19b   : > { %10297 = vst [vmem:[#allocation151_spill] sm:$0xff] %v6651_v17  ;;  %v1139_v1 = vsub.f32 1.0, %v979_v28  ;;  %v1966_v30 = vsub.f32 1.0, %v1806_v51  ;;  %v823_v49 = vsub.f32 %v6206_v52, %v5875_v35  ;;  %v6698_v17 = vmax.f32 %v1131_v57, 0.0  ;;  %v5079_v52 = vld [vmem:[%s9983_s1 + $0x218] sm:$0xff] }
 0x19c   : > { %10298 = vst [vmem:[#allocation152_spill] sm:$0xff] %v6653_v31  ;;  %v1811_v58 = vand.u32 2147483647, %v1651_v18  ;;  %v1812_v31 = vand.u32 2147483647, %v1652_v34  ;;  %v1136_v9 = vsub.f32 1.0, %v976_v62  ;;  %v830_v28 = vsub.f32 %v6245_v45, %v5873_v3 }
 0x19d   : > { %10299 = vst [vmem:[#allocation153_spill] sm:$0xff] %v6659_v27  ;;  %v6686_v55 = vpop.permute.xlu0 %1415  ;;  %v1965_v27 = vsub.f32 1.0, %v1805_v41  ;;  %v984_v7 = vand.u32 2147483647, %v824_v11  ;;  %v6700_v48 = vmax.f32 %v1138_v32, 0.0  ;;  %v831_v41 = vsub.f32 %v6245_v45, %v5875_v35  ;;  %v5081_v34 = vld [vmem:[%s9983_s1 + $0x228] sm:$0xff] }
 0x19e   : > { %10300 = vst [vmem:[#allocation154_spill] sm:$0xff] %v6672_v25  ;;  %v6696_v25 = vmax.f32 %v1130_v13, 0.0  ;;  %v982_v0 = vand.u32 2147483647, %v822_v63  ;;  %v5080_v13 = vld [vmem:[%s9983_s1 + $0x220] sm:$0xff]  ;;  %v6712_v51 = vmax.f32 %v1139_v1, 0.0  ;;  %v1655_v11 = vsub.f32 %v6253_v43, %v5898_v12 }
 0x19f   : > { %10301 = vst [vmem:[#allocation155_spill] sm:$0xff] %v6688_v54  ;;  %v1137_v54 = vsub.f32 1.0, %v977_v2  ;;  %1587 = vperm.xlu1 %5044, %v5079_v52   ;;  %v2125_v32 = vmax.f32 %v1965_v27, 0.0  ;;  %v2126_v57 = vmax.f32 %v1966_v30, 0.0  ;;  %v983_v18 = vand.u32 2147483647, %v823_v49 }
 0x1a0   : > { %10302 = vst [vmem:[#allocation156_spill] sm:$0xff] %v6690_v4  ;;  %v985_v4 = vand.u32 2147483647, %v825_v42  ;;  %1591 = vperm.xlu2 %5042, %v5080_v13   ;;  %v1971_v45 = vsub.f32 1.0, %v1811_v58  ;;  %v1972_v62 = vsub.f32 1.0, %v1812_v31  ;;  %v828_v2 = vsub.f32 %v6247_v60, %v5873_v3 }
 0x1a1   : > { %10303 = vst [vmem:[#allocation157_spill] sm:$0xff] %v6696_v25  ;;  %1595 = vperm.xlu0 %5043, %v5081_v34   ;;  %v6721_v42 = vpop.permute.xlu1 %1419  ;;  %v6723_v1 = vpop.permute.xlu2 %1459  ;;  %v1144_v27 = vsub.f32 1.0, %v984_v7  ;;  %v829_v30 = vsub.f32 %v6247_v60, %v5875_v35  ;;  %v1656_v49 = vsub.f32 %v6253_v43, %v5902_v5  ;;  %v6731_v31 = vmax.f32 %v1136_v9, 0.0 }
 0x1a2   : > { %10304 = vst [vmem:[#allocation158_spill] sm:$0xff] %v6698_v17  ;;  %v1145_v63 = vsub.f32 1.0, %v985_v4  ;;  %v1142_v52 = vsub.f32 1.0, %v982_v0  ;;  %v990_v13 = vand.u32 2147483647, %v830_v28  ;;  %v6736_v25 = vmul.f32 %v2125_v32, %v5980_v40  ;;  %v5083_v32 = vld [vmem:[%s9983_s1 + $0x238] sm:$0xff] }
 0x1a3   : > { %10305 = vst [vmem:[#allocation159_spill] sm:$0xff] %v6700_v48  ;;  %v991_v34 = vand.u32 2147483647, %v831_v41  ;;  %v6733_v48 = vmax.f32 %v1137_v54, 0.0  ;;  %v6739_v4 = vmul.f32 %v2126_v57, %v5984_v33  ;;  %v2131_v60 = vmax.f32 %v1971_v45, 0.0  ;;  %v5082_v33 = vld [vmem:[%s9983_s1 + $0x230] sm:$0xff] }
 0x1a4   : > { %10306 = vst [vmem:[#allocation160_spill] sm:$0xff] %v6712_v51  ;;  %v1143_v51 = vsub.f32 1.0, %v983_v18  ;;  %v2132_v7 = vmax.f32 %v1972_v62, 0.0  ;;  %v988_v17 = vand.u32 2147483647, %v828_v2  ;;  %v6741_v39 = vmax.f32 %v1144_v27, 0.0 }
 0x1a5   : > { %v6729_v58 = vpop.permute.xlu0 %1427  ;;  %10307 = vst [vmem:[#allocation161_spill] sm:$0xff] %v6731_v31  ;;  %v1815_v43 = vand.u32 2147483647, %v1655_v11  ;;  %v6743_v9 = vmax.f32 %v1145_v63, 0.0  ;;  %v989_v0 = vand.u32 2147483647, %v829_v30  ;;  %v836_v40 = vsub.f32 %v6296_v22, %v5873_v3 }
 0x1a6   : > { %10308 = vst [vmem:[#allocation162_spill] sm:$0xff] %v6733_v48  ;;  %v1816_v28 = vand.u32 2147483647, %v1656_v49  ;;  %v6745_v41 = vmax.f32 %v1142_v52, 0.0  ;;  %v1150_v54 = vsub.f32 1.0, %v990_v13  ;;  %v1151_v18 = vsub.f32 1.0, %v991_v34 }
 0x1a7   : > { %10309 = vst [vmem:[#allocation163_spill] sm:$0xff] %v6736_v25  ;;  %1599 = vperm.xlu1 %5044, %v5082_v33   ;;  %v6755_v57 = vmax.f32 %v1143_v51, 0.0  ;;  %v837_v45 = vsub.f32 %v6296_v22, %v5875_v35  ;;  %v1661_v62 = vsub.f32 %v6304_v46, %v5898_v12  ;;  %v1662_v2 = vsub.f32 %v6304_v46, %v5902_v5  ;;  %v5084_v11 = vld [vmem:[%s9983_s1 + $0x240] sm:$0xff]  ;;  %v10315_v49 = vld [vmem:[#allocation63_spill] sm:$0xff]  ;;  %v10317_v22 = vld [vmem:[#allocation64_spill] sm:$0xff] }
 0x1a8   : > { %10310 = vst [vmem:[#allocation164_spill] sm:$0xff] %v6739_v4  ;;  %1603 = vperm.xlu2 %5042, %v5083_v32   ;;  %v1148_v27 = vsub.f32 1.0, %v988_v17  ;;  %v1975_v63 = vsub.f32 1.0, %v1815_v43  ;;  %v6771_v52 = vmul.f32 %v2131_v60, %v10315_v49  ;;  %v6774_v13 = vmul.f32 %v2132_v7, %v10317_v22  ;;  %v10319_v46 = vld [vmem:[#allocation31_spill] sm:$0xff] }
 0x1a9   : > { %10311 = vst [vmem:[#allocation165_spill] sm:$0xff] %v6741_v39  ;;  %1607 = vperm.xlu0 %5043, %v5084_v11   ;;  %v6766_v30 = vpop.permute.xlu1 %1431  ;;  %v6768_v51 = vpop.permute.xlu2 %1471  ;;  %v1149_v34 = vsub.f32 1.0, %v989_v0  ;;  %v1976_v33 = vsub.f32 1.0, %v1816_v28  ;;  %v834_v32 = vsub.f32 %v10319_v46, %v5873_v3  ;;  %v10320_v39 = vld [vmem:[#allocation101_spill] sm:$0xff]  ;;  %v6782_v43 = vmax.f32 %v1150_v54, 0.0  ;;  %v10323_v28 = vld [vmem:[#allocation100_spill] sm:$0xff] }
 0x1aa   : > { %10312 = vst [vmem:[#allocation166_spill] sm:$0xff] %v6743_v9  ;;  %v1667_v11 = vsub.f32 %v10320_v39, %v5898_v12  ;;  %v6784_v9 = vmax.f32 %v1151_v18, 0.0  ;;  %v835_v60 = vsub.f32 %v10319_v46, %v5875_v35  ;;  %v997_v7 = vand.u32 2147483647, %v837_v45  ;;  %v10324_v18 = vld [vmem:[#allocation104_spill] sm:$0xff] }
 0x1ab   : > { %10313 = vst [vmem:[#allocation167_spill] sm:$0xff] %v6745_v41  ;;  %v996_v41 = vand.u32 2147483647, %v836_v40  ;;  %v1821_v49 = vand.u32 2147483647, %v1661_v62  ;;  %v1649_v22 = vsub.f32 %v10323_v28, %v5898_v12  ;;  %v2135_v3 = vmax.f32 %v1975_v63, 0.0 }
 0x1ac   : > { %10314 = vst [vmem:[#allocation168_spill] sm:$0xff] %v6755_v57  ;;  %v1822_v0 = vand.u32 2147483647, %v1662_v2  ;;  %v1668_v54 = vsub.f32 %v10320_v39, %v5902_v5  ;;  %v2136_v40 = vmax.f32 %v1976_v33, 0.0  ;;  %v1648_v45 = vsub.f32 %v10324_v18, %v5902_v5  ;;  %v5086_v39 = vld [vmem:[%s9983_s1 + $0x250] sm:$0xff] }
 0x1ad   : > { %10316 = vst [vmem:[#allocation63_spill] sm:$0xff] %v6771_v52  ;;  %v6780_v17 = vpop.permute.xlu0 %1439  ;;  %v1827_v52 = vand.u32 2147483647, %v1667_v11  ;;  %v6798_v62 = vmax.f32 %v1148_v27, 0.0  ;;  %v6800_v2 = vmax.f32 %v1149_v34, 0.0  ;;  %v1156_v63 = vsub.f32 1.0, %v996_v41 }
 0x1ae   : > { %10318 = vst [vmem:[#allocation64_spill] sm:$0xff] %v6774_v13  ;;  %v1650_v13 = vsub.f32 %v10323_v28, %v5902_v5  ;;  %v995_v46 = vand.u32 2147483647, %v835_v60  ;;  %v5085_v28 = vld [vmem:[%s9983_s1 + $0x248] sm:$0xff]  ;;  %v1157_v33 = vsub.f32 1.0, %v997_v7  ;;  %v1982_v11 = vsub.f32 1.0, %v1822_v0 }
 0x1af   : > { %10321 = vst [vmem:[#allocation31_spill] sm:$0xff] %v6782_v43  ;;  %v1647_v43 = vsub.f32 %v10324_v18, %v5898_v12  ;;  %1611 = vperm.xlu1 %5044, %v5085_v28   ;;  %v1809_v18 = vand.u32 2147483647, %v1649_v22  ;;  %v5087_v27 = vld [vmem:[%s9983_s1 + $0x258] sm:$0xff]  ;;  %v1828_v34 = vand.u32 2147483647, %v1668_v54 }
 0x1b0   : > { %10322 = vst [vmem:[#allocation101_spill] sm:$0xff] %v6784_v9  ;;  %v994_v9 = vand.u32 2147483647, %v834_v32  ;;  %1615 = vperm.xlu2 %5042, %v5086_v39   ;;  %v1981_v32 = vsub.f32 1.0, %v1821_v49  ;;  %v1810_v41 = vand.u32 2147483647, %v1650_v13 }
 0x1b1   : > { %10325 = vst [vmem:[#allocation100_spill] sm:$0xff] %v6798_v62  ;;  %1619 = vperm.xlu0 %5043, %v5087_v27   ;;  %v1807_v60 = vand.u32 2147483647, %v1647_v43  ;;  %v6811_v35 = vpop.permute.xlu1 %1443  ;;  %v6813_v28 = vpop.permute.xlu2 %1483  ;;  %v10327_v62 = vld [vmem:[#allocation53_spill] sm:$0xff]  ;;  %v1987_v7 = vsub.f32 1.0, %v1827_v52  ;;  %v10329_v22 = vld [vmem:[#allocation54_spill] sm:$0xff] }
 0x1b2   : > { %10326 = vst [vmem:[#allocation104_spill] sm:$0xff] %v6800_v2  ;;  %v6816_v2 = vmul.f32 %v2135_v3, %v10327_v62  ;;  %v1154_v39 = vsub.f32 1.0, %v994_v9  ;;  %v1808_v49 = vand.u32 2147483647, %v1648_v45  ;;  %v6821_v4 = vmul.f32 %v2136_v40, %v10329_v22  ;;  %v10332_v43 = vld [vmem:[#allocation110_spill] sm:$0xff]  ;;  %v10333_v27 = vld [vmem:[#allocation39_spill] sm:$0xff] }
 0x1b3   : > { %v6823_v25 = vmax.f32 %v1156_v63, 0.0  ;;  %v1155_v13 = vsub.f32 1.0, %v995_v46  ;;  %v1673_v54 = vsub.f32 %v10332_v43, %v5898_v12  ;;  %v1657_v57 = vsub.f32 %v10333_v27, %v5898_v12  ;;  %v10335_v40 = vld [vmem:[#allocation109_spill] sm:$0xff] }
 0x1b4   : > { %10328 = vst [vmem:[#allocation53_spill] sm:$0xff] %v6816_v2  ;;  %v6829_v31 = vmax.f32 %v1157_v33, 0.0  ;;  %v2141_v3 = vmax.f32 %v1981_v32, 0.0  ;;  %v2142_v9 = vmax.f32 %v1982_v11, 0.0  ;;  %v1969_v52 = vsub.f32 1.0, %v1809_v18  ;;  %v5088_v18 = vld [vmem:[%s9983_s1 + $0x260] sm:$0xff] }
 0x1b5   : > { %v6818_v0 = vpop.permute.xlu0 %1451  ;;  %10330 = vst [vmem:[#allocation54_spill] sm:$0xff] %v6821_v4  ;;  %v1970_v45 = vsub.f32 1.0, %v1810_v41  ;;  %v1988_v62 = vsub.f32 1.0, %v1828_v34  ;;  %v1967_v2 = vsub.f32 1.0, %v1807_v60  ;;  %v1653_v22 = vsub.f32 %v10335_v40, %v5898_v12  ;;  %v5089_v41 = vld [vmem:[%s9983_s1 + $0x268] sm:$0xff] }
 0x1b6   : > { %10331 = vst [vmem:[#allocation169_spill] sm:$0xff] %v6823_v25  ;;  %v2147_v63 = vmax.f32 %v1987_v7, 0.0  ;;  %v1968_v25 = vsub.f32 1.0, %v1808_v49  ;;  %v1654_v46 = vsub.f32 %v10335_v40, %v5902_v5  ;;  %v1674_v4 = vsub.f32 %v10332_v43, %v5902_v5  ;;  %v10338_v7 = vld [vmem:[#allocation55_spill] sm:$0xff]  ;;  %v10340_v49 = vld [vmem:[#allocation56_spill] sm:$0xff] }
 0x1b7   : > { %10334 = vst [vmem:[#allocation110_spill] sm:$0xff] %v6829_v31  ;;  %v6837_v48 = vmax.f32 %v1154_v39, 0.0  ;;  %v1833_v33 = vand.u32 2147483647, %v1673_v54  ;;  %v1658_v32 = vsub.f32 %v10333_v27, %v5902_v5  ;;  %v1817_v11 = vand.u32 2147483647, %v1657_v57  ;;  %1623 = vperm.xlu1 %5044, %v5088_v18  }
 0x1b8   : > { %1627 = vperm.xlu2 %5042, %v5089_v41   ;;  %v6847_v34 = vmax.f32 %v1155_v13, 0.0  ;;  %v2129_v60 = vmax.f32 %v1969_v52, 0.0  ;;  %v5090_v39 = vld [vmem:[%s9983_s1 + $0x270] sm:$0xff]  ;;  %v6853_v57 = vmul.f32 %v2141_v3, %v10338_v7  ;;  %v6856_v43 = vmul.f32 %v2142_v9, %v10340_v49  ;;  %v10346_v49 = vld [vmem:[#allocation65_spill] sm:$0xff] }
 0x1b9   : > { %10336 = vst [vmem:[#allocation39_spill] sm:$0xff] %v6837_v48  ;;  %1631 = vperm.xlu0 %5043, %v5090_v39   ;;  %v2130_v54 = vmax.f32 %v1970_v45, 0.0  ;;  %v2148_v27 = vmax.f32 %v1988_v62, 0.0  ;;  %v2127_v40 = vmax.f32 %v1967_v2, 0.0  ;;  %v1813_v18 = vand.u32 2147483647, %v1653_v22  ;;  %v6858_v31 = vpop.permute.xlu1 %1455  ;;  %v6860_v13 = vpop.permute.xlu2 %1495 }
 0x1ba   : > { %10337 = vst [vmem:[#allocation109_spill] sm:$0xff] %v6847_v34  ;;  %v2128_v52 = vmax.f32 %v1968_v25, 0.0  ;;  %v1814_v41 = vand.u32 2147483647, %v1654_v46  ;;  %v1834_v48 = vand.u32 2147483647, %v1674_v4  ;;  %v1663_v45 = vsub.f32 %v6449_v21, %v5898_v12 }
 0x1bb   : > { %10339 = vst [vmem:[#allocation55_spill] sm:$0xff] %v6853_v57  ;;  %v10342_v39 = vld [vmem:[#allocation57_spill] sm:$0xff]  ;;  %v1993_v3 = vsub.f32 1.0, %v1833_v33  ;;  %v1818_v7 = vand.u32 2147483647, %v1658_v32  ;;  %v1977_v9 = vsub.f32 1.0, %v1817_v11  ;;  %v1659_v2 = vsub.f32 %v6441_v50, %v5898_v12 }
 0x1bc   : > { %10341 = vst [vmem:[#allocation56_spill] sm:$0xff] %v6856_v43  ;;  %v6865_v53 = vmul.f32 %v2147_v63, %v10342_v39  ;;  %v1660_v62 = vsub.f32 %v6441_v50, %v5902_v5  ;;  %v1679_v25 = vsub.f32 %v6443_v61, %v5898_v12  ;;  %v1973_v4 = vsub.f32 1.0, %v1813_v18  ;;  %v10344_v46 = vld [vmem:[#allocation59_spill] sm:$0xff] }
 0x1bd   : > { %v6862_v34 = vpop.permute.xlu0 %1463  ;;  %v1680_v22 = vsub.f32 %v6443_v61, %v5902_v5  ;;  %v1664_v63 = vsub.f32 %v6449_v21, %v5902_v5  ;;  %v6880_v33 = vmul.f32 %v2129_v60, %v10344_v46  ;;  %v1974_v32 = vsub.f32 1.0, %v1814_v41  ;;  %v5091_v61 = vld [vmem:[%s9983_s1 + $0x278] sm:$0xff] }
 0x1be   : > { %10343 = vst [vmem:[#allocation57_spill] sm:$0xff] %v6865_v53  ;;  %v1994_v11 = vsub.f32 1.0, %v1834_v48  ;;  %v6883_v39 = vmul.f32 %v2127_v40, %v10346_v49  ;;  %v10348_v53 = vld [vmem:[#allocation58_spill] sm:$0xff]  ;;  %v2153_v43 = vmax.f32 %v1993_v3, 0.0  ;;  %v1978_v57 = vsub.f32 1.0, %v1818_v7 }
 0x1bf   : > { %10345 = vst [vmem:[#allocation59_spill] sm:$0xff] %v6880_v33  ;;  %v6886_v50 = vmul.f32 %v2148_v27, %v10348_v53  ;;  %v2137_v18 = vmax.f32 %v1977_v9, 0.0  ;;  %v1823_v47 = vand.u32 2147483647, %v1663_v45  ;;  %1635 = vperm.xlu1 %5044, %v5091_v61   ;;  %v5318_v21 = vmov 2   ;;  %v5092_v53 = vld [vmem:[%s9983_s1] sm:$0xff] }
 0x1c0   : > { %10347 = vst [vmem:[#allocation65_spill] sm:$0xff] %v6883_v39  ;;  %5045 = vset.pattern.permute.xlu2 %v5318_v21  ;;  %v1819_v60 = vand.u32 2147483647, %v1659_v2  ;;  %v1820_v41 = vand.u32 2147483647, %v1660_v62  ;;  %v10350_v27 = vld [vmem:[#allocation60_spill] sm:$0xff]  ;;  %v1685_v39 = vsub.f32 %v6492_v6, %v5898_v12 }
 0x1c1   : > { %10349 = vst [vmem:[#allocation58_spill] sm:$0xff] %v6886_v50  ;;  %v1839_v48 = vand.u32 2147483647, %v1679_v25  ;;  %5046 = vset.pattern.permute.xlu0 %v5318_v21  ;;  %2446 = vperm.xlu2 %5045, %v5092_v53   ;;  %v6895_v40 = vmul.f32 %v2130_v54, %v10350_v27  ;;  %v2133_v3 = vmax.f32 %v1973_v4, 0.0  ;;  %v1840_v7 = vand.u32 2147483647, %v1680_v22  ;;  %v6900_v2 = vpop.permute.xlu1 %1467  ;;  %v6902_v62 = vpop.permute.xlu2 %1507 }
 0x1c2   : > { %v1824_v9 = vand.u32 2147483647, %v1664_v63  ;;  %v5093_v45 = vld [vmem:[%s9983_s1 + $0x8] sm:$0xff]  ;;  %v2134_v49 = vmax.f32 %v1974_v32, 0.0  ;;  %v2154_v61 = vmax.f32 %v1994_v11, 0.0  ;;  %v1665_v54 = vsub.f32 %v6490_v38, %v5898_v12  ;;  %v10354_v27 = vld [vmem:[#allocation61_spill] sm:$0xff] }
 0x1c3   : > { %10351 = vst [vmem:[#allocation60_spill] sm:$0xff] %v6895_v40  ;;  %2450 = vperm.xlu0 %5046, %v5093_v45   ;;  %v10352_v25 = vld [vmem:[#allocation66_spill] sm:$0xff]  ;;  %v1669_v4 = vsub.f32 %v6498_v16, %v5898_v12  ;;  %v2138_v63 = vmax.f32 %v1978_v57, 0.0  ;;  %v1983_v53 = vsub.f32 1.0, %v1823_v47  ;;  %v6914_v45 = vmul.f32 %v2153_v43, %v10354_v27  ;;  %v10356_v40 = vld [vmem:[#allocation71_spill] sm:$0xff]  ;;  %v10364_v27 = vld [vmem:[#allocation52_spill] sm:$0xff] }
 0x1c4   : > { %v6905_v46 = vmul.f32 %v2128_v52, %v10352_v25  ;;  %v6917_v50 = vmul.f32 %v2137_v18, %v10356_v40  ;;  %v1979_v52 = vsub.f32 1.0, %v1819_v60  ;;  %v1980_v25 = vsub.f32 1.0, %v1820_v41  ;;  %v10358_v40 = vld [vmem:[#allocation51_spill] sm:$0xff] }
 0x1c5   : > { %v6911_v22 = vpop.permute.xlu0 %1475  ;;  %10355 = vst [vmem:[#allocation61_spill] sm:$0xff] %v6914_v45  ;;  %v1999_v32 = vsub.f32 1.0, %v1839_v48  ;;  %v1666_v11 = vsub.f32 %v6490_v38, %v5902_v5  ;;  %v2000_v33 = vsub.f32 1.0, %v1840_v7  ;;  %v1686_v47 = vsub.f32 %v6492_v6, %v5902_v5  ;;  %v10360_v48 = vld [vmem:[#allocation62_spill] sm:$0xff]  ;;  %v10362_v7 = vld [vmem:[#allocation72_spill] sm:$0xff] }
 0x1c6   : > { %10353 = vst [vmem:[#allocation66_spill] sm:$0xff] %v6905_v46  ;;  %v1984_v46 = vsub.f32 1.0, %v1824_v9  ;;  %v1825_v57 = vand.u32 2147483647, %v1665_v54  ;;  %v1670_v43 = vsub.f32 %v6498_v16, %v5902_v5  ;;  %v1829_v18 = vand.u32 2147483647, %v1669_v4 }
 0x1c7   : > { %10357 = vst [vmem:[#allocation71_spill] sm:$0xff] %v6917_v50  ;;  %v6928_v60 = vmul.f32 %v2133_v3, %v10358_v40  ;;  %v2143_v41 = vmax.f32 %v1983_v53, 0.0  ;;  %5047 = vset.pattern.permute.xlu1 %v5318_v21  ;;  %v6931_v38 = vmul.f32 %v2154_v61, %v10360_v48  ;;  %v6934_v9 = vmul.f32 %v2138_v63, %v10362_v7  ;;  %v5094_v16 = vld [vmem:[%s9983_s1 + $0x10] sm:$0xff]  ;;  %v5095_v21 = vld [vmem:[%s9983_s1 + $0x18] sm:$0xff] }
 0x1c8   : > { %v6937_v45 = vmul.f32 %v2134_v49, %v10364_v27  ;;  %v2139_v6 = vmax.f32 %v1979_v52, 0.0  ;;  %v2140_v54 = vmax.f32 %v1980_v25, 0.0  ;;  %v2159_v50 = vmax.f32 %v1999_v32, 0.0  ;;  %2454 = vperm.xlu1 %5047, %v5094_v16   ;;  %v5096_v49 = vld [vmem:[%s9983_s1 + $0x30] sm:$0xff]  ;;  %v10369_v27 = vld [vmem:[#allocation69_spill] sm:$0xff] }
 0x1c9   : > { %10359 = vst [vmem:[#allocation51_spill] sm:$0xff] %v6928_v60  ;;  %v1826_v59 = vand.u32 2147483647, %v1666_v11  ;;  %2458 = vperm.xlu2 %5045, %v5095_v21   ;;  %v2160_v3 = vmax.f32 %v2000_v33, 0.0  ;;  %v2144_v61 = vmax.f32 %v1984_v46, 0.0  ;;  %v6948_v53 = vpop.permute.xlu1 %1479  ;;  %v1985_v25 = vsub.f32 1.0, %v1825_v57 }
 0x1ca   : > { %10361 = vst [vmem:[#allocation62_spill] sm:$0xff] %v6931_v38  ;;  %v1845_v4 = vand.u32 2147483647, %v1685_v39  ;;  %v1846_v63 = vand.u32 2147483647, %v1686_v47  ;;  %v6950_v52 = vpop.permute.xlu2 %1519  ;;  %v1989_v11 = vsub.f32 1.0, %v1829_v18  ;;  %v1675_v40 = vsub.f32 %v6543_v26, %v5898_v12 }
 0x1cb   : > { %10363 = vst [vmem:[#allocation72_spill] sm:$0xff] %v6934_v9  ;;  %2470 = vperm.xlu0 %5046, %v5096_v49   ;;  %v1830_v32 = vand.u32 2147483647, %v1670_v43  ;;  %v1671_v33 = vsub.f32 %v6535_v15, %v5898_v12  ;;  %v1672_v39 = vsub.f32 %v6535_v15, %v5902_v5  ;;  %v1691_v46 = vsub.f32 %v6537_v36, %v5898_v12  ;;  %v10367_v47 = vld [vmem:[#allocation77_spill] sm:$0xff]  ;;  %v10373_v38 = vld [vmem:[#allocation78_spill] sm:$0xff] }
 0x1cc   : > { %10365 = vst [vmem:[#allocation52_spill] sm:$0xff] %v6937_v45  ;;  %v6963_v7 = vmul.f32 %v2143_v41, %v10367_v47  ;;  %v1986_v57 = vsub.f32 1.0, %v1826_v59  ;;  %v1692_v43 = vsub.f32 %v6537_v36, %v5902_v5  ;;  %v1676_v18 = vsub.f32 %v6543_v26, %v5902_v5  ;;  %v10371_v45 = vld [vmem:[#allocation67_spill] sm:$0xff] }
 0x1cd   : > { %10366 = vst [vmem:[#allocation170_spill] sm:$0xff] %v6950_v52  ;;  %v6954_v48 = vpop.permute.xlu0 %1487  ;;  %v6970_v16 = vmul.f32 %v2139_v6, %v10369_v27  ;;  %v2005_v21 = vsub.f32 1.0, %v1845_v4  ;;  %v2006_v49 = vsub.f32 1.0, %v1846_v63  ;;  %v6973_v15 = vmul.f32 %v2159_v50, %v10371_v45  ;;  %v5097_v50 = vld [vmem:[%s9983_s1 + $0x20] sm:$0xff]  ;;  %v5098_v45 = vld [vmem:[%s9983_s1 + $0x28] sm:$0xff] }
 0x1ce   : > { %10368 = vst [vmem:[#allocation77_spill] sm:$0xff] %v6963_v7  ;;  %v6976_v60 = vmul.f32 %v2144_v61, %v10373_v38  ;;  %v2145_v41 = vmax.f32 %v1985_v25, 0.0  ;;  %v1990_v47 = vsub.f32 1.0, %v1830_v32  ;;  %v2149_v59 = vmax.f32 %v1989_v11, 0.0  ;;  %v10377_v38 = vld [vmem:[#allocation68_spill] sm:$0xff]  ;;  %v5099_v32 = vld [vmem:[%s9983_s1 + $0x48] sm:$0xff] }
 0x1cf   : > { %10370 = vst [vmem:[#allocation69_spill] sm:$0xff] %v6970_v16  ;;  %v1835_v7 = vand.u32 2147483647, %v1675_v40  ;;  %v1831_v9 = vand.u32 2147483647, %v1671_v33  ;;  %v6979_v26 = vmul.f32 %v2140_v54, %v10375_v8  ;;  %v2146_v6 = vmax.f32 %v1986_v57, 0.0 }
 0x1d0   : > { %10372 = vst [vmem:[#allocation67_spill] sm:$0xff] %v6973_v15  ;;  %v1832_v36 = vand.u32 2147483647, %v1672_v39  ;;  %v1851_v37 = vand.u32 2147483647, %v1691_v46  ;;  %2462 = vperm.xlu1 %5047, %v5097_v50   ;;  %v6988_v61 = vmul.f32 %v2160_v3, %v10377_v38  ;;  %v2165_v63 = vmax.f32 %v2005_v21, 0.0 }
 0x1d1   : > { %10374 = vst [vmem:[#allocation78_spill] sm:$0xff] %v6976_v60  ;;  %v1852_v27 = vand.u32 2147483647, %v1692_v43  ;;  %v1836_v4 = vand.u32 2147483647, %v1676_v18  ;;  %2466 = vperm.xlu2 %5045, %v5098_v45   ;;  %v2166_v25 = vmax.f32 %v2006_v49, 0.0  ;;  %v1697_v8 = vsub.f32 %v6586_v23, %v5898_v12  ;;  %v6997_v11 = vpop.permute.xlu1 %1491 }
 0x1d2   : > { %10376 = vst [vmem:[#allocation70_spill] sm:$0xff] %v6979_v26  ;;  %v1681_v54 = vsub.f32 %v6592_v14, %v5898_v12  ;;  %v6999_v40 = vpop.permute.xlu2 %1531  ;;  %v2150_v33 = vmax.f32 %v1990_v47, 0.0  ;;  %v1995_v3 = vsub.f32 1.0, %v1835_v7  ;;  %v1677_v39 = vsub.f32 %v6584_v44, %v5898_v12  ;;  %v10380_v57 = vld [vmem:[#allocation83_spill] sm:$0xff]  ;;  %v10401_v60 = vld [vmem:[#allocation82_spill] sm:$0xff] }
 0x1d3   : > { %10378 = vst [vmem:[#allocation68_spill] sm:$0xff] %v6988_v61  ;;  %2482 = vperm.xlu0 %5046, %v5099_v32   ;;  %v7006_v43 = vmul.f32 %v2149_v59, %v10380_v57  ;;  %v1991_v18 = vsub.f32 1.0, %v1831_v9  ;;  %v1992_v21 = vsub.f32 1.0, %v1832_v36  ;;  %v2011_v49 = vsub.f32 1.0, %v1851_v37  ;;  %v10382_v50 = vld [vmem:[#allocation75_spill] sm:$0xff]  ;;  %v10384_v57 = vld [vmem:[#allocation73_spill] sm:$0xff] }
 0x1d4   : > { %10379 = vst [vmem:[#allocation171_spill] sm:$0xff] %v6999_v40  ;;  %v7009_v45 = vmul.f32 %v2145_v41, %v10382_v50  ;;  %v2012_v38 = vsub.f32 1.0, %v1852_v27  ;;  %v1996_v32 = vsub.f32 1.0, %v1836_v4  ;;  %v1678_v47 = vsub.f32 %v6584_v44, %v5902_v5  ;;  %v10386_v41 = vld [vmem:[#allocation84_spill] sm:$0xff] }
 0x1d5   : > { %v7003_v46 = vpop.permute.xlu0 %1499  ;;  %10381 = vst [vmem:[#allocation83_spill] sm:$0xff] %v7006_v43  ;;  %v1698_v7 = vsub.f32 %v6586_v23, %v5902_v5  ;;  %v1857_v61 = vand.u32 2147483647, %v1697_v8  ;;  %v1682_v26 = vsub.f32 %v6592_v14, %v5902_v5  ;;  %v1841_v59 = vand.u32 2147483647, %v1681_v54  ;;  %v10388_v27 = vld [vmem:[#allocation76_spill] sm:$0xff] }
 0x1d6   : > { %10383 = vst [vmem:[#allocation75_spill] sm:$0xff] %v7009_v45  ;;  %v7018_v9 = vmul.f32 %v2165_v63, %v10384_v57  ;;  %v2155_v37 = vmax.f32 %v1995_v3, 0.0  ;;  %v1837_v36 = vand.u32 2147483647, %v1677_v39  ;;  %v7021_v50 = vmul.f32 %v2150_v33, %v10386_v41  ;;  %v10390_v23 = vld [vmem:[#allocation74_spill] sm:$0xff]  ;;  %v5100_v63 = vld [vmem:[%s9983_s1 + $0x38] sm:$0xff] }
 0x1d7   : > { %v7024_v4 = vmul.f32 %v2146_v6, %v10388_v27  ;;  %v2151_v44 = vmax.f32 %v1991_v18, 0.0  ;;  %v2152_v45 = vmax.f32 %v1992_v21, 0.0  ;;  %v2171_v15 = vmax.f32 %v2011_v49, 0.0  ;;  %v5101_v6 = vld [vmem:[%s9983_s1 + $0x40] sm:$0xff] }
 0x1d8   : > { %10385 = vst [vmem:[#allocation73_spill] sm:$0xff] %v7018_v9  ;;  %v7027_v8 = vmul.f32 %v2166_v25, %v10390_v23  ;;  %v2172_v16 = vmax.f32 %v2012_v38, 0.0  ;;  %v2156_v14 = vmax.f32 %v1996_v32, 0.0  ;;  %v1838_v54 = vand.u32 2147483647, %v1678_v47  ;;  %2474 = vperm.xlu1 %5047, %v5100_v63   ;;  %v5102_v18 = vld [vmem:[%s9983_s1 + $0x60] sm:$0xff] }
 0x1d9   : > { %10387 = vst [vmem:[#allocation84_spill] sm:$0xff] %v7021_v50  ;;  %v1858_v43 = vand.u32 2147483647, %v1698_v7  ;;  %2478 = vperm.xlu2 %5045, %v5101_v6   ;;  %v2017_v33 = vsub.f32 1.0, %v1857_v61  ;;  %v1842_v3 = vand.u32 2147483647, %v1682_v26  ;;  %v1703_v25 = vsub.f32 %v6631_v29, %v5898_v12  ;;  %v7040_v21 = vpop.permute.xlu1 %1503 }
 0x1da   : > { %10389 = vst [vmem:[#allocation76_spill] sm:$0xff] %v7024_v4  ;;  %v2001_v39 = vsub.f32 1.0, %v1841_v59  ;;  %v7042_v49 = vpop.permute.xlu2 %1543  ;;  %v1997_v38 = vsub.f32 1.0, %v1837_v36  ;;  %v1683_v32 = vsub.f32 %v6629_v24, %v5898_v12  ;;  %v1684_v26 = vsub.f32 %v6629_v24, %v5902_v5  ;;  %v10393_v47 = vld [vmem:[#allocation16_spill] sm:$0xff]  ;;  %v10395_v41 = vld [vmem:[#allocation81_spill] sm:$0xff]  ;;  %v10397_v24 = vld [vmem:[#allocation79_spill] sm:$0xff] }
 0x1db   : > { %10391 = vst [vmem:[#allocation74_spill] sm:$0xff] %v7027_v8  ;;  %2494 = vperm.xlu0 %5046, %v5102_v18   ;;  %v7051_v7 = vmul.f32 %v2155_v37, %v10393_v47  ;;  %v1704_v59 = vsub.f32 %v6631_v29, %v5902_v5  ;;  %v1687_v57 = vsub.f32 %v6637_v56, %v5898_v12  ;;  %v1998_v23 = vsub.f32 1.0, %v1838_v54  ;;  %v10399_v18 = vld [vmem:[#allocation17_spill] sm:$0xff] }
 0x1dc   : > { %v1688_v36 = vsub.f32 %v6637_v56, %v5902_v5  ;;  %v7060_v27 = vmul.f32 %v2151_v44, %v10395_v41  ;;  %v2018_v63 = vsub.f32 1.0, %v1858_v43  ;;  %v7063_v6 = vmul.f32 %v2171_v15, %v10397_v24  ;;  %v10403_v43 = vld [vmem:[#allocation80_spill] sm:$0xff] }
 0x1dd   : > { %v7048_v61 = vpop.permute.xlu0 %1511  ;;  %10394 = vst [vmem:[#allocation16_spill] sm:$0xff] %v7051_v7  ;;  %v7066_v37 = vmul.f32 %v2156_v14, %v10399_v18  ;;  %v2177_v47 = vmax.f32 %v2017_v33, 0.0  ;;  %v2002_v8 = vsub.f32 1.0, %v1842_v3  ;;  %v2161_v29 = vmax.f32 %v2001_v39, 0.0  ;;  %v5103_v3 = vld [vmem:[%s9983_s1 + $0x50] sm:$0xff]  ;;  %v5105_v39 = vld [vmem:[%s9983_s1 + $0x78] sm:$0xff] }
 0x1de   : > { %10392 = vst [vmem:[#allocation172_spill] sm:$0xff] %v7048_v61  ;;  %v1863_v4 = vand.u32 2147483647, %v1703_v25  ;;  %v2157_v9 = vmax.f32 %v1997_v38, 0.0  ;;  %v1843_v7 = vand.u32 2147483647, %v1683_v32  ;;  %v7069_v56 = vmul.f32 %v2152_v45, %v10401_v60 }
 0x1df   : > { %10396 = vst [vmem:[#allocation81_spill] sm:$0xff] %v7060_v27  ;;  %v1844_v50 = vand.u32 2147483647, %v1684_v26  ;;  %v1864_v44 = vand.u32 2147483647, %v1704_v59  ;;  %v7072_v27 = vmul.f32 %v2172_v16, %v10403_v43  ;;  %v2158_v15 = vmax.f32 %v1998_v23, 0.0 }
 0x1e0   : > { %10398 = vst [vmem:[#allocation79_spill] sm:$0xff] %v7063_v6  ;;  %v1847_v41 = vand.u32 2147483647, %v1687_v57  ;;  %v1848_v54 = vand.u32 2147483647, %v1688_v36  ;;  %v2178_v24 = vmax.f32 %v2018_v63, 0.0  ;;  %v1689_v14 = vsub.f32 %v6678_v20, %v5898_v12  ;;  %2486 = vperm.xlu1 %5047, %v5103_v3  }
 0x1e1   : > { %10400 = vst [vmem:[#allocation17_spill] sm:$0xff] %v7066_v37  ;;  %v1693_v33 = vsub.f32 %v6686_v55, %v5898_v12  ;;  %v5104_v60 = vld [vmem:[%s9983_s1 + $0x58] sm:$0xff]  ;;  %v2162_v16 = vmax.f32 %v2002_v8, 0.0  ;;  %v2023_v45 = vsub.f32 1.0, %v1863_v4  ;;  %v7087_v25 = vpop.permute.xlu1 %1515  ;;  %v10406_v32 = vld [vmem:[#allocation85_spill] sm:$0xff]  ;;  %v2003_v36 = vsub.f32 1.0, %v1843_v7 }
 0x1e2   : > { %10402 = vst [vmem:[#allocation82_spill] sm:$0xff] %v7069_v56  ;;  %2490 = vperm.xlu2 %5045, %v5104_v60   ;;  %v7089_v38 = vpop.permute.xlu2 %1555  ;;  %v7092_v26 = vmul.f32 %v2177_v47, %v10406_v32  ;;  %v10408_v59 = vld [vmem:[#allocation8_spill] sm:$0xff]  ;;  %v2004_v23 = vsub.f32 1.0, %v1844_v50  ;;  %v1690_v4 = vsub.f32 %v6678_v20, %v5902_v5  ;;  %v1709_v8 = vsub.f32 %v6680_v10, %v5898_v12  ;;  %v10411_v50 = vld [vmem:[#allocation5_spill] sm:$0xff]  ;;  %v10413_v32 = vld [vmem:[#allocation6_spill] sm:$0xff] }
 0x1e3   : > { %10404 = vst [vmem:[#allocation80_spill] sm:$0xff] %v7072_v27  ;;  %2506 = vperm.xlu0 %5046, %v5105_v39   ;;  %v7095_v57 = vmul.f32 %v2161_v29, %v10408_v59  ;;  %v2024_v18 = vsub.f32 1.0, %v1864_v44  ;;  %v2007_v43 = vsub.f32 1.0, %v1847_v41  ;;  %v2008_v3 = vsub.f32 1.0, %v1848_v54  ;;  %v10417_v44 = vld [vmem:[#allocation9_spill] sm:$0xff] }
 0x1e4   : > { %10405 = vst [vmem:[#allocation173_spill] sm:$0xff] %v7087_v25  ;;  %v1710_v47 = vsub.f32 %v6680_v10, %v5902_v5  ;;  %v1849_v60 = vand.u32 2147483647, %v1689_v14  ;;  %v1694_v29 = vsub.f32 %v6686_v55, %v5902_v5  ;;  %v1853_v7 = vand.u32 2147483647, %v1693_v33 }
 0x1e5   : > { %10407 = vst [vmem:[#allocation85_spill] sm:$0xff] %v7092_v26  ;;  %v7101_v63 = vpop.permute.xlu0 %1523  ;;  %v7108_v39 = vmul.f32 %v2157_v9, %v10411_v50  ;;  %v2183_v20 = vmax.f32 %v2023_v45, 0.0  ;;  %v7111_v59 = vmul.f32 %v2178_v24, %v10413_v32  ;;  %v10415_v26 = vld [vmem:[#allocation7_spill] sm:$0xff]  ;;  %v7117_v41 = vmul.f32 %v2158_v15, %v10417_v44 }
 0x1e6   : > { %10409 = vst [vmem:[#allocation8_spill] sm:$0xff] %v7095_v57  ;;  %v7114_v27 = vmul.f32 %v2162_v16, %v10415_v26  ;;  %v2163_v54 = vmax.f32 %v2003_v36, 0.0  ;;  %v2164_v10 = vmax.f32 %v2004_v23, 0.0  ;;  %v1850_v14 = vand.u32 2147483647, %v1690_v4  ;;  %v5106_v16 = vld [vmem:[%s9983_s1 + $0x68] sm:$0xff] }
 0x1e7   : > { %10410 = vst [vmem:[#allocation174_spill] sm:$0xff] %v7101_v63  ;;  %v1869_v56 = vand.u32 2147483647, %v1709_v8  ;;  %v2184_v57 = vmax.f32 %v2024_v18, 0.0  ;;  %v2167_v55 = vmax.f32 %v2007_v43, 0.0  ;;  %v2168_v33 = vmax.f32 %v2008_v3, 0.0 }
 0x1e8   : > { %10412 = vst [vmem:[#allocation5_spill] sm:$0xff] %v7108_v39  ;;  %v1870_v6 = vand.u32 2147483647, %v1710_v47  ;;  %v2009_v9 = vsub.f32 1.0, %v1849_v60  ;;  %v1854_v50 = vand.u32 2147483647, %v1694_v29  ;;  %v1699_v24 = vsub.f32 %v6729_v58, %v5898_v12  ;;  %2498 = vperm.xlu1 %5047, %v5106_v16  }
 0x1e9   : > { %10414 = vst [vmem:[#allocation6_spill] sm:$0xff] %v7111_v59  ;;  %v2013_v45 = vsub.f32 1.0, %v1853_v7  ;;  %v5107_v15 = vld [vmem:[%s9983_s1 + $0x70] sm:$0xff]  ;;  %v1695_v26 = vsub.f32 %v6721_v42, %v5898_v12  ;;  %v1696_v36 = vsub.f32 %v6721_v42, %v5902_v5  ;;  %v1715_v23 = vsub.f32 %v6723_v1, %v5898_v12  ;;  %v7136_v8 = vpop.permute.xlu1 %1527  ;;  %v10420_v43 = vld [vmem:[#allocation86_spill] sm:$0xff] }
 0x1ea   : > { %10416 = vst [vmem:[#allocation7_spill] sm:$0xff] %v7114_v27  ;;  %2502 = vperm.xlu2 %5045, %v5107_v15   ;;  %v5108_v4 = vld [vmem:[%s9983_s1 + $0x90] sm:$0xff]  ;;  %v7138_v18 = vpop.permute.xlu2 %1567  ;;  %v7141_v3 = vmul.f32 %v2183_v20, %v10420_v43  ;;  %v2010_v47 = vsub.f32 1.0, %v1850_v14  ;;  %v2029_v60 = vsub.f32 1.0, %v1869_v56  ;;  %v1716_v42 = vsub.f32 %v6723_v1, %v5902_v5 }
 0x1eb   : > { %10418 = vst [vmem:[#allocation9_spill] sm:$0xff] %v7117_v41  ;;  %2518 = vperm.xlu0 %5046, %v5108_v4   ;;  %v1700_v29 = vsub.f32 %v6729_v58, %v5902_v5  ;;  %v2030_v32 = vsub.f32 1.0, %v1870_v6  ;;  %v10422_v44 = vld [vmem:[#allocation23_spill] sm:$0xff]  ;;  %v10426_v41 = vld [vmem:[#allocation18_spill] sm:$0xff]  ;;  %v2169_v14 = vmax.f32 %v2009_v9, 0.0  ;;  %v2014_v56 = vsub.f32 1.0, %v1854_v50 }
 0x1ec   : > { %10419 = vst [vmem:[#allocation175_spill] sm:$0xff] %v7136_v8  ;;  %v7150_v16 = vmul.f32 %v2167_v55, %v10422_v44  ;;  %v10424_v15 = vld [vmem:[#allocation87_spill] sm:$0xff]  ;;  %v7156_v20 = vmul.f32 %v2184_v57, %v10426_v41  ;;  %v2173_v43 = vmax.f32 %v2013_v45, 0.0  ;;  %v1855_v1 = vand.u32 2147483647, %v1695_v26  ;;  %v5110_v26 = vld [vmem:[%s9983_s1 + $0x88] sm:$0xff] }
 0x1ed   : > { %10421 = vst [vmem:[#allocation86_spill] sm:$0xff] %v7141_v3  ;;  %v7147_v7 = vpop.permute.xlu0 %1535  ;;  %v7153_v4 = vmul.f32 %v2163_v54, %v10424_v15  ;;  %v1859_v3 = vand.u32 2147483647, %v1699_v24  ;;  %v1856_v59 = vand.u32 2147483647, %v1696_v36  ;;  %v10428_v58 = vld [vmem:[#allocation11_spill] sm:$0xff]  ;;  %v1701_v54 = vsub.f32 %v6766_v30, %v5898_v12 }
 0x1ee   : > { %10423 = vst [vmem:[#allocation23_spill] sm:$0xff] %v7150_v16  ;;  %v1875_v39 = vand.u32 2147483647, %v1715_v23  ;;  %v7159_v27 = vmul.f32 %v2168_v33, %v10428_v58  ;;  %v2170_v6 = vmax.f32 %v2010_v47, 0.0  ;;  %v2189_v37 = vmax.f32 %v2029_v60, 0.0  ;;  %v10430_v41 = vld [vmem:[#allocation19_spill] sm:$0xff] }
 0x1ef   : > { %10425 = vst [vmem:[#allocation87_spill] sm:$0xff] %v7153_v4  ;;  %v1876_v55 = vand.u32 2147483647, %v1716_v42  ;;  %v1860_v44 = vand.u32 2147483647, %v1700_v29  ;;  %v2190_v16 = vmax.f32 %v2030_v32, 0.0  ;;  %v1705_v57 = vsub.f32 %v6780_v17, %v5898_v12 }
 0x1f0   : > { %10427 = vst [vmem:[#allocation18_spill] sm:$0xff] %v7156_v20  ;;  %v7166_v9 = vmul.f32 %v2164_v10, %v10430_v41  ;;  %v2174_v50 = vmax.f32 %v2014_v56, 0.0  ;;  %v2019_v45 = vsub.f32 1.0, %v1859_v3  ;;  %v1702_v33 = vsub.f32 %v6766_v30, %v5902_v5  ;;  %v5109_v24 = vld [vmem:[%s9983_s1 + $0x80] sm:$0xff]  ;;  %v10432_v36 = vld [vmem:[#allocation26_spill] sm:$0xff]  ;;  %v10442_v20 = vld [vmem:[#allocation20_spill] sm:$0xff] }
 0x1f1   : > { %10429 = vst [vmem:[#allocation11_spill] sm:$0xff] %v7159_v27  ;;  %2510 = vperm.xlu1 %5047, %v5109_v24   ;;  %v7177_v23 = vmul.f32 %v2173_v43, %v10432_v36  ;;  %v2015_v10 = vsub.f32 1.0, %v1855_v1  ;;  %v2016_v47 = vsub.f32 1.0, %v1856_v59  ;;  %v2035_v60 = vsub.f32 1.0, %v1875_v39  ;;  %v5111_v30 = vld [vmem:[%s9983_s1 + $0xa8] sm:$0xff]  ;;  %v7182_v3 = vpop.permute.xlu1 %1539  ;;  %v10434_v29 = vld [vmem:[#allocation21_spill] sm:$0xff] }
 0x1f2   : > { %10431 = vst [vmem:[#allocation19_spill] sm:$0xff] %v7166_v9  ;;  %2514 = vperm.xlu2 %5045, %v5110_v26   ;;  %v7184_v42 = vpop.permute.xlu2 %1579  ;;  %v7187_v32 = vmul.f32 %v2169_v14, %v10434_v29  ;;  %v2036_v15 = vsub.f32 1.0, %v1876_v55  ;;  %v2020_v56 = vsub.f32 1.0, %v1860_v44  ;;  %v1721_v43 = vsub.f32 %v6768_v51, %v5898_v12  ;;  %v10436_v24 = vld [vmem:[#allocation12_spill] sm:$0xff] }
 0x1f3   : > { %10433 = vst [vmem:[#allocation26_spill] sm:$0xff] %v7177_v23  ;;  %2530 = vperm.xlu0 %5046, %v5111_v30   ;;  %v1722_v39 = vsub.f32 %v6768_v51, %v5902_v5  ;;  %v1861_v1 = vand.u32 2147483647, %v1701_v54  ;;  %v1706_v58 = vsub.f32 %v6780_v17, %v5902_v5  ;;  %v1865_v41 = vand.u32 2147483647, %v1705_v57  ;;  %v10438_v55 = vld [vmem:[#allocation88_spill] sm:$0xff] }
 0x1f4   : > { %10435 = vst [vmem:[#allocation21_spill] sm:$0xff] %v7187_v32  ;;  %v7198_v26 = vmul.f32 %v2189_v37, %v10436_v24  ;;  %v2179_v14 = vmax.f32 %v2019_v45, 0.0  ;;  %v1862_v36 = vand.u32 2147483647, %v1702_v33  ;;  %v7201_v44 = vmul.f32 %v2174_v50, %v10438_v55  ;;  %v10440_v30 = vld [vmem:[#allocation22_spill] sm:$0xff] }
 0x1f5   : > { %v7193_v59 = vpop.permute.xlu0 %1547  ;;  %v7204_v29 = vmul.f32 %v2170_v6, %v10440_v30  ;;  %v2175_v32 = vmax.f32 %v2015_v10, 0.0  ;;  %v2176_v51 = vmax.f32 %v2016_v47, 0.0  ;;  %v2195_v9 = vmax.f32 %v2035_v60, 0.0  ;;  %v10444_v47 = vld [vmem:[#allocation90_spill] sm:$0xff] }
 0x1f6   : > { %10437 = vst [vmem:[#allocation12_spill] sm:$0xff] %v7198_v26  ;;  %v7207_v54 = vmul.f32 %v2190_v16, %v10442_v20  ;;  %v2196_v4 = vmax.f32 %v2036_v15, 0.0  ;;  %v2180_v17 = vmax.f32 %v2020_v56, 0.0  ;;  %v1881_v57 = vand.u32 2147483647, %v1721_v43  ;;  %v5112_v16 = vld [vmem:[%s9983_s1 + $0x98] sm:$0xff] }
 0x1f7   : > { %10439 = vst [vmem:[#allocation88_spill] sm:$0xff] %v7201_v44  ;;  %v1882_v23 = vand.u32 2147483647, %v1722_v39  ;;  %v2021_v37 = vsub.f32 1.0, %v1861_v1  ;;  %v1866_v24 = vand.u32 2147483647, %v1706_v58  ;;  %v1707_v50 = vsub.f32 %v6811_v35, %v5898_v12 }
 0x1f8   : > { %10441 = vst [vmem:[#allocation22_spill] sm:$0xff] %v7204_v29  ;;  %v2025_v45 = vsub.f32 1.0, %v1865_v41  ;;  %v2022_v33 = vsub.f32 1.0, %v1862_v36  ;;  %v1727_v6 = vsub.f32 %v6813_v28, %v5898_v12  ;;  %v1711_v10 = vsub.f32 %v6818_v0, %v5898_v12  ;;  %v5113_v20 = vld [vmem:[%s9983_s1 + $0xa0] sm:$0xff]  ;;  %v10446_v41 = vld [vmem:[#allocation24_spill] sm:$0xff] }
 0x1f9   : > { %10443 = vst [vmem:[#allocation20_spill] sm:$0xff] %v7207_v54  ;;  %2522 = vperm.xlu1 %5047, %v5112_v16   ;;  %v7222_v60 = vmul.f32 %v2179_v14, %v10444_v47  ;;  %v1708_v15 = vsub.f32 %v6811_v35, %v5902_v5  ;;  %v1728_v56 = vsub.f32 %v6813_v28, %v5902_v5  ;;  %v5114_v39 = vld [vmem:[%s9983_s1 + $0xc0] sm:$0xff]  ;;  %v7233_v1 = vpop.permute.xlu1 %1551  ;;  %v2041_v36 = vsub.f32 1.0, %v1881_v57  ;;  %v10448_v28 = vld [vmem:[#allocation10_spill] sm:$0xff] }
 0x1fa   : > { %2526 = vperm.xlu2 %5045, %v5113_v20   ;;  %v1712_v43 = vsub.f32 %v6818_v0, %v5902_v5  ;;  %v7235_v58 = vpop.permute.xlu2 %1591  ;;  %v7238_v14 = vmul.f32 %v2175_v32, %v10446_v41  ;;  %v2042_v35 = vsub.f32 1.0, %v1882_v23  ;;  %v7243_v30 = vmul.f32 %v2195_v9, %v10448_v28  ;;  %v10450_v0 = vld [vmem:[#allocation28_spill] sm:$0xff]  ;;  %v10451_v44 = vld [vmem:[#allocation25_spill] sm:$0xff] }
 0x1fb   : > { %10445 = vst [vmem:[#allocation90_spill] sm:$0xff] %v7222_v60  ;;  %2542 = vperm.xlu0 %5046, %v5114_v39   ;;  %v7246_v16 = vmul.f32 %v2180_v17, %v10450_v0  ;;  %v2181_v20 = vmax.f32 %v2021_v37, 0.0  ;;  %v2026_v47 = vsub.f32 1.0, %v1866_v24  ;;  %v2185_v39 = vmax.f32 %v2025_v45, 0.0 }
 0x1fc   : > { %10447 = vst [vmem:[#allocation24_spill] sm:$0xff] %v7238_v14  ;;  %v1867_v54 = vand.u32 2147483647, %v1707_v50  ;;  %v2182_v29 = vmax.f32 %v2022_v33, 0.0  ;;  %v1887_v26 = vand.u32 2147483647, %v1727_v6  ;;  %v7249_v32 = vmul.f32 %v2176_v51, %v10451_v44 }
 0x1fd   : > { %v7240_v55 = vpop.permute.xlu0 %1559  ;;  %10449 = vst [vmem:[#allocation10_spill] sm:$0xff] %v7243_v30  ;;  %v1871_v60 = vand.u32 2147483647, %v1711_v10  ;;  %v1868_v57 = vand.u32 2147483647, %v1708_v15  ;;  %v10453_v14 = vld [vmem:[#allocation14_spill] sm:$0xff]  ;;  %v1733_v17 = vsub.f32 %v6860_v13, %v5898_v12  ;;  %v1717_v37 = vsub.f32 %v6862_v34, %v5898_v12 }
 0x1fe   : > { %10452 = vst [vmem:[#allocation28_spill] sm:$0xff] %v7249_v32  ;;  %v1888_v23 = vand.u32 2147483647, %v1728_v56  ;;  %v1872_v41 = vand.u32 2147483647, %v1712_v43  ;;  %v7252_v27 = vmul.f32 %v2196_v4, %v10453_v14  ;;  %v2201_v9 = vmax.f32 %v2041_v36, 0.0 }
 0x1ff   : > { %v2202_v28 = vmax.f32 %v2042_v35, 0.0  ;;  %v2186_v24 = vmax.f32 %v2026_v47, 0.0  ;;  %v2027_v45 = vsub.f32 1.0, %v1867_v54  ;;  %v10455_v50 = vld [vmem:[#allocation93_spill] sm:$0xff]  ;;  %v2047_v6 = vsub.f32 1.0, %v1887_v26  ;;  %v5115_v56 = vld [vmem:[%s9983_s1 + $0xb0] sm:$0xff] }
 0x200   : > { %10454 = vst [vmem:[#allocation25_spill] sm:$0xff] %v7252_v27  ;;  %v7259_v33 = vmul.f32 %v2185_v39, %v10455_v50  ;;  %v10457_v44 = vld [vmem:[#allocation13_spill] sm:$0xff]  ;;  %v2031_v10 = vsub.f32 1.0, %v1871_v60  ;;  %v1713_v4 = vsub.f32 %v6858_v31, %v5898_v12  ;;  %v1714_v15 = vsub.f32 %v6858_v31, %v5902_v5  ;;  %v5116_v54 = vld [vmem:[%s9983_s1 + $0xb8] sm:$0xff] }
 0x201   : > { %v7262_v51 = vmul.f32 %v2181_v20, %v10457_v44  ;;  %2534 = vperm.xlu1 %5047, %v5115_v56   ;;  %v2028_v43 = vsub.f32 1.0, %v1868_v57  ;;  %v2048_v14 = vsub.f32 1.0, %v1888_v23  ;;  %v2032_v26 = vsub.f32 1.0, %v1872_v41  ;;  %v5117_v31 = vld [vmem:[%s9983_s1 + $0xd8] sm:$0xff]  ;;  %v7279_v36 = vpop.permute.xlu1 %1563  ;;  %v10459_v57 = vld [vmem:[#allocation89_spill] sm:$0xff]  ;;  %v10460_v41 = vld [vmem:[#allocation94_spill] sm:$0xff] }
 0x202   : > { %10456 = vst [vmem:[#allocation14_spill] sm:$0xff] %v7259_v33  ;;  %2538 = vperm.xlu2 %5045, %v5116_v54   ;;  %v1734_v60 = vsub.f32 %v6860_v13, %v5902_v5  ;;  %v7281_v35 = vpop.permute.xlu2 %1603  ;;  %v1893_v0 = vand.u32 2147483647, %v1733_v17  ;;  %v1718_v20 = vsub.f32 %v6862_v34, %v5902_v5  ;;  %v1877_v47 = vand.u32 2147483647, %v1717_v37  ;;  %v10461_v44 = vld [vmem:[#allocation15_spill] sm:$0xff] }
 0x203   : > { %10458 = vst [vmem:[#allocation93_spill] sm:$0xff] %v7262_v51  ;;  %2554 = vperm.xlu0 %5046, %v5117_v31   ;;  %v7288_v23 = vmul.f32 %v2201_v9, %v10459_v57  ;;  %v2187_v13 = vmax.f32 %v2027_v45, 0.0  ;;  %v7291_v50 = vmul.f32 %v2186_v24, %v10460_v41  ;;  %v7294_v56 = vmul.f32 %v2182_v29, %v10461_v44  ;;  %v10463_v54 = vld [vmem:[#allocation27_spill] sm:$0xff] }
 0x204   : > { %v7297_v31 = vmul.f32 %v2202_v28, %v10463_v54  ;;  %v2207_v17 = vmax.f32 %v2047_v6, 0.0  ;;  %v2191_v51 = vmax.f32 %v2031_v10, 0.0  ;;  %v1873_v27 = vand.u32 2147483647, %v1713_v4  ;;  %v10465_v10 = vld [vmem:[#allocation30_spill] sm:$0xff]  ;;  %v5120_v41 = vld [vmem:[%s9983_s1 + $0xf0] sm:$0xff] }
 0x205   : > { %v7285_v39 = vpop.permute.xlu0 %1571  ;;  %10462 = vst [vmem:[#allocation13_spill] sm:$0xff] %v7294_v56  ;;  %v1874_v34 = vand.u32 2147483647, %v1714_v15  ;;  %v2188_v37 = vmax.f32 %v2028_v43, 0.0  ;;  %v2208_v32 = vmax.f32 %v2048_v14, 0.0  ;;  %v2192_v30 = vmax.f32 %v2032_v26, 0.0 }
 0x206   : > { %10464 = vst [vmem:[#allocation89_spill] sm:$0xff] %v7297_v31  ;;  %v1894_v33 = vand.u32 2147483647, %v1734_v60  ;;  %v2053_v9 = vsub.f32 1.0, %v1893_v0  ;;  %v1878_v57 = vand.u32 2147483647, %v1718_v20  ;;  %v1739_v24 = vsub.f32 %v6902_v62, %v5898_v12 }
 0x207   : > { %v2037_v45 = vsub.f32 1.0, %v1877_v47  ;;  %v1719_v29 = vsub.f32 %v6900_v2, %v5898_v12  ;;  %v1740_v28 = vsub.f32 %v6902_v62, %v5902_v5  ;;  %v1723_v6 = vsub.f32 %v6911_v22, %v5898_v12  ;;  %v5118_v14 = vld [vmem:[%s9983_s1 + $0xc8] sm:$0xff]  ;;  %v5119_v26 = vld [vmem:[%s9983_s1 + $0xd0] sm:$0xff]  ;;  %v10467_v60 = vld [vmem:[#allocation29_spill] sm:$0xff] }
 0x208   : > { %v7308_v4 = vmul.f32 %v2187_v13, %v10465_v10  ;;  %v2033_v15 = vsub.f32 1.0, %v1873_v27  ;;  %v2034_v43 = vsub.f32 1.0, %v1874_v34  ;;  %v7317_v62 = vmul.f32 %v2207_v17, %v10467_v60  ;;  %v10469_v0 = vld [vmem:[#allocation97_spill] sm:$0xff]  ;;  %v10470_v17 = vld [vmem:[#allocation92_spill] sm:$0xff]  ;;  %v10474_v56 = vld [vmem:[#allocation98_spill] sm:$0xff] }
 0x209   : > { %2546 = vperm.xlu1 %5047, %v5118_v14   ;;  %v7320_v20 = vmul.f32 %v2191_v51, %v10469_v0  ;;  %v2054_v47 = vsub.f32 1.0, %v1894_v33  ;;  %v1720_v27 = vsub.f32 %v6900_v2, %v5902_v5  ;;  %v1724_v13 = vsub.f32 %v6911_v22, %v5902_v5  ;;  %v7329_v44 = vpop.permute.xlu1 %1575  ;;  %v10472_v0 = vld [vmem:[#allocation91_spill] sm:$0xff] }
 0x20a   : > { %10466 = vst [vmem:[#allocation94_spill] sm:$0xff] %v7308_v4  ;;  %2550 = vperm.xlu2 %5045, %v5119_v26   ;;  %v7331_v54 = vpop.permute.xlu2 %1615  ;;  %v7334_v34 = vmul.f32 %v2188_v37, %v10470_v17  ;;  %v2213_v51 = vmax.f32 %v2053_v9, 0.0  ;;  %v2038_v33 = vsub.f32 1.0, %v1878_v57  ;;  %v2197_v10 = vmax.f32 %v2037_v45, 0.0 }
 0x20b   : > { %10468 = vst [vmem:[#allocation15_spill] sm:$0xff] %v7317_v62  ;;  %2566 = vperm.xlu0 %5046, %v5120_v41   ;;  %v1899_v14 = vand.u32 2147483647, %v1739_v24  ;;  %v1879_v26 = vand.u32 2147483647, %v1719_v29  ;;  %v7339_v62 = vmul.f32 %v2208_v32, %v10472_v0  ;;  %v2193_v41 = vmax.f32 %v2033_v15, 0.0 }
 0x20c   : > { %10471 = vst [vmem:[#allocation27_spill] sm:$0xff] %v7334_v34  ;;  %v1900_v22 = vand.u32 2147483647, %v1740_v28  ;;  %v1883_v60 = vand.u32 2147483647, %v1723_v6  ;;  %v2194_v4 = vmax.f32 %v2034_v43, 0.0  ;;  %v1729_v31 = vsub.f32 %v6954_v48, %v5898_v12 }
 0x20d   : > { %v7336_v2 = vpop.permute.xlu0 %1583  ;;  %10473 = vst [vmem:[#allocation30_spill] sm:$0xff] %v7339_v62  ;;  %v7344_v37 = vmul.f32 %v2192_v30, %v10474_v56  ;;  %v2214_v9 = vmax.f32 %v2054_v47, 0.0  ;;  %v1880_v57 = vand.u32 2147483647, %v1720_v27  ;;  %v1884_v45 = vand.u32 2147483647, %v1724_v13 }
 0x20e   : > { %v1725_v24 = vsub.f32 %v6948_v53, %v5898_v12  ;;  %v2198_v29 = vmax.f32 %v2038_v33, 0.0  ;;  %v2059_v28 = vsub.f32 1.0, %v1899_v14  ;;  %v1745_v32 = vsub.f32 %v6950_v52, %v5898_v12  ;;  %v10475_v6 = vld [vmem:[#allocation95_spill] sm:$0xff]  ;;  %v10477_v62 = vld [vmem:[#allocation36_spill] sm:$0xff]  ;;  %v5121_v13 = vld [vmem:[%s9983_s1 + $0xe0] sm:$0xff] }
 0x20f   : > { %v7351_v15 = vmul.f32 %v2213_v51, %v10475_v6  ;;  %v2039_v43 = vsub.f32 1.0, %v1879_v26  ;;  %v2060_v17 = vsub.f32 1.0, %v1900_v22  ;;  %v2043_v0 = vsub.f32 1.0, %v1883_v60  ;;  %v5122_v51 = vld [vmem:[%s9983_s1 + $0xe8] sm:$0xff]  ;;  %v10478_v33 = vld [vmem:[#allocation33_spill] sm:$0xff]  ;;  %v10480_v22 = vld [vmem:[#allocation32_spill] sm:$0xff] }
 0x210   : > { %v7354_v30 = vmul.f32 %v2197_v10, %v10477_v62  ;;  %v1726_v56 = vsub.f32 %v6948_v53, %v5902_v5  ;;  %v1730_v47 = vsub.f32 %v6954_v48, %v5902_v5  ;;  %v1889_v27 = vand.u32 2147483647, %v1729_v31  ;;  %v5123_v48 = vld [vmem:[%s9983_s1 + $0x108] sm:$0xff] }
 0x211   : > { %10476 = vst [vmem:[#allocation29_spill] sm:$0xff] %v7351_v15  ;;  %2558 = vperm.xlu1 %5047, %v5121_v13   ;;  %v7367_v62 = vmul.f32 %v2193_v41, %v10478_v33  ;;  %v2040_v10 = vsub.f32 1.0, %v1880_v57  ;;  %v2044_v14 = vsub.f32 1.0, %v1884_v45  ;;  %v1885_v53 = vand.u32 2147483647, %v1725_v24  ;;  %v7372_v31 = vpop.permute.xlu1 %1587  ;;  %v10482_v41 = vld [vmem:[#allocation105_spill] sm:$0xff] }
 0x212   : > { %2562 = vperm.xlu2 %5045, %v5122_v51   ;;  %v7374_v26 = vpop.permute.xlu2 %1627  ;;  %v7377_v60 = vmul.f32 %v2214_v9, %v10480_v22  ;;  %v2219_v6 = vmax.f32 %v2059_v28, 0.0  ;;  %v1905_v13 = vand.u32 2147483647, %v1745_v32  ;;  %v7382_v57 = vmul.f32 %v2198_v29, %v10482_v41  ;;  %v10484_v45 = vld [vmem:[#allocation96_spill] sm:$0xff] }
 0x213   : > { %10479 = vst [vmem:[#allocation97_spill] sm:$0xff] %v7367_v62  ;;  %2578 = vperm.xlu0 %5046, %v5123_v48   ;;  %v7385_v24 = vmul.f32 %v2194_v4, %v10484_v45  ;;  %v2199_v33 = vmax.f32 %v2039_v43, 0.0  ;;  %v2220_v52 = vmax.f32 %v2060_v17, 0.0  ;;  %v2203_v48 = vmax.f32 %v2043_v0, 0.0  ;;  %v10486_v0 = vld [vmem:[#allocation99_spill] sm:$0xff] }
 0x214   : > { %10481 = vst [vmem:[#allocation92_spill] sm:$0xff] %v7377_v60  ;;  %v1735_v62 = vsub.f32 %v7003_v46, %v5898_v12  ;;  %v1886_v15 = vand.u32 2147483647, %v1726_v56  ;;  %v1890_v34 = vand.u32 2147483647, %v1730_v47  ;;  %v2049_v9 = vsub.f32 1.0, %v1889_v27 }
 0x215   : > { %v7379_v51 = vpop.permute.xlu0 %1595  ;;  %10483 = vst [vmem:[#allocation91_spill] sm:$0xff] %v7382_v57  ;;  %v1731_v28 = vsub.f32 %v6997_v11, %v5898_v12  ;;  %v2200_v32 = vmax.f32 %v2040_v10, 0.0  ;;  %v2204_v22 = vmax.f32 %v2044_v14, 0.0  ;;  %v2045_v60 = vsub.f32 1.0, %v1885_v53  ;;  %v10488_v27 = vld [vmem:[#allocation108_spill] sm:$0xff]  ;;  %v10490_v10 = vld [vmem:[#allocation103_spill] sm:$0xff] }
 0x216   : > { %10485 = vst [vmem:[#allocation98_spill] sm:$0xff] %v7385_v24  ;;  %v1751_v29 = vsub.f32 %v6999_v40, %v5898_v12  ;;  %v2065_v4 = vsub.f32 1.0, %v1905_v13  ;;  %v1732_v43 = vsub.f32 %v6997_v11, %v5902_v5  ;;  %v1736_v17 = vsub.f32 %v7003_v46, %v5902_v5  ;;  %v10492_v53 = vld [vmem:[#allocation102_spill] sm:$0xff]  ;;  %v5124_v46 = vld [vmem:[%s9983_s1 + $0xf8] sm:$0xff]  ;;  %v10500_v57 = vld [vmem:[#allocation37_spill] sm:$0xff] }
 0x217   : > { %v7398_v56 = vmul.f32 %v2219_v6, %v10486_v0  ;;  %v1895_v47 = vand.u32 2147483647, %v1735_v62  ;;  %v7401_v41 = vmul.f32 %v2203_v48, %v10488_v27  ;;  %v7404_v14 = vmul.f32 %v2199_v33, %v10490_v10  ;;  %v5125_v62 = vld [vmem:[%s9983_s1 + $0x100] sm:$0xff]  ;;  %v10494_v48 = vld [vmem:[#allocation111_spill] sm:$0xff] }
 0x218   : > { %v7407_v45 = vmul.f32 %v2220_v52, %v10492_v53  ;;  %v2046_v13 = vsub.f32 1.0, %v1886_v15  ;;  %v2050_v40 = vsub.f32 1.0, %v1890_v34  ;;  %v2209_v24 = vmax.f32 %v2049_v9, 0.0  ;;  %v5126_v34 = vld [vmem:[%s9983_s1 + $0x120] sm:$0xff] }
 0x219   : > { %10487 = vst [vmem:[#allocation95_spill] sm:$0xff] %v7398_v56  ;;  %v1891_v11 = vand.u32 2147483647, %v1731_v28  ;;  %2570 = vperm.xlu1 %5047, %v5124_v46   ;;  %v2205_v6 = vmax.f32 %v2045_v60, 0.0  ;;  %v1911_v33 = vand.u32 2147483647, %v1751_v29  ;;  %v1758_v52 = vsub.f32 %v7042_v49, %v5902_v5  ;;  %v7420_v15 = vpop.permute.xlu1 %1599 }
 0x21a   : > { %10489 = vst [vmem:[#allocation36_spill] sm:$0xff] %v7401_v41  ;;  %2574 = vperm.xlu2 %5045, %v5125_v62   ;;  %v7423_v9 = vmul.f32 %v2204_v22, %v10494_v48  ;;  %v2225_v28 = vmax.f32 %v2065_v4, 0.0  ;;  %v1892_v0 = vand.u32 2147483647, %v1732_v43  ;;  %v1896_v27 = vand.u32 2147483647, %v1736_v17 }
 0x21b   : > { %10491 = vst [vmem:[#allocation33_spill] sm:$0xff] %v7404_v14  ;;  %2590 = vperm.xlu0 %5046, %v5126_v34   ;;  %v1737_v60 = vsub.f32 %v7040_v21, %v5898_v12  ;;  %v7429_v10 = vpop.permute.xlu2 %2446  ;;  %v2055_v53 = vsub.f32 1.0, %v1895_v47  ;;  %v1757_v46 = vsub.f32 %v7042_v49, %v5898_v12  ;;  %v1741_v62 = vsub.f32 %v7048_v61, %v5898_v12  ;;  %v10496_v34 = vld [vmem:[#allocation35_spill] sm:$0xff] }
 0x21c   : > { %10493 = vst [vmem:[#allocation32_spill] sm:$0xff] %v7407_v45  ;;  %v7436_v22 = vmul.f32 %v2200_v32, %v10496_v34  ;;  %v2206_v4 = vmax.f32 %v2046_v13, 0.0  ;;  %v2210_v43 = vmax.f32 %v2050_v40, 0.0  ;;  %v2051_v17 = vsub.f32 1.0, %v1891_v11  ;;  %v10498_v56 = vld [vmem:[#allocation107_spill] sm:$0xff] }
 0x21d   : > { %10495 = vst [vmem:[#allocation105_spill] sm:$0xff] %v7423_v9  ;;  %v7427_v29 = vpop.permute.xlu0 %1607  ;;  %v7439_v48 = vmul.f32 %v2209_v24, %v6430_v19  ;;  %v2071_v45 = vsub.f32 1.0, %v1911_v33  ;;  %v1738_v14 = vsub.f32 %v7040_v21, %v5902_v5  ;;  %v1918_v47 = vand.u32 2147483647, %v1758_v52  ;;  %v10503_v52 = vld [vmem:[#allocation38_spill] sm:$0xff] }
 0x21e   : > { %10497 = vst [vmem:[#allocation96_spill] sm:$0xff] %v7436_v22  ;;  %v7444_v9 = vmul.f32 %v2205_v6, %v10498_v56  ;;  %v2052_v49 = vsub.f32 1.0, %v1892_v0  ;;  %v2056_v41 = vsub.f32 1.0, %v1896_v27  ;;  %v1897_v61 = vand.u32 2147483647, %v1737_v60  ;;  %v5127_v56 = vld [vmem:[%s9983_s1 + $0x110] sm:$0xff] }
 0x21f   : > { %v7447_v32 = vmul.f32 %v2225_v28, %v10500_v57  ;;  %v2215_v13 = vmax.f32 %v2055_v53, 0.0  ;;  %v1917_v40 = vand.u32 2147483647, %v1757_v46  ;;  %v1901_v11 = vand.u32 2147483647, %v1741_v62  ;;  %v5128_v57 = vld [vmem:[%s9983_s1 + $0x118] sm:$0xff] }
 0x220   : > { %10499 = vst [vmem:[#allocation99_spill] sm:$0xff] %v7444_v9  ;;  %v1764_v19 = vsub.f32 %v7089_v38, %v5902_v5  ;;  %v2211_v24 = vmax.f32 %v2051_v17, 0.0  ;;  %v1763_v21 = vsub.f32 %v7089_v38, %v5898_v12  ;;  %v10502_v6 = vld [vmem:[#allocation114_spill] sm:$0xff]  ;;  %v7463_v28 = vmul.f32 %v2206_v4, %v10503_v52  ;;  %v5129_v53 = vld [vmem:[%s9983_s1 + $0x138] sm:$0xff] }
 0x221   : > { %10501 = vst [vmem:[#allocation108_spill] sm:$0xff] %v7447_v32  ;;  %2582 = vperm.xlu1 %5047, %v5127_v56   ;;  %v7460_v33 = vmul.f32 %v2210_v43, %v10502_v6  ;;  %v2231_v0 = vmax.f32 %v2071_v45, 0.0  ;;  %v1898_v27 = vand.u32 2147483647, %v1738_v14  ;;  %v2078_v60 = vsub.f32 1.0, %v1918_v47  ;;  %v7470_v46 = vpop.permute.xlu1 %1611  ;;  %v10509_v32 = vld [vmem:[#allocation41_spill] sm:$0xff] }
 0x222   : > { %2586 = vperm.xlu2 %5045, %v5128_v57   ;;  %10504 = vst [vmem:[#allocation103_spill] sm:$0xff] %v7463_v28  ;;  %v1747_v38 = vsub.f32 %v7101_v63, %v5898_v12  ;;  %v2212_v62 = vmax.f32 %v2052_v49, 0.0  ;;  %v2216_v34 = vmax.f32 %v2056_v41, 0.0  ;;  %v2057_v43 = vsub.f32 1.0, %v1897_v61  ;;  %v10505_v57 = vld [vmem:[#allocation119_spill] sm:$0xff]  ;;  %v10507_v41 = vld [vmem:[#allocation112_spill] sm:$0xff] }
 0x223   : > { %2602 = vperm.xlu0 %5046, %v5129_v53   ;;  %v1743_v4 = vsub.f32 %v7087_v25, %v5898_v12  ;;  %v7476_v14 = vpop.permute.xlu2 %2458  ;;  %v2077_v45 = vsub.f32 1.0, %v1917_v40  ;;  %v2061_v47 = vsub.f32 1.0, %v1901_v11  ;;  %v1924_v56 = vand.u32 2147483647, %v1764_v19  ;;  %v10591_v22 = vld [vmem:[#allocation156_spill] sm:$0xff] }
 0x224   : > { %v7479_v6 = vmul.f32 %v2215_v13, %v10505_v57  ;;  %v1923_v52 = vand.u32 2147483647, %v1763_v21  ;;  %v1770_v53 = vsub.f32 %v7138_v18, %v5902_v5  ;;  %v1754_v61 = vsub.f32 %v7147_v7, %v5902_v5 }
 0x225   : > { %v7474_v17 = vpop.permute.xlu0 %1619  ;;  %v7486_v49 = vmul.f32 %v2211_v24, %v10507_v41  ;;  %v2058_v25 = vsub.f32 1.0, %v1898_v27  ;;  %v2238_v63 = vmax.f32 %v2078_v60, 0.0  ;;  %v1907_v28 = vand.u32 2147483647, %v1747_v38 }
 0x226   : > { %10506 = vst [vmem:[#allocation102_spill] sm:$0xff] %v7479_v6  ;;  %v7489_v40 = vmul.f32 %v2231_v0, %v10509_v32  ;;  %v2217_v11 = vmax.f32 %v2057_v43, 0.0  ;;  %v1903_v19 = vand.u32 2147483647, %v1743_v4  ;;  %v1749_v13 = vsub.f32 %v7136_v8, %v5898_v12  ;;  %v5130_v32 = vld [vmem:[%s9983_s1 + $0x128] sm:$0xff]  ;;  %v5131_v0 = vld [vmem:[%s9983_s1 + $0x130] sm:$0xff] }
 0x227   : > { %10508 = vst [vmem:[#allocation111_spill] sm:$0xff] %v7486_v49  ;;  %v1769_v21 = vsub.f32 %v7138_v18, %v5898_v12  ;;  %v2237_v57 = vmax.f32 %v2077_v45, 0.0  ;;  %v2221_v9 = vmax.f32 %v2061_v47, 0.0  ;;  %v2084_v6 = vsub.f32 1.0, %v1924_v56  ;;  %v10511_v18 = vld [vmem:[#allocation120_spill] sm:$0xff]  ;;  %v5132_v56 = vld [vmem:[%s9983_s1 + $0x150] sm:$0xff] }
 0x228   : > { %10510 = vst [vmem:[#allocation35_spill] sm:$0xff] %v7489_v40  ;;  %v1753_v24 = vsub.f32 %v7147_v7, %v5898_v12  ;;  %v2083_v27 = vsub.f32 1.0, %v1923_v52  ;;  %v1930_v60 = vand.u32 2147483647, %v1770_v53  ;;  %v1914_v38 = vand.u32 2147483647, %v1754_v61 }
 0x229   : > { %2594 = vperm.xlu1 %5047, %v5130_v32   ;;  %v7504_v43 = vmul.f32 %v2216_v34, %v10511_v18  ;;  %v2218_v4 = vmax.f32 %v2058_v25, 0.0  ;;  %v10513_v45 = vld [vmem:[#allocation116_spill] sm:$0xff]  ;;  %v2067_v7 = vsub.f32 1.0, %v1907_v28  ;;  %v7512_v52 = vpop.permute.xlu1 %1623  ;;  %v10515_v53 = vld [vmem:[#allocation113_spill] sm:$0xff]  ;;  %v2063_v41 = vsub.f32 1.0, %v1903_v19  ;;  %v10519_v8 = vld [vmem:[#allocation115_spill] sm:$0xff] }
 0x22a   : > { %2598 = vperm.xlu2 %5045, %v5131_v0   ;;  %v7507_v47 = vmul.f32 %v2238_v63, %v10513_v45  ;;  %v7515_v61 = vmul.f32 %v2212_v62, %v10515_v53  ;;  %v1909_v32 = vand.u32 2147483647, %v1749_v13  ;;  %v1929_v0 = vand.u32 2147483647, %v1769_v21  ;;  %v10517_v63 = vld [vmem:[#allocation117_spill] sm:$0xff] }
 0x22b   : > { %10512 = vst [vmem:[#allocation107_spill] sm:$0xff] %v7504_v43  ;;  %2614 = vperm.xlu0 %5046, %v5132_v56   ;;  %v7519_v25 = vpop.permute.xlu2 %2466  ;;  %v7522_v18 = vmul.f32 %v2217_v11, %v10517_v63  ;;  %v2244_v28 = vmax.f32 %v2084_v6, 0.0  ;;  %v1913_v45 = vand.u32 2147483647, %v1753_v24  ;;  %v10521_v56 = vld [vmem:[#allocation124_spill] sm:$0xff]  ;;  %v2243_v62 = vmax.f32 %v2083_v27, 0.0 }
 0x22c   : > { %10514 = vst [vmem:[#allocation37_spill] sm:$0xff] %v7507_v47  ;;  %v7525_v47 = vmul.f32 %v2237_v57, %v10519_v8  ;;  %v7528_v40 = vmul.f32 %v2221_v9, %v10521_v56  ;;  %v2090_v53 = vsub.f32 1.0, %v1930_v60  ;;  %v2074_v19 = vsub.f32 1.0, %v1914_v38  ;;  %v10523_v24 = vld [vmem:[#allocation118_spill] sm:$0xff] }
 0x22d   : > { %10516 = vst [vmem:[#allocation114_spill] sm:$0xff] %v7515_v61  ;;  %v7517_v34 = vpop.permute.xlu0 %1631  ;;  %v1756_v13 = vsub.f32 %v7182_v3, %v5902_v5  ;;  %v2227_v21 = vmax.f32 %v2067_v7, 0.0  ;;  %v1755_v61 = vsub.f32 %v7182_v3, %v5898_v12  ;;  %v1775_v6 = vsub.f32 %v7184_v42, %v5898_v12  ;;  %v10525_v60 = vld [vmem:[#allocation122_spill] sm:$0xff] }
 0x22e   : > { %10518 = vst [vmem:[#allocation38_spill] sm:$0xff] %v7522_v18  ;;  %v1776_v8 = vsub.f32 %v7184_v42, %v5902_v5  ;;  %v2223_v11 = vmax.f32 %v2063_v41, 0.0  ;;  %v2069_v57 = vsub.f32 1.0, %v1909_v32  ;;  %v2089_v9 = vsub.f32 1.0, %v1929_v0  ;;  %v5133_v42 = vld [vmem:[%s9983_s1 + $0x140] sm:$0xff] }
 0x22f   : > { %10520 = vst [vmem:[#allocation119_spill] sm:$0xff] %v7525_v47  ;;  %v7539_v27 = vmul.f32 %v2218_v4, %v10523_v24  ;;  %v7542_v38 = vmul.f32 %v2244_v28, %v10525_v60  ;;  %v2073_v63 = vsub.f32 1.0, %v1913_v45  ;;  %v1759_v7 = vsub.f32 %v7193_v59, %v5898_v12  ;;  %v5134_v4 = vld [vmem:[%s9983_s1 + $0x148] sm:$0xff]  ;;  %v10527_v41 = vld [vmem:[#allocation121_spill] sm:$0xff] }
 0x230   : > { %10522 = vst [vmem:[#allocation112_spill] sm:$0xff] %v7528_v40  ;;  %v1760_v3 = vsub.f32 %v7193_v59, %v5902_v5  ;;  %v2250_v56 = vmax.f32 %v2090_v53, 0.0  ;;  %v2234_v47 = vmax.f32 %v2074_v19, 0.0  ;;  %v1916_v18 = vand.u32 2147483647, %v1756_v13  ;;  %v5135_v59 = vld [vmem:[%s9983_s1 + $0x168] sm:$0xff] }
 0x231   : > { %10524 = vst [vmem:[#allocation41_spill] sm:$0xff] %v7539_v27  ;;  %2606 = vperm.xlu1 %5047, %v5133_v42   ;;  %v7555_v32 = vmul.f32 %v2243_v62, %v10527_v41  ;;  %v1915_v0 = vand.u32 2147483647, %v1755_v61  ;;  %v1935_v28 = vand.u32 2147483647, %v1775_v6  ;;  %v7560_v53 = vpop.permute.xlu1 %1635  ;;  %v10529_v19 = vld [vmem:[#allocation128_spill] sm:$0xff]  ;;  %v1762_v42 = vsub.f32 %v7233_v1, %v5902_v5 }
 0x232   : > { %10526 = vst [vmem:[#allocation120_spill] sm:$0xff] %v7542_v38  ;;  %2610 = vperm.xlu2 %5045, %v5134_v4   ;;  %v1936_v45 = vand.u32 2147483647, %v1776_v8  ;;  %v7563_v13 = vmul.f32 %v2227_v21, %v10529_v19  ;;  %v2229_v24 = vmax.f32 %v2069_v57, 0.0  ;;  %v2249_v60 = vmax.f32 %v2089_v9, 0.0  ;;  %v10531_v61 = vld [vmem:[#allocation123_spill] sm:$0xff] }
 0x233   : > { %10528 = vst [vmem:[#allocation116_spill] sm:$0xff] %v7555_v32  ;;  %2626 = vperm.xlu0 %5046, %v5135_v59   ;;  %v7567_v62 = vpop.permute.xlu2 %2478  ;;  %v7570_v6 = vmul.f32 %v2223_v11, %v10531_v61  ;;  %v2233_v8 = vmax.f32 %v2073_v63, 0.0  ;;  %v1919_v4 = vand.u32 2147483647, %v1759_v7  ;;  %v1920_v41 = vand.u32 2147483647, %v1760_v3 }
 0x234   : > { %10530 = vst [vmem:[#allocation113_spill] sm:$0xff] %v7563_v13  ;;  %v1782_v59 = vsub.f32 %v7235_v58, %v5902_v5  ;;  %v10533_v21 = vld [vmem:[#allocation126_spill] sm:$0xff]  ;;  %v2076_v57 = vsub.f32 1.0, %v1916_v18  ;;  %v1765_v9 = vsub.f32 %v7240_v55, %v5898_v12  ;;  %v1766_v38 = vsub.f32 %v7240_v55, %v5902_v5  ;;  %v10537_v18 = vld [vmem:[#allocation125_spill] sm:$0xff] }
 0x235   : > { %10532 = vst [vmem:[#allocation117_spill] sm:$0xff] %v7570_v6  ;;  %v7574_v32 = vpop.permute.xlu0 %2450  ;;  %v7577_v19 = vmul.f32 %v2250_v56, %v10533_v21  ;;  %v10535_v11 = vld [vmem:[#allocation134_spill] sm:$0xff]  ;;  %v2075_v63 = vsub.f32 1.0, %v1915_v0  ;;  %v2095_v7 = vsub.f32 1.0, %v1935_v28  ;;  %v2096_v3 = vsub.f32 1.0, %v1936_v45  ;;  %v10539_v55 = vld [vmem:[#allocation133_spill] sm:$0xff] }
 0x236   : > { %v7584_v61 = vmul.f32 %v2234_v47, %v10535_v11  ;;  %v1761_v6 = vsub.f32 %v7233_v1, %v5898_v12  ;;  %v1922_v27 = vand.u32 2147483647, %v1762_v42  ;;  %v1781_v56 = vsub.f32 %v7235_v58, %v5898_v12  ;;  %v5136_v1 = vld [vmem:[%s9983_s1 + $0x158] sm:$0xff]  ;;  %v5137_v58 = vld [vmem:[%s9983_s1 + $0x160] sm:$0xff]  ;;  %v10541_v45 = vld [vmem:[#allocation127_spill] sm:$0xff] }
 0x237   : > { %10534 = vst [vmem:[#allocation115_spill] sm:$0xff] %v7577_v19  ;;  %v7591_v21 = vmul.f32 %v2249_v60, %v10537_v18  ;;  %v2079_v19 = vsub.f32 1.0, %v1919_v4  ;;  %v2080_v13 = vsub.f32 1.0, %v1920_v41  ;;  %v1942_v40 = vand.u32 2147483647, %v1782_v59 }
 0x238   : > { %10536 = vst [vmem:[#allocation124_spill] sm:$0xff] %v7584_v61  ;;  %v7594_v49 = vmul.f32 %v2233_v8, %v10539_v55  ;;  %v2236_v47 = vmax.f32 %v2076_v57, 0.0  ;;  %v1925_v0 = vand.u32 2147483647, %v1765_v9  ;;  %v1926_v28 = vand.u32 2147483647, %v1766_v38 }
 0x239   : > { %10538 = vst [vmem:[#allocation118_spill] sm:$0xff] %v7591_v21  ;;  %2618 = vperm.xlu1 %5047, %v5136_v1   ;;  %v7603_v60 = vmul.f32 %v2229_v24, %v10541_v45  ;;  %v2235_v42 = vmax.f32 %v2075_v63, 0.0  ;;  %v2255_v4 = vmax.f32 %v2095_v7, 0.0  ;;  %v2256_v8 = vmax.f32 %v2096_v3, 0.0  ;;  %v5138_v38 = vld [vmem:[%s9983_s1 + $0x180] sm:$0xff] }
 0x23a   : > { %10540 = vst [vmem:[#allocation122_spill] sm:$0xff] %v7594_v49  ;;  %2622 = vperm.xlu2 %5045, %v5137_v58   ;;  %v1768_v41 = vsub.f32 %v7279_v36, %v5902_v5  ;;  %v1921_v59 = vand.u32 2147483647, %v1761_v6  ;;  %v2082_v57 = vsub.f32 1.0, %v1922_v27  ;;  %v1941_v9 = vand.u32 2147483647, %v1781_v56  ;;  %v7612_v18 = vpop.permute.xlu1 %2454 }
 0x23b   : > { %10542 = vst [vmem:[#allocation121_spill] sm:$0xff] %v7603_v60  ;;  %2638 = vperm.xlu0 %5046, %v5138_v38   ;;  %v1788_v11 = vsub.f32 %v7281_v35, %v5902_v5  ;;  %v2239_v63 = vmax.f32 %v2079_v19, 0.0  ;;  %v2240_v7 = vmax.f32 %v2080_v13, 0.0  ;;  %v2102_v3 = vsub.f32 1.0, %v1942_v40  ;;  %v10543_v58 = vld [vmem:[#allocation132_spill] sm:$0xff]  ;;  %v10545_v38 = vld [vmem:[#allocation130_spill] sm:$0xff] }
 0x23c   : > { %v7614_v24 = vpop.permute.xlu2 %2490  ;;  %v1767_v55 = vsub.f32 %v7279_v36, %v5898_v12  ;;  %v7621_v45 = vmul.f32 %v2236_v47, %v10543_v58  ;;  %v2085_v27 = vsub.f32 1.0, %v1925_v0  ;;  %v2086_v6 = vsub.f32 1.0, %v1926_v28  ;;  %v10547_v58 = vld [vmem:[#allocation140_spill] sm:$0xff] }
 0x23d   : > { %v7618_v1 = vpop.permute.xlu0 %2470  ;;  %v1787_v56 = vsub.f32 %v7281_v35, %v5898_v12  ;;  %v7626_v60 = vmul.f32 %v2256_v8, %v10545_v38  ;;  %v1928_v21 = vand.u32 2147483647, %v1768_v41  ;;  %v1771_v40 = vsub.f32 %v7285_v39, %v5898_v12  ;;  %v10549_v35 = vld [vmem:[#allocation139_spill] sm:$0xff] }
 0x23e   : > { %10544 = vst [vmem:[#allocation128_spill] sm:$0xff] %v7621_v45  ;;  %v1772_v36 = vsub.f32 %v7285_v39, %v5902_v5  ;;  %v2081_v13 = vsub.f32 1.0, %v1921_v59  ;;  %v2242_v19 = vmax.f32 %v2082_v57, 0.0  ;;  %v2101_v49 = vsub.f32 1.0, %v1941_v9  ;;  %v5140_v39 = vld [vmem:[%s9983_s1 + $0x178] sm:$0xff]  ;;  %v10551_v59 = vld [vmem:[#allocation131_spill] sm:$0xff] }
 0x23f   : > { %10546 = vst [vmem:[#allocation123_spill] sm:$0xff] %v7626_v60  ;;  %v1948_v47 = vand.u32 2147483647, %v1788_v11  ;;  %v7633_v0 = vmul.f32 %v2240_v7, %v10547_v58  ;;  %v2262_v28 = vmax.f32 %v2102_v3, 0.0  ;;  %v1927_v45 = vand.u32 2147483647, %v1767_v55 }
 0x240   : > { %v7636_v61 = vmul.f32 %v2239_v63, %v10549_v35  ;;  %v2245_v8 = vmax.f32 %v2085_v27, 0.0  ;;  %v2246_v41 = vmax.f32 %v2086_v6, 0.0  ;;  %v1947_v38 = vand.u32 2147483647, %v1787_v56  ;;  %v5139_v60 = vld [vmem:[%s9983_s1 + $0x170] sm:$0xff]  ;;  %v5141_v7 = vld [vmem:[%s9983_s1 + $0x198] sm:$0xff] }
 0x241   : > { %10548 = vst [vmem:[#allocation126_spill] sm:$0xff] %v7633_v0  ;;  %2630 = vperm.xlu1 %5047, %v5139_v60   ;;  %v7645_v57 = vmul.f32 %v2235_v42, %v10551_v59  ;;  %v2088_v9 = vsub.f32 1.0, %v1928_v21  ;;  %v1931_v11 = vand.u32 2147483647, %v1771_v40  ;;  %v1932_v63 = vand.u32 2147483647, %v1772_v36 }
 0x242   : > { %10550 = vst [vmem:[#allocation134_spill] sm:$0xff] %v7636_v61  ;;  %2634 = vperm.xlu2 %5045, %v5140_v39   ;;  %v10553_v3 = vld [vmem:[#allocation129_spill] sm:$0xff]  ;;  %v2241_v60 = vmax.f32 %v2081_v13, 0.0  ;;  %v10555_v27 = vld [vmem:[#allocation138_spill] sm:$0xff]  ;;  %v2261_v56 = vmax.f32 %v2101_v49, 0.0  ;;  %v2108_v58 = vsub.f32 1.0, %v1948_v47  ;;  %v7656_v35 = vpop.permute.xlu1 %2462  ;;  %v1773_v39 = vsub.f32 %v7329_v44, %v5898_v12 }
 0x243   : > { %10552 = vst [vmem:[#allocation125_spill] sm:$0xff] %v7645_v57  ;;  %2650 = vperm.xlu0 %5046, %v5141_v7   ;;  %v7651_v55 = vmul.f32 %v2255_v4, %v10553_v3  ;;  %v7654_v6 = vmul.f32 %v2242_v19, %v10555_v27  ;;  %v10557_v21 = vld [vmem:[#allocation136_spill] sm:$0xff]  ;;  %v2087_v36 = vsub.f32 1.0, %v1927_v45  ;;  %v1794_v4 = vsub.f32 %v7331_v54, %v5902_v5  ;;  %v10559_v19 = vld [vmem:[#allocation146_spill] sm:$0xff]  ;;  %v10561_v7 = vld [vmem:[#allocation145_spill] sm:$0xff] }
 0x244   : > { %v7658_v42 = vpop.permute.xlu2 %2502  ;;  %v7661_v40 = vmul.f32 %v2262_v28, %v10557_v21  ;;  %v7670_v59 = vmul.f32 %v2246_v41, %v10559_v19  ;;  %v2107_v49 = vsub.f32 1.0, %v1947_v38  ;;  %v1774_v47 = vsub.f32 %v7329_v44, %v5902_v5  ;;  %v10563_v38 = vld [vmem:[#allocation137_spill] sm:$0xff] }
 0x245   : > { %10554 = vst [vmem:[#allocation133_spill] sm:$0xff] %v7651_v55  ;;  %v7667_v13 = vpop.permute.xlu0 %2482  ;;  %v7675_v3 = vmul.f32 %v2245_v8, %v10561_v7  ;;  %v2248_v28 = vmax.f32 %v2088_v9, 0.0  ;;  %v2091_v45 = vsub.f32 1.0, %v1931_v11  ;;  %v2092_v27 = vsub.f32 1.0, %v1932_v63  ;;  %v10565_v7 = vld [vmem:[#allocation135_spill] sm:$0xff]  ;;  %v10577_v0 = vld [vmem:[#allocation141_spill] sm:$0xff] }
 0x246   : > { %10556 = vst [vmem:[#allocation127_spill] sm:$0xff] %v7654_v6  ;;  %v1778_v21 = vsub.f32 %v7336_v2, %v5902_v5  ;;  %v2268_v55 = vmax.f32 %v2108_v58, 0.0  ;;  %v1777_v41 = vsub.f32 %v7336_v2, %v5898_v12  ;;  %v7684_v19 = vmul.f32 %v2241_v60, %v10563_v38  ;;  %v5142_v2 = vld [vmem:[%s9983_s1 + $0x188] sm:$0xff]  ;;  %v5143_v60 = vld [vmem:[%s9983_s1 + $0x190] sm:$0xff] }
 0x247   : > { %10558 = vst [vmem:[#allocation132_spill] sm:$0xff] %v7661_v40  ;;  %v1793_v40 = vsub.f32 %v7331_v54, %v5898_v12  ;;  %v2247_v44 = vmax.f32 %v2087_v36, 0.0  ;;  %v1933_v6 = vand.u32 2147483647, %v1773_v39  ;;  %v1954_v8 = vand.u32 2147483647, %v1794_v4 }
 0x248   : > { %10560 = vst [vmem:[#allocation130_spill] sm:$0xff] %v7670_v59  ;;  %v7687_v9 = vmul.f32 %v2261_v56, %v10565_v7  ;;  %v2267_v11 = vmax.f32 %v2107_v49, 0.0  ;;  %v1934_v63 = vand.u32 2147483647, %v1774_v47  ;;  %v1780_v58 = vsub.f32 %v7372_v31, %v5902_v5  ;;  %v10567_v56 = vld [vmem:[#allocation144_spill] sm:$0xff]  ;;  %v5144_v47 = vld [vmem:[%s9983_s1 + $0x1b0] sm:$0xff] }
 0x249   : > { %10562 = vst [vmem:[#allocation140_spill] sm:$0xff] %v7675_v3  ;;  %v1800_v54 = vsub.f32 %v7374_v26, %v5902_v5  ;;  %2642 = vperm.xlu1 %5047, %v5142_v2   ;;  %v7700_v36 = vmul.f32 %v2248_v28, %v10567_v56  ;;  %v2251_v39 = vmax.f32 %v2091_v45, 0.0  ;;  %v2252_v4 = vmax.f32 %v2092_v27, 0.0  ;;  %v10569_v38 = vld [vmem:[#allocation142_spill] sm:$0xff]  ;;  %v10575_v3 = vld [vmem:[#allocation143_spill] sm:$0xff] }
 0x24a   : > { %10564 = vst [vmem:[#allocation139_spill] sm:$0xff] %v7684_v19  ;;  %2646 = vperm.xlu2 %5045, %v5143_v60   ;;  %v1938_v49 = vand.u32 2147483647, %v1778_v21  ;;  %v7706_v7 = vmul.f32 %v2268_v55, %v10569_v38  ;;  %v1953_v2 = vand.u32 2147483647, %v1793_v40  ;;  %v1784_v19 = vsub.f32 %v7379_v51, %v5902_v5  ;;  %v7710_v60 = vpop.permute.xlu1 %2474 }
 0x24b   : > { %10566 = vst [vmem:[#allocation131_spill] sm:$0xff] %v7687_v9  ;;  %2662 = vperm.xlu0 %5046, %v5144_v47   ;;  %v1937_v9 = vand.u32 2147483647, %v1777_v41  ;;  %v2093_v45 = vsub.f32 1.0, %v1933_v6  ;;  %v2114_v27 = vsub.f32 1.0, %v1954_v8  ;;  %v1779_v21 = vsub.f32 %v7372_v31, %v5898_v12  ;;  %v10573_v6 = vld [vmem:[#allocation151_spill] sm:$0xff] }
 0x24c   : > { %10568 = vst [vmem:[#allocation129_spill] sm:$0xff] %v7700_v36  ;;  %v7712_v28 = vpop.permute.xlu2 %2514  ;;  %v1799_v56 = vsub.f32 %v7374_v26, %v5898_v12  ;;  %v2094_v55 = vsub.f32 1.0, %v1934_v63  ;;  %v1940_v40 = vand.u32 2147483647, %v1780_v58  ;;  %v1960_v41 = vand.u32 2147483647, %v1800_v54 }
 0x24d   : > { %10570 = vst [vmem:[#allocation138_spill] sm:$0xff] %v7706_v7  ;;  %v7718_v47 = vpop.permute.xlu0 %2494  ;;  %v1783_v38 = vsub.f32 %v7379_v51, %v5898_v12  ;;  %v10571_v7 = vld [vmem:[#allocation152_spill] sm:$0xff]  ;;  %v2098_v57 = vsub.f32 1.0, %v1938_v49  ;;  %v7726_v8 = vmul.f32 %v2251_v39, %v10573_v6  ;;  %v7729_v31 = vmul.f32 %v2247_v44, %v10575_v3  ;;  %v5145_v3 = vld [vmem:[%s9983_s1 + $0x1a0] sm:$0xff] }
 0x24e   : > { %v7723_v36 = vmul.f32 %v2252_v4, %v10571_v7  ;;  %v2113_v59 = vsub.f32 1.0, %v1953_v2  ;;  %v2097_v26 = vsub.f32 1.0, %v1937_v9  ;;  %v1944_v61 = vand.u32 2147483647, %v1784_v19 }
 0x24f   : > { %10574 = vst [vmem:[#allocation146_spill] sm:$0xff] %v7726_v8  ;;  %v7732_v63 = vmul.f32 %v2267_v11, %v10577_v0  ;;  %v7734_v58 = vmax.f32 %v2093_v45, 0.0  ;;  %v2274_v54 = vmax.f32 %v2114_v27, 0.0  ;;  %v1939_v51 = vand.u32 2147483647, %v1779_v21  ;;  %v5146_v0 = vld [vmem:[%s9983_s1 + $0x1a8] sm:$0xff] }
 0x250   : > { %10572 = vst [vmem:[#allocation136_spill] sm:$0xff] %v7723_v36  ;;  %v1959_v43 = vand.u32 2147483647, %v1799_v56  ;;  %v7736_v4 = vmax.f32 %v2094_v55, 0.0  ;;  %v2100_v49 = vsub.f32 1.0, %v1940_v40  ;;  %v2120_v7 = vsub.f32 1.0, %v1960_v41 }
 0x251   : > { %10576 = vst [vmem:[#allocation145_spill] sm:$0xff] %v7729_v31  ;;  %v1943_v39 = vand.u32 2147483647, %v1783_v38  ;;  %2654 = vperm.xlu1 %5047, %v5145_v3   ;;  %v2258_v19 = vmax.f32 %v2098_v57, 0.0  ;;  %v1786_v44 = vsub.f32 %v7420_v15, %v5902_v5  ;;  %v1790_v9 = vsub.f32 %v7427_v29, %v5902_v5  ;;  %v10581_v11 = vld [vmem:[#allocation45_spill] sm:$0xff]  ;;  %v5147_v45 = vld [vmem:[%s9983_s1 + $0x1c8] sm:$0xff] }
 0x252   : > { %10578 = vst [vmem:[#allocation137_spill] sm:$0xff] %v7732_v63  ;;  %2658 = vperm.xlu2 %5045, %v5146_v0   ;;  %v2771_v2 = vsub.f32 %v7429_v10, %v10581_v11  ;;  %v2273_v27 = vmax.f32 %v2113_v59, 0.0  ;;  %v2257_v21 = vmax.f32 %v2097_v26, 0.0  ;;  %v2104_v56 = vsub.f32 1.0, %v1944_v61  ;;  %v7755_v55 = vpop.permute.xlu1 %2486  ;;  %v10582_v41 = vld [vmem:[#allocation148_spill] sm:$0xff]  ;;  %v10584_v0 = vld [vmem:[#allocation46_spill] sm:$0xff] }
 0x253   : > { %10579 = vst [vmem:[#allocation135_spill] sm:$0xff] %v7734_v58  ;;  %2674 = vperm.xlu0 %5046, %v5147_v45   ;;  %v1785_v57 = vsub.f32 %v7420_v15, %v5898_v12  ;;  %v7760_v38 = vmul.f32 %v2274_v54, %v10582_v41  ;;  %v2099_v6 = vsub.f32 1.0, %v1939_v51  ;;  %v2119_v3 = vsub.f32 1.0, %v1959_v43  ;;  %v10585_v45 = vld [vmem:[#allocation158_spill] sm:$0xff]  ;;  %v10587_v43 = vld [vmem:[#allocation147_spill] sm:$0xff] }
 0x254   : > { %10580 = vst [vmem:[#allocation144_spill] sm:$0xff] %v7736_v4  ;;  %v7757_v40 = vpop.permute.xlu2 %2526  ;;  %v2772_v58 = vsub.f32 %v7429_v10, %v10584_v0  ;;  %v2260_v59 = vmax.f32 %v2100_v49, 0.0  ;;  %v2280_v26 = vmax.f32 %v2120_v7, 0.0  ;;  %v2103_v61 = vsub.f32 1.0, %v1943_v39  ;;  %v10589_v10 = vld [vmem:[#allocation157_spill] sm:$0xff] }
 0x255   : > { %10583 = vst [vmem:[#allocation142_spill] sm:$0xff] %v7760_v38  ;;  %v7764_v4 = vpop.permute.xlu0 %2506  ;;  %v1789_v15 = vsub.f32 %v7427_v29, %v5898_v12  ;;  %v7769_v63 = vmul.f32 %v2258_v19, %v10585_v45  ;;  %v1946_v31 = vand.u32 2147483647, %v1786_v44  ;;  %v1950_v8 = vand.u32 2147483647, %v1790_v9 }
 0x256   : > { %v2931_v54 = vand.u32 2147483647, %v2771_v2  ;;  %v2264_v41 = vmax.f32 %v2104_v56, 0.0  ;;  %v1945_v51 = vand.u32 2147483647, %v1785_v57  ;;  %v7772_v38 = vmul.f32 %v2273_v27, %v10587_v43  ;;  %v5148_v27 = vld [vmem:[%s9983_s1 + $0x1b8] sm:$0xff] }
 0x257   : > { %10586 = vst [vmem:[#allocation152_spill] sm:$0xff] %v7769_v63  ;;  %v7775_v36 = vmul.f32 %v2257_v21, %v10589_v10  ;;  %v2259_v49 = vmax.f32 %v2099_v6, 0.0  ;;  %v2279_v7 = vmax.f32 %v2119_v3, 0.0  ;;  %v2932_v39 = vand.u32 2147483647, %v2772_v58  ;;  %v5149_v58 = vld [vmem:[%s9983_s1 + $0x1c0] sm:$0xff] }
 0x258   : > { %10588 = vst [vmem:[#allocation151_spill] sm:$0xff] %v7772_v38  ;;  %v1792_v29 = vsub.f32 %v7470_v46, %v5902_v5  ;;  %v7780_v19 = vmul.f32 %v2260_v59, %v10591_v22  ;;  %v2263_v44 = vmax.f32 %v2103_v61, 0.0  ;;  %v1949_v9 = vand.u32 2147483647, %v1789_v15  ;;  %v10593_v21 = vld [vmem:[#allocation154_spill] sm:$0xff]  ;;  %v5150_v3 = vld [vmem:[%s9983_s1 + $0x1e0] sm:$0xff] }
 0x259   : > { %10590 = vst [vmem:[#allocation143_spill] sm:$0xff] %v7775_v36  ;;  %v1796_v2 = vsub.f32 %v7474_v17, %v5902_v5  ;;  %2666 = vperm.xlu1 %5047, %v5148_v27   ;;  %v7791_v56 = vmul.f32 %v2280_v26, %v10593_v21  ;;  %v2106_v22 = vsub.f32 1.0, %v1946_v31  ;;  %v2110_v57 = vsub.f32 1.0, %v1950_v8  ;;  %v10595_v59 = vld [vmem:[#allocation162_spill] sm:$0xff] }
 0x25a   : > { %10592 = vst [vmem:[#allocation141_spill] sm:$0xff] %v7780_v19  ;;  %2670 = vperm.xlu2 %5045, %v5149_v58   ;;  %v3091_v6 = vsub.f32 1.0, %v2931_v54  ;;  %v7797_v61 = vmul.f32 %v2264_v41, %v10595_v59  ;;  %v2105_v15 = vsub.f32 1.0, %v1945_v51  ;;  %v1791_v45 = vsub.f32 %v7470_v46, %v5898_v12  ;;  %v7803_v26 = vpop.permute.xlu1 %2498  ;;  %v10597_v46 = vld [vmem:[#allocation153_spill] sm:$0xff] }
 0x25b   : > { %10594 = vst [vmem:[#allocation148_spill] sm:$0xff] %v7791_v56  ;;  %2686 = vperm.xlu0 %5046, %v5150_v3   ;;  %v2777_v43 = vsub.f32 %v7476_v14, %v10581_v11  ;;  %v3092_v8 = vsub.f32 1.0, %v2932_v39  ;;  %v1952_v54 = vand.u32 2147483647, %v1792_v29  ;;  %v1795_v10 = vsub.f32 %v7474_v17, %v5898_v12  ;;  %v10599_v3 = vld [vmem:[#allocation161_spill] sm:$0xff]  ;;  %v10601_v29 = vld [vmem:[#allocation155_spill] sm:$0xff] }
 0x25c   : > { %10596 = vst [vmem:[#allocation158_spill] sm:$0xff] %v7797_v61  ;;  %v7805_v31 = vpop.permute.xlu2 %2538  ;;  %v2778_v41 = vsub.f32 %v7476_v14, %v10584_v0  ;;  %v2109_v51 = vsub.f32 1.0, %v1949_v9  ;;  %v1956_v58 = vand.u32 2147483647, %v1796_v2  ;;  %v7814_v21 = vmul.f32 %v2279_v7, %v10597_v46 }
 0x25d   : > { %v7811_v27 = vpop.permute.xlu0 %2518  ;;  %v7817_v59 = vmul.f32 %v2263_v44, %v10599_v3  ;;  %v2266_v36 = vmax.f32 %v2106_v22, 0.0  ;;  %v2270_v63 = vmax.f32 %v2110_v57, 0.0  ;;  %v3251_v39 = vmax.f32 %v3091_v6, 0.0  ;;  %v5152_v57 = vld [vmem:[%s9983_s1 + $0x1d8] sm:$0xff] }
 0x25e   : > { %10598 = vst [vmem:[#allocation147_spill] sm:$0xff] %v7814_v21  ;;  %v7820_v19 = vmul.f32 %v2259_v49, %v10601_v29  ;;  %v2265_v17 = vmax.f32 %v2105_v15, 0.0  ;;  %v1951_v61 = vand.u32 2147483647, %v1791_v45  ;;  %v2937_v38 = vand.u32 2147483647, %v2777_v43 }
 0x25f   : > { %10600 = vst [vmem:[#allocation157_spill] sm:$0xff] %v7817_v59  ;;  %v1798_v14 = vsub.f32 %v7512_v52, %v5902_v5  ;;  %v3252_v9 = vmax.f32 %v3092_v8, 0.0  ;;  %v2112_v2 = vsub.f32 1.0, %v1952_v54  ;;  %v1955_v56 = vand.u32 2147483647, %v1795_v10  ;;  %v5151_v49 = vld [vmem:[%s9983_s1 + $0x1d0] sm:$0xff] }
 0x260   : > { %10602 = vst [vmem:[#allocation156_spill] sm:$0xff] %v7820_v19  ;;  %v2938_v7 = vand.u32 2147483647, %v2778_v41  ;;  %v2269_v46 = vmax.f32 %v2109_v51, 0.0  ;;  %v2116_v21 = vsub.f32 1.0, %v1956_v58  ;;  %v1797_v44 = vsub.f32 %v7512_v52, %v5898_v12  ;;  %v10603_v6 = vld [vmem:[#allocation160_spill] sm:$0xff] }
 0x261   : > { %v1802_v22 = vsub.f32 %v7517_v34, %v5902_v5  ;;  %2678 = vperm.xlu1 %5047, %v5151_v49   ;;  %v7835_v15 = vmul.f32 %v2266_v36, %v10603_v6  ;;  %v10605_v45 = vld [vmem:[#allocation168_spill] sm:$0xff]  ;;  %v2781_v52 = vsub.f32 %v7519_v25, %v10581_v11  ;;  %v10607_v54 = vld [vmem:[#allocation163_spill] sm:$0xff]  ;;  %v2111_v41 = vsub.f32 1.0, %v1951_v61 }
 0x262   : > { %2682 = vperm.xlu2 %5045, %v5152_v57   ;;  %v7838_v43 = vmul.f32 %v2270_v63, %v10605_v45  ;;  %v5153_v8 = vld [vmem:[%s9983_s1 + $0x1f8] sm:$0xff]  ;;  %v7846_v10 = vmul.f32 %v3251_v39, %v10607_v54  ;;  %v3097_v51 = vsub.f32 1.0, %v2937_v38  ;;  %v1958_v58 = vand.u32 2147483647, %v1798_v14  ;;  %v10610_v19 = vld [vmem:[#allocation167_spill] sm:$0xff] }
 0x263   : > { %10604 = vst [vmem:[#allocation154_spill] sm:$0xff] %v7835_v15  ;;  %2698 = vperm.xlu0 %5046, %v5153_v8   ;;  %v2782_v36 = vsub.f32 %v7519_v25, %v10584_v0  ;;  %v7850_v3 = vpop.permute.xlu1 %2510  ;;  %v2272_v29 = vmax.f32 %v2112_v2, 0.0  ;;  %v2115_v49 = vsub.f32 1.0, %v1955_v56  ;;  %v3098_v57 = vsub.f32 1.0, %v2938_v7  ;;  %v10608_v45 = vld [vmem:[#allocation164_spill] sm:$0xff]  ;;  %v10612_v56 = vld [vmem:[#allocation159_spill] sm:$0xff] }
 0x264   : > { %10606 = vst [vmem:[#allocation162_spill] sm:$0xff] %v7838_v43  ;;  %v7852_v63 = vpop.permute.xlu2 %2550  ;;  %v7857_v8 = vmul.f32 %v3252_v9, %v10608_v45  ;;  %v2276_v39 = vmax.f32 %v2116_v21, 0.0  ;;  %v1957_v54 = vand.u32 2147483647, %v1797_v44  ;;  %v1801_v38 = vsub.f32 %v7517_v34, %v5898_v12  ;;  %v10614_v21 = vld [vmem:[#allocation166_spill] sm:$0xff] }
 0x265   : > { %v7854_v6 = vpop.permute.xlu0 %2530  ;;  %v1962_v61 = vand.u32 2147483647, %v1802_v22  ;;  %v2941_v14 = vand.u32 2147483647, %v2781_v52  ;;  %v1804_v25 = vsub.f32 %v7560_v53, %v5902_v5  ;;  %v7864_v59 = vmul.f32 %v2269_v46, %v10610_v19  ;;  %v10616_v52 = vld [vmem:[#allocation104_spill] sm:$0xff] }
 0x266   : > { %10609 = vst [vmem:[#allocation153_spill] sm:$0xff] %v7857_v8  ;;  %v7867_v2 = vmul.f32 %v2265_v17, %v10612_v56  ;;  %v2271_v7 = vmax.f32 %v2111_v41, 0.0  ;;  %v3257_v15 = vmax.f32 %v3097_v51, 0.0  ;;  %v2118_v9 = vsub.f32 1.0, %v1958_v58  ;;  %v5154_v17 = vld [vmem:[%s9983_s1 + $0x1e8] sm:$0xff]  ;;  %v5155_v41 = vld [vmem:[%s9983_s1 + $0x1f0] sm:$0xff] }
 0x267   : > { %10611 = vst [vmem:[#allocation161_spill] sm:$0xff] %v7864_v59  ;;  %v2942_v45 = vand.u32 2147483647, %v2782_v36  ;;  %v7870_v44 = vmul.f32 %v2272_v29, %v10614_v21  ;;  %v2275_v43 = vmax.f32 %v2115_v49, 0.0  ;;  %v3258_v34 = vmax.f32 %v3098_v57, 0.0  ;;  %v5156_v36 = vld [vmem:[%s9983_s1 + $0x210] sm:$0xff] }
 0x268   : > { %10613 = vst [vmem:[#allocation155_spill] sm:$0xff] %v7867_v2  ;;  %v1803_v22 = vsub.f32 %v7560_v53, %v5898_v12  ;;  %v7875_v5 = vmul.f32 %v2276_v39, %v10616_v52  ;;  %v2117_v19 = vsub.f32 1.0, %v1957_v54  ;;  %v1961_v46 = vand.u32 2147483647, %v1801_v38  ;;  %v10618_v38 = vld [vmem:[#allocation63_spill] sm:$0xff]  ;;  %v10620_v56 = vld [vmem:[#allocation64_spill] sm:$0xff] }
 0x269   : > { %10615 = vst [vmem:[#allocation160_spill] sm:$0xff] %v7870_v44  ;;  %v2122_v59 = vsub.f32 1.0, %v1962_v61  ;;  %2690 = vperm.xlu1 %5047, %v5154_v17   ;;  %v3101_v51 = vsub.f32 1.0, %v2941_v14  ;;  %v1964_v58 = vand.u32 2147483647, %v1804_v25  ;;  %v2787_v12 = vsub.f32 %v7567_v62, %v10581_v11 }
 0x26a   : > { %10617 = vst [vmem:[#allocation168_spill] sm:$0xff] %v7875_v5  ;;  %2694 = vperm.xlu2 %5045, %v5155_v41   ;;  %v2788_v53 = vsub.f32 %v7567_v62, %v10584_v0  ;;  %v2278_v29 = vmax.f32 %v2118_v9, 0.0  ;;  %v3102_v49 = vsub.f32 1.0, %v2942_v45  ;;  %v2773_v57 = vsub.f32 %v7574_v32, %v10581_v11  ;;  %v10622_v9 = vld [vmem:[#allocation100_spill] sm:$0xff]  ;;  %v10626_v5 = vld [vmem:[#allocation101_spill] sm:$0xff] }
 0x26b   : > { %2710 = vperm.xlu0 %5046, %v5156_v36   ;;  %v7892_v39 = vpop.permute.xlu1 %2522  ;;  %v7897_v61 = vmul.f32 %v3257_v15, %v10618_v38  ;;  %v1963_v14 = vand.u32 2147483647, %v1803_v22  ;;  %v2774_v62 = vsub.f32 %v7574_v32, %v10584_v0  ;;  %v7904_v21 = vmul.f32 %v3258_v34, %v10620_v56  ;;  %v10624_v36 = vld [vmem:[#allocation165_spill] sm:$0xff] }
 0x26c   : > { %v7894_v54 = vpop.permute.xlu2 %2562  ;;  %v7907_v45 = vmul.f32 %v2275_v43, %v10622_v9  ;;  %v2277_v52 = vmax.f32 %v2117_v19, 0.0  ;;  %v2121_v17 = vsub.f32 1.0, %v1961_v46  ;;  %v2282_v41 = vmax.f32 %v2122_v59, 0.0  ;;  %v10628_v46 = vld [vmem:[#allocation109_spill] sm:$0xff] }
 0x26d   : > { %10619 = vst [vmem:[#allocation163_spill] sm:$0xff] %v7897_v61  ;;  %v7901_v25 = vpop.permute.xlu0 %2542  ;;  %v7910_v2 = vmul.f32 %v2271_v7, %v10624_v36  ;;  %v3261_v15 = vmax.f32 %v3101_v51, 0.0  ;;  %v2124_v38 = vsub.f32 1.0, %v1964_v58  ;;  %v2947_v22 = vand.u32 2147483647, %v2787_v12  ;;  %v5157_v12 = vld [vmem:[%s9983_s1 + $0x200] sm:$0xff] }
 0x26e   : > { %10621 = vst [vmem:[#allocation164_spill] sm:$0xff] %v7904_v21  ;;  %v2948_v44 = vand.u32 2147483647, %v2788_v53  ;;  %v7913_v32 = vmul.f32 %v2278_v29, %v10626_v5  ;;  %v3262_v61 = vmax.f32 %v3102_v49, 0.0  ;;  %v2933_v8 = vand.u32 2147483647, %v2773_v57 }
 0x26f   : > { %10623 = vst [vmem:[#allocation167_spill] sm:$0xff] %v7907_v45  ;;  %v2793_v34 = vsub.f32 %v7614_v24, %v10581_v11  ;;  %v2123_v43 = vsub.f32 1.0, %v1963_v14  ;;  %v2934_v56 = vand.u32 2147483647, %v2774_v62  ;;  %v2775_v59 = vsub.f32 %v7612_v18, %v10581_v11  ;;  %v5158_v53 = vld [vmem:[%s9983_s1 + $0x208] sm:$0xff]  ;;  %v10634_v45 = vld [vmem:[#allocation31_spill] sm:$0xff] }
 0x270   : > { %10625 = vst [vmem:[#allocation159_spill] sm:$0xff] %v7910_v2  ;;  %v2783_v7 = vsub.f32 %v7618_v1, %v10581_v11  ;;  %v2281_v19 = vmax.f32 %v2121_v17, 0.0  ;;  %v7922_v51 = vmul.f32 %v2282_v41, %v10628_v46  ;;  %v2776_v5 = vsub.f32 %v7612_v18, %v10584_v0  ;;  %v5159_v18 = vld [vmem:[%s9983_s1 + $0x228] sm:$0xff]  ;;  %v10629_v41 = vld [vmem:[#allocation53_spill] sm:$0xff] }
 0x271   : > { %10627 = vst [vmem:[#allocation166_spill] sm:$0xff] %v7913_v32  ;;  %v2794_v58 = vsub.f32 %v7614_v24, %v10584_v0  ;;  %2702 = vperm.xlu1 %5047, %v5157_v12   ;;  %v2284_v29 = vmax.f32 %v2124_v38, 0.0  ;;  %v3107_v49 = vsub.f32 1.0, %v2947_v22  ;;  %v3108_v57 = vsub.f32 1.0, %v2948_v44  ;;  %v10631_v38 = vld [vmem:[#allocation54_spill] sm:$0xff] }
 0x272   : > { %2706 = vperm.xlu2 %5045, %v5158_v53   ;;  %v2784_v14 = vsub.f32 %v7618_v1, %v10584_v0  ;;  %v3093_v24 = vsub.f32 1.0, %v2933_v8  ;;  %v2953_v62 = vand.u32 2147483647, %v2793_v34  ;;  %v7944_v36 = vmul.f32 %v3261_v15, %v10629_v41  ;;  %v10633_v8 = vld [vmem:[#allocation39_spill] sm:$0xff]  ;;  %v10636_v21 = vld [vmem:[#allocation110_spill] sm:$0xff] }
 0x273   : > { %2722 = vperm.xlu0 %5046, %v5159_v18   ;;  %v7939_v9 = vpop.permute.xlu1 %2534  ;;  %v7947_v22 = vmul.f32 %v3262_v61, %v10631_v38  ;;  %v2283_v44 = vmax.f32 %v2123_v43, 0.0  ;;  %v3094_v46 = vsub.f32 1.0, %v2934_v56  ;;  %v2935_v1 = vand.u32 2147483647, %v2775_v59 }
 0x274   : > { %v7941_v17 = vpop.permute.xlu2 %2574  ;;  %10630 = vst [vmem:[#allocation104_spill] sm:$0xff] %v7944_v36  ;;  %v2943_v12 = vand.u32 2147483647, %v2783_v7  ;;  %v2936_v2 = vand.u32 2147483647, %v2776_v5  ;;  %v7952_v34 = vmul.f32 %v2281_v19, %v10633_v8  ;;  %v7955_v32 = vmul.f32 %v2277_v52, %v10634_v45  ;;  %v10638_v8 = vld [vmem:[#allocation169_spill] sm:$0xff] }
 0x275   : > { %10632 = vst [vmem:[#allocation63_spill] sm:$0xff] %v7947_v22  ;;  %v7949_v53 = vpop.permute.xlu0 %2554  ;;  %v2954_v18 = vand.u32 2147483647, %v2794_v58  ;;  %v7958_v15 = vmul.f32 %v2284_v29, %v10636_v21  ;;  %v3267_v41 = vmax.f32 %v3107_v49, 0.0  ;;  %v3268_v61 = vmax.f32 %v3108_v57, 0.0  ;;  %v5160_v57 = vld [vmem:[%s9983_s1 + $0x218] sm:$0xff] }
 0x276   : > { %10635 = vst [vmem:[#allocation64_spill] sm:$0xff] %v7955_v32  ;;  %v2944_v38 = vand.u32 2147483647, %v2784_v14  ;;  %v3253_v43 = vmax.f32 %v3093_v24, 0.0  ;;  %v3113_v56 = vsub.f32 1.0, %v2953_v62  ;;  %v2799_v59 = vsub.f32 %v7658_v42, %v10581_v11  ;;  %v5161_v14 = vld [vmem:[%s9983_s1 + $0x220] sm:$0xff] }
 0x277   : > { %10637 = vst [vmem:[#allocation100_spill] sm:$0xff] %v7958_v15  ;;  %v2789_v7 = vsub.f32 %v7667_v13, %v10581_v11  ;;  %v3254_v5 = vmax.f32 %v3094_v46, 0.0  ;;  %v3095_v19 = vsub.f32 1.0, %v2935_v1  ;;  %v3103_v58 = vsub.f32 1.0, %v2943_v12  ;;  %v10644_v15 = vld [vmem:[#allocation56_spill] sm:$0xff] }
 0x278   : > { %v7965_v45 = vmul.f32 %v2283_v44, %v10638_v8  ;;  %v3096_v52 = vsub.f32 1.0, %v2936_v2  ;;  %v3114_v21 = vsub.f32 1.0, %v2954_v18  ;;  %v2779_v29 = vsub.f32 %v7656_v35, %v10581_v11  ;;  %v10640_v44 = vld [vmem:[#allocation55_spill] sm:$0xff] }
 0x279   : > { %v2780_v49 = vsub.f32 %v7656_v35, %v10584_v0  ;;  %2714 = vperm.xlu1 %5047, %v5160_v57   ;;  %v3104_v24 = vsub.f32 1.0, %v2944_v38  ;;  %v2800_v2 = vsub.f32 %v7658_v42, %v10584_v0  ;;  %v2790_v62 = vsub.f32 %v7667_v13, %v10584_v0  ;;  %v5162_v35 = vld [vmem:[%s9983_s1 + $0x240] sm:$0xff] }
 0x27a   : > { %10639 = vst [vmem:[#allocation165_spill] sm:$0xff] %v7965_v45  ;;  %2718 = vperm.xlu2 %5045, %v5161_v14   ;;  %v7985_v46 = vmul.f32 %v3267_v41, %v10640_v44  ;;  %v3273_v1 = vmax.f32 %v3113_v56, 0.0  ;;  %v2959_v12 = vand.u32 2147483647, %v2799_v59  ;;  %v2949_v18 = vand.u32 2147483647, %v2789_v7 }
 0x27b   : > { %2734 = vperm.xlu0 %5046, %v5162_v35   ;;  %v7987_v8 = vpop.permute.xlu1 %2546  ;;  %v10642_v57 = vld [vmem:[#allocation65_spill] sm:$0xff]  ;;  %v3255_v14 = vmax.f32 %v3095_v19, 0.0  ;;  %v3263_v13 = vmax.f32 %v3103_v58, 0.0  ;;  %v7997_v45 = vmul.f32 %v3268_v61, %v10644_v15  ;;  %v10646_v35 = vld [vmem:[#allocation66_spill] sm:$0xff]  ;;  %v3256_v56 = vmax.f32 %v3096_v52, 0.0 }
 0x27c   : > { %10641 = vst [vmem:[#allocation101_spill] sm:$0xff] %v7985_v46  ;;  %v7989_v38 = vpop.permute.xlu2 %2586  ;;  %v7992_v42 = vmul.f32 %v3253_v43, %v10642_v57  ;;  %v8000_v41 = vmul.f32 %v3254_v5, %v10646_v35  ;;  %v3274_v59 = vmax.f32 %v3114_v21, 0.0  ;;  %v2939_v7 = vand.u32 2147483647, %v2779_v29  ;;  %v10648_v15 = vld [vmem:[#allocation57_spill] sm:$0xff]  ;;  %v10650_v29 = vld [vmem:[#allocation71_spill] sm:$0xff] }
 0x27d   : > { %v7994_v32 = vpop.permute.xlu0 %2566  ;;  %10645 = vst [vmem:[#allocation53_spill] sm:$0xff] %v7997_v45  ;;  %v2940_v44 = vand.u32 2147483647, %v2780_v49  ;;  %v3264_v46 = vmax.f32 %v3104_v24, 0.0  ;;  %v2960_v22 = vand.u32 2147483647, %v2800_v2  ;;  %v2795_v43 = vsub.f32 %v7718_v47, %v10581_v11 }
 0x27e   : > { %10643 = vst [vmem:[#allocation109_spill] sm:$0xff] %v7992_v42  ;;  %v2950_v36 = vand.u32 2147483647, %v2790_v62  ;;  %v3119_v19 = vsub.f32 1.0, %v2959_v12  ;;  %v3109_v58 = vsub.f32 1.0, %v2949_v18  ;;  %v2785_v57 = vsub.f32 %v7710_v60, %v10581_v11  ;;  %v10652_v12 = vld [vmem:[#allocation59_spill] sm:$0xff] }
 0x27f   : > { %10647 = vst [vmem:[#allocation54_spill] sm:$0xff] %v8000_v41  ;;  %v8007_v61 = vmul.f32 %v3273_v1, %v10648_v15  ;;  %v2786_v5 = vsub.f32 %v7710_v60, %v10584_v0  ;;  %v2805_v52 = vsub.f32 %v7712_v28, %v10581_v11  ;;  %v2806_v21 = vsub.f32 %v7712_v28, %v10584_v0  ;;  %v5163_v1 = vld [vmem:[%s9983_s1 + $0x230] sm:$0xff]  ;;  %v5164_v60 = vld [vmem:[%s9983_s1 + $0x238] sm:$0xff]  ;;  %v10716_v41 = vld [vmem:[#allocation6_spill] sm:$0xff] }
 0x280   : > { %v8016_v49 = vmul.f32 %v3263_v13, %v10650_v29  ;;  %v3099_v24 = vsub.f32 1.0, %v2939_v7  ;;  %v3100_v2 = vsub.f32 1.0, %v2940_v44  ;;  %v2796_v62 = vsub.f32 %v7718_v47, %v10584_v0  ;;  %v5165_v47 = vld [vmem:[%s9983_s1 + $0x258] sm:$0xff]  ;;  %v10654_v7 = vld [vmem:[#allocation58_spill] sm:$0xff] }
 0x281   : > { %10649 = vst [vmem:[#allocation39_spill] sm:$0xff] %v8007_v61  ;;  %2726 = vperm.xlu1 %5047, %v5163_v1   ;;  %v8027_v28 = vmul.f32 %v3255_v14, %v10652_v12  ;;  %v3120_v18 = vsub.f32 1.0, %v2960_v22  ;;  %v3110_v13 = vsub.f32 1.0, %v2950_v36  ;;  %v2955_v35 = vand.u32 2147483647, %v2795_v43  ;;  %v10656_v14 = vld [vmem:[#allocation72_spill] sm:$0xff] }
 0x282   : > { %10651 = vst [vmem:[#allocation31_spill] sm:$0xff] %v8016_v49  ;;  %2730 = vperm.xlu2 %5045, %v5164_v60   ;;  %v8033_v44 = vmul.f32 %v3274_v59, %v10654_v7  ;;  %v3279_v15 = vmax.f32 %v3119_v19, 0.0  ;;  %v3269_v29 = vmax.f32 %v3109_v58, 0.0  ;;  %v2945_v1 = vand.u32 2147483647, %v2785_v57  ;;  %v10658_v49 = vld [vmem:[#allocation60_spill] sm:$0xff] }
 0x283   : > { %10653 = vst [vmem:[#allocation110_spill] sm:$0xff] %v8027_v28  ;;  %2746 = vperm.xlu0 %5046, %v5165_v47   ;;  %v8035_v45 = vpop.permute.xlu1 %2558  ;;  %v8040_v12 = vmul.f32 %v3264_v46, %v10656_v14  ;;  %v2946_v36 = vand.u32 2147483647, %v2786_v5  ;;  %v2965_v22 = vand.u32 2147483647, %v2805_v52  ;;  %v8045_v47 = vmul.f32 %v3256_v56, %v10658_v49  ;;  %v10660_v56 = vld [vmem:[#allocation61_spill] sm:$0xff] }
 0x284   : > { %10655 = vst [vmem:[#allocation169_spill] sm:$0xff] %v8033_v44  ;;  %v8037_v60 = vpop.permute.xlu2 %2598  ;;  %v2966_v43 = vand.u32 2147483647, %v2806_v21  ;;  %v3259_v59 = vmax.f32 %v3099_v24, 0.0  ;;  %v3260_v7 = vmax.f32 %v3100_v2, 0.0  ;;  %v2801_v58 = vsub.f32 %v7764_v4, %v10581_v11  ;;  %v10662_v49 = vld [vmem:[#allocation77_spill] sm:$0xff] }
 0x285   : > { %10657 = vst [vmem:[#allocation55_spill] sm:$0xff] %v8040_v12  ;;  %v8042_v28 = vpop.permute.xlu0 %2578  ;;  %v2956_v19 = vand.u32 2147483647, %v2796_v62  ;;  %v3280_v57 = vmax.f32 %v3120_v18, 0.0  ;;  %v3270_v44 = vmax.f32 %v3110_v13, 0.0  ;;  %v3115_v61 = vsub.f32 1.0, %v2955_v35 }
 0x286   : > { %10659 = vst [vmem:[#allocation65_spill] sm:$0xff] %v8045_v47  ;;  %v2791_v46 = vsub.f32 %v7755_v55, %v10581_v11  ;;  %v2792_v5 = vsub.f32 %v7755_v55, %v10584_v0  ;;  %v2811_v52 = vsub.f32 %v7757_v40, %v10581_v11  ;;  %v8056_v21 = vmul.f32 %v3279_v15, %v10660_v56  ;;  %v5166_v15 = vld [vmem:[%s9983_s1 + $0x248] sm:$0xff] }
 0x287   : > { %v8059_v24 = vmul.f32 %v3269_v29, %v10662_v49  ;;  %v3105_v2 = vsub.f32 1.0, %v2945_v1  ;;  %v3106_v62 = vsub.f32 1.0, %v2946_v36  ;;  %v3125_v18 = vsub.f32 1.0, %v2965_v22  ;;  %v5167_v29 = vld [vmem:[%s9983_s1 + $0x250] sm:$0xff] }
 0x288   : > { %10661 = vst [vmem:[#allocation56_spill] sm:$0xff] %v8056_v21  ;;  %v3126_v13 = vsub.f32 1.0, %v2966_v43  ;;  %v3116_v35 = vsub.f32 1.0, %v2956_v19  ;;  %v2812_v14 = vsub.f32 %v7757_v40, %v10584_v0  ;;  %v2802_v55 = vsub.f32 %v7764_v4, %v10584_v0  ;;  %v5168_v40 = vld [vmem:[%s9983_s1 + $0x270] sm:$0xff]  ;;  %v10666_v43 = vld [vmem:[#allocation62_spill] sm:$0xff] }
 0x289   : > { %10663 = vst [vmem:[#allocation66_spill] sm:$0xff] %v8059_v24  ;;  %v2961_v47 = vand.u32 2147483647, %v2801_v58  ;;  %2738 = vperm.xlu1 %5047, %v5166_v15   ;;  %v3275_v1 = vmax.f32 %v3115_v61, 0.0  ;;  %v2951_v36 = vand.u32 2147483647, %v2791_v46  ;;  %v8078_v19 = vmul.f32 %v3280_v57, %v10666_v43 }
 0x28a   : > { %2742 = vperm.xlu2 %5045, %v5167_v29   ;;  %v10664_v22 = vld [vmem:[#allocation51_spill] sm:$0xff]  ;;  %v2952_v58 = vand.u32 2147483647, %v2792_v5  ;;  %v2971_v56 = vand.u32 2147483647, %v2811_v52  ;;  %v10668_v29 = vld [vmem:[#allocation78_spill] sm:$0xff] }
 0x28b   : > { %2758 = vperm.xlu0 %5046, %v5168_v40   ;;  %v8075_v4 = vmul.f32 %v3259_v59, %v10664_v22  ;;  %10667 = vst [vmem:[#allocation71_spill] sm:$0xff] %v8078_v19  ;;  %v8080_v49 = vpop.permute.xlu1 %2570  ;;  %v8085_v61 = vmul.f32 %v3270_v44, %v10668_v29  ;;  %v10670_v46 = vld [vmem:[#allocation52_spill] sm:$0xff]  ;;  %v3265_v24 = vmax.f32 %v3105_v2, 0.0  ;;  %v3266_v40 = vmax.f32 %v3106_v62, 0.0  ;;  %v10672_v29 = vld [vmem:[#allocation83_spill] sm:$0xff] }
 0x28c   : > { %v8082_v15 = vpop.permute.xlu2 %2610  ;;  %v8088_v12 = vmul.f32 %v3260_v7, %v10670_v46  ;;  %v3285_v21 = vmax.f32 %v3125_v18, 0.0  ;;  %v3286_v59 = vmax.f32 %v3126_v13, 0.0  ;;  %v3276_v57 = vmax.f32 %v3116_v35, 0.0 }
 0x28d   : > { %10665 = vst [vmem:[#allocation57_spill] sm:$0xff] %v8075_v4  ;;  %v8090_v22 = vpop.permute.xlu0 %2590  ;;  %v2972_v43 = vand.u32 2147483647, %v2812_v14  ;;  %v2962_v5 = vand.u32 2147483647, %v2802_v55  ;;  %v3121_v52 = vsub.f32 1.0, %v2961_v47  ;;  %v2797_v19 = vsub.f32 %v7803_v26, %v10581_v11 }
 0x28e   : > { %10669 = vst [vmem:[#allocation59_spill] sm:$0xff] %v8085_v61  ;;  %v3111_v4 = vsub.f32 1.0, %v2951_v36  ;;  %v2817_v44 = vsub.f32 %v7805_v31, %v10581_v11  ;;  %v8097_v7 = vmul.f32 %v3275_v1, %v10672_v29  ;;  %v3112_v2 = vsub.f32 1.0, %v2952_v58  ;;  %v10674_v14 = vld [vmem:[#allocation69_spill] sm:$0xff] }
 0x28f   : > { %10671 = vst [vmem:[#allocation58_spill] sm:$0xff] %v8088_v12  ;;  %v3131_v62 = vsub.f32 1.0, %v2971_v56  ;;  %v2798_v18 = vsub.f32 %v7803_v26, %v10584_v0  ;;  %v2818_v13 = vsub.f32 %v7805_v31, %v10584_v0  ;;  %v2807_v47 = vsub.f32 %v7811_v27, %v10581_v11  ;;  %v5169_v58 = vld [vmem:[%s9983_s1 + $0x260] sm:$0xff]  ;;  %v5170_v26 = vld [vmem:[%s9983_s1 + $0x268] sm:$0xff]  ;;  %v10676_v31 = vld [vmem:[#allocation67_spill] sm:$0xff] }
 0x290   : > { %10673 = vst [vmem:[#allocation72_spill] sm:$0xff] %v8097_v7  ;;  %v2808_v35 = vsub.f32 %v7811_v27, %v10584_v0  ;;  %v8108_v55 = vmul.f32 %v3265_v24, %v10674_v14  ;;  %v3132_v36 = vsub.f32 1.0, %v2972_v43  ;;  %v3122_v1 = vsub.f32 1.0, %v2962_v5  ;;  %v10678_v43 = vld [vmem:[#allocation84_spill] sm:$0xff] }
 0x291   : > { %v3281_v46 = vmax.f32 %v3121_v52, 0.0  ;;  %2750 = vperm.xlu1 %5047, %v5169_v58   ;;  %v8117_v56 = vmul.f32 %v3285_v21, %v10676_v31  ;;  %v2957_v27 = vand.u32 2147483647, %v2797_v19  ;;  %v2977_v29 = vand.u32 2147483647, %v2817_v44  ;;  %v10680_v52 = vld [vmem:[#allocation70_spill] sm:$0xff] }
 0x292   : > { %10675 = vst [vmem:[#allocation60_spill] sm:$0xff] %v8108_v55  ;;  %2754 = vperm.xlu2 %5045, %v5170_v26   ;;  %v10049_v24 = vmov 3   ;;  %v8121_v5 = vmul.f32 %v3276_v57, %v10678_v43  ;;  %v8124_v14 = vmul.f32 %v3266_v40, %v10680_v52  ;;  %v3271_v58 = vmax.f32 %v3111_v4, 0.0  ;;  %v5171_v21 = vld [vmem:[%s9983_s1 + $0x8] sm:$0xff]  ;;  %v10682_v40 = vld [vmem:[#allocation68_spill] sm:$0xff] }
 0x293   : > { %10677 = vst [vmem:[#allocation61_spill] sm:$0xff] %v8117_v56  ;;  %5049 = vset.pattern.permute.xlu0 %v10049_v24  ;;  %v3272_v12 = vmax.f32 %v3112_v2, 0.0  ;;  %v3291_v61 = vmax.f32 %v3131_v62, 0.0  ;;  %v2958_v55 = vand.u32 2147483647, %v2798_v18  ;;  %v8129_v19 = vpop.permute.xlu1 %2582  ;;  %v8136_v52 = vmul.f32 %v3286_v59, %v10682_v40  ;;  %v10684_v18 = vld [vmem:[#allocation16_spill] sm:$0xff] }
 0x294   : > { %10679 = vst [vmem:[#allocation77_spill] sm:$0xff] %v8121_v5  ;;  %3576 = vperm.xlu0 %5049, %v5171_v21   ;;  %v8131_v44 = vpop.permute.xlu2 %2622  ;;  %v2978_v26 = vand.u32 2147483647, %v2818_v13  ;;  %v2967_v31 = vand.u32 2147483647, %v2807_v47  ;;  %v3292_v4 = vmax.f32 %v3132_v36, 0.0  ;;  %v2823_v62 = vsub.f32 %v7852_v63, %v10581_v11 }
 0x295   : > { %10681 = vst [vmem:[#allocation51_spill] sm:$0xff] %v8124_v14  ;;  %v2968_v57 = vand.u32 2147483647, %v2808_v35  ;;  %v8133_v43 = vpop.permute.xlu0 %2602  ;;  %v3282_v2 = vmax.f32 %v3122_v1, 0.0  ;;  %v8141_v24 = vmul.f32 %v3281_v46, %v10684_v18  ;;  %v3117_v21 = vsub.f32 1.0, %v2957_v27  ;;  %v10686_v1 = vld [vmem:[#allocation75_spill] sm:$0xff] }
 0x296   : > { %10683 = vst [vmem:[#allocation62_spill] sm:$0xff] %v8136_v52  ;;  %v3137_v14 = vsub.f32 1.0, %v2977_v29  ;;  %v2803_v13 = vsub.f32 %v7850_v3, %v10581_v11  ;;  %v2813_v47 = vsub.f32 %v7854_v6, %v10581_v11  ;;  %v3118_v35 = vsub.f32 1.0, %v2958_v55  ;;  %v10688_v29 = vld [vmem:[#allocation73_spill] sm:$0xff] }
 0x297   : > { %10685 = vst [vmem:[#allocation78_spill] sm:$0xff] %v8141_v24  ;;  %v2804_v59 = vsub.f32 %v7850_v3, %v10584_v0  ;;  %v2824_v36 = vsub.f32 %v7852_v63, %v10584_v0  ;;  %v8152_v40 = vmul.f32 %v3271_v58, %v10686_v1  ;;  %v3138_v46 = vsub.f32 1.0, %v2978_v26  ;;  %v5172_v3 = vld [vmem:[%s9983_s1 + $0x278] sm:$0xff]  ;;  %v10691_v63 = vld [vmem:[#allocation17_spill] sm:$0xff] }
 0x298   : > { %v3127_v18 = vsub.f32 1.0, %v2967_v31  ;;  %v3128_v27 = vsub.f32 1.0, %v2968_v57  ;;  %v8155_v7 = vmul.f32 %v3291_v61, %v10688_v29  ;;  %v2983_v52 = vand.u32 2147483647, %v2823_v62  ;;  %v10693_v26 = vld [vmem:[#allocation76_spill] sm:$0xff] }
 0x299   : > { %10687 = vst [vmem:[#allocation52_spill] sm:$0xff] %v8152_v40  ;;  %v2814_v56 = vsub.f32 %v7854_v6, %v10584_v0  ;;  %2762 = vperm.xlu1 %5047, %v5172_v3   ;;  %v10690_v55 = vmov 3   ;;  %v8164_v58 = vmul.f32 %v3282_v2, %v10691_v63  ;;  %v8167_v31 = vmul.f32 %v3272_v12, %v10693_v26  ;;  %v5173_v6 = vld [vmem:[%s9983_s1] sm:$0xff]  ;;  %v5174_v2 = vld [vmem:[%s9983_s1 + $0x30] sm:$0xff] }
 0x29a   : > { %10689 = vst [vmem:[#allocation83_spill] sm:$0xff] %v8155_v7  ;;  %5048 = vset.pattern.permute.xlu2 %v10690_v55  ;;  %v3277_v57 = vmax.f32 %v3117_v21, 0.0  ;;  %v3297_v61 = vmax.f32 %v3137_v14, 0.0  ;;  %v2963_v1 = vand.u32 2147483647, %v2803_v13  ;;  %v3278_v29 = vmax.f32 %v3118_v35, 0.0 }
 0x29b   : > { %10692 = vst [vmem:[#allocation69_spill] sm:$0xff] %v8164_v58  ;;  %v2973_v62 = vand.u32 2147483647, %v2813_v47  ;;  %3572 = vperm.xlu2 %5048, %v5173_v6   ;;  %v2964_v40 = vand.u32 2147483647, %v2804_v59  ;;  %v8175_v63 = vpop.permute.xlu1 %2594  ;;  %v10695_v14 = vld [vmem:[#allocation74_spill] sm:$0xff]  ;;  %v2829_v35 = vsub.f32 %v7894_v54, %v10581_v11  ;;  %v2820_v5 = vsub.f32 %v7901_v25, %v10584_v0 }
 0x29c   : > { %10694 = vst [vmem:[#allocation67_spill] sm:$0xff] %v8167_v31  ;;  %v2984_v3 = vand.u32 2147483647, %v2824_v36  ;;  %3596 = vperm.xlu0 %5049, %v5174_v2   ;;  %v8177_v12 = vpop.permute.xlu2 %2634  ;;  %v8180_v21 = vmul.f32 %v3292_v4, %v10695_v14  ;;  %v3298_v13 = vmax.f32 %v3138_v46, 0.0  ;;  %v3287_v47 = vmax.f32 %v3127_v18, 0.0  ;;  %v10697_v4 = vld [vmem:[#allocation81_spill] sm:$0xff] }
 0x29d   : > { %v3288_v26 = vmax.f32 %v3128_v27, 0.0  ;;  %v8184_v59 = vpop.permute.xlu0 %2614  ;;  %v3143_v36 = vsub.f32 1.0, %v2983_v52  ;;  %v2974_v6 = vand.u32 2147483647, %v2814_v56  ;;  %v2809_v2 = vsub.f32 %v7892_v39, %v10581_v11  ;;  %v10699_v46 = vld [vmem:[#allocation79_spill] sm:$0xff] }
 0x29e   : > { %10696 = vst [vmem:[#allocation84_spill] sm:$0xff] %v8180_v21  ;;  %v2819_v31 = vsub.f32 %v7901_v25, %v10581_v11  ;;  %v3123_v7 = vsub.f32 1.0, %v2963_v1  ;;  %v3133_v58 = vsub.f32 1.0, %v2973_v62  ;;  %v8191_v14 = vmul.f32 %v3277_v57, %v10697_v4  ;;  %v10701_v1 = vld [vmem:[#allocation8_spill] sm:$0xff]  ;;  %v10703_v57 = vld [vmem:[#allocation82_spill] sm:$0xff] }
 0x29f   : > { %v8194_v18 = vmul.f32 %v3297_v61, %v10699_v46  ;;  %v3124_v27 = vsub.f32 1.0, %v2964_v40  ;;  %v3144_v21 = vsub.f32 1.0, %v2984_v3  ;;  %v2810_v52 = vsub.f32 %v7892_v39, %v10584_v0  ;;  %v5176_v25 = vld [vmem:[%s9983_s1 + $0x18] sm:$0xff] }
 0x2a0   : > { %10698 = vst [vmem:[#allocation70_spill] sm:$0xff] %v8191_v14  ;;  %v2830_v56 = vsub.f32 %v7894_v54, %v10584_v0  ;;  %v2989_v24 = vand.u32 2147483647, %v2829_v35  ;;  %v8203_v62 = vmul.f32 %v3287_v47, %v10701_v1  ;;  %v8206_v4 = vmul.f32 %v3278_v29, %v10703_v57  ;;  %v5175_v54 = vld [vmem:[%s9983_s1 + $0x10] sm:$0xff]  ;;  %v10705_v29 = vld [vmem:[#allocation80_spill] sm:$0xff] }
 0x2a1   : > { %10700 = vst [vmem:[#allocation68_spill] sm:$0xff] %v8194_v18  ;;  %v3303_v61 = vmax.f32 %v3143_v36, 0.0  ;;  %v3134_v46 = vsub.f32 1.0, %v2974_v6  ;;  %v2969_v40 = vand.u32 2147483647, %v2809_v2  ;;  %5050 = vset.pattern.permute.xlu1 %v10690_v55  ;;  %v3283_v39 = vmax.f32 %v3123_v7, 0.0 }
 0x2a2   : > { %10702 = vst [vmem:[#allocation16_spill] sm:$0xff] %v8203_v62  ;;  %v2979_v3 = vand.u32 2147483647, %v2819_v31  ;;  %v3293_v18 = vmax.f32 %v3133_v58, 0.0  ;;  %3580 = vperm.xlu1 %5050, %v5175_v54   ;;  %v8216_v47 = vmul.f32 %v3298_v13, %v10705_v29  ;;  %v10707_v35 = vld [vmem:[#allocation7_spill] sm:$0xff]  ;;  %v3284_v31 = vmax.f32 %v3124_v27, 0.0 }
 0x2a3   : > { %10704 = vst [vmem:[#allocation75_spill] sm:$0xff] %v8206_v4  ;;  %3584 = vperm.xlu2 %5048, %v5176_v25   ;;  %v8219_v36 = vmul.f32 %v3288_v26, %v10707_v35  ;;  %v3304_v55 = vmax.f32 %v3144_v21, 0.0  ;;  %v2970_v7 = vand.u32 2147483647, %v2810_v52  ;;  %v2990_v58 = vand.u32 2147483647, %v2830_v56  ;;  %v8224_v2 = vpop.permute.xlu1 %2606 }
 0x2a4   : > { %10706 = vst [vmem:[#allocation73_spill] sm:$0xff] %v8216_v47  ;;  %v5177_v6 = vld [vmem:[%s9983_s1 + $0x48] sm:$0xff]  ;;  %v8226_v1 = vpop.permute.xlu2 %2646  ;;  %v3149_v57 = vsub.f32 1.0, %v2989_v24  ;;  %v2980_v54 = vand.u32 2147483647, %v2820_v5  ;;  %v2815_v13 = vsub.f32 %v7939_v9, %v10581_v11  ;;  %v2825_v26 = vsub.f32 %v7949_v53, %v10581_v11  ;;  %v10710_v25 = vld [vmem:[#allocation85_spill] sm:$0xff] }
 0x2a5   : > { %10708 = vst [vmem:[#allocation17_spill] sm:$0xff] %v8219_v36  ;;  %3608 = vperm.xlu0 %5049, %v5177_v6   ;;  %v8232_v21 = vpop.permute.xlu0 %2626  ;;  %v3294_v27 = vmax.f32 %v3134_v46, 0.0  ;;  %v3129_v52 = vsub.f32 1.0, %v2969_v40  ;;  %v3139_v56 = vsub.f32 1.0, %v2979_v3  ;;  %v8235_v29 = vmul.f32 %v3303_v61, %v10710_v25  ;;  %v10712_v6 = vld [vmem:[#allocation23_spill] sm:$0xff]  ;;  %v10714_v40 = vld [vmem:[#allocation5_spill] sm:$0xff] }
 0x2a6   : > { %10709 = vst [vmem:[#allocation76_spill] sm:$0xff] %v8226_v1  ;;  %v2816_v35 = vsub.f32 %v7939_v9, %v10584_v0  ;;  %v2835_v24 = vsub.f32 %v7941_v17, %v10581_v11  ;;  %v2836_v5 = vsub.f32 %v7941_v17, %v10584_v0  ;;  %v8244_v4 = vmul.f32 %v3293_v18, %v10712_v6  ;;  %v10718_v17 = vld [vmem:[#allocation11_spill] sm:$0xff] }
 0x2a7   : > { %10711 = vst [vmem:[#allocation74_spill] sm:$0xff] %v8235_v29  ;;  %v3130_v47 = vsub.f32 1.0, %v2970_v7  ;;  %v3150_v14 = vsub.f32 1.0, %v2990_v58  ;;  %v2826_v46 = vsub.f32 %v7949_v53, %v10584_v0  ;;  %v8249_v61 = vmul.f32 %v3283_v39, %v10714_v40  ;;  %v5178_v53 = vld [vmem:[%s9983_s1 + $0x20] sm:$0xff]  ;;  %v5179_v39 = vld [vmem:[%s9983_s1 + $0x28] sm:$0xff] }
 0x2a8   : > { %10713 = vst [vmem:[#allocation81_spill] sm:$0xff] %v8244_v4  ;;  %v3309_v3 = vmax.f32 %v3149_v57, 0.0  ;;  %v3140_v25 = vsub.f32 1.0, %v2980_v54  ;;  %v2975_v9 = vand.u32 2147483647, %v2815_v13  ;;  %v3289_v36 = vmax.f32 %v3129_v52, 0.0 }
 0x2a9   : > { %10715 = vst [vmem:[#allocation79_spill] sm:$0xff] %v8249_v61  ;;  %v2985_v29 = vand.u32 2147483647, %v2825_v26  ;;  %v3299_v62 = vmax.f32 %v3139_v56, 0.0  ;;  %v8252_v42 = vmul.f32 %v3304_v55, %v10716_v41  ;;  %v8255_v18 = vmul.f32 %v3294_v27, %v10718_v17  ;;  %v10720_v57 = vld [vmem:[#allocation9_spill] sm:$0xff]  ;;  %v10730_v61 = vld [vmem:[#allocation18_spill] sm:$0xff] }
 0x2aa   : > { %v2976_v7 = vand.u32 2147483647, %v2816_v35  ;;  %v2995_v58 = vand.u32 2147483647, %v2835_v24  ;;  %v2996_v6 = vand.u32 2147483647, %v2836_v5  ;;  %3588 = vperm.xlu1 %5050, %v5178_v53   ;;  %v8264_v54 = vmul.f32 %v3284_v31, %v10720_v57 }
 0x2ab   : > { %10717 = vst [vmem:[#allocation8_spill] sm:$0xff] %v8252_v42  ;;  %3592 = vperm.xlu2 %5048, %v5179_v39   ;;  %v3290_v41 = vmax.f32 %v3130_v47, 0.0  ;;  %v3310_v55 = vmax.f32 %v3150_v14, 0.0  ;;  %v2986_v13 = vand.u32 2147483647, %v2826_v46  ;;  %v2831_v26 = vsub.f32 %v7994_v32, %v10581_v11  ;;  %v5180_v27 = vld [vmem:[%s9983_s1 + $0x60] sm:$0xff]  ;;  %v8271_v52 = vpop.permute.xlu1 %2618 }
 0x2ac   : > { %10719 = vst [vmem:[#allocation82_spill] sm:$0xff] %v8255_v18  ;;  %v8273_v56 = vpop.permute.xlu2 %2658  ;;  %v3300_v35 = vmax.f32 %v3140_v25, 0.0  ;;  %v3135_v24 = vsub.f32 1.0, %v2975_v9  ;;  %v3145_v5 = vsub.f32 1.0, %v2985_v29  ;;  %v10724_v47 = vld [vmem:[#allocation86_spill] sm:$0xff]  ;;  %v2821_v46 = vsub.f32 %v7987_v8, %v10581_v11 }
 0x2ad   : > { %10721 = vst [vmem:[#allocation80_spill] sm:$0xff] %v8264_v54  ;;  %3620 = vperm.xlu0 %5049, %v5180_v27   ;;  %v8275_v31 = vpop.permute.xlu0 %2638  ;;  %v8278_v14 = vmul.f32 %v3309_v3, %v10724_v47  ;;  %v2822_v40 = vsub.f32 %v7987_v8, %v10584_v0  ;;  %v2841_v17 = vsub.f32 %v7989_v38, %v10581_v11  ;;  %v10726_v53 = vld [vmem:[#allocation26_spill] sm:$0xff]  ;;  %v3136_v25 = vsub.f32 1.0, %v2976_v7 }
 0x2ae   : > { %10722 = vst [vmem:[#allocation7_spill] sm:$0xff] %v8273_v56  ;;  %v8287_v39 = vmul.f32 %v3299_v62, %v10726_v53  ;;  %v3155_v9 = vsub.f32 1.0, %v2995_v58  ;;  %v3156_v29 = vsub.f32 1.0, %v2996_v6  ;;  %v2842_v57 = vsub.f32 %v7989_v38, %v10584_v0  ;;  %v10732_v62 = vld [vmem:[#allocation88_spill] sm:$0xff]  ;;  %v10733_v38 = vld [vmem:[#allocation19_spill] sm:$0xff] }
 0x2af   : > { %10723 = vst [vmem:[#allocation85_spill] sm:$0xff] %v8275_v31  ;;  %v3146_v3 = vsub.f32 1.0, %v2986_v13  ;;  %v2832_v27 = vsub.f32 %v7994_v32, %v10584_v0  ;;  %v2991_v47 = vand.u32 2147483647, %v2831_v26  ;;  %v3295_v8 = vmax.f32 %v3135_v24, 0.0 }
 0x2b0   : > { %10725 = vst [vmem:[#allocation23_spill] sm:$0xff] %v8278_v14  ;;  %v10728_v14 = vld [vmem:[#allocation87_spill] sm:$0xff]  ;;  %v3305_v42 = vmax.f32 %v3145_v5, 0.0  ;;  %v8297_v18 = vmul.f32 %v3310_v55, %v10730_v61  ;;  %v8300_v7 = vmul.f32 %v3300_v35, %v10732_v62  ;;  %v2981_v58 = vand.u32 2147483647, %v2821_v46  ;;  %v5182_v61 = vld [vmem:[%s9983_s1 + $0x40] sm:$0xff] }
 0x2b1   : > { %10727 = vst [vmem:[#allocation5_spill] sm:$0xff] %v8287_v39  ;;  %v8294_v54 = vmul.f32 %v3289_v36, %v10728_v14  ;;  %v2982_v6 = vand.u32 2147483647, %v2822_v40  ;;  %v3001_v53 = vand.u32 2147483647, %v2841_v17  ;;  %v8303_v13 = vmul.f32 %v3290_v41, %v10733_v38  ;;  %v5181_v36 = vld [vmem:[%s9983_s1 + $0x38] sm:$0xff] }
 0x2b2   : > { %10731 = vst [vmem:[#allocation11_spill] sm:$0xff] %v8297_v18  ;;  %v3296_v39 = vmax.f32 %v3136_v25, 0.0  ;;  %v3315_v32 = vmax.f32 %v3155_v9, 0.0  ;;  %v3316_v26 = vmax.f32 %v3156_v29, 0.0  ;;  %v3002_v4 = vand.u32 2147483647, %v2842_v57  ;;  %3600 = vperm.xlu1 %5050, %v5181_v36  }
 0x2b3   : > { %10729 = vst [vmem:[#allocation6_spill] sm:$0xff] %v8294_v54  ;;  %3604 = vperm.xlu2 %5048, %v5182_v61   ;;  %v3306_v55 = vmax.f32 %v3146_v3, 0.0  ;;  %v2992_v35 = vand.u32 2147483647, %v2832_v27  ;;  %v3151_v24 = vsub.f32 1.0, %v2991_v47  ;;  %v2827_v41 = vsub.f32 %v8035_v45, %v10581_v11  ;;  %v5183_v5 = vld [vmem:[%s9983_s1 + $0x78] sm:$0xff]  ;;  %v8316_v14 = vpop.permute.xlu1 %2630 }
 0x2b4   : > { %10734 = vst [vmem:[#allocation9_spill] sm:$0xff] %v8303_v13  ;;  %v8318_v46 = vpop.permute.xlu2 %2670  ;;  %v2828_v40 = vsub.f32 %v8035_v45, %v10584_v0  ;;  %v2847_v17 = vsub.f32 %v8037_v60, %v10581_v11  ;;  %v2848_v25 = vsub.f32 %v8037_v60, %v10584_v0  ;;  %v10736_v29 = vld [vmem:[#allocation90_spill] sm:$0xff]  ;;  %v3141_v3 = vsub.f32 1.0, %v2981_v58  ;;  %v10738_v62 = vld [vmem:[#allocation21_spill] sm:$0xff]  ;;  %v10745_v18 = vld [vmem:[#allocation20_spill] sm:$0xff] }
 0x2b5   : > { %3632 = vperm.xlu0 %5049, %v5183_v5   ;;  %v8326_v9 = vpop.permute.xlu0 %2650  ;;  %v8329_v57 = vmul.f32 %v3305_v42, %v10736_v29  ;;  %v3142_v27 = vsub.f32 1.0, %v2982_v6  ;;  %v3161_v47 = vsub.f32 1.0, %v3001_v53  ;;  %v8332_v38 = vmul.f32 %v3295_v8, %v10738_v62  ;;  %v10740_v5 = vld [vmem:[#allocation12_spill] sm:$0xff]  ;;  %v10743_v29 = vld [vmem:[#allocation22_spill] sm:$0xff] }
 0x2b6   : > { %10735 = vst [vmem:[#allocation86_spill] sm:$0xff] %v8326_v9  ;;  %v3162_v36 = vsub.f32 1.0, %v3002_v4  ;;  %v2837_v45 = vsub.f32 %v8042_v28, %v10581_v11  ;;  %v2838_v61 = vsub.f32 %v8042_v28, %v10584_v0  ;;  %v8339_v60 = vmul.f32 %v3315_v32, %v10740_v5 }
 0x2b7   : > { %10737 = vst [vmem:[#allocation26_spill] sm:$0xff] %v8329_v57  ;;  %v3152_v54 = vsub.f32 1.0, %v2992_v35  ;;  %v3311_v13 = vmax.f32 %v3151_v24, 0.0  ;;  %v2987_v42 = vand.u32 2147483647, %v2827_v41  ;;  %v8342_v58 = vmul.f32 %v3306_v55, %v7246_v16  ;;  %v5184_v16 = vld [vmem:[%s9983_s1 + $0x50] sm:$0xff] }
 0x2b8   : > { %10739 = vst [vmem:[#allocation87_spill] sm:$0xff] %v8332_v38  ;;  %v2988_v6 = vand.u32 2147483647, %v2828_v40  ;;  %v3007_v53 = vand.u32 2147483647, %v2847_v17  ;;  %v8345_v4 = vmul.f32 %v3296_v39, %v10743_v29  ;;  %v3301_v62 = vmax.f32 %v3141_v3, 0.0 }
 0x2b9   : > { %10741 = vst [vmem:[#allocation18_spill] sm:$0xff] %v8339_v60  ;;  %v3008_v8 = vand.u32 2147483647, %v2848_v25  ;;  %v3302_v38 = vmax.f32 %v3142_v27, 0.0  ;;  %v3321_v57 = vmax.f32 %v3161_v47, 0.0  ;;  %v8348_v28 = vmul.f32 %v3316_v26, %v10745_v18  ;;  %v5185_v39 = vld [vmem:[%s9983_s1 + $0x58] sm:$0xff] }
 0x2ba   : > { %10742 = vst [vmem:[#allocation88_spill] sm:$0xff] %v8342_v58  ;;  %v3322_v32 = vmax.f32 %v3162_v36, 0.0  ;;  %v2997_v5 = vand.u32 2147483647, %v2837_v45  ;;  %v2998_v35 = vand.u32 2147483647, %v2838_v61  ;;  %v2833_v24 = vsub.f32 %v8080_v49, %v10581_v11  ;;  %3612 = vperm.xlu1 %5050, %v5184_v16  }
 0x2bb   : > { %10744 = vst [vmem:[#allocation19_spill] sm:$0xff] %v8345_v4  ;;  %3616 = vperm.xlu2 %5048, %v5185_v39   ;;  %v3312_v55 = vmax.f32 %v3152_v54, 0.0  ;;  %v3147_v41 = vsub.f32 1.0, %v2987_v42  ;;  %v2853_v18 = vsub.f32 %v8082_v15, %v10581_v11  ;;  %v2843_v26 = vsub.f32 %v8090_v22, %v10581_v11  ;;  %v5186_v40 = vld [vmem:[%s9983_s1 + $0x90] sm:$0xff]  ;;  %v8365_v17 = vpop.permute.xlu1 %2642  ;;  %v10748_v36 = vld [vmem:[#allocation14_spill] sm:$0xff]  ;;  %v10750_v16 = vld [vmem:[#allocation24_spill] sm:$0xff] }
 0x2bc   : > { %10746 = vst [vmem:[#allocation90_spill] sm:$0xff] %v8348_v28  ;;  %v8367_v25 = vpop.permute.xlu2 %2682  ;;  %v3148_v3 = vsub.f32 1.0, %v2988_v6  ;;  %v3167_v27 = vsub.f32 1.0, %v3007_v53  ;;  %v3168_v47 = vsub.f32 1.0, %v3008_v8  ;;  %v8372_v45 = vmul.f32 %v3311_v13, %v10748_v36  ;;  %v10753_v58 = vld [vmem:[#allocation28_spill] sm:$0xff] }
 0x2bd   : > { %3644 = vperm.xlu0 %5049, %v5186_v40   ;;  %10747 = vst [vmem:[#allocation21_spill] sm:$0xff] %v8365_v17  ;;  %v8369_v54 = vpop.permute.xlu0 %2662  ;;  %v2834_v61 = vsub.f32 %v8080_v49, %v10584_v0  ;;  %v2854_v42 = vsub.f32 %v8082_v15, %v10584_v0  ;;  %v2844_v29 = vsub.f32 %v8090_v22, %v10584_v0  ;;  %v3157_v6 = vsub.f32 1.0, %v2997_v5  ;;  %v10752_v40 = vld [vmem:[#allocation10_spill] sm:$0xff] }
 0x2be   : > { %10749 = vst [vmem:[#allocation12_spill] sm:$0xff] %v8372_v45  ;;  %v8381_v39 = vmul.f32 %v3301_v62, %v10750_v16  ;;  %v3158_v53 = vsub.f32 1.0, %v2998_v35  ;;  %v2993_v8 = vand.u32 2147483647, %v2833_v24  ;;  %v8384_v28 = vmul.f32 %v3321_v57, %v10752_v40  ;;  %v10754_v35 = vld [vmem:[#allocation25_spill] sm:$0xff] }
 0x2bf   : > { %v3307_v13 = vmax.f32 %v3147_v41, 0.0  ;;  %v3013_v36 = vand.u32 2147483647, %v2853_v18  ;;  %v3003_v45 = vand.u32 2147483647, %v2843_v26  ;;  %v8387_v49 = vmul.f32 %v3312_v55, %v7291_v50  ;;  %v5187_v50 = vld [vmem:[%s9983_s1 + $0x68] sm:$0xff] }
 0x2c0   : > { %10751 = vst [vmem:[#allocation22_spill] sm:$0xff] %v8381_v39  ;;  %v3308_v4 = vmax.f32 %v3148_v3, 0.0  ;;  %v3327_v15 = vmax.f32 %v3167_v27, 0.0  ;;  %v3328_v60 = vmax.f32 %v3168_v47, 0.0  ;;  %v8390_v22 = vmul.f32 %v3302_v38, %v10753_v58  ;;  %v5188_v38 = vld [vmem:[%s9983_s1 + $0x70] sm:$0xff]  ;;  %v5189_v26 = vld [vmem:[%s9983_s1 + $0xa8] sm:$0xff] }
 0x2c1   : > { %v2994_v62 = vand.u32 2147483647, %v2834_v61  ;;  %v3014_v16 = vand.u32 2147483647, %v2854_v42  ;;  %v3004_v5 = vand.u32 2147483647, %v2844_v29  ;;  %v8393_v24 = vmul.f32 %v3322_v32, %v10754_v35 }
 0x2c2   : > { %v3317_v57 = vmax.f32 %v3157_v6, 0.0  ;;  %v3318_v40 = vmax.f32 %v3158_v53, 0.0  ;;  %v3153_v41 = vsub.f32 1.0, %v2993_v8  ;;  %v2859_v18 = vsub.f32 %v8131_v44, %v10581_v11  ;;  %3624 = vperm.xlu1 %5050, %v5187_v50   ;;  %v10757_v47 = vld [vmem:[#allocation93_spill] sm:$0xff] }
 0x2c3   : > { %10755 = vst [vmem:[#allocation20_spill] sm:$0xff] %v8393_v24  ;;  %3628 = vperm.xlu2 %5048, %v5188_v38   ;;  %v3173_v58 = vsub.f32 1.0, %v3013_v36  ;;  %v3163_v55 = vsub.f32 1.0, %v3003_v45  ;;  %v2849_v32 = vsub.f32 %v8133_v43, %v10581_v11  ;;  %v8408_v3 = vpop.permute.xlu1 %2654  ;;  %v8413_v61 = vmul.f32 %v3307_v13, %v10757_v47  ;;  %v10761_v24 = vld [vmem:[#allocation89_spill] sm:$0xff] }
 0x2c4   : > { %10756 = vst [vmem:[#allocation14_spill] sm:$0xff] %v8408_v3  ;;  %v8410_v27 = vpop.permute.xlu2 %2694  ;;  %v2839_v42 = vsub.f32 %v8129_v19, %v10581_v11  ;;  %v2840_v45 = vsub.f32 %v8129_v19, %v10584_v0  ;;  %v2860_v29 = vsub.f32 %v8131_v44, %v10584_v0  ;;  %v8424_v53 = vmul.f32 %v3327_v15, %v7288_v23  ;;  %v10759_v19 = vld [vmem:[#allocation13_spill] sm:$0xff] }
 0x2c5   : > { %3656 = vperm.xlu0 %5049, %v5189_v26   ;;  %10758 = vst [vmem:[#allocation24_spill] sm:$0xff] %v8413_v61  ;;  %v8421_v6 = vpop.permute.xlu0 %2674  ;;  %v3154_v8 = vsub.f32 1.0, %v2994_v62  ;;  %v3174_v36 = vsub.f32 1.0, %v3014_v16  ;;  %v3164_v35 = vsub.f32 1.0, %v3004_v5  ;;  %v2850_v13 = vsub.f32 %v8133_v43, %v10584_v0 }
 0x2c6   : > { %v3313_v50 = vmax.f32 %v3153_v41, 0.0  ;;  %v3019_v38 = vand.u32 2147483647, %v2859_v18  ;;  %v8429_v26 = vmul.f32 %v3317_v57, %v7320_v20  ;;  %v8432_v47 = vmul.f32 %v3308_v4, %v10759_v19 }
 0x2c7   : > { %v3333_v44 = vmax.f32 %v3173_v58, 0.0  ;;  %v3323_v39 = vmax.f32 %v3163_v55, 0.0  ;;  %v3009_v61 = vand.u32 2147483647, %v2849_v32  ;;  %v8435_v23 = vmul.f32 %v3328_v60, %v10761_v24  ;;  %v5190_v60 = vld [vmem:[%s9983_s1 + $0x80] sm:$0xff]  ;;  %v10763_v24 = vld [vmem:[#allocation94_spill] sm:$0xff] }
 0x2c8   : > { %10760 = vst [vmem:[#allocation10_spill] sm:$0xff] %v8432_v47  ;;  %v2999_v15 = vand.u32 2147483647, %v2839_v42  ;;  %v3000_v62 = vand.u32 2147483647, %v2840_v45  ;;  %v8438_v5 = vmul.f32 %v3318_v40, %v7344_v37  ;;  %v3314_v43 = vmax.f32 %v3154_v8, 0.0 }
 0x2c9   : > { %10762 = vst [vmem:[#allocation28_spill] sm:$0xff] %v8435_v23  ;;  %v3020_v16 = vand.u32 2147483647, %v2860_v29  ;;  %v3334_v41 = vmax.f32 %v3174_v36, 0.0  ;;  %v3324_v18 = vmax.f32 %v3164_v35, 0.0  ;;  %v3179_v57 = vsub.f32 1.0, %v3019_v38 }
 0x2ca   : > { %v3010_v20 = vand.u32 2147483647, %v2850_v13  ;;  %v2865_v4 = vsub.f32 %v8177_v12, %v10581_v11  ;;  %v2855_v58 = vsub.f32 %v8184_v59, %v10581_v11  ;;  %3636 = vperm.xlu1 %5050, %v5190_v60   ;;  %v5191_v37 = vld [vmem:[%s9983_s1 + $0x88] sm:$0xff]  ;;  %v8451_v40 = vmul.f32 %v3313_v50, %v10763_v24  ;;  %v5192_v45 = vld [vmem:[%s9983_s1 + $0xc0] sm:$0xff]  ;;  %v10765_v36 = vld [vmem:[#allocation15_spill] sm:$0xff] }
 0x2cb   : > { %3640 = vperm.xlu2 %5048, %v5191_v37   ;;  %v3169_v55 = vsub.f32 1.0, %v3009_v61  ;;  %v2845_v32 = vsub.f32 %v8175_v63, %v10581_v11  ;;  %v2866_v42 = vsub.f32 %v8177_v12, %v10584_v0  ;;  %v8460_v29 = vpop.permute.xlu1 %2666  ;;  %v8465_v35 = vmul.f32 %v3333_v44, %v10765_v36  ;;  %v10767_v37 = vld [vmem:[#allocation27_spill] sm:$0xff] }
 0x2cc   : > { %10764 = vst [vmem:[#allocation25_spill] sm:$0xff] %v8451_v40  ;;  %v8462_v8 = vpop.permute.xlu2 %2706  ;;  %v3159_v13 = vsub.f32 1.0, %v2999_v15  ;;  %v3160_v61 = vsub.f32 1.0, %v3000_v62  ;;  %v3180_v50 = vsub.f32 1.0, %v3020_v16  ;;  %v8470_v19 = vmul.f32 %v3323_v39, %v7354_v30  ;;  %v10771_v39 = vld [vmem:[#allocation91_spill] sm:$0xff] }
 0x2cd   : > { %3668 = vperm.xlu0 %5049, %v5192_v45   ;;  %10766 = vst [vmem:[#allocation93_spill] sm:$0xff] %v8465_v35  ;;  %v8467_v38 = vpop.permute.xlu0 %2686  ;;  %v3170_v12 = vsub.f32 1.0, %v3010_v20  ;;  %v2846_v60 = vsub.f32 %v8175_v63, %v10584_v0  ;;  %v8475_v24 = vmul.f32 %v3314_v43, %v10767_v37  ;;  %v10769_v45 = vld [vmem:[#allocation30_spill] sm:$0xff]  ;;  %v3339_v44 = vmax.f32 %v3179_v57, 0.0 }
 0x2ce   : > { %v8478_v40 = vmul.f32 %v3334_v41, %v10769_v45  ;;  %v3025_v36 = vand.u32 2147483647, %v2865_v4  ;;  %v2856_v15 = vsub.f32 %v8184_v59, %v10584_v0  ;;  %v3015_v62 = vand.u32 2147483647, %v2855_v58 }
 0x2cf   : > { %10768 = vst [vmem:[#allocation13_spill] sm:$0xff] %v8475_v24  ;;  %v3329_v16 = vmax.f32 %v3169_v55, 0.0  ;;  %v3005_v35 = vand.u32 2147483647, %v2845_v32  ;;  %v3026_v30 = vand.u32 2147483647, %v2866_v42  ;;  %v8483_v20 = vmul.f32 %v3324_v18, %v10771_v39 }
 0x2d0   : > { %10770 = vst [vmem:[#allocation89_spill] sm:$0xff] %v8478_v40  ;;  %v3319_v23 = vmax.f32 %v3159_v13, 0.0  ;;  %v3320_v63 = vmax.f32 %v3160_v61, 0.0  ;;  %v3340_v47 = vmax.f32 %v3180_v50, 0.0  ;;  %v2861_v43 = vsub.f32 %v8232_v21, %v10581_v11  ;;  %v5193_v18 = vld [vmem:[%s9983_s1 + $0x98] sm:$0xff]  ;;  %v5194_v32 = vld [vmem:[%s9983_s1 + $0xa0] sm:$0xff] }
 0x2d1   : > { %10772 = vst [vmem:[#allocation94_spill] sm:$0xff] %v8483_v20  ;;  %v3330_v41 = vmax.f32 %v3170_v12, 0.0  ;;  %v3006_v37 = vand.u32 2147483647, %v2846_v60  ;;  %v2851_v57 = vsub.f32 %v8224_v2, %v10581_v11  ;;  %v2871_v59 = vsub.f32 %v8226_v1, %v10581_v11  ;;  %v10773_v42 = vld [vmem:[#allocation29_spill] sm:$0xff]  ;;  %v5195_v60 = vld [vmem:[%s9983_s1 + $0xd8] sm:$0xff] }
 0x2d2   : > { %v3185_v4 = vsub.f32 1.0, %v3025_v36  ;;  %v3016_v58 = vand.u32 2147483647, %v2856_v15  ;;  %v3175_v55 = vsub.f32 1.0, %v3015_v62  ;;  %3648 = vperm.xlu1 %5050, %v5193_v18   ;;  %v8498_v13 = vmul.f32 %v3339_v44, %v10773_v42  ;;  %v10775_v15 = vld [vmem:[#allocation36_spill] sm:$0xff]  ;;  %v10777_v39 = vld [vmem:[#allocation97_spill] sm:$0xff] }
 0x2d3   : > { %3652 = vperm.xlu2 %5048, %v5194_v32   ;;  %v3165_v61 = vsub.f32 1.0, %v3005_v35  ;;  %v3186_v50 = vsub.f32 1.0, %v3026_v30  ;;  %v2852_v12 = vsub.f32 %v8224_v2, %v10584_v0  ;;  %v8505_v45 = vpop.permute.xlu1 %2678  ;;  %v8510_v62 = vmul.f32 %v3329_v16, %v10775_v15  ;;  %v10779_v18 = vld [vmem:[#allocation92_spill] sm:$0xff] }
 0x2d4   : > { %10774 = vst [vmem:[#allocation15_spill] sm:$0xff] %v8498_v13  ;;  %v8507_v36 = vpop.permute.xlu2 %2718  ;;  %v2862_v44 = vsub.f32 %v8232_v21, %v10584_v0  ;;  %v3021_v35 = vand.u32 2147483647, %v2861_v43  ;;  %v8517_v2 = vmul.f32 %v3319_v23, %v10777_v39  ;;  %v8520_v32 = vmul.f32 %v3340_v47, %v10779_v18  ;;  %v10781_v13 = vld [vmem:[#allocation105_spill] sm:$0xff]  ;;  %v5198_v18 = vld [vmem:[%s9983_s1 + $0xf0] sm:$0xff] }
 0x2d5   : > { %3680 = vperm.xlu0 %5049, %v5195_v60   ;;  %10776 = vst [vmem:[#allocation27_spill] sm:$0xff] %v8510_v62  ;;  %v8514_v30 = vpop.permute.xlu0 %2698  ;;  %v3166_v42 = vsub.f32 1.0, %v3006_v37  ;;  %v3011_v60 = vand.u32 2147483647, %v2851_v57  ;;  %v3031_v1 = vand.u32 2147483647, %v2871_v59  ;;  %v8523_v40 = vmul.f32 %v3330_v41, %v10781_v13 }
 0x2d6   : > { %10778 = vst [vmem:[#allocation30_spill] sm:$0xff] %v8517_v2  ;;  %v3345_v16 = vmax.f32 %v3185_v4, 0.0  ;;  %v3176_v15 = vsub.f32 1.0, %v3016_v58  ;;  %v3335_v62 = vmax.f32 %v3175_v55, 0.0  ;;  %v2857_v21 = vsub.f32 %v8271_v52, %v10581_v11  ;;  %v10782_v57 = vld [vmem:[#allocation98_spill] sm:$0xff] }
 0x2d7   : > { %10780 = vst [vmem:[#allocation91_spill] sm:$0xff] %v8520_v32  ;;  %v3325_v43 = vmax.f32 %v3165_v61, 0.0  ;;  %v3346_v24 = vmax.f32 %v3186_v50, 0.0  ;;  %v3012_v20 = vand.u32 2147483647, %v2852_v12  ;;  %v2877_v23 = vsub.f32 %v8273_v56, %v10581_v11  ;;  %v5196_v50 = vld [vmem:[%s9983_s1 + $0xb0] sm:$0xff] }
 0x2d8   : > { %v3022_v47 = vand.u32 2147483647, %v2862_v44  ;;  %v3181_v39 = vsub.f32 1.0, %v3021_v35  ;;  %v2867_v37 = vsub.f32 %v8275_v31, %v10581_v11  ;;  %v8532_v41 = vmul.f32 %v3320_v63, %v10782_v57  ;;  %v5197_v12 = vld [vmem:[%s9983_s1 + $0xb8] sm:$0xff]  ;;  %v10783_v63 = vld [vmem:[#allocation95_spill] sm:$0xff]  ;;  %v10791_v2 = vld [vmem:[#allocation102_spill] sm:$0xff] }
 0x2d9   : > { %v3326_v59 = vmax.f32 %v3166_v42, 0.0  ;;  %v3171_v4 = vsub.f32 1.0, %v3011_v60  ;;  %v3191_v58 = vsub.f32 1.0, %v3031_v1  ;;  %v2858_v55 = vsub.f32 %v8271_v52, %v10584_v0  ;;  %v10787_v57 = vld [vmem:[#allocation32_spill] sm:$0xff] }
 0x2da   : > { %v3336_v13 = vmax.f32 %v3176_v15, 0.0  ;;  %v3017_v61 = vand.u32 2147483647, %v2857_v21  ;;  %3660 = vperm.xlu1 %5050, %v5196_v50   ;;  %v8543_v44 = vmul.f32 %v3345_v16, %v10783_v63  ;;  %v8546_v1 = vmul.f32 %v3335_v62, %v7439_v48  ;;  %v10785_v15 = vld [vmem:[#allocation33_spill] sm:$0xff] }
 0x2db   : > { %3664 = vperm.xlu2 %5048, %v5197_v12   ;;  %v3172_v35 = vsub.f32 1.0, %v3012_v20  ;;  %v3037_v52 = vand.u32 2147483647, %v2877_v23  ;;  %v8551_v42 = vpop.permute.xlu1 %2690  ;;  %v8556_v21 = vmul.f32 %v3325_v43, %v10785_v15  ;;  %v8559_v16 = vmul.f32 %v3346_v24, %v10787_v57 }
 0x2dc   : > { %10784 = vst [vmem:[#allocation29_spill] sm:$0xff] %v8546_v1  ;;  %v8553_v60 = vpop.permute.xlu2 %2730  ;;  %v3182_v50 = vsub.f32 1.0, %v3022_v47  ;;  %v3341_v48 = vmax.f32 %v3181_v39, 0.0  ;;  %v3027_v62 = vand.u32 2147483647, %v2867_v37  ;;  %v2884_v20 = vsub.f32 %v8318_v46, %v10584_v0  ;;  %v10789_v47 = vld [vmem:[#allocation96_spill] sm:$0xff] }
 0x2dd   : > { %3692 = vperm.xlu0 %5049, %v5198_v18   ;;  %10786 = vst [vmem:[#allocation36_spill] sm:$0xff] %v8556_v21  ;;  %v8563_v23 = vpop.permute.xlu0 %2710  ;;  %v3331_v12 = vmax.f32 %v3171_v4, 0.0  ;;  %v3351_v63 = vmax.f32 %v3191_v58, 0.0  ;;  %v3018_v18 = vand.u32 2147483647, %v2858_v55  ;;  %v2863_v31 = vsub.f32 %v8316_v14, %v10581_v11 }
 0x2de   : > { %v3177_v56 = vsub.f32 1.0, %v3017_v61  ;;  %v2883_v43 = vsub.f32 %v8318_v46, %v10581_v11  ;;  %v8570_v24 = vmul.f32 %v3336_v13, %v7460_v33  ;;  %v8573_v39 = vmul.f32 %v3326_v59, %v10789_v47  ;;  %v10793_v13 = vld [vmem:[#allocation99_spill] sm:$0xff]  ;;  %v10795_v59 = vld [vmem:[#allocation108_spill] sm:$0xff] }
 0x2df   : > { %v3332_v37 = vmax.f32 %v3172_v35, 0.0  ;;  %v3197_v15 = vsub.f32 1.0, %v3037_v52  ;;  %v2864_v4 = vsub.f32 %v8316_v14, %v10584_v0  ;;  %v2873_v58 = vsub.f32 %v8326_v9, %v10581_v11 }
 0x2e0   : > { %10788 = vst [vmem:[#allocation97_spill] sm:$0xff] %v8570_v24  ;;  %v3342_v55 = vmax.f32 %v3182_v50, 0.0  ;;  %v3187_v57 = vsub.f32 1.0, %v3027_v62  ;;  %v3044_v61 = vand.u32 2147483647, %v2884_v20  ;;  %v8580_v1 = vmul.f32 %v3341_v48, %v10791_v2  ;;  %v5199_v2 = vld [vmem:[%s9983_s1 + $0xc8] sm:$0xff] }
 0x2e1   : > { %10790 = vst [vmem:[#allocation92_spill] sm:$0xff] %v8573_v39  ;;  %v3178_v46 = vsub.f32 1.0, %v3018_v18  ;;  %v3023_v33 = vand.u32 2147483647, %v2863_v31  ;;  %v8583_v21 = vmul.f32 %v3331_v12, %v10793_v13  ;;  %v8586_v35 = vmul.f32 %v3351_v63, %v10795_v59  ;;  %v5200_v31 = vld [vmem:[%s9983_s1 + $0xd0] sm:$0xff]  ;;  %v5201_v12 = vld [vmem:[%s9983_s1 + $0x108] sm:$0xff] }
 0x2e2   : > { %10792 = vst [vmem:[#allocation105_spill] sm:$0xff] %v8580_v1  ;;  %v3337_v52 = vmax.f32 %v3177_v56, 0.0  ;;  %v3043_v47 = vand.u32 2147483647, %v2883_v43  ;;  %v2890_v14 = vsub.f32 %v8367_v25, %v10584_v0  ;;  %v2880_v50 = vsub.f32 %v8369_v54, %v10584_v0  ;;  %3672 = vperm.xlu1 %5050, %v5199_v2   ;;  %v10805_v39 = vld [vmem:[#allocation35_spill] sm:$0xff] }
 0x2e3   : > { %10794 = vst [vmem:[#allocation98_spill] sm:$0xff] %v8583_v21  ;;  %3676 = vperm.xlu2 %5048, %v5200_v31   ;;  %v3357_v48 = vmax.f32 %v3197_v15, 0.0  ;;  %v3024_v62 = vand.u32 2147483647, %v2864_v4  ;;  %v3033_v56 = vand.u32 2147483647, %v2873_v58  ;;  %v2889_v20 = vsub.f32 %v8367_v25, %v10581_v11  ;;  %v8603_v63 = vpop.permute.xlu1 %2702 }
 0x2e4   : > { %10796 = vst [vmem:[#allocation95_spill] sm:$0xff] %v8586_v35  ;;  %v8605_v18 = vpop.permute.xlu2 %2742  ;;  %v3347_v43 = vmax.f32 %v3187_v57, 0.0  ;;  %v3204_v13 = vsub.f32 1.0, %v3044_v61  ;;  %v2879_v59 = vsub.f32 %v8369_v54, %v10581_v11  ;;  %v10799_v4 = vld [vmem:[#allocation107_spill] sm:$0xff]  ;;  %v3338_v25 = vmax.f32 %v3178_v46, 0.0 }
 0x2e5   : > { %3704 = vperm.xlu0 %5049, %v5201_v12   ;;  %10797 = vst [vmem:[#allocation33_spill] sm:$0xff] %v8603_v63  ;;  %v8609_v15 = vpop.permute.xlu0 %2722  ;;  %v8612_v58 = vmul.f32 %v3342_v55, %v10799_v4  ;;  %v3183_v2 = vsub.f32 1.0, %v3023_v33  ;;  %v2869_v31 = vsub.f32 %v8365_v17, %v10581_v11  ;;  %v10801_v12 = vld [vmem:[#allocation103_spill] sm:$0xff]  ;;  %v3203_v35 = vsub.f32 1.0, %v3043_v47  ;;  %v10807_v17 = vld [vmem:[#allocation112_spill] sm:$0xff] }
 0x2e6   : > { %10798 = vst [vmem:[#allocation32_spill] sm:$0xff] %v8609_v15  ;;  %v8617_v9 = vmul.f32 %v3332_v37, %v10801_v12  ;;  %v3050_v63 = vand.u32 2147483647, %v2890_v14  ;;  %v3040_v57 = vand.u32 2147483647, %v2880_v50  ;;  %v10803_v61 = vld [vmem:[#allocation111_spill] sm:$0xff]  ;;  %v8623_v55 = vmul.f32 %v3357_v48, %v10805_v39 }
 0x2e7   : > { %10800 = vst [vmem:[#allocation96_spill] sm:$0xff] %v8612_v58  ;;  %v8620_v21 = vmul.f32 %v3337_v52, %v10803_v61  ;;  %v3184_v54 = vsub.f32 1.0, %v3024_v62  ;;  %v3193_v24 = vsub.f32 1.0, %v3033_v56  ;;  %v3049_v1 = vand.u32 2147483647, %v2889_v20  ;;  %v5202_v20 = vld [vmem:[%s9983_s1 + $0xe0] sm:$0xff] }
 0x2e8   : > { %10802 = vst [vmem:[#allocation102_spill] sm:$0xff] %v8617_v9  ;;  %v3364_v46 = vmax.f32 %v3204_v13, 0.0  ;;  %v3039_v33 = vand.u32 2147483647, %v2879_v59  ;;  %v2896_v4 = vsub.f32 %v8410_v27, %v10584_v0  ;;  %v8628_v37 = vmul.f32 %v3347_v43, %v10807_v17  ;;  %v5203_v17 = vld [vmem:[%s9983_s1 + $0xe8] sm:$0xff]  ;;  %v10817_v9 = vld [vmem:[#allocation119_spill] sm:$0xff] }
 0x2e9   : > { %10804 = vst [vmem:[#allocation99_spill] sm:$0xff] %v8620_v21  ;;  %v3343_v47 = vmax.f32 %v3183_v2, 0.0  ;;  %v3029_v14 = vand.u32 2147483647, %v2869_v31  ;;  %v2875_v52 = vsub.f32 %v8408_v3, %v10581_v11  ;;  %v2886_v50 = vsub.f32 %v8421_v6, %v10584_v0  ;;  %v10810_v2 = vld [vmem:[#allocation114_spill] sm:$0xff] }
 0x2ea   : > { %10806 = vst [vmem:[#allocation108_spill] sm:$0xff] %v8623_v55  ;;  %v3363_v62 = vmax.f32 %v3203_v35, 0.0  ;;  %v3210_v56 = vsub.f32 1.0, %v3050_v63  ;;  %v3200_v39 = vsub.f32 1.0, %v3040_v57  ;;  %v2895_v48 = vsub.f32 %v8410_v27, %v10581_v11  ;;  %3684 = vperm.xlu1 %5050, %v5202_v20   ;;  %v5204_v63 = vld [vmem:[%s9983_s1 + $0x120] sm:$0xff] }
 0x2eb   : > { %10808 = vst [vmem:[#allocation107_spill] sm:$0xff] %v8628_v37  ;;  %3688 = vperm.xlu2 %5048, %v5203_v17   ;;  %v3353_v43 = vmax.f32 %v3193_v24, 0.0  ;;  %v3209_v13 = vsub.f32 1.0, %v3049_v1  ;;  %v2885_v35 = vsub.f32 %v8421_v6, %v10581_v11  ;;  %v8647_v27 = vpop.permute.xlu1 %2714  ;;  %v8652_v31 = vmul.f32 %v3338_v25, %v10810_v2  ;;  %v10812_v57 = vld [vmem:[#allocation37_spill] sm:$0xff]  ;;  %v10815_v37 = vld [vmem:[#allocation38_spill] sm:$0xff] }
 0x2ec   : > { %10809 = vst [vmem:[#allocation103_spill] sm:$0xff] %v8647_v27  ;;  %v8649_v59 = vpop.permute.xlu2 %2754  ;;  %v3344_v12 = vmax.f32 %v3184_v54, 0.0  ;;  %v8655_v61 = vmul.f32 %v3364_v46, %v10812_v57  ;;  %v3199_v1 = vsub.f32 1.0, %v3039_v33  ;;  %v3056_v24 = vand.u32 2147483647, %v2896_v4  ;;  %v10819_v33 = vld [vmem:[#allocation113_spill] sm:$0xff] }
 0x2ed   : > { %3716 = vperm.xlu0 %5049, %v5204_v63   ;;  %10811 = vst [vmem:[#allocation111_spill] sm:$0xff] %v8652_v31  ;;  %v8657_v20 = vpop.permute.xlu0 %2734  ;;  %v3189_v6 = vsub.f32 1.0, %v3029_v14  ;;  %v3035_v17 = vand.u32 2147483647, %v2875_v52  ;;  %v3046_v3 = vand.u32 2147483647, %v2886_v50  ;;  %v8660_v63 = vmul.f32 %v3343_v47, %v10815_v37 }
 0x2ee   : > { %10813 = vst [vmem:[#allocation35_spill] sm:$0xff] %v8655_v61  ;;  %v3370_v27 = vmax.f32 %v3210_v56, 0.0  ;;  %v3360_v55 = vmax.f32 %v3200_v39, 0.0  ;;  %v3055_v21 = vand.u32 2147483647, %v2895_v48  ;;  %v8663_v25 = vmul.f32 %v3363_v62, %v10817_v9  ;;  %v10821_v47 = vld [vmem:[#allocation41_spill] sm:$0xff] }
 0x2ef   : > { %10814 = vst [vmem:[#allocation112_spill] sm:$0xff] %v8657_v20  ;;  %v3369_v54 = vmax.f32 %v3209_v13, 0.0  ;;  %v3045_v2 = vand.u32 2147483647, %v2885_v35  ;;  %v2882_v46 = vsub.f32 %v8460_v29, %v10584_v0  ;;  %v8668_v4 = vmul.f32 %v3353_v43, %v10819_v33  ;;  %v10823_v48 = vld [vmem:[#allocation120_spill] sm:$0xff] }
 0x2f0   : > { %10816 = vst [vmem:[#allocation114_spill] sm:$0xff] %v8660_v63  ;;  %v3359_v14 = vmax.f32 %v3199_v1, 0.0  ;;  %v3216_v52 = vsub.f32 1.0, %v3056_v24  ;;  %v2892_v37 = vsub.f32 %v8467_v38, %v10584_v0  ;;  %v8673_v50 = vmul.f32 %v3344_v12, %v10821_v47  ;;  %v10825_v35 = vld [vmem:[#allocation124_spill] sm:$0xff] }
 0x2f1   : > { %10818 = vst [vmem:[#allocation37_spill] sm:$0xff] %v8663_v25  ;;  %v3349_v56 = vmax.f32 %v3189_v6, 0.0  ;;  %v3195_v39 = vsub.f32 1.0, %v3035_v17  ;;  %v3206_v9 = vsub.f32 1.0, %v3046_v3  ;;  %v2891_v62 = vsub.f32 %v8467_v38, %v10581_v11  ;;  %v5205_v12 = vld [vmem:[%s9983_s1 + $0xf8] sm:$0xff]  ;;  %v5206_v3 = vld [vmem:[%s9983_s1 + $0x100] sm:$0xff] }
 0x2f2   : > { %10820 = vst [vmem:[#allocation38_spill] sm:$0xff] %v8668_v4  ;;  %v8678_v13 = vmul.f32 %v3370_v27, %v10823_v48  ;;  %v8681_v43 = vmul.f32 %v3360_v55, %v10825_v35  ;;  %v3215_v57 = vsub.f32 1.0, %v3055_v21  ;;  %v2881_v1 = vsub.f32 %v8460_v29, %v10581_v11  ;;  %3696 = vperm.xlu1 %5050, %v5205_v12   ;;  %v5207_v21 = vld [vmem:[%s9983_s1 + $0x138] sm:$0xff]  ;;  %v10830_v48 = vld [vmem:[#allocation122_spill] sm:$0xff]  ;;  %v10832_v4 = vld [vmem:[#allocation117_spill] sm:$0xff] }
 0x2f3   : > { %10822 = vst [vmem:[#allocation119_spill] sm:$0xff] %v8673_v50  ;;  %3700 = vperm.xlu2 %5048, %v5206_v3   ;;  %v3205_v38 = vsub.f32 1.0, %v3045_v2  ;;  %v3042_v27 = vand.u32 2147483647, %v2882_v46  ;;  %v2901_v55 = vsub.f32 %v8462_v8, %v10581_v11  ;;  %v8696_v29 = vpop.permute.xlu1 %2726  ;;  %v10828_v24 = vld [vmem:[#allocation116_spill] sm:$0xff]  ;;  %v3376_v17 = vmax.f32 %v3216_v52, 0.0 }
 0x2f4   : > { %10824 = vst [vmem:[#allocation113_spill] sm:$0xff] %v8678_v13  ;;  %v8699_v6 = vmul.f32 %v3369_v54, %v10828_v24  ;;  %v2902_v33 = vsub.f32 %v8462_v8, %v10584_v0  ;;  %v3052_v47 = vand.u32 2147483647, %v2892_v37  ;;  %v8708_v35 = vmul.f32 %v3359_v14, %v10830_v48  ;;  %v10921_v63 = vld [vmem:[#allocation84_spill] sm:$0xff] }
 0x2f5   : > { %10826 = vst [vmem:[#allocation41_spill] sm:$0xff] %v8681_v43  ;;  %3728 = vperm.xlu0 %5049, %v5207_v21   ;;  %v8703_v2 = vpop.permute.xlu0 %2746  ;;  %v8705_v46 = vpop.permute.xlu2 %3572  ;;  %v3355_v12 = vmax.f32 %v3195_v39, 0.0  ;;  %v3366_v3 = vmax.f32 %v3206_v9, 0.0  ;;  %v3051_v21 = vand.u32 2147483647, %v2891_v62  ;;  %v3375_v54 = vmax.f32 %v3215_v57, 0.0 }
 0x2f6   : > { %10827 = vst [vmem:[#allocation120_spill] sm:$0xff] %v8696_v29  ;;  %v8711_v29 = vmul.f32 %v3349_v56, %v10832_v4  ;;  %v3041_v24 = vand.u32 2147483647, %v2881_v1  ;;  %v2888_v52 = vsub.f32 %v8505_v45, %v10584_v0  ;;  %v2908_v8 = vsub.f32 %v8507_v36, %v10584_v0  ;;  %v10835_v39 = vld [vmem:[#allocation115_spill] sm:$0xff]  ;;  %v10838_v57 = vld [vmem:[#allocation126_spill] sm:$0xff] }
 0x2f7   : > { %10829 = vst [vmem:[#allocation124_spill] sm:$0xff] %v8699_v6  ;;  %v3365_v37 = vmax.f32 %v3205_v38, 0.0  ;;  %v3202_v61 = vsub.f32 1.0, %v3042_v27  ;;  %v8717_v25 = vand.u32 2147483647, %v2901_v55  ;;  %v2898_v14 = vsub.f32 %v8514_v30, %v10584_v0 }
 0x2f8   : > { %10831 = vst [vmem:[#allocation116_spill] sm:$0xff] %v8708_v35  ;;  %v8722_v9 = vmul.f32 %v3376_v17, %v10835_v39  ;;  %v8724_v4 = vand.u32 2147483647, %v2902_v33  ;;  %v3212_v56 = vsub.f32 1.0, %v3052_v47  ;;  %v2897_v62 = vsub.f32 %v8514_v30, %v10581_v11  ;;  %v5208_v33 = vld [vmem:[%s9983_s1 + $0x110] sm:$0xff]  ;;  %v5209_v30 = vld [vmem:[%s9983_s1 + $0x118] sm:$0xff] }
 0x2f9   : > { %10833 = vst [vmem:[#allocation122_spill] sm:$0xff] %v8711_v29  ;;  %v8729_v1 = vmul.f32 %v3366_v3, %v10838_v57  ;;  %v3211_v48 = vsub.f32 1.0, %v3051_v21  ;;  %v2887_v38 = vsub.f32 %v8505_v45, %v10581_v11  ;;  %v2907_v27 = vsub.f32 %v8507_v36, %v10581_v11  ;;  %v10840_v47 = vld [vmem:[#allocation118_spill] sm:$0xff] }
 0x2fa   : > { %10834 = vst [vmem:[#allocation117_spill] sm:$0xff] %v8717_v25  ;;  %v3201_v55 = vsub.f32 1.0, %v3041_v24  ;;  %v3048_v29 = vand.u32 2147483647, %v2888_v52  ;;  %v3068_v17 = vand.u32 2147483647, %v2908_v8  ;;  %3708 = vperm.xlu1 %5050, %v5208_v33   ;;  %v8742_v3 = vmul.f32 %v3375_v54, %v10840_v47 }
 0x2fb   : > { %10836 = vst [vmem:[#allocation115_spill] sm:$0xff] %v8722_v9  ;;  %3712 = vperm.xlu2 %5048, %v5209_v30   ;;  %v3362_v45 = vmax.f32 %v3202_v61, 0.0  ;;  %v3058_v36 = vand.u32 2147483647, %v2898_v14  ;;  %v5210_v24 = vld [vmem:[%s9983_s1 + $0x178] sm:$0xff]  ;;  %v8748_v52 = vpop.permute.xlu1 %2738  ;;  %v10843_v8 = vld [vmem:[#allocation134_spill] sm:$0xff]  ;;  %v2894_v61 = vsub.f32 %v8551_v42, %v10584_v0  ;;  %v2913_v43 = vsub.f32 %v8553_v60, %v10581_v11 }
 0x2fc   : > { %10837 = vst [vmem:[#allocation176_spill] sm:$0xff] %v8724_v4  ;;  %v8751_v39 = vmul.f32 %v3365_v37, %v10843_v8  ;;  %v3372_v33 = vmax.f32 %v3212_v56, 0.0  ;;  %v3057_v30 = vand.u32 2147483647, %v2897_v62  ;;  %v3371_v47 = vmax.f32 %v3211_v48, 0.0  ;;  %v10845_v62 = vld [vmem:[#allocation128_spill] sm:$0xff] }
 0x2fd   : > { %10839 = vst [vmem:[#allocation126_spill] sm:$0xff] %v8729_v1  ;;  %3760 = vperm.xlu0 %5049, %v5210_v24   ;;  %v8756_v54 = vpop.permute.xlu0 %2758  ;;  %v8758_v14 = vpop.permute.xlu2 %3584  ;;  %v3047_v21 = vand.u32 2147483647, %v2887_v38  ;;  %v3067_v25 = vand.u32 2147483647, %v2907_v27  ;;  %v2914_v24 = vsub.f32 %v8553_v60, %v10584_v0  ;;  %v3361_v35 = vmax.f32 %v3201_v55, 0.0 }
 0x2fe   : > { %10841 = vst [vmem:[#allocation118_spill] sm:$0xff] %v8742_v3  ;;  %v3208_v37 = vsub.f32 1.0, %v3048_v29  ;;  %v3228_v8 = vsub.f32 1.0, %v3068_v17  ;;  %v2893_v56 = vsub.f32 %v8551_v42, %v10581_v11  ;;  %v8765_v57 = vmul.f32 %v3362_v45, %v10845_v62  ;;  %v10849_v38 = vld [vmem:[#allocation130_spill] sm:$0xff]  ;;  %v10851_v45 = vld [vmem:[#allocation140_spill] sm:$0xff] }
 0x2ff   : > { %10842 = vst [vmem:[#allocation177_spill] sm:$0xff] %v8748_v52  ;;  %v3218_v4 = vsub.f32 1.0, %v3058_v36  ;;  %v8773_v27 = vmul.f32 %v3372_v33, %v10849_v38  ;;  %v3217_v13 = vsub.f32 1.0, %v3057_v30  ;;  %v3054_v55 = vand.u32 2147483647, %v2894_v61  ;;  %v10853_v33 = vld [vmem:[#allocation125_spill] sm:$0xff] }
 0x300   : > { %10844 = vst [vmem:[#allocation134_spill] sm:$0xff] %v8751_v39  ;;  %v10847_v39 = vld [vmem:[#allocation121_spill] sm:$0xff]  ;;  %v2920_v29 = vsub.f32 %v8605_v18, %v10584_v0  ;;  %v3207_v17 = vsub.f32 1.0, %v3047_v21  ;;  %v3227_v42 = vsub.f32 1.0, %v3067_v25  ;;  %v3074_v6 = vand.u32 2147483647, %v2914_v24 }
 0x301   : > { %10846 = vst [vmem:[#allocation128_spill] sm:$0xff] %v8765_v57  ;;  %v8770_v48 = vmul.f32 %v3355_v12, %v10847_v39  ;;  %v8778_v62 = vmul.f32 %v3371_v47, %v10851_v45  ;;  %v3368_v36 = vmax.f32 %v3208_v37, 0.0  ;;  %v3388_v57 = vmax.f32 %v3228_v8, 0.0  ;;  %v5211_v12 = vld [vmem:[%s9983_s1 + $0x128] sm:$0xff]  ;;  %v5212_v39 = vld [vmem:[%s9983_s1 + $0x130] sm:$0xff] }
 0x302   : > { %10850 = vst [vmem:[#allocation130_spill] sm:$0xff] %v8773_v27  ;;  %v3053_v60 = vand.u32 2147483647, %v2893_v56  ;;  %3720 = vperm.xlu1 %5050, %v5211_v12   ;;  %v8787_v21 = vmul.f32 %v3361_v35, %v10853_v33  ;;  %v3378_v25 = vmax.f32 %v3218_v4, 0.0  ;;  %v3073_v30 = vand.u32 2147483647, %v2913_v43 }
 0x303   : > { %10848 = vst [vmem:[#allocation121_spill] sm:$0xff] %v8770_v48  ;;  %3724 = vperm.xlu2 %5048, %v5212_v39   ;;  %v2903_v61 = vsub.f32 %v8563_v23, %v10581_v11  ;;  %v2919_v47 = vsub.f32 %v8605_v18, %v10581_v11  ;;  %v5213_v24 = vld [vmem:[%s9983_s1 + $0x168] sm:$0xff]  ;;  %v8796_v37 = vpop.permute.xlu1 %2750  ;;  %v3377_v8 = vmax.f32 %v3217_v13, 0.0  ;;  %v3214_v56 = vsub.f32 1.0, %v3054_v55  ;;  %v10856_v33 = vld [vmem:[#allocation127_spill] sm:$0xff]  ;;  %v10858_v13 = vld [vmem:[#allocation132_spill] sm:$0xff] }
 0x304   : > { %10852 = vst [vmem:[#allocation140_spill] sm:$0xff] %v8778_v62  ;;  %v2904_v35 = vsub.f32 %v8563_v23, %v10584_v0  ;;  %v3080_v4 = vand.u32 2147483647, %v2920_v29  ;;  %v3367_v38 = vmax.f32 %v3207_v17, 0.0  ;;  %v8802_v45 = vmax.f32 %v3227_v42, 0.0  ;;  %v10860_v29 = vld [vmem:[#allocation136_spill] sm:$0xff] }
 0x305   : > { %10854 = vst [vmem:[#allocation125_spill] sm:$0xff] %v8787_v21  ;;  %3752 = vperm.xlu0 %5049, %v5213_v24   ;;  %v8800_v43 = vpop.permute.xlu2 %3592  ;;  %v3234_v12 = vsub.f32 1.0, %v3074_v6  ;;  %v2926_v18 = vsub.f32 %v8649_v59, %v10584_v0  ;;  %v8809_v24 = vmul.f32 %v3368_v36, %v10856_v33  ;;  %v8812_v55 = vmul.f32 %v3388_v57, %v10858_v13  ;;  %v10863_v36 = vld [vmem:[#allocation146_spill] sm:$0xff] }
 0x306   : > { %10855 = vst [vmem:[#allocation178_spill] sm:$0xff] %v8802_v45  ;;  %v8806_v39 = vpop.permute.xlu0 %3576  ;;  %v3213_v48 = vsub.f32 1.0, %v3053_v60  ;;  %v2925_v23 = vsub.f32 %v8649_v59, %v10581_v11  ;;  %v8817_v17 = vmul.f32 %v3378_v25, %v10860_v29  ;;  %v3233_v42 = vsub.f32 1.0, %v3073_v30  ;;  %v10864_v59 = vld [vmem:[#allocation139_spill] sm:$0xff]  ;;  %v10869_v29 = vld [vmem:[#allocation129_spill] sm:$0xff]  ;;  %v10877_v62 = vld [vmem:[#allocation142_spill] sm:$0xff] }
 0x307   : > { %10857 = vst [vmem:[#allocation127_spill] sm:$0xff] %v8809_v24  ;;  %v8819_v6 = vand.u32 2147483647, %v2903_v61  ;;  %v3079_v45 = vand.u32 2147483647, %v2919_v47  ;;  %v3374_v21 = vmax.f32 %v3214_v56, 0.0  ;;  %v8824_v33 = vmul.f32 %v3377_v8, %v10863_v36 }
 0x308   : > { %10859 = vst [vmem:[#allocation132_spill] sm:$0xff] %v8812_v55  ;;  %v8821_v31 = vand.u32 2147483647, %v2904_v35  ;;  %v3240_v1 = vsub.f32 1.0, %v3080_v4  ;;  %v3394_v57 = vmax.f32 %v3234_v12, 0.0  ;;  %v2909_v60 = vsub.f32 %v8609_v15, %v10581_v11  ;;  %v10866_v61 = vld [vmem:[#allocation49_spill] sm:$0xff] }
 0x309   : > { %10861 = vst [vmem:[#allocation136_spill] sm:$0xff] %v8819_v6  ;;  %v3086_v13 = vand.u32 2147483647, %v2926_v18  ;;  %v8829_v55 = vmul.f32 %v3367_v38, %v10864_v59  ;;  %v3373_v25 = vmax.f32 %v3213_v48, 0.0  ;;  %v3085_v30 = vand.u32 2147483647, %v2925_v23 }
 0x30a   : > { %10862 = vst [vmem:[#allocation179_spill] sm:$0xff] %v8821_v31  ;;  %v3897_v47 = vsub.f32 %v8705_v46, %v10866_v61  ;;  %v10867_v56 = vld [vmem:[#allocation50_spill] sm:$0xff]  ;;  %v5214_v8 = vld [vmem:[%s9983_s1 + $0x140] sm:$0xff]  ;;  %v8841_v38 = vmax.f32 %v3233_v42, 0.0  ;;  %v3239_v48 = vsub.f32 1.0, %v3079_v45  ;;  %v2928_v12 = vsub.f32 %v8756_v54, %v10584_v0 }
 0x30b   : > { %10865 = vst [vmem:[#allocation146_spill] sm:$0xff] %v8829_v55  ;;  %v3898_v35 = vsub.f32 %v8705_v46, %v10867_v56  ;;  %3732 = vperm.xlu1 %5050, %v5214_v8   ;;  %v5215_v4 = vld [vmem:[%s9983_s1 + $0x148] sm:$0xff]  ;;  %v3903_v18 = vsub.f32 %v8758_v14, %v10866_v61  ;;  %v8850_v23 = vpop.permute.xlu1 %2762  ;;  %v8853_v36 = vmul.f32 %v3374_v21, %v10869_v29  ;;  %v3400_v59 = vmax.f32 %v3240_v1, 0.0 }
 0x30c   : > { %3736 = vperm.xlu2 %5048, %v5215_v4   ;;  %10868 = vst [vmem:[#allocation139_spill] sm:$0xff] %v8841_v38  ;;  %v5216_v46 = vld [vmem:[%s9983_s1 + $0x1e8] sm:$0xff]  ;;  %v2927_v45 = vsub.f32 %v8756_v54, %v10581_v11  ;;  %v3904_v42 = vsub.f32 %v8758_v14, %v10867_v56  ;;  %v8866_v6 = vand.u32 2147483647, %v2909_v60  ;;  %v3246_v38 = vsub.f32 1.0, %v3086_v13  ;;  %v10874_v54 = vld [vmem:[#allocation145_spill] sm:$0xff] }
 0x30d   : > { %3816 = vperm.xlu0 %5049, %v5216_v46   ;;  %10870 = vst [vmem:[#allocation49_spill] sm:$0xff] %v8853_v36  ;;  %v8859_v8 = vpop.permute.xlu2 %3604  ;;  %v10871_v4 = vld [vmem:[#allocation138_spill] sm:$0xff]  ;;  %v3245_v1 = vsub.f32 1.0, %v3085_v30  ;;  %v4057_v29 = vand.u32 2147483647, %v3897_v47  ;;  %v8871_v24 = vmul.f32 %v3373_v25, %v10874_v54  ;;  %v8873_v14 = vmax.f32 %v3239_v48, 0.0 }
 0x30e   : > { %v8862_v31 = vmul.f32 %v3394_v57, %v10871_v4  ;;  %10873 = vst [vmem:[#allocation129_spill] sm:$0xff] %v8866_v6  ;;  %v8868_v21 = vpop.permute.xlu0 %3596  ;;  %v4058_v55 = vand.u32 2147483647, %v3898_v35  ;;  %v2921_v57 = vsub.f32 %v8703_v2, %v10581_v11  ;;  %v3088_v4 = vand.u32 2147483647, %v2928_v12 }
 0x30f   : > { %10875 = vst [vmem:[#allocation138_spill] sm:$0xff] %v8871_v24  ;;  %v8878_v46 = vmul.f32 %v3400_v59, %v10877_v62  ;;  %v2915_v60 = vsub.f32 %v8657_v20, %v10581_v11  ;;  %v3087_v13 = vand.u32 2147483647, %v2927_v45  ;;  %v4064_v30 = vand.u32 2147483647, %v3904_v42  ;;  %v5217_v59 = vld [vmem:[%s9983_s1 + $0x170] sm:$0xff] }
 0x310   : > { %10872 = vst [vmem:[#allocation50_spill] sm:$0xff] %v8862_v31  ;;  %v4063_v31 = vand.u32 2147483647, %v3903_v18  ;;  %v3406_v47 = vmax.f32 %v3246_v38, 0.0  ;;  %v2922_v35 = vsub.f32 %v8703_v2, %v10584_v0  ;;  %v3907_v48 = vsub.f32 %v8800_v43, %v10866_v61  ;;  %v5218_v38 = vld [vmem:[%s9983_s1 + $0x1f8] sm:$0xff] }
 0x311   : > { %10876 = vst [vmem:[#allocation145_spill] sm:$0xff] %v8873_v14  ;;  %v3405_v12 = vmax.f32 %v3245_v1, 0.0  ;;  %v4217_v18 = vsub.f32 1.0, %v4057_v29  ;;  %v4218_v54 = vsub.f32 1.0, %v4058_v55  ;;  %v3908_v62 = vsub.f32 %v8800_v43, %v10867_v56  ;;  %v5219_v43 = vld [vmem:[%s9983_s1 + $0x150] sm:$0xff] }
 0x312   : > { %10878 = vst [vmem:[#allocation142_spill] sm:$0xff] %v8878_v46  ;;  %v8896_v2 = vand.u32 2147483647, %v2921_v57  ;;  %v3248_v45 = vsub.f32 1.0, %v3088_v4  ;;  %v4223_v42 = vsub.f32 1.0, %v4063_v31  ;;  %v3899_v55 = vsub.f32 %v8806_v39, %v10866_v61  ;;  %v10881_v31 = vld [vmem:[#allocation148_spill] sm:$0xff] }
 0x313   : > { %3756 = vperm.xlu1 %5050, %v5217_v59   ;;  %v8903_v1 = vand.u32 2147483647, %v2915_v60  ;;  %v3247_v29 = vsub.f32 1.0, %v3087_v13  ;;  %v4224_v59 = vsub.f32 1.0, %v4064_v30  ;;  %v3900_v25 = vsub.f32 %v8806_v39, %v10867_v56  ;;  %v10884_v46 = vld [vmem:[#allocation147_spill] sm:$0xff] }
 0x314   : > { %3824 = vperm.xlu2 %5048, %v5218_v38   ;;  %10879 = vst [vmem:[#allocation180_spill] sm:$0xff] %v8896_v2  ;;  %v8907_v38 = vpop.permute.xlu1 %3580  ;;  %v8912_v4 = vmul.f32 %v3406_v47, %v10881_v31  ;;  %v8914_v6 = vand.u32 2147483647, %v2922_v35  ;;  %v2924_v15 = vsub.f32 %v8796_v37, %v10584_v0  ;;  %v4377_v13 = vmax.f32 %v4217_v18, 0.0 }
 0x315   : > { %3740 = vperm.xlu0 %5049, %v5219_v43   ;;  %10880 = vst [vmem:[#allocation181_spill] sm:$0xff] %v8903_v1  ;;  %v8909_v57 = vpop.permute.xlu2 %3616  ;;  %v4067_v43 = vand.u32 2147483647, %v3907_v48  ;;  %v4378_v30 = vmax.f32 %v4218_v54, 0.0  ;;  %v4068_v1 = vand.u32 2147483647, %v3908_v62  ;;  %v8921_v39 = vmul.f32 %v3405_v12, %v10884_v46 }
 0x316   : > { %10882 = vst [vmem:[#allocation148_spill] sm:$0xff] %v8912_v4  ;;  %v3408_v14 = vmax.f32 %v3248_v45, 0.0  ;;  %v4383_v9 = vmax.f32 %v4223_v42, 0.0  ;;  %v4059_v47 = vand.u32 2147483647, %v3899_v55  ;;  %v3407_v31 = vmax.f32 %v3247_v29, 0.0 }
 0x317   : > { %10883 = vst [vmem:[#allocation182_spill] sm:$0xff] %v8914_v6  ;;  %v8918_v60 = vpop.permute.xlu0 %3608  ;;  %v4384_v35 = vmax.f32 %v4224_v59, 0.0  ;;  %v2923_v4 = vsub.f32 %v8796_v37, %v10581_v11  ;;  %v4060_v24 = vand.u32 2147483647, %v3900_v25  ;;  %v3084_v54 = vand.u32 2147483647, %v2924_v15 }
 0x318   : > { %10885 = vst [vmem:[#allocation147_spill] sm:$0xff] %v8921_v39  ;;  %v4227_v62 = vsub.f32 1.0, %v4067_v43  ;;  %v4228_v12 = vsub.f32 1.0, %v4068_v1  ;;  %v5220_v45 = vld [vmem:[%s9983_s1 + $0x1f0] sm:$0xff]  ;;  %v5221_v37 = vld [vmem:[%s9983_s1 + $0x160] sm:$0xff]  ;;  %v8938_v25 = vmul.f32 %v4377_v13, %v7846_v10  ;;  %v8944_v55 = vmul.f32 %v3408_v14, %v7922_v51  ;;  %v10891_v51 = vld [vmem:[#allocation164_spill] sm:$0xff] }
 0x319   : > { %v10886_v42 = vld [vmem:[#allocation153_spill] sm:$0xff]  ;;  %v4219_v1 = vsub.f32 1.0, %v4059_v47  ;;  %v2929_v29 = vsub.f32 %v8850_v23, %v10581_v11  ;;  %v5222_v59 = vld [vmem:[%s9983_s1 + $0x1d0] sm:$0xff]  ;;  %v8954_v10 = vand.u32 2147483647, %v2923_v4  ;;  %v4220_v13 = vsub.f32 1.0, %v4060_v24 }
 0x31a   : > { %v8941_v15 = vmul.f32 %v4378_v30, %v10886_v42  ;;  %10888 = vst [vmem:[#allocation183_spill] sm:$0xff] %v8944_v55  ;;  %v10889_v43 = vld [vmem:[#allocation163_spill] sm:$0xff]  ;;  %v8959_v14 = vmul.f32 %v4384_v35, %v10891_v51  ;;  %v8962_v47 = vmul.f32 %v3407_v31, %v7952_v34  ;;  %v3244_v42 = vsub.f32 1.0, %v3084_v54 }
 0x31b   : > { %3820 = vperm.xlu1 %5050, %v5220_v45   ;;  %v8952_v45 = vmul.f32 %v4383_v9, %v10889_v43  ;;  %10890 = vst [vmem:[#allocation163_spill] sm:$0xff] %v8954_v10  ;;  %v4387_v48 = vmax.f32 %v4227_v62, 0.0  ;;  %v4388_v4 = vmax.f32 %v4228_v12, 0.0  ;;  %v3913_v24 = vsub.f32 %v8859_v8, %v10866_v61 }
 0x31c   : > { %3748 = vperm.xlu2 %5048, %v5221_v37   ;;  %10887 = vst [vmem:[#allocation153_spill] sm:$0xff] %v8941_v15  ;;  %v8956_v30 = vpop.permute.xlu1 %3588  ;;  %v3914_v35 = vsub.f32 %v8859_v8, %v10867_v56  ;;  %v4379_v31 = vmax.f32 %v4219_v1, 0.0  ;;  %v3089_v54 = vand.u32 2147483647, %v2929_v29  ;;  %v3909_v62 = vsub.f32 %v8868_v21, %v10866_v61 }
 0x31d   : > { %3804 = vperm.xlu0 %5049, %v5222_v59   ;;  %v3629_v37 = vpop.permute.xlu2 %3628  ;;  %10892 = vst [vmem:[#allocation164_spill] sm:$0xff] %v8959_v14  ;;  %v2930_v59 = vsub.f32 %v8850_v23, %v10584_v0  ;;  %v4380_v51 = vmax.f32 %v4220_v13, 0.0  ;;  %v3910_v12 = vsub.f32 %v8868_v21, %v10867_v56  ;;  %v8981_v6 = vmax.f32 %v3244_v42, 0.0  ;;  %v10895_v0 = vld [vmem:[#allocation104_spill] sm:$0xff]  ;;  %v5224_v21 = vld [vmem:[%s9983_s1 + $0x1e0] sm:$0xff] }
 0x31e   : > { %10893 = vst [vmem:[#allocation184_spill] sm:$0xff] %v8962_v47  ;;  %v3926_v9 = vsub.f32 %v3629_v37, %v10867_v56  ;;  %v3925_v23 = vsub.f32 %v3629_v37, %v10866_v61  ;;  %v8984_v2 = vmul.f32 %v4387_v48, %v10895_v0  ;;  %v4073_v1 = vand.u32 2147483647, %v3913_v24  ;;  %v5223_v13 = vld [vmem:[%s9983_s1 + $0x158] sm:$0xff]  ;;  %v5225_v0 = vld [vmem:[%s9983_s1 + $0x268] sm:$0xff] }
 0x31f   : > { %v8967_v43 = vpop.permute.xlu0 %3620  ;;  %10894 = vst [vmem:[#allocation185_spill] sm:$0xff] %v8981_v6  ;;  %v3090_v8 = vand.u32 2147483647, %v2930_v59  ;;  %v4074_v29 = vand.u32 2147483647, %v3914_v35  ;;  %v3249_v37 = vsub.f32 1.0, %v3089_v54 }
 0x320   : > { %v3922_v34 = vsub.f32 %v8967_v43, %v10867_v56  ;;  %v4086_v46 = vand.u32 2147483647, %v3926_v9  ;;  %v8992_v42 = vand.u32 2147483647, %v3909_v62  ;;  %v4085_v59 = vand.u32 2147483647, %v3925_v23 }
 0x321   : > { %v10899_v54 = vld [vmem:[#allocation54_spill] sm:$0xff]  ;;  %v3250_v23 = vsub.f32 1.0, %v3090_v8  ;;  %v3409_v55 = vmax.f32 %v3249_v37, 0.0  ;;  %v10903_v6 = vld [vmem:[#allocation77_spill] sm:$0xff] }
 0x322   : > { %v4082_v20 = vand.u32 2147483647, %v3922_v34  ;;  %v4246_v11 = vsub.f32 1.0, %v4086_v46  ;;  %v9000_v46 = vand.u32 2147483647, %v3910_v12  ;;  %v10897_v34 = vld [vmem:[#allocation63_spill] sm:$0xff]  ;;  %v9008_v62 = vmul.f32 %v4380_v51, %v10899_v54 }
 0x323   : > { %3744 = vperm.xlu1 %5050, %v5223_v13   ;;  %v9005_v13 = vmul.f32 %v4388_v4, %v10897_v34  ;;  %v4234_v12 = vsub.f32 1.0, %v4074_v29  ;;  %v4229_v4 = vsub.f32 1.0, %v8992_v42  ;;  %v4245_v34 = vsub.f32 1.0, %v4085_v59  ;;  %v5227_v59 = vld [vmem:[%s9983_s1 + $0x278] sm:$0xff] }
 0x324   : > { %v4242_v52 = vsub.f32 1.0, %v4082_v20  ;;  %3812 = vperm.xlu2 %5048, %v5224_v21   ;;  %v10896_v20 = vld [vmem:[#allocation109_spill] sm:$0xff]  ;;  %v4406_v9 = vmax.f32 %v4246_v11, 0.0  ;;  %v9002_v24 = vpop.permute.xlu1 %3600  ;;  %v4230_v37 = vsub.f32 1.0, %v9000_v46  ;;  %v5228_v46 = vld [vmem:[%s9983_s1 + $0x1b8] sm:$0xff] }
 0x325   : > { %3880 = vperm.xlu0 %5049, %v5225_v0   ;;  %v8998_v48 = vmul.f32 %v4379_v31, %v10896_v20  ;;  %v3641_v35 = vpop.permute.xlu2 %3640  ;;  %10898 = vst [vmem:[#allocation104_spill] sm:$0xff] %v9005_v13  ;;  %v4233_v20 = vsub.f32 1.0, %v4073_v1  ;;  %v3915_v1 = vsub.f32 %v8918_v60, %v10866_v61  ;;  %v10907_v13 = vld [vmem:[#allocation61_spill] sm:$0xff]  ;;  %v9061_v50 = vmax.f32 %v4229_v4, 0.0  ;;  %v10915_v4 = vld [vmem:[#allocation100_spill] sm:$0xff] }
 0x326   : > { %10900 = vst [vmem:[#allocation109_spill] sm:$0xff] %v9008_v62  ;;  %v4402_v21 = vmax.f32 %v4242_v52, 0.0  ;;  %v3931_v18 = vsub.f32 %v3641_v35, %v10866_v61  ;;  %v3932_v0 = vsub.f32 %v3641_v35, %v10867_v56  ;;  %v10901_v52 = vld [vmem:[#allocation71_spill] sm:$0xff]  ;;  %v3919_v35 = vsub.f32 %v8909_v57, %v10866_v61 }
 0x327   : > { %v3633_v31 = vpop.permute.xlu0 %3632  ;;  %v9016_v15 = vmul.f32 %v4406_v9, %v10901_v52 }
 0x328   : > { %v3927_v11 = vsub.f32 %v3633_v31, %v10866_v61  ;;  %v3928_v39 = vsub.f32 %v3633_v31, %v10867_v56  ;;  %v4091_v47 = vand.u32 2147483647, %v3931_v18  ;;  %v4092_v51 = vand.u32 2147483647, %v3932_v0 }
 0x329   : > { %10902 = vst [vmem:[#allocation63_spill] sm:$0xff] %v9016_v15  ;;  %v9023_v31 = vmul.f32 %v4402_v21, %v10903_v6  ;;  %v3410_v0 = vmax.f32 %v3250_v23, 0.0  ;;  %v3921_v6 = vsub.f32 %v8967_v43, %v10866_v61  ;;  %v9043_v23 = vand.u32 2147483647, %v3919_v35 }
 0x32a   : > { %v4087_v54 = vand.u32 2147483647, %v3927_v11  ;;  %v4088_v8 = vand.u32 2147483647, %v3928_v39  ;;  %v4251_v29 = vsub.f32 1.0, %v4091_v47  ;;  %v4252_v42 = vsub.f32 1.0, %v4092_v51 }
 0x32b   : > { %10904 = vst [vmem:[#allocation54_spill] sm:$0xff] %v9023_v31  ;;  %v5226_v39 = vld [vmem:[%s9983_s1 + $0x1d8] sm:$0xff]  ;;  %v4405_v47 = vmax.f32 %v4245_v34, 0.0  ;;  %v9037_v11 = vmax.f32 %v4233_v20, 0.0  ;;  %v9039_v51 = vmax.f32 %v4234_v12, 0.0 }
 0x32c   : > { %v4248_v18 = vsub.f32 1.0, %v4088_v8  ;;  %3808 = vperm.xlu1 %5050, %v5226_v39   ;;  %3888 = vperm.xlu2 %5048, %v5227_v59   ;;  %v4247_v9 = vsub.f32 1.0, %v4087_v54  ;;  %v4411_v21 = vmax.f32 %v4251_v29, 0.0  ;;  %v9041_v52 = vpop.permute.xlu1 %3612  ;;  %v9045_v34 = vand.u32 2147483647, %v3915_v1 }
 0x32d   : > { %3792 = vperm.xlu0 %5049, %v5228_v46   ;;  %v3653_v39 = vpop.permute.xlu2 %3652  ;;  %v4412_v62 = vmax.f32 %v4252_v42, 0.0  ;;  %v10905_v46 = vld [vmem:[#allocation78_spill] sm:$0xff]  ;;  %v9052_v10 = vand.u32 2147483647, %v3921_v6  ;;  %v10911_v6 = vld [vmem:[#allocation165_spill] sm:$0xff] }
 0x32e   : > { %v4408_v8 = vmax.f32 %v4248_v18, 0.0  ;;  %v4407_v54 = vmax.f32 %v4247_v9, 0.0  ;;  %v3937_v43 = vsub.f32 %v3653_v39, %v10866_v61  ;;  %v3938_v29 = vsub.f32 %v3653_v39, %v10867_v56  ;;  %v10906_v9 = vld [vmem:[#allocation56_spill] sm:$0xff]  ;;  %v10909_v39 = vld [vmem:[#allocation69_spill] sm:$0xff] }
 0x32f   : > { %v3645_v59 = vpop.permute.xlu0 %3644  ;;  %v4565_v35 = vmul.f32 %v4405_v47, %v10906_v9  ;;  %v9056_v1 = vmul.f32 %v4411_v21, %v10907_v13  ;;  %v5229_v13 = vld [vmem:[%s9983_s1 + $0x270] sm:$0xff]  ;;  %v10913_v21 = vld [vmem:[#allocation62_spill] sm:$0xff] }
 0x330   : > { %v3933_v20 = vsub.f32 %v3645_v59, %v10866_v61  ;;  %v3934_v12 = vsub.f32 %v3645_v59, %v10867_v56  ;;  %v4567_v18 = vmul.f32 %v4407_v54, %v10905_v46  ;;  %v4097_v14 = vand.u32 2147483647, %v3937_v43 }
 0x331   : > { %10908 = vst [vmem:[#allocation71_spill] sm:$0xff] %v9056_v1  ;;  %v4098_v3 = vand.u32 2147483647, %v3938_v29  ;;  %v9059_v42 = vmul.f32 %v4408_v8, %v10909_v39  ;;  %v9063_v59 = vmax.f32 %v4230_v37, 0.0  ;;  %v9066_v46 = vmul.f32 %v3409_v55, %v10911_v6 }
 0x332   : > { %v4093_v31 = vand.u32 2147483647, %v3933_v20  ;;  %v4094_v15 = vand.u32 2147483647, %v3934_v12  ;;  %4702 = vmatpush.msra.mxu0 %v4567_v18  ;;  %v4257_v54 = vsub.f32 1.0, %v4097_v14  ;;  %v9072_v8 = vmul.f32 %v4412_v62, %v10913_v21  ;;  %v5231_v62 = vld [vmem:[%s9983_s1 + $0x250] sm:$0xff] }
 0x333   : > { %10910 = vst [vmem:[#allocation77_spill] sm:$0xff] %v9059_v42  ;;  %v4258_v43 = vsub.f32 1.0, %v4098_v3  ;;  %v9075_v29 = vmul.f32 %v3410_v0, %v10915_v4  ;;  %v3917_v3 = vsub.f32 %v9041_v52, %v10866_v61  ;;  %v4235_v37 = vsub.f32 1.0, %v9045_v34  ;;  %v10917_v4 = vld [vmem:[#allocation83_spill] sm:$0xff] }
 0x334   : > { %10912 = vst [vmem:[#allocation78_spill] sm:$0xff] %v9066_v46  ;;  %v4253_v47 = vsub.f32 1.0, %v4093_v31  ;;  %v4254_v9 = vsub.f32 1.0, %v4094_v15  ;;  %4703 = vmatpush.msra.mxu0 %v4565_v35  ;;  %3884 = vperm.xlu1 %5050, %v5229_v13   ;;  %v4417_v55 = vmax.f32 %v4257_v54, 0.0  ;;  %v5230_v15 = vld [vmem:[%s9983_s1 + $0x1c8] sm:$0xff]  ;;  %v4239_v31 = vsub.f32 1.0, %v9043_v23  ;;  %v9090_v12 = vpop.permute.xlu1 %3624 }
 0x335   : > { %10914 = vst [vmem:[#allocation56_spill] sm:$0xff] %v9072_v8  ;;  %3800 = vperm.xlu2 %5048, %v5230_v15   ;;  %3868 = vperm.xlu0 %5049, %v5231_v62   ;;  %v4241_v0 = vsub.f32 1.0, %v9052_v10  ;;  %v3665_v18 = vpop.permute.xlu2 %3664  ;;  %v4418_v35 = vmax.f32 %v4258_v43, 0.0  ;;  %v3923_v39 = vsub.f32 %v9090_v12, %v10866_v61  ;;  %v10919_v43 = vld [vmem:[#allocation16_spill] sm:$0xff]  ;;  %v3911_v8 = vsub.f32 %v9002_v24, %v10866_v61 }
 0x336   : > { %10916 = vst [vmem:[#allocation61_spill] sm:$0xff] %v9075_v29  ;;  %v4413_v20 = vmax.f32 %v4253_v47, 0.0  ;;  %v3943_v54 = vsub.f32 %v3665_v18, %v10866_v61  ;;  %v3944_v6 = vsub.f32 %v3665_v18, %v10867_v56  ;;  %v4414_v21 = vmax.f32 %v4254_v9, 0.0 }
 0x337   : > { %v3657_v13 = vpop.permute.xlu0 %3656  ;;  %v9099_v10 = vmul.f32 %v4417_v55, %v10917_v4  ;;  %v4077_v47 = vand.u32 2147483647, %v3917_v3  ;;  %v4083_v15 = vand.u32 2147483647, %v3923_v39  ;;  %v9109_v55 = vmul.f32 %v4418_v35, %v10921_v63  ;;  %v10923_v4 = vld [vmem:[#allocation17_spill] sm:$0xff] }
 0x338   : > { %v3939_v23 = vsub.f32 %v3657_v13, %v10866_v61  ;;  %v3940_v34 = vsub.f32 %v3657_v13, %v10867_v56  ;;  %v4103_v62 = vand.u32 2147483647, %v3943_v54  ;;  %v9102_v14 = vmul.f32 %v4413_v20, %v10919_v43  ;;  %v5232_v20 = vld [vmem:[%s9983_s1 + $0x1c0] sm:$0xff] }
 0x339   : > { %10918 = vst [vmem:[#allocation69_spill] sm:$0xff] %v9099_v10  ;;  %v4104_v29 = vand.u32 2147483647, %v3944_v6  ;;  %v4243_v46 = vsub.f32 1.0, %v4083_v15  ;;  %v9115_v6 = vmul.f32 %v4414_v21, %v10923_v4  ;;  %v5233_v63 = vld [vmem:[%s9983_s1 + $0x260] sm:$0xff] }
 0x33a   : > { %10920 = vst [vmem:[#allocation165_spill] sm:$0xff] %v9102_v14  ;;  %v4099_v18 = vand.u32 2147483647, %v3939_v23  ;;  %v4100_v42 = vand.u32 2147483647, %v3940_v34  ;;  %v4263_v13 = vsub.f32 1.0, %v4103_v62 }
 0x33b   : > { %10922 = vst [vmem:[#allocation62_spill] sm:$0xff] %v9109_v55  ;;  %v4264_v3 = vsub.f32 1.0, %v4104_v29  ;;  %v4399_v23 = vmax.f32 %v4239_v31, 0.0  ;;  %v9117_v34 = vmax.f32 %v4235_v37, 0.0  ;;  %v4403_v43 = vmax.f32 %v4243_v46, 0.0 }
 0x33c   : > { %v4259_v39 = vsub.f32 1.0, %v4099_v18  ;;  %v4260_v54 = vsub.f32 1.0, %v4100_v42  ;;  %3796 = vperm.xlu1 %5050, %v5232_v20   ;;  %10924 = vst [vmem:[#allocation100_spill] sm:$0xff] %v9115_v6  ;;  %v4423_v15 = vmax.f32 %v4263_v13, 0.0  ;;  %v5234_v42 = vld [vmem:[%s9983_s1 + $0x1a0] sm:$0xff]  ;;  %v4401_v29 = vmax.f32 %v4241_v0, 0.0  ;;  %v3637_v18 = vpop.permute.xlu1 %3636 }
 0x33d   : > { %3876 = vperm.xlu2 %5048, %v5233_v63   ;;  %3780 = vperm.xlu0 %5049, %v5234_v42   ;;  %v4071_v35 = vand.u32 2147483647, %v3911_v8  ;;  %v4237_v62 = vsub.f32 1.0, %v4077_v47  ;;  %v9125_v31 = vpop.permute.xlu2 %3676  ;;  %v4424_v37 = vmax.f32 %v4264_v3, 0.0  ;;  %v3929_v46 = vsub.f32 %v3637_v18, %v10866_v61  ;;  %v10925_v8 = vld [vmem:[#allocation70_spill] sm:$0xff] }
 0x33e   : > { %v4419_v21 = vmax.f32 %v4259_v39, 0.0  ;;  %v3930_v13 = vsub.f32 %v3637_v18, %v10867_v56  ;;  %v3950_v20 = vsub.f32 %v9125_v31, %v10867_v56  ;;  %v4420_v63 = vmax.f32 %v4260_v54, 0.0  ;;  %v10926_v39 = vld [vmem:[#allocation68_spill] sm:$0xff]  ;;  %v10928_v18 = vld [vmem:[#allocation81_spill] sm:$0xff] }
 0x33f   : > { %v9131_v4 = vpop.permute.xlu0 %3668  ;;  %v4563_v47 = vmul.f32 %v4403_v43, %v10925_v8  ;;  %v9137_v42 = vmul.f32 %v4423_v15, %v10926_v39  ;;  %v3905_v3 = vsub.f32 %v8956_v30, %v10866_v61  ;;  %v4089_v9 = vand.u32 2147483647, %v3929_v46  ;;  %v10929_v54 = vld [vmem:[#allocation72_spill] sm:$0xff]  ;;  %v10930_v43 = vld [vmem:[#allocation39_spill] sm:$0xff]  ;;  %v10931_v15 = vld [vmem:[#allocation73_spill] sm:$0xff] }
 0x340   : > { %v3946_v0 = vsub.f32 %v9131_v4, %v10867_v56  ;;  %v4090_v6 = vand.u32 2147483647, %v3930_v13  ;;  %v9142_v55 = vmul.f32 %v4419_v21, %v10928_v18  ;;  %v4397_v1 = vmax.f32 %v4237_v62, 0.0  ;;  %v5235_v62 = vld [vmem:[%s9983_s1 + $0x258] sm:$0xff]  ;;  %v10933_v21 = vld [vmem:[#allocation82_spill] sm:$0xff] }
 0x341   : > { %10927 = vst [vmem:[#allocation83_spill] sm:$0xff] %v9137_v42  ;;  %v4110_v27 = vand.u32 2147483647, %v3950_v20  ;;  %4704 = vmatpush.msra.mxu0 %v4563_v47  ;;  %v4561_v36 = vmul.f32 %v4401_v29, %v10929_v54  ;;  %v4231_v10 = vsub.f32 1.0, %v4071_v35  ;;  %v4249_v32 = vsub.f32 1.0, %v4089_v9 }
 0x342   : > { %v4106_v14 = vand.u32 2147483647, %v3946_v0  ;;  %v4559_v8 = vmul.f32 %v4399_v23, %v10930_v43  ;;  %v9147_v39 = vmul.f32 %v4424_v37, %v10931_v15  ;;  %v4250_v58 = vsub.f32 1.0, %v4090_v6 }
 0x343   : > { %v4270_v42 = vsub.f32 1.0, %v4110_v27  ;;  %4705 = vmatpush.msra.mxu0 %v4561_v36  ;;  %v9153_v13 = vmul.f32 %v4420_v63, %v10933_v21  ;;  %v3920_v9 = vsub.f32 %v8909_v57, %v10867_v56  ;;  %v3916_v23 = vsub.f32 %v8918_v60, %v10867_v56  ;;  %v5236_v27 = vld [vmem:[%s9983_s1 + $0x1b0] sm:$0xff]  ;;  %v5237_v36 = vld [vmem:[%s9983_s1 + $0x238] sm:$0xff]  ;;  %v10937_v63 = vld [vmem:[#allocation101_spill] sm:$0xff] }
 0x344   : > { %10932 = vst [vmem:[#allocation16_spill] sm:$0xff] %v9147_v39  ;;  %v4266_v46 = vsub.f32 1.0, %v4106_v14  ;;  %3872 = vperm.xlu1 %5050, %v5235_v62   ;;  %v4065_v29 = vand.u32 2147483647, %v3905_v3  ;;  %v4409_v35 = vmax.f32 %v4249_v32, 0.0  ;;  %v10935_v14 = vsub.f32 %v8907_v38, %v10866_v61  ;;  %v9168_v37 = vpop.permute.xlu1 %3648  ;;  %v10936_v32 = vld [vmem:[#allocation52_spill] sm:$0xff] }
 0x345   : > { %10934 = vst [vmem:[#allocation84_spill] sm:$0xff] %v9153_v13  ;;  %3788 = vperm.xlu2 %5048, %v5236_v27   ;;  %3856 = vperm.xlu0 %5049, %v5237_v36   ;;  %v4430_v57 = vmax.f32 %v4270_v42, 0.0  ;;  %v9170_v60 = vpop.permute.xlu2 %3688  ;;  %v4557_v20 = vmul.f32 %v4397_v1, %v10936_v32  ;;  %v4553_v0 = vmul.f32 %v9037_v11, %v10937_v63  ;;  %v4391_v47 = vmax.f32 %v4231_v10, 0.0  ;;  %v10939_v11 = vld [vmem:[#allocation66_spill] sm:$0xff]  ;;  %v10940_v27 = vld [vmem:[#allocation79_spill] sm:$0xff]  ;;  %v10943_v13 = vld [vmem:[#allocation60_spill] sm:$0xff] }
 0x346   : > { %v4061_v6 = vand.u32 2147483647, %v10935_v14  ;;  %4706 = vmatpush.msra.mxu0 %v4559_v8  ;;  %v4426_v3 = vmax.f32 %v4266_v46, 0.0  ;;  %v3936_v18 = vsub.f32 %v9168_v37, %v10867_v56  ;;  %v3956_v54 = vsub.f32 %v9170_v60, %v10867_v56 }
 0x347   : > { %v9179_v43 = vpop.permute.xlu0 %3680  ;;  %v10938_v42 = vsub.f32 %v8907_v38, %v10867_v56  ;;  %v4410_v15 = vmax.f32 %v4250_v58, 0.0  ;;  %v4555_v10 = vmul.f32 %v9117_v34, %v10939_v11  ;;  %v4080_v46 = vand.u32 2147483647, %v3920_v9  ;;  %v10941_v38 = vld [vmem:[#allocation8_spill] sm:$0xff] }
 0x348   : > { %v3952_v1 = vsub.f32 %v9179_v43, %v10867_v56  ;;  %4707 = vmatpush.msra.mxu0 %v4557_v20  ;;  %v4225_v62 = vsub.f32 1.0, %v4065_v29  ;;  %v4096_v21 = vand.u32 2147483647, %v3936_v18  ;;  %v9189_v36 = vmul.f32 %v4409_v35, %v10940_v27 }
 0x349   : > { %v4062_v8 = vand.u32 2147483647, %v10938_v42  ;;  %v4076_v14 = vand.u32 2147483647, %v3916_v23  ;;  %v4116_v32 = vand.u32 2147483647, %v3956_v54  ;;  %v9192_v42 = vmul.f32 %v4430_v57, %v10941_v38 }
 0x34a   : > { %v4112_v63 = vand.u32 2147483647, %v3952_v1  ;;  %4708 = vmatpush.msra.mxu0 %v4555_v10  ;;  %v4221_v58 = vsub.f32 1.0, %v4061_v6  ;;  %v3906_v20 = vsub.f32 %v8956_v30, %v10867_v56  ;;  %v4551_v39 = vmul.f32 %v4391_v47, %v10943_v13  ;;  %v5238_v23 = vld [vmem:[%s9983_s1 + $0x1a8] sm:$0xff]  ;;  %v10945_v57 = vld [vmem:[#allocation80_spill] sm:$0xff]  ;;  %v10947_v13 = vld [vmem:[#allocation31_spill] sm:$0xff] }
 0x34b   : > { %10942 = vst [vmem:[#allocation17_spill] sm:$0xff] %v9192_v42  ;;  %v9198_v34 = vmul.f32 %v4426_v3, %v8300_v7  ;;  %v4256_v9 = vsub.f32 1.0, %v4096_v21  ;;  %v4276_v29 = vsub.f32 1.0, %v4116_v32  ;;  %v9204_v18 = vmul.f32 %v4410_v15, %v10945_v57  ;;  %v5239_v30 = vld [vmem:[%s9983_s1 + $0x248] sm:$0xff]  ;;  %v10948_v47 = vld [vmem:[#allocation53_spill] sm:$0xff] }
 0x34c   : > { %v4272_v35 = vsub.f32 1.0, %v4112_v63  ;;  %4709 = vmatpush.msra.mxu0 %v4553_v0  ;;  %3784 = vperm.xlu1 %5050, %v5238_v23   ;;  %v4222_v6 = vsub.f32 1.0, %v4062_v8  ;;  %v4385_v54 = vmax.f32 %v4225_v62, 0.0  ;;  %v5240_v7 = vld [vmem:[%s9983_s1 + $0x188] sm:$0xff]  ;;  %v4549_v0 = vmul.f32 %v9061_v50, %v10947_v13  ;;  %v9218_v11 = vpop.permute.xlu1 %3660  ;;  %v10949_v62 = vld [vmem:[#allocation55_spill] sm:$0xff]  ;;  %v10950_v23 = vld [vmem:[#allocation57_spill] sm:$0xff] }
 0x34d   : > { %10944 = vst [vmem:[#allocation70_spill] sm:$0xff] %v9198_v34  ;;  %3864 = vperm.xlu2 %5048, %v5239_v30   ;;  %3768 = vperm.xlu0 %5049, %v5240_v7   ;;  %v9216_v3 = vmul.f32 %v9039_v51, %v10948_v47  ;;  %v4240_v15 = vsub.f32 1.0, %v4080_v46  ;;  %v4236_v8 = vsub.f32 1.0, %v4076_v14  ;;  %v4436_v1 = vmax.f32 %v4276_v29, 0.0  ;;  %v3701_v10 = vpop.permute.xlu2 %3700 }
 0x34e   : > { %10946 = vst [vmem:[#allocation68_spill] sm:$0xff] %v9204_v18  ;;  %4710 = vmatpush.msra.mxu0 %v4551_v39  ;;  %v9222_v21 = vmul.f32 %v9063_v59, %v10949_v62  ;;  %v4432_v27 = vmax.f32 %v4272_v35, 0.0  ;;  %v3942_v32 = vsub.f32 %v9218_v11, %v10867_v56  ;;  %v3961_v50 = vsub.f32 %v3701_v10, %v10866_v61 }
 0x34f   : > { %v3962_v51 = vsub.f32 %v3701_v10, %v10867_v56  ;;  %v9228_v63 = vpop.permute.xlu0 %3692  ;;  %v4381_v46 = vmax.f32 %v4221_v58, 0.0  ;;  %v9230_v14 = vand.u32 2147483647, %v3906_v20  ;;  %v4416_v39 = vmax.f32 %v4256_v9, 0.0  ;;  %v10951_v58 = vld [vmem:[#allocation11_spill] sm:$0xff]  ;;  %v10953_v10 = vld [vmem:[#allocation88_spill] sm:$0xff] }
 0x350   : > { %v3958_v38 = vsub.f32 %v9228_v63, %v10867_v56  ;;  %4711 = vmatpush.msra.mxu0 %v4549_v0  ;;  %v3912_v59 = vsub.f32 %v9002_v24, %v10867_v56  ;;  %v4102_v29 = vand.u32 2147483647, %v3942_v32  ;;  %v4121_v35 = vand.u32 2147483647, %v3961_v50  ;;  %v10959_v50 = vld [vmem:[#allocation19_spill] sm:$0xff] }
 0x351   : > { %v4545_v57 = vmul.f32 %v4385_v54, %v10950_v23  ;;  %v3918_v30 = vsub.f32 %v9041_v52, %v10867_v56  ;;  %v4122_v7 = vand.u32 2147483647, %v3962_v51  ;;  %v9241_v20 = vmul.f32 %v4436_v1, %v10951_v58  ;;  %v5241_v52 = vld [vmem:[%s9983_s1 + $0x240] sm:$0xff] }
 0x352   : > { %v4118_v13 = vand.u32 2147483647, %v3958_v38  ;;  %4712 = vmatpush.msra.mxu0 %v8984_v2  ;;  %v9243_v9 = vmax.f32 %v4222_v6, 0.0  ;;  %v4262_v0 = vsub.f32 1.0, %v4102_v29  ;;  %v4281_v47 = vsub.f32 1.0, %v4121_v35  ;;  %v10955_v2 = vld [vmem:[#allocation9_spill] sm:$0xff] }
 0x353   : > { %10952 = vst [vmem:[#allocation81_spill] sm:$0xff] %v9241_v20  ;;  %v9246_v24 = vmul.f32 %v4432_v27, %v10953_v10  ;;  %v9248_v62 = vmax.f32 %v4240_v15, 0.0  ;;  %v4282_v54 = vsub.f32 1.0, %v4122_v7  ;;  %v9254_v1 = vmul.f32 %v4416_v39, %v10955_v2  ;;  %v5242_v15 = vld [vmem:[%s9983_s1 + $0x198] sm:$0xff]  ;;  %v5243_v27 = vld [vmem:[%s9983_s1 + $0x220] sm:$0xff]  ;;  %v10957_v38 = vld [vmem:[#allocation110_spill] sm:$0xff] }
 0x354   : > { %v4278_v32 = vsub.f32 1.0, %v4118_v13  ;;  %4713 = vmatpush.msra.mxu0 %v4545_v57  ;;  %3860 = vperm.xlu1 %5050, %v5241_v52   ;;  %v9256_v6 = vmax.f32 %v4236_v8, 0.0  ;;  %v4441_v51 = vmax.f32 %v4281_v47, 0.0  ;;  %v4541_v29 = vmul.f32 %v4381_v46, %v10957_v38  ;;  %v9273_v57 = vpop.permute.xlu1 %3672  ;;  %v10958_v2 = vld [vmem:[#allocation18_spill] sm:$0xff] }
 0x355   : > { %10954 = vst [vmem:[#allocation72_spill] sm:$0xff] %v9246_v24  ;;  %3776 = vperm.xlu2 %5048, %v5242_v15   ;;  %3844 = vperm.xlu0 %5049, %v5243_v27   ;;  %v9266_v35 = vand.u32 2147483647, %v3912_v59  ;;  %v9268_v39 = vand.u32 2147483647, %v3918_v30  ;;  %v3924_v8 = vsub.f32 %v9090_v12, %v10867_v56  ;;  %v3713_v7 = vpop.permute.xlu2 %3712  ;;  %v4422_v13 = vmax.f32 %v4262_v0, 0.0 }
 0x356   : > { %10956 = vst [vmem:[#allocation39_spill] sm:$0xff] %v9254_v1  ;;  %v4438_v23 = vmax.f32 %v4278_v32, 0.0  ;;  %4714 = vmatpush.msra.mxu0 %v8952_v45  ;;  %v3948_v58 = vsub.f32 %v9273_v57, %v10867_v56  ;;  %v3967_v47 = vsub.f32 %v3713_v7, %v10866_v61  ;;  %v3968_v46 = vsub.f32 %v3713_v7, %v10867_v56 }
 0x357   : > { %v3705_v59 = vpop.permute.xlu0 %3704  ;;  %v3955_v30 = vsub.f32 %v9170_v60, %v10866_v61  ;;  %v4442_v10 = vmax.f32 %v4282_v54, 0.0  ;;  %v3951_v0 = vsub.f32 %v9179_v43, %v10866_v61  ;;  %v9286_v15 = vmul.f32 %v4441_v51, %v10958_v2  ;;  %v5244_v51 = vld [vmem:[%s9983_s1 + $0x190] sm:$0xff] }
 0x358   : > { %v3963_v12 = vsub.f32 %v3705_v59, %v10866_v61  ;;  %v3964_v45 = vsub.f32 %v3705_v59, %v10867_v56  ;;  %4715 = vmatpush.msra.mxu0 %v4541_v29  ;;  %v4108_v32 = vand.u32 2147483647, %v3948_v58  ;;  %v4127_v52 = vand.u32 2147483647, %v3967_v47 }
 0x359   : > { %v4128_v27 = vand.u32 2147483647, %v3968_v46  ;;  %v9290_v60 = vmul.f32 %v4438_v23, %v8387_v49  ;;  %v9292_v54 = vand.u32 2147483647, %v3924_v8  ;;  %v9295_v18 = vmul.f32 %v4422_v13, %v10959_v50  ;;  %v5246_v46 = vld [vmem:[%s9983_s1 + $0x208] sm:$0xff] }
 0x35a   : > { %v4123_v38 = vand.u32 2147483647, %v3963_v12  ;;  %v4124_v7 = vand.u32 2147483647, %v3964_v45  ;;  %4716 = vmatpush.msra.mxu0 %v8998_v48  ;;  %v4268_v59 = vsub.f32 1.0, %v4108_v32  ;;  %v4287_v29 = vsub.f32 1.0, %v4127_v52 }
 0x35b   : > { %10960 = vst [vmem:[#allocation73_spill] sm:$0xff] %v9295_v18  ;;  %v4288_v43 = vsub.f32 1.0, %v4128_v27  ;;  %v10961_v48 = vld [vmem:[#allocation90_spill] sm:$0xff]  ;;  %v3949_v8 = vsub.f32 %v9125_v31, %v10866_v61  ;;  %v3945_v50 = vsub.f32 %v9131_v4, %v10866_v61  ;;  %v4115_v23 = vand.u32 2147483647, %v3955_v30  ;;  %v10964_v18 = vld [vmem:[#allocation20_spill] sm:$0xff] }
 0x35c   : > { %v4283_v58 = vsub.f32 1.0, %v4123_v38  ;;  %v4284_v47 = vsub.f32 1.0, %v4124_v7  ;;  %4717 = vmatpush.msra.mxu0 %v8938_v25  ;;  %3772 = vperm.xlu1 %5050, %v5244_v51   ;;  %v9302_v49 = vmul.f32 %v4442_v10, %v10961_v48  ;;  %v4447_v13 = vmax.f32 %v4287_v29, 0.0  ;;  %v5245_v25 = vld [vmem:[%s9983_s1 + $0x230] sm:$0xff]  ;;  %v3685_v4 = vpop.permute.xlu1 %3684 }
 0x35d   : > { %3852 = vperm.xlu2 %5048, %v5245_v25   ;;  %3832 = vperm.xlu0 %5049, %v5246_v46   ;;  %v9314_v10 = vand.u32 2147483647, %v3951_v0  ;;  %v3957_v31 = vsub.f32 %v9228_v63, %v10866_v61  ;;  %v4428_v12 = vmax.f32 %v4268_v59, 0.0  ;;  %v3725_v30 = vpop.permute.xlu2 %3724  ;;  %v4448_v32 = vmax.f32 %v4288_v43, 0.0 }
 0x35e   : > { %10962 = vst [vmem:[#allocation82_spill] sm:$0xff] %v9302_v49  ;;  %v4443_v45 = vmax.f32 %v4283_v58, 0.0  ;;  %v3954_v52 = vsub.f32 %v3685_v4, %v10867_v56  ;;  %v3973_v2 = vsub.f32 %v3725_v30, %v10866_v61  ;;  %v3974_v27 = vsub.f32 %v3725_v30, %v10867_v56 }
 0x35f   : > { %v3717_v38 = vpop.permute.xlu0 %3716  ;;  %v4444_v7 = vmax.f32 %v4284_v47, 0.0  ;;  %v9324_v51 = vmul.f32 %v4447_v13, %v8384_v28  ;;  %v4275_v63 = vsub.f32 1.0, %v4115_v23  ;;  %v9330_v30 = vmul.f32 %v4428_v12, %v8390_v22 }
 0x360   : > { %v3969_v29 = vsub.f32 %v3717_v38, %v10866_v61  ;;  %v3970_v0 = vsub.f32 %v3717_v38, %v10867_v56  ;;  %v4114_v59 = vand.u32 2147483647, %v3954_v52  ;;  %v4133_v58 = vand.u32 2147483647, %v3973_v2 }
 0x361   : > { %v9327_v43 = vmul.f32 %v4443_v45, %v8429_v26  ;;  %v4134_v48 = vand.u32 2147483647, %v3974_v27  ;;  %10963 = vst [vmem:[#allocation52_spill] sm:$0xff] %v9330_v30  ;;  %v4117_v47 = vand.u32 2147483647, %v3957_v31  ;;  %v9333_v38 = vmul.f32 %v4448_v32, %v10964_v18  ;;  %v5247_v26 = vld [vmem:[%s9983_s1 + $0x228] sm:$0xff] }
 0x362   : > { %v4129_v25 = vand.u32 2147483647, %v3969_v29  ;;  %v4130_v46 = vand.u32 2147483647, %v3970_v0  ;;  %v4274_v49 = vsub.f32 1.0, %v4114_v59  ;;  %v4293_v1 = vsub.f32 1.0, %v4133_v58 }
 0x363   : > { %10965 = vst [vmem:[#allocation101_spill] sm:$0xff] %v9333_v38  ;;  %v4294_v28 = vsub.f32 1.0, %v4134_v48  ;;  %v9339_v45 = vmul.f32 %v4444_v7, %v8438_v5  ;;  %v9341_v52 = vand.u32 2147483647, %v3949_v8  ;;  %v9343_v22 = vand.u32 2147483647, %v3945_v50 }
 0x364   : > { %v4289_v13 = vsub.f32 1.0, %v4129_v25  ;;  %v4290_v23 = vsub.f32 1.0, %v4130_v46  ;;  %3848 = vperm.xlu1 %5050, %v5247_v26   ;;  %v3953_v31 = vsub.f32 %v3685_v4, %v10866_v61  ;;  %v4453_v12 = vmax.f32 %v4293_v1, 0.0  ;;  %v5248_v18 = vld [vmem:[%s9983_s1 + $0x180] sm:$0xff]  ;;  %v3697_v0 = vpop.permute.xlu1 %3696 }
 0x365   : > { %10966 = vst [vmem:[#allocation66_spill] sm:$0xff] %v9339_v45  ;;  %3764 = vperm.xlu2 %5048, %v5248_v18   ;;  %v4435_v32 = vmax.f32 %v4275_v63, 0.0  ;;  %v4271_v2 = vsub.f32 1.0, %v9314_v10  ;;  %v4434_v27 = vmax.f32 %v4274_v49, 0.0  ;;  %v4454_v8 = vmax.f32 %v4294_v28, 0.0  ;;  %v10967_v18 = vld [vmem:[#allocation10_spill] sm:$0xff] }
 0x366   : > { %v4449_v29 = vmax.f32 %v4289_v13, 0.0  ;;  %v9350_v5 = vpop.permute.xlu2 %3736  ;;  %v3959_v50 = vsub.f32 %v3697_v0, %v10866_v61  ;;  %v3960_v7 = vsub.f32 %v3697_v0, %v10867_v56  ;;  %v4277_v59 = vsub.f32 1.0, %v4117_v47  ;;  %v10976_v30 = vld [vmem:[#allocation13_spill] sm:$0xff] }
 0x367   : > { %v3980_v1 = vsub.f32 %v9350_v5, %v10867_v56  ;;  %v9356_v4 = vpop.permute.xlu0 %3728  ;;  %v4450_v58 = vmax.f32 %v4290_v23, 0.0  ;;  %v9361_v49 = vmul.f32 %v4453_v12, %v8424_v53  ;;  %v4113_v63 = vand.u32 2147483647, %v3953_v31  ;;  %v10969_v53 = vld [vmem:[#allocation28_spill] sm:$0xff] }
 0x368   : > { %v3976_v10 = vsub.f32 %v9356_v4, %v10867_v56  ;;  %v4119_v48 = vand.u32 2147483647, %v3959_v50  ;;  %v4120_v25 = vand.u32 2147483647, %v3960_v7  ;;  %v9364_v46 = vmul.f32 %v4449_v29, %v8470_v19  ;;  %v10971_v29 = vld [vmem:[#allocation94_spill] sm:$0xff] }
 0x369   : > { %v3947_v28 = vsub.f32 %v9273_v57, %v10866_v61  ;;  %v4140_v13 = vand.u32 2147483647, %v3980_v1  ;;  %v9369_v47 = vmul.f32 %v4434_v27, %v10967_v18  ;;  %v4269_v23 = vsub.f32 1.0, %v9341_v52  ;;  %v5249_v57 = vld [vmem:[%s9983_s1 + $0x218] sm:$0xff] }
 0x36a   : > { %v4136_v26 = vand.u32 2147483647, %v3976_v10  ;;  %v4280_v0 = vsub.f32 1.0, %v4120_v25  ;;  %v4279_v45 = vsub.f32 1.0, %v4119_v48  ;;  %v9373_v12 = vmul.f32 %v4454_v8, %v10969_v53  ;;  %v5250_v8 = vld [vmem:[%s9983_s1 + $0x210] sm:$0xff] }
 0x36b   : > { %10968 = vst [vmem:[#allocation79_spill] sm:$0xff] %v9369_v47  ;;  %v4300_v50 = vsub.f32 1.0, %v4140_v13  ;;  %v9380_v7 = vmul.f32 %v4450_v58, %v10971_v29  ;;  %v4431_v27 = vmax.f32 %v4271_v2, 0.0  ;;  %v4437_v1 = vmax.f32 %v4277_v59, 0.0  ;;  %v10973_v53 = vld [vmem:[#allocation23_spill] sm:$0xff]  ;;  %v10977_v47 = vld [vmem:[#allocation89_spill] sm:$0xff] }
 0x36c   : > { %10970 = vst [vmem:[#allocation8_spill] sm:$0xff] %v9373_v12  ;;  %v4296_v19 = vsub.f32 1.0, %v4136_v26  ;;  %3840 = vperm.xlu1 %5050, %v5249_v57   ;;  %v4273_v52 = vsub.f32 1.0, %v4113_v63  ;;  %v4439_v10 = vmax.f32 %v4279_v45, 0.0  ;;  %v3941_v48 = vsub.f32 %v9218_v11, %v10866_v61  ;;  %v9387_v26 = vpop.permute.xlu1 %3708 }
 0x36d   : > { %10972 = vst [vmem:[#allocation60_spill] sm:$0xff] %v9380_v7  ;;  %3836 = vperm.xlu2 %5048, %v5250_v8   ;;  %v4107_v25 = vand.u32 2147483647, %v3947_v28  ;;  %v4440_v13 = vmax.f32 %v4280_v0, 0.0  ;;  %v4595_v58 = vmul.f32 %v4435_v32, %v10973_v53  ;;  %v4460_v57 = vmax.f32 %v4300_v50, 0.0  ;;  %v10974_v28 = vld [vmem:[#allocation25_spill] sm:$0xff] }
 0x36e   : > { %v3825_v18 = vpop.permute.xlu2 %3824  ;;  %v3966_v2 = vsub.f32 %v9387_v26, %v10867_v56  ;;  %v4456_v45 = vmax.f32 %v4296_v19, 0.0  ;;  %v4599_v0 = vmul.f32 %v4439_v10, %v10974_v28  ;;  %v4433_v31 = vmax.f32 %v4273_v52, 0.0  ;;  %v10975_v32 = vld [vmem:[#allocation12_spill] sm:$0xff] }
 0x36f   : > { %v4023_v59 = vsub.f32 %v3825_v18, %v10866_v61  ;;  %v4024_v63 = vsub.f32 %v3825_v18, %v10867_v56  ;;  %v3761_v29 = vpop.permute.xlu0 %3760  ;;  %v4597_v50 = vmul.f32 %v4437_v1, %v10975_v32  ;;  %v9399_v42 = vmul.f32 %v4440_v13, %v10976_v30  ;;  %v5251_v1 = vld [vmem:[%s9983_s1 + $0x200] sm:$0xff] }
 0x370   : > { %v3991_v8 = vsub.f32 %v3761_v29, %v10866_v61  ;;  %v3992_v11 = vsub.f32 %v3761_v29, %v10867_v56  ;;  %v4126_v38 = vand.u32 2147483647, %v3966_v2  ;;  %4722 = vmatpush.msra.mxu1 %v4599_v0  ;;  %v4267_v18 = vsub.f32 1.0, %v4107_v25 }
 0x371   : > { %v4183_v7 = vand.u32 2147483647, %v4023_v59  ;;  %v4184_v53 = vand.u32 2147483647, %v4024_v63  ;;  %v9402_v20 = vmul.f32 %v4460_v57, %v10977_v47  ;;  %v9408_v2 = vmul.f32 %v4456_v45, %v8523_v40  ;;  %v10978_v57 = vld [vmem:[#allocation24_spill] sm:$0xff]  ;;  %v10979_v63 = vld [vmem:[#allocation26_spill] sm:$0xff] }
 0x372   : > { %v4151_v12 = vand.u32 2147483647, %v3991_v8  ;;  %v4152_v34 = vand.u32 2147483647, %v3992_v11  ;;  %v4286_v19 = vsub.f32 1.0, %v4126_v38  ;;  %4723 = vmatpush.msra.mxu1 %v4597_v50  ;;  %v4429_v30 = vmax.f32 %v4269_v23, 0.0 }
 0x373   : > { %v4343_v24 = vsub.f32 1.0, %v4183_v7  ;;  %v4344_v29 = vsub.f32 1.0, %v4184_v53  ;;  %v3935_v38 = vsub.f32 %v9168_v37, %v10866_v61  ;;  %v4101_v7 = vand.u32 2147483647, %v3941_v48 }
 0x374   : > { %v4312_v10 = vsub.f32 1.0, %v4152_v34  ;;  %3828 = vperm.xlu1 %5050, %v5251_v1   ;;  %v4311_v52 = vsub.f32 1.0, %v4151_v12  ;;  %4724 = vmatpush.msra.mxu1 %v4595_v58  ;;  %v9412_v13 = vpop.permute.xlu1 %3720  ;;  %v4593_v59 = vmul.f32 %v4433_v31, %v10978_v57  ;;  %v4591_v8 = vmul.f32 %v4431_v27, %v10979_v63 }
 0x375   : > { %v4503_v25 = vmax.f32 %v4343_v24, 0.0  ;;  %v4504_v47 = vmax.f32 %v4344_v29, 0.0  ;;  %v4427_v11 = vmax.f32 %v4267_v18, 0.0  ;;  %v3972_v23 = vsub.f32 %v9412_v13, %v10867_v56 }
 0x376   : > { %v9414_v34 = vpop.permute.xlu2 %3748  ;;  %v4471_v12 = vmax.f32 %v4311_v52, 0.0  ;;  %v4472_v40 = vmax.f32 %v4312_v10, 0.0  ;;  %v4446_v48 = vmax.f32 %v4286_v19, 0.0  ;;  %4725 = vmatpush.msra.mxu1 %v4593_v59  ;;  %v4095_v27 = vand.u32 2147483647, %v3935_v38  ;;  %v10981_v19 = vld [vmem:[#allocation74_spill] sm:$0xff] }
 0x377   : > { %v3986_v37 = vsub.f32 %v9414_v34, %v10867_v56  ;;  %v3753_v24 = vpop.permute.xlu0 %3752  ;;  %v9423_v58 = vmul.f32 %v4504_v47, %v8817_v17  ;;  %v4261_v28 = vsub.f32 1.0, %v4101_v7  ;;  %v4132_v0 = vand.u32 2147483647, %v3972_v23 }
 0x378   : > { %v3988_v45 = vsub.f32 %v3753_v24, %v10867_v56  ;;  %v4631_v31 = vmul.f32 %v4471_v12, %v8543_v44  ;;  %v4663_v32 = vmul.f32 %v4503_v25, %v8824_v33  ;;  %v10980_v50 = vsub.f32 1.0, %v9343_v22  ;;  %4726 = vmatpush.msra.mxu1 %v4591_v8  ;;  %v10982_v44 = vld [vmem:[#allocation22_spill] sm:$0xff] }
 0x379   : > { %v4146_v18 = vand.u32 2147483647, %v3986_v37  ;;  %v4589_v17 = vmul.f32 %v4429_v30, %v10981_v19  ;;  %v4238_v10 = vsub.f32 1.0, %v9268_v39  ;;  %v4244_v1 = vsub.f32 1.0, %v9292_v54  ;;  %v10984_v30 = vld [vmem:[#allocation169_spill] sm:$0xff]  ;;  %v10985_v54 = vld [vmem:[#allocation59_spill] sm:$0xff] }
 0x37a   : > { %v4425_v53 = vmax.f32 %v10980_v50, 0.0  ;;  %v4148_v29 = vand.u32 2147483647, %v3988_v45  ;;  %4742 = vmatpush.msra.mxu2 %v4631_v31  ;;  %4762 = vmatpush.msra.mxu3 %v4663_v32  ;;  %v4587_v52 = vmul.f32 %v4427_v11, %v10982_v44  ;;  %v9435_v38 = vmul.f32 %v4472_v40, %v8559_v16  ;;  %v10987_v40 = vld [vmem:[#allocation5_spill] sm:$0xff]  ;;  %v10988_v50 = vld [vmem:[#allocation87_spill] sm:$0xff]  ;;  %v10991_v44 = vld [vmem:[#allocation58_spill] sm:$0xff] }
 0x37b   : > { %v4292_v33 = vsub.f32 1.0, %v4132_v0  ;;  %v4306_v7 = vsub.f32 1.0, %v4146_v18  ;;  %4727 = vmatpush.msra.mxu1 %v4589_v17  ;;  %v9438_v25 = vmul.f32 %v4446_v48, %v8532_v41  ;;  %v4255_v47 = vsub.f32 1.0, %v4095_v27  ;;  %v10989_v17 = vld [vmem:[#allocation83_spill] sm:$0xff] }
 0x37c   : > { %v4308_v22 = vsub.f32 1.0, %v4148_v29  ;;  %v4421_v57 = vmax.f32 %v4261_v28, 0.0  ;;  %v9442_v39 = vmul.f32 %v9248_v62, %v10984_v30  ;;  %v9446_v59 = vmul.f32 %v9256_v6, %v10985_v54  ;;  %v10994_v30 = vld [vmem:[#allocation92_spill] sm:$0xff] }
 0x37d   : > { %10983 = vst [vmem:[#allocation80_spill] sm:$0xff] %v9438_v25  ;;  %v10986_v16 = vsub.f32 1.0, %v9230_v14  ;;  %v4232_v8 = vsub.f32 1.0, %v9266_v35  ;;  %4728 = vmatpush.msra.mxu1 %v4587_v52  ;;  %v9451_v11 = vpop.permute.xlu1 %3732  ;;  %v4585_v23 = vmul.f32 %v4425_v53, %v10987_v40  ;;  %v4398_v37 = vmax.f32 %v4238_v10, 0.0  ;;  %v10990_v10 = vld [vmem:[#allocation96_spill] sm:$0xff] }
 0x37e   : > { %v4468_v12 = vmax.f32 %v4308_v22, 0.0  ;;  %v9453_v41 = vpop.permute.xlu2 %3812  ;;  %v4466_v62 = vmax.f32 %v4306_v7, 0.0  ;;  %v3978_v48 = vsub.f32 %v9451_v11, %v10867_v56  ;;  %v4404_v45 = vmax.f32 %v4244_v1, 0.0  ;;  %v10993_v7 = vld [vmem:[#allocation91_spill] sm:$0xff] }
 0x37f   : > { %v4386_v63 = vmax.f32 %v10986_v16, 0.0  ;;  %v4018_v6 = vsub.f32 %v9453_v41, %v10867_v56  ;;  %v3817_v14 = vpop.permute.xlu0 %3816  ;;  %v4452_v31 = vmax.f32 %v4292_v33, 0.0  ;;  %v3987_v35 = vsub.f32 %v3753_v24, %v10866_v61  ;;  %4729 = vmatpush.msra.mxu1 %v4585_v23  ;;  %v10992_v33 = vld [vmem:[#allocation65_spill] sm:$0xff] }
 0x380   : > { %v4020_v27 = vsub.f32 %v3817_v14, %v10867_v56  ;;  %v4415_v28 = vmax.f32 %v4255_v47, 0.0  ;;  %v3979_v0 = vsub.f32 %v9350_v5, %v10866_v61  ;;  %v4138_v32 = vand.u32 2147483647, %v3978_v48  ;;  %v10997_v48 = vld [vmem:[#allocation67_spill] sm:$0xff] }
 0x381   : > { %v4581_v53 = vmul.f32 %v4421_v57, %v10988_v50  ;;  %v3985_v18 = vsub.f32 %v9414_v34, %v10866_v61  ;;  %v4178_v29 = vand.u32 2147483647, %v4018_v6  ;;  %4730 = vmatpush.msra.mxu1 %v10989_v17  ;;  %v9469_v1 = vmul.f32 %v4468_v12, %v10990_v10  ;;  %v10995_v12 = vld [vmem:[#allocation6_spill] sm:$0xff] }
 0x382   : > { %v4180_v19 = vand.u32 2147483647, %v4020_v27  ;;  %v4298_v24 = vsub.f32 1.0, %v4138_v32  ;;  %v9472_v52 = vmul.f32 %v4386_v63, %v10991_v44  ;;  %v9476_v5 = vmul.f32 %v9243_v9, %v10992_v33  ;;  %v10996_v63 = vld [vmem:[#allocation75_spill] sm:$0xff] }
 0x383   : > { %v9479_v22 = vmul.f32 %v4466_v62, %v10993_v7  ;;  %v4147_v47 = vand.u32 2147483647, %v3987_v35  ;;  %v4338_v34 = vsub.f32 1.0, %v4178_v29  ;;  %4731 = vmatpush.msra.mxu1 %v4581_v53  ;;  %v9482_v54 = vmul.f32 %v4452_v31, %v10994_v30  ;;  %v10999_v7 = vld [vmem:[#allocation102_spill] sm:$0xff]  ;;  %v11000_v30 = vld [vmem:[#allocation49_spill] sm:$0xff] }
 0x384   : > { %v4340_v57 = vsub.f32 1.0, %v4180_v19  ;;  %v9484_v16 = vmax.f32 %v4232_v8, 0.0  ;;  %v4575_v40 = vmul.f32 %v4415_v28, %v10995_v12  ;;  %v9488_v23 = vmul.f32 %v4404_v45, %v10996_v63 }
 0x385   : > { %v9491_v9 = vmul.f32 %v4398_v37, %v10997_v48  ;;  %v9493_v6 = vand.u32 2147483647, %v3979_v0  ;;  %v3975_v62 = vsub.f32 %v9356_v4, %v10866_v61  ;;  %v4145_v35 = vand.u32 2147483647, %v3985_v18  ;;  %4732 = vmatpush.msra.mxu1 %v9142_v55  ;;  %v3757_v31 = vpop.permute.xlu1 %3756  ;;  %v10998_v18 = vld [vmem:[#allocation69_spill] sm:$0xff] }
 0x386   : > { %v4458_v27 = vmax.f32 %v4298_v24, 0.0  ;;  %v9498_v8 = vpop.permute.xlu2 %3888  ;;  %v4500_v32 = vmax.f32 %v4340_v57, 0.0  ;;  %v3989_v28 = vsub.f32 %v3757_v31, %v10866_v61  ;;  %v3990_v45 = vsub.f32 %v3757_v31, %v10867_v56  ;;  %v11001_v31 = vld [vmem:[#allocation165_spill] sm:$0xff] }
 0x387   : > { %v4055_v37 = vsub.f32 %v9498_v8, %v10866_v61  ;;  %v9504_v0 = vpop.permute.xlu0 %3740  ;;  %v4307_v50 = vsub.f32 1.0, %v4147_v47  ;;  %v4498_v53 = vmax.f32 %v4338_v34, 0.0  ;;  %v4019_v4 = vsub.f32 %v3817_v14, %v10866_v61  ;;  %4733 = vmatpush.msra.mxu1 %v10998_v18 }
 0x388   : > { %v3982_v55 = vsub.f32 %v9504_v0, %v10867_v56  ;;  %v3971_v29 = vsub.f32 %v9412_v13, %v10866_v61  ;;  %v4149_v19 = vand.u32 2147483647, %v3989_v28  ;;  %v4150_v17 = vand.u32 2147483647, %v3990_v45 }
 0x389   : > { %v4215_v10 = vand.u32 2147483647, %v4055_v37  ;;  %v4305_v24 = vsub.f32 1.0, %v4145_v35  ;;  %v4017_v44 = vsub.f32 %v9453_v41, %v10866_v61  ;;  %4734 = vmatpush.msra.mxu1 %v4575_v40  ;;  %v9515_v47 = vmul.f32 %v4458_v27, %v10999_v7  ;;  %v11002_v35 = vld [vmem:[#allocation130_spill] sm:$0xff] }
 0x38a   : > { %v4142_v33 = vand.u32 2147483647, %v3982_v55  ;;  %v4309_v14 = vsub.f32 1.0, %v4149_v19  ;;  %v4310_v34 = vsub.f32 1.0, %v4150_v17  ;;  %v9518_v12 = vmul.f32 %v4500_v32, %v11000_v30  ;;  %v11004_v19 = vld [vmem:[#allocation71_spill] sm:$0xff] }
 0x38b   : > { %v4375_v57 = vsub.f32 1.0, %v4215_v10  ;;  %v4467_v63 = vmax.f32 %v4307_v50, 0.0  ;;  %v4179_v13 = vand.u32 2147483647, %v4019_v4  ;;  %4735 = vmatpush.msra.mxu1 %v11001_v31  ;;  %v9522_v28 = vmul.f32 %v4498_v53, %v11002_v35  ;;  %v11005_v10 = vld [vmem:[#allocation114_spill] sm:$0xff] }
 0x38c   : > { %v4302_v48 = vsub.f32 1.0, %v4142_v33  ;;  %v9524_v41 = vand.u32 2147483647, %v3975_v62  ;;  %v3965_v40 = vsub.f32 %v9387_v26, %v10866_v61  ;;  %v4469_v27 = vmax.f32 %v4309_v14, 0.0  ;;  %v11006_v26 = vld [vmem:[#allocation78_spill] sm:$0xff] }
 0x38d   : > { %11003 = vst [vmem:[#allocation31_spill] sm:$0xff] %v9522_v28  ;;  %v4535_v45 = vmax.f32 %v4375_v57, 0.0  ;;  %v4465_v37 = vmax.f32 %v4305_v24, 0.0  ;;  %v4177_v55 = vand.u32 2147483647, %v4017_v44  ;;  %v4470_v18 = vmax.f32 %v4310_v34, 0.0  ;;  %4736 = vmatpush.msra.mxu1 %v11004_v19  ;;  %v3821_v50 = vpop.permute.xlu1 %3820 }
 0x38e   : > { %v4462_v32 = vmax.f32 %v4302_v48, 0.0  ;;  %v4021_v4 = vsub.f32 %v3821_v50, %v10866_v61  ;;  %v4022_v17 = vsub.f32 %v3821_v50, %v10867_v56  ;;  %v4629_v33 = vmul.f32 %v4469_v27, %v11005_v10  ;;  %v11007_v34 = vld [vmem:[#allocation105_spill] sm:$0xff]  ;;  %v11010_v50 = vld [vmem:[#allocation119_spill] sm:$0xff] }
 0x38f   : > { %v9531_v53 = vpop.permute.xlu2 %3800  ;;  %v9533_v62 = vpop.permute.xlu0 %3804  ;;  %v4695_v7 = vmul.f32 %v4535_v45, %v11006_v26  ;;  %v4131_v14 = vand.u32 2147483647, %v3971_v29  ;;  %v4339_v24 = vsub.f32 1.0, %v4179_v13  ;;  %4737 = vmatpush.msra.mxu1 %v9189_v36  ;;  %v4627_v57 = vmul.f32 %v4467_v63, %v11007_v34  ;;  %v11008_v27 = vld [vmem:[#allocation77_spill] sm:$0xff]  ;;  %v11009_v45 = vld [vmem:[#allocation15_spill] sm:$0xff] }
 0x390   : > { %v4012_v44 = vsub.f32 %v9531_v53, %v10867_v56  ;;  %v3981_v30 = vsub.f32 %v9504_v0, %v10866_v61  ;;  %v4181_v48 = vand.u32 2147483647, %v4021_v4  ;;  %v4182_v31 = vand.u32 2147483647, %v4022_v17  ;;  %4743 = vmatpush.msra.mxu2 %v4629_v33  ;;  %v11011_v0 = vld [vmem:[#allocation63_spill] sm:$0xff]  ;;  %v9554_v4 = vld [vmem:[%s9984_s2 + $0x8] sm:$0xff] }
 0x391   : > { %v4014_v35 = vsub.f32 %v9533_v62, %v10867_v56  ;;  %4802 = vmatpush.msrb.mxu1 %v11008_v27  ;;  %v4337_v29 = vsub.f32 1.0, %v4177_v55  ;;  %4782 = vmatpush.msrb.mxu0 %v4695_v7  ;;  %v4625_v19 = vmul.f32 %v4465_v37, %v11009_v45  ;;  %v9548_v36 = vmul.f32 %v4470_v18, %v11010_v50  ;;  %v11012_v17 = vld [vmem:[#allocation97_spill] sm:$0xff] }
 0x392   : > { %v4172_v13 = vand.u32 2147483647, %v4012_v44  ;;  %v4341_v63 = vsub.f32 1.0, %v4181_v48  ;;  %v4342_v10 = vsub.f32 1.0, %v4182_v31  ;;  %4744 = vmatpush.msra.mxu2 %v4627_v57  ;;  %v9557_v55 = vmul.f32 %v4462_v32, %v11012_v17  ;;  %4738 = vmatmul.f32.vlgmr.msra.gmra.mxu1 %v9554_v4 }
 0x393   : > { %v4174_v26 = vand.u32 2147483647, %v4014_v35  ;;  %4803 = vmatpush.msrb.mxu1 %v11011_v0  ;;  %v4299_v33 = vsub.f32 1.0, %v9493_v6  ;;  %v4295_v37 = vsub.f32 1.0, %v9524_v41  ;;  %v3977_v18 = vsub.f32 %v9451_v11, %v10866_v61  ;;  %v11015_v0 = vld [vmem:[#allocation138_spill] sm:$0xff] }
 0x394   : > { %v4332_v7 = vsub.f32 1.0, %v4172_v13  ;;  %v4499_v44 = vmax.f32 %v4339_v24, 0.0  ;;  %v4141_v34 = vand.u32 2147483647, %v3981_v30  ;;  %v4501_v57 = vmax.f32 %v4341_v63, 0.0  ;;  %4745 = vmatpush.msra.mxu2 %v4625_v19  ;;  %v11013_v24 = vld [vmem:[#allocation54_spill] sm:$0xff] }
 0x395   : > { %v4334_v48 = vsub.f32 1.0, %v4174_v26  ;;  %4804 = vmatpush.msrb.mxu1 %v9488_v23  ;;  %v4125_v31 = vand.u32 2147483647, %v3965_v40  ;;  %v4291_v32 = vsub.f32 1.0, %v4131_v14  ;;  %v4497_v35 = vmax.f32 %v4337_v29, 0.0  ;;  %v3745_v6 = vpop.permute.xlu1 %3744  ;;  %v11014_v30 = vld [vmem:[#allocation118_spill] sm:$0xff] }
 0x396   : > { %v4502_v27 = vmax.f32 %v4342_v10, 0.0  ;;  %v3983_v41 = vsub.f32 %v3745_v6, %v10866_v61  ;;  %v3984_v11 = vsub.f32 %v3745_v6, %v10867_v56  ;;  %v4661_v63 = vmul.f32 %v4501_v57, %v11014_v30 }
 0x397   : > { %v4494_v45 = vmax.f32 %v4334_v48, 0.0  ;;  %v9567_v13 = vpop.permute.xlu2 %3876  ;;  %v9569_v50 = vpop.permute.xlu0 %3880  ;;  %4805 = vmatpush.msrb.mxu1 %v11013_v24  ;;  %v4459_v23 = vmax.f32 %v4299_v33, 0.0  ;;  %v4455_v19 = vmax.f32 %v4295_v37, 0.0  ;;  %v4137_v40 = vand.u32 2147483647, %v3977_v18  ;;  %v11016_v24 = vld [vmem:[#allocation115_spill] sm:$0xff] }
 0x398   : > { %v4492_v14 = vmax.f32 %v4332_v7, 0.0  ;;  %v4301_v29 = vsub.f32 1.0, %v4141_v34  ;;  %v4143_v10 = vand.u32 2147483647, %v3983_v41  ;;  %v4144_v26 = vand.u32 2147483647, %v3984_v11  ;;  %4763 = vmatpush.msra.mxu3 %v4661_v63 }
 0x399   : > { %4806 = vmatpush.msrb.mxu1 %v9442_v39  ;;  %v4659_v17 = vmul.f32 %v4499_v44, %v11015_v0  ;;  %v4285_v48 = vsub.f32 1.0, %v4125_v31  ;;  %v4451_v6 = vmax.f32 %v4291_v32, 0.0  ;;  %v4013_v28 = vsub.f32 %v9533_v62, %v10866_v61  ;;  %v11017_v18 = vld [vmem:[#allocation140_spill] sm:$0xff]  ;;  %v11018_v7 = vld [vmem:[#allocation127_spill] sm:$0xff]  ;;  %v11020_v32 = vld [vmem:[#allocation126_spill] sm:$0xff] }
 0x39a   : > { %v9578_v25 = vmul.f32 %v4502_v27, %v11016_v24  ;;  %v4011_v33 = vsub.f32 %v9531_v53, %v10866_v61  ;;  %v4303_v37 = vsub.f32 1.0, %v4143_v10  ;;  %v4657_v39 = vmul.f32 %v4497_v35, %v11017_v18  ;;  %v11019_v31 = vld [vmem:[#allocation51_spill] sm:$0xff]  ;;  %v11025_v18 = vld [vmem:[#allocation29_spill] sm:$0xff] }
 0x39b   : > { %4807 = vmatpush.msrb.mxu1 %v9491_v9  ;;  %4764 = vmatpush.msra.mxu3 %v4659_v17  ;;  %v9585_v34 = vmul.f32 %v4494_v45, %v11018_v7  ;;  %v4297_v44 = vsub.f32 1.0, %v4137_v40  ;;  %v4304_v57 = vsub.f32 1.0, %v4144_v26  ;;  %v4552_v62 = vmul.f32 %v9484_v16, %v11019_v31  ;;  %v11021_v9 = vld [vmem:[#allocation93_spill] sm:$0xff]  ;;  %v11022_v40 = vld [vmem:[#allocation27_spill] sm:$0xff]  ;;  %v11023_v16 = vld [vmem:[#allocation36_spill] sm:$0xff] }
 0x39c   : > { %v9590_v27 = vmul.f32 %v4492_v14, %v11020_v32  ;;  %v4056_v53 = vsub.f32 %v9498_v8, %v10867_v56  ;;  %v4461_v41 = vmax.f32 %v4301_v29, 0.0  ;;  %v4463_v11 = vmax.f32 %v4303_v37, 0.0 }
 0x39d   : > { %4808 = vmatpush.msrb.mxu1 %v9446_v59  ;;  %4765 = vmatpush.msra.mxu3 %v4657_v39  ;;  %v4619_v35 = vmul.f32 %v4459_v23, %v11021_v9  ;;  %v9596_v45 = vmax.f32 %v4285_v48, 0.0  ;;  %v4173_v30 = vand.u32 2147483647, %v4013_v28  ;;  %v4615_v10 = vmul.f32 %v4455_v19, %v11022_v40  ;;  %v11024_v23 = vld [vmem:[#allocation99_spill] sm:$0xff] }
 0x39e   : > { %v3809_v63 = vpop.permute.xlu1 %3808  ;;  %v9600_v26 = vmul.f32 %v4451_v6, %v11023_v16  ;;  %v4171_v14 = vand.u32 2147483647, %v4011_v33  ;;  %v4623_v17 = vmul.f32 %v4463_v11, %v11024_v23  ;;  %v4457_v28 = vmax.f32 %v4297_v44, 0.0 }
 0x39f   : > { %v4015_v0 = vsub.f32 %v3809_v63, %v10866_v61  ;;  %v4016_v8 = vsub.f32 %v3809_v63, %v10867_v56  ;;  %v9604_v29 = vpop.permute.xlu2 %3788  ;;  %v9606_v59 = vpop.permute.xlu0 %3792  ;;  %4809 = vmatpush.msrb.mxu1 %v9216_v3  ;;  %v4464_v48 = vmax.f32 %v4304_v57, 0.0  ;;  %v4216_v24 = vand.u32 2147483647, %v4056_v53 }
 0x3a0   : > { %v4006_v19 = vsub.f32 %v9604_v29, %v10867_v56  ;;  %v4008_v6 = vsub.f32 %v9606_v59, %v10867_v56  ;;  %4746 = vmatpush.msra.mxu2 %v4623_v17  ;;  %v4621_v39 = vmul.f32 %v4461_v41, %v11025_v18  ;;  %v4333_v7 = vsub.f32 1.0, %v4173_v30  ;;  %v11026_v30 = vld [vmem:[#allocation111_spill] sm:$0xff] }
 0x3a1   : > { %v4175_v33 = vand.u32 2147483647, %v4015_v0  ;;  %v4176_v37 = vand.u32 2147483647, %v4016_v8  ;;  %4810 = vmatpush.msrb.mxu1 %v4552_v62  ;;  %v4051_v3 = vsub.f32 %v9569_v50, %v10866_v61  ;;  %v4052_v44 = vsub.f32 %v9569_v50, %v10867_v56  ;;  %v11028_v0 = vld [vmem:[#allocation98_spill] sm:$0xff] }
 0x3a2   : > { %v4166_v57 = vand.u32 2147483647, %v4006_v19  ;;  %v4331_v31 = vsub.f32 1.0, %v4171_v14  ;;  %v4168_v9 = vand.u32 2147483647, %v4008_v6  ;;  %4747 = vmatpush.msra.mxu2 %v4621_v39  ;;  %v4049_v62 = vsub.f32 %v9567_v13, %v10866_v61  ;;  %v11027_v14 = vld [vmem:[#allocation104_spill] sm:$0xff] }
 0x3a3   : > { %v4335_v32 = vsub.f32 1.0, %v4175_v33  ;;  %v4336_v11 = vsub.f32 1.0, %v4176_v37  ;;  %4811 = vmatpush.msrb.mxu1 %v9222_v21  ;;  %v4050_v53 = vsub.f32 %v9567_v13, %v10867_v56  ;;  %v9625_v63 = vmul.f32 %v4464_v48, %v11026_v30 }
 0x3a4   : > { %v4326_v41 = vsub.f32 1.0, %v4166_v57  ;;  %v4376_v40 = vsub.f32 1.0, %v4216_v24  ;;  %v4328_v16 = vsub.f32 1.0, %v4168_v9  ;;  %4748 = vmatpush.msra.mxu2 %v4619_v35  ;;  %v4617_v8 = vmul.f32 %v4457_v28, %v11028_v0  ;;  %v11029_v24 = vld [vmem:[#allocation124_spill] sm:$0xff]  ;;  %v11034_v0 = vld [vmem:[#allocation134_spill] sm:$0xff] }
 0x3a5   : > { %v4495_v50 = vmax.f32 %v4335_v32, 0.0  ;;  %4812 = vmatpush.msrb.mxu1 %v11027_v14  ;;  %v4493_v21 = vmax.f32 %v4333_v7, 0.0  ;;  %v4211_v23 = vand.u32 2147483647, %v4051_v3  ;;  %v4212_v17 = vand.u32 2147483647, %v4052_v44 }
 0x3a6   : > { %v4496_v19 = vmax.f32 %v4336_v11, 0.0  ;;  %v3885_v6 = vpop.permute.xlu1 %3884  ;;  %v4488_v33 = vmax.f32 %v4328_v16, 0.0  ;;  %4749 = vmatpush.msra.mxu2 %v4617_v8  ;;  %v4491_v35 = vmax.f32 %v4331_v31, 0.0  ;;  %v4209_v39 = vand.u32 2147483647, %v4049_v62  ;;  %v11030_v11 = vld [vmem:[#allocation164_spill] sm:$0xff] }
 0x3a7   : > { %v4053_v13 = vsub.f32 %v3885_v6, %v10866_v61  ;;  %v4054_v37 = vsub.f32 %v3885_v6, %v10867_v56  ;;  %v9631_v48 = vpop.permute.xlu0 %3868  ;;  %4813 = vmatpush.msrb.mxu1 %v9472_v52  ;;  %v4655_v18 = vmul.f32 %v4495_v50, %v11029_v24  ;;  %v4210_v28 = vand.u32 2147483647, %v4050_v53  ;;  %v9640_v30 = vpop.permute.xlu2 %3864  ;;  %v11031_v31 = vld [vmem:[#allocation146_spill] sm:$0xff]  ;;  %v11032_v53 = vld [vmem:[#allocation113_spill] sm:$0xff] }
 0x3a8   : > { %v4486_v7 = vmax.f32 %v4326_v41, 0.0  ;;  %v4536_v3 = vmax.f32 %v4376_v40, 0.0  ;;  %v4007_v44 = vsub.f32 %v9606_v59, %v10866_v61  ;;  %4750 = vmatpush.msra.mxu2 %v4615_v10  ;;  %v4371_v9 = vsub.f32 1.0, %v4211_v23  ;;  %v11033_v10 = vld [vmem:[#allocation128_spill] sm:$0xff]  ;;  %v11035_v23 = vld [vmem:[#allocation41_spill] sm:$0xff] }
 0x3a9   : > { %v4213_v57 = vand.u32 2147483647, %v4053_v13  ;;  %v4214_v32 = vand.u32 2147483647, %v4054_v37  ;;  %4814 = vmatpush.msrb.mxu1 %v11030_v11  ;;  %v4005_v52 = vsub.f32 %v9604_v29, %v10866_v61  ;;  %4766 = vmatpush.msra.mxu3 %v4655_v18  ;;  %v4653_v62 = vmul.f32 %v4493_v21, %v11031_v31 }
 0x3aa   : > { %v9644_v41 = vmul.f32 %v4496_v19, %v11032_v53  ;;  %v4372_v40 = vsub.f32 1.0, %v4212_v17  ;;  %4751 = vmatpush.msra.mxu2 %v9361_v49  ;;  %v9649_v16 = vmul.f32 %v4488_v33, %v11033_v10  ;;  %v4369_v14 = vsub.f32 1.0, %v4209_v39  ;;  %v11036_v19 = vld [vmem:[#allocation163_spill] sm:$0xff]  ;;  %v11039_v49 = vld [vmem:[#allocation166_spill] sm:$0xff]  ;;  %v11040_v33 = vld [vmem:[#allocation185_spill] sm:$0xff] }
 0x3ab   : > { %v4373_v50 = vsub.f32 1.0, %v4213_v57  ;;  %v4374_v59 = vsub.f32 1.0, %v4214_v32  ;;  %4815 = vmatpush.msrb.mxu1 %v9476_v5  ;;  %v4370_v29 = vsub.f32 1.0, %v4210_v28  ;;  %4767 = vmatpush.msra.mxu3 %v4653_v62  ;;  %v4651_v8 = vmul.f32 %v4491_v35, %v11034_v0  ;;  %v11038_v5 = vld [vmem:[#allocation109_spill] sm:$0xff] }
 0x3ac   : > { %v9653_v21 = vmul.f32 %v4486_v7, %v11035_v23  ;;  %v11037_v6 = vsub.f32 1.0, %v11036_v19  ;;  %v4167_v13 = vand.u32 2147483647, %v4007_v44  ;;  %4752 = vmatpush.msra.mxu2 %v9600_v26  ;;  %v3564_v18 = vmul.f32 %v11040_v33, %v11039_v49  ;;  %v11041_v39 = vld [vmem:[#allocation61_spill] sm:$0xff]  ;;  %v11043_v26 = vld [vmem:[#allocation184_spill] sm:$0xff] }
 0x3ad   : > { %v4533_v37 = vmax.f32 %v4373_v50, 0.0  ;;  %v4534_v24 = vmax.f32 %v4374_v59, 0.0  ;;  %4816 = vmatpush.msrb.mxu1 %v11038_v5  ;;  %v4696_v28 = vmul.f32 %v4536_v3, %v11041_v39  ;;  %v4531_v57 = vmax.f32 %v4371_v9, 0.0  ;;  %4768 = vmatpush.msra.mxu3 %v4651_v8  ;;  %v11042_v62 = vld [vmem:[#allocation153_spill] sm:$0xff]  ;;  %v11044_v9 = vld [vmem:[#allocation30_spill] sm:$0xff]  ;;  %v11045_v8 = vld [vmem:[#allocation183_spill] sm:$0xff] }
 0x3ae   : > { %v3403_v17 = vmax.f32 %v11037_v6, 0.0  ;;  %v4165_v35 = vand.u32 2147483647, %v4005_v52  ;;  %v3797_v7 = vpop.permute.xlu1 %3796  ;;  %v4532_v32 = vmax.f32 %v4372_v40, 0.0  ;;  %4753 = vmatpush.msra.mxu2 %v9364_v46  ;;  %v4529_v50 = vmax.f32 %v4369_v14, 0.0  ;;  %v11047_v6 = vld [vmem:[#allocation64_spill] sm:$0xff] }
 0x3af   : > { %v4009_v11 = vsub.f32 %v3797_v7, %v10866_v61  ;;  %v4010_v44 = vsub.f32 %v3797_v7, %v10867_v56  ;;  %v9664_v31 = vpop.permute.xlu0 %3780  ;;  %4817 = vmatpush.msrb.mxu1 %v11042_v62  ;;  %v4693_v53 = vmul.f32 %v4533_v37, %v11043_v26  ;;  %v4530_v59 = vmax.f32 %v4370_v29, 0.0  ;;  %v11046_v29 = vld [vmem:[#allocation147_spill] sm:$0xff]  ;;  %v11048_v49 = vld [vmem:[#allocation148_spill] sm:$0xff]  ;;  %v11049_v33 = vld [vmem:[#allocation177_spill] sm:$0xff] }
 0x3b0   : > { %v4045_v3 = vsub.f32 %v9631_v48, %v10866_v61  ;;  %v4605_v52 = vmul.f32 %v9596_v45, %v11044_v9  ;;  %v4327_v40 = vsub.f32 1.0, %v4167_v13  ;;  %4754 = vmatpush.msra.mxu2 %v9324_v51  ;;  %v4694_v23 = vmul.f32 %v4534_v24, %v11045_v8  ;;  %v11050_v39 = vld [vmem:[#allocation45_spill] sm:$0xff] }
 0x3b1   : > { %4882 = vmatpush.msra.mxu1 %v4696_v28  ;;  %v4169_v10 = vand.u32 2147483647, %v4009_v11  ;;  %v4170_v0 = vand.u32 2147483647, %v4010_v44  ;;  %4783 = vmatpush.msrb.mxu0 %v4693_v53  ;;  %v4325_v46 = vsub.f32 1.0, %v4165_v35  ;;  %v4043_v14 = vsub.f32 %v9640_v30, %v10866_v61  ;;  %v11052_v11 = vld [vmem:[#allocation180_spill] sm:$0xff] }
 0x3b2   : > { %v4691_v19 = vmul.f32 %v4531_v57, %v11046_v29  ;;  %v3563_v37 = vmul.f32 %v3403_v17, %v11047_v6  ;;  %v4046_v5 = vsub.f32 %v9631_v48, %v10867_v56  ;;  %4755 = vmatpush.msra.mxu2 %v4605_v52  ;;  %v4692_v51 = vmul.f32 %v4532_v32, %v11048_v49  ;;  %v9687_v57 = vpop.permute.xlu2 %3776  ;;  %v11054_v53 = vld [vmem:[#allocation46_spill] sm:$0xff] }
 0x3b3   : > { %v4329_v45 = vsub.f32 1.0, %v4169_v10  ;;  %v4330_v13 = vsub.f32 1.0, %v4170_v0  ;;  %4883 = vmatpush.msra.mxu1 %v4694_v23  ;;  %v11051_v24 = vsub.f32 %v11049_v33, %v11050_v39  ;;  %v4044_v35 = vsub.f32 %v9640_v30, %v10867_v56  ;;  %v11056_v23 = vld [vmem:[#allocation37_spill] sm:$0xff] }
 0x3b4   : > { %v4205_v7 = vand.u32 2147483647, %v4045_v3  ;;  %4784 = vmatpush.msrb.mxu0 %v4691_v19  ;;  %v4689_v17 = vmul.f32 %v4529_v50, %v3563_v37  ;;  %v11053_v48 = vsub.f32 1.0, %v11052_v11  ;;  %v4487_v62 = vmax.f32 %v4327_v40, 0.0  ;;  %4756 = vmatpush.msra.mxu2 %v9327_v43 }
 0x3b5   : > { %v3077_v28 = vand.u32 2147483647, %v11051_v24  ;;  %v4489_v26 = vmax.f32 %v4329_v45, 0.0  ;;  %4884 = vmatpush.msra.mxu1 %v4692_v51  ;;  %v4690_v32 = vmul.f32 %v4530_v59, %v3564_v18  ;;  %v11055_v9 = vsub.f32 %v11049_v33, %v11054_v53  ;;  %v11057_v18 = vld [vmem:[#allocation182_spill] sm:$0xff]  ;;  %v11060_v33 = vld [vmem:[#allocation116_spill] sm:$0xff] }
 0x3b6   : > { %v3401_v44 = vmax.f32 %v11053_v48, 0.0  ;;  %v4485_v10 = vmax.f32 %v4325_v46, 0.0  ;;  %v4203_v30 = vand.u32 2147483647, %v4043_v14  ;;  %v4490_v3 = vmax.f32 %v4330_v13, 0.0  ;;  %4785 = vmatpush.msrb.mxu0 %v4689_v17  ;;  %v3873_v0 = vpop.permute.xlu1 %3872  ;;  %4757 = vmatpush.msra.mxu2 %v9286_v15  ;;  %v11059_v13 = vld [vmem:[#allocation125_spill] sm:$0xff] }
 0x3b7   : > { %v3078_v52 = vand.u32 2147483647, %v11055_v9  ;;  %v4206_v8 = vand.u32 2147483647, %v4046_v5  ;;  %4885 = vmatpush.msra.mxu1 %v4690_v32  ;;  %v4047_v50 = vsub.f32 %v3873_v0, %v10866_v61  ;;  %v4048_v40 = vsub.f32 %v3873_v0, %v10867_v56  ;;  %v9704_v45 = vpop.permute.xlu0 %3856  ;;  %v11063_v9 = vld [vmem:[#allocation151_spill] sm:$0xff] }
 0x3b8   : > { %v4649_v43 = vmul.f32 %v4489_v26, %v11056_v23  ;;  %v11058_v59 = vsub.f32 1.0, %v11057_v18  ;;  %v3237_v19 = vsub.f32 1.0, %v3077_v28  ;;  %v4204_v6 = vand.u32 2147483647, %v4044_v35  ;;  %4822 = vmatpush.msrb.mxu2 %v9399_v42  ;;  %v11061_v28 = vld [vmem:[#allocation35_spill] sm:$0xff]  ;;  %v11066_v23 = vld [vmem:[#allocation112_spill] sm:$0xff] }
 0x3b9   : > { %v4365_v46 = vsub.f32 1.0, %v4205_v7  ;;  %v4001_v14 = vsub.f32 %v9664_v31, %v10866_v61  ;;  %v4207_v37 = vand.u32 2147483647, %v4047_v50  ;;  %v4208_v5 = vand.u32 2147483647, %v4048_v40 }
 0x3ba   : > { %v3402_v29 = vmax.f32 %v11058_v59, 0.0  ;;  %4769 = vmatpush.msra.mxu3 %v4649_v43  ;;  %v4647_v15 = vmul.f32 %v4487_v62, %v11059_v13  ;;  %v3238_v49 = vsub.f32 1.0, %v3078_v52  ;;  %v3999_v51 = vsub.f32 %v9687_v57, %v10866_v61  ;;  %4823 = vmatpush.msrb.mxu2 %v9290_v60  ;;  %v11062_v62 = vld [vmem:[#allocation81_spill] sm:$0xff]  ;;  %v11068_v43 = vld [vmem:[#allocation168_spill] sm:$0xff] }
 0x3bb   : > { %v4645_v24 = vmul.f32 %v4485_v10, %v11060_v33  ;;  %v9712_v42 = vmul.f32 %v4490_v3, %v11061_v28  ;;  %v4363_v35 = vsub.f32 1.0, %v4203_v30  ;;  %v4366_v7 = vsub.f32 1.0, %v4206_v8  ;;  %v11064_v52 = vld [vmem:[#allocation145_spill] sm:$0xff]  ;;  %v11065_v10 = vld [vmem:[#allocation167_spill] sm:$0xff]  ;;  %v11071_v28 = vld [vmem:[#allocation72_spill] sm:$0xff] }
 0x3bc   : > { %v4367_v17 = vsub.f32 1.0, %v4207_v37  ;;  %v4368_v11 = vsub.f32 1.0, %v4208_v5  ;;  %4770 = vmatpush.msra.mxu3 %v4647_v15  ;;  %v3397_v48 = vmax.f32 %v3237_v19, 0.0  ;;  %v4364_v26 = vsub.f32 1.0, %v4204_v6  ;;  %4824 = vmatpush.msrb.mxu2 %v11062_v62  ;;  %v3853_v6 = vpop.permute.xlu2 %3852  ;;  %v11069_v37 = vld [vmem:[#allocation79_spill] sm:$0xff]  ;;  %v11070_v15 = vld [vmem:[#allocation120_spill] sm:$0xff] }
 0x3bd   : > { %v4525_v32 = vmax.f32 %v4365_v46, 0.0  ;;  %v3559_v0 = vmul.f32 %v11064_v52, %v11063_v9  ;;  %v4161_v50 = vand.u32 2147483647, %v4001_v14  ;;  %v3561_v3 = vmul.f32 %v3401_v44, %v11065_v10  ;;  %v11073_v9 = vld [vmem:[#allocation160_spill] sm:$0xff]  ;;  %v11074_v10 = vld [vmem:[#allocation17_spill] sm:$0xff] }
 0x3be   : > { %v4527_v60 = vmax.f32 %v4367_v17, 0.0  ;;  %v4528_v40 = vmax.f32 %v4368_v11, 0.0  ;;  %4771 = vmatpush.msra.mxu3 %v4645_v24  ;;  %v11067_v30 = vsub.f32 %v11066_v23, %v11054_v53  ;;  %v3562_v18 = vmul.f32 %v3402_v29, %v11068_v43  ;;  %v9724_v46 = vpop.permute.xlu1 %3784  ;;  %4825 = vmatpush.msrb.mxu2 %v11069_v37  ;;  %v11076_v23 = vld [vmem:[#allocation32_spill] sm:$0xff] }
 0x3bf   : > { %v3398_v59 = vmax.f32 %v3238_v49, 0.0  ;;  %v4159_v19 = vand.u32 2147483647, %v3999_v51  ;;  %v4523_v14 = vmax.f32 %v4363_v35, 0.0  ;;  %v4526_v5 = vmax.f32 %v4366_v7, 0.0  ;;  %v11072_v49 = vld [vmem:[#allocation159_spill] sm:$0xff] }
 0x3c0   : > { %v9721_v8 = vand.u32 2147483647, %v11067_v30  ;;  %v4003_v13 = vsub.f32 %v9724_v46, %v10866_v61  ;;  %v4687_v44 = vmul.f32 %v4527_v60, %v3561_v3  ;;  %v2911_v33 = vsub.f32 %v11070_v15, %v11050_v39  ;;  %4826 = vmatpush.msrb.mxu2 %v11071_v28  ;;  %v11079_v37 = vld [vmem:[#allocation52_spill] sm:$0xff] }
 0x3c1   : > { %v4524_v24 = vmax.f32 %v4364_v26, 0.0  ;;  %v4685_v29 = vmul.f32 %v4525_v32, %v3559_v0  ;;  %v3557_v51 = vmul.f32 %v3397_v48, %v11072_v49  ;;  %v4321_v17 = vsub.f32 1.0, %v4161_v50  ;;  %v9742_v0 = vpop.permute.xlu0 %3768  ;;  %v11075_v50 = vld [vmem:[#allocation142_spill] sm:$0xff] }
 0x3c2   : > { %v4039_v11 = vsub.f32 %v9704_v45, %v10866_v61  ;;  %v4163_v62 = vand.u32 2147483647, %v4003_v13  ;;  %4786 = vmatpush.msrb.mxu0 %v4687_v44  ;;  %v4688_v35 = vmul.f32 %v4528_v40, %v3562_v18  ;;  %v2912_v7 = vsub.f32 %v11070_v15, %v11054_v53  ;;  %4827 = vmatpush.msrb.mxu2 %v11074_v10  ;;  %v11078_v18 = vld [vmem:[#allocation181_spill] sm:$0xff] }
 0x3c3   : > { %v3558_v52 = vmul.f32 %v3398_v59, %v11073_v9  ;;  %v4319_v60 = vsub.f32 1.0, %v4159_v19  ;;  %v4040_v26 = vsub.f32 %v9704_v45, %v10867_v56  ;;  %v4037_v48 = vsub.f32 %v3853_v6, %v10866_v61 }
 0x3c4   : > { %v4323_v32 = vsub.f32 1.0, %v4163_v62  ;;  %4886 = vmatpush.msra.mxu1 %v4688_v35  ;;  %4787 = vmatpush.msrb.mxu0 %v4685_v29  ;;  %v4686_v40 = vmul.f32 %v4526_v5, %v11075_v50  ;;  %v4683_v3 = vmul.f32 %v4523_v14, %v3557_v51  ;;  %v11077_v30 = vsub.f32 %v11076_v23, %v11054_v53  ;;  %v11080_v62 = vld [vmem:[#allocation70_spill] sm:$0xff] }
 0x3c5   : > { %v3235_v59 = vsub.f32 1.0, %v11078_v18  ;;  %v3071_v45 = vand.u32 2147483647, %v2911_v33  ;;  %v4038_v19 = vsub.f32 %v3853_v6, %v10867_v56  ;;  %4828 = vmatpush.msrb.mxu2 %v11079_v37  ;;  %v4481_v13 = vmax.f32 %v4321_v17, 0.0  ;;  %v11081_v17 = vld [vmem:[#allocation108_spill] sm:$0xff]  ;;  %v11085_v18 = vld [vmem:[#allocation38_spill] sm:$0xff] }
 0x3c6   : > { %v9748_v43 = vand.u32 2147483647, %v11077_v30  ;;  %v4199_v44 = vand.u32 2147483647, %v4039_v11  ;;  %v4483_v15 = vmax.f32 %v4323_v32, 0.0  ;;  %4887 = vmatpush.msra.mxu1 %v4686_v40  ;;  %4788 = vmatpush.msrb.mxu0 %v4683_v3  ;;  %v4684_v28 = vmul.f32 %v4524_v24, %v3558_v52  ;;  %v3861_v51 = vpop.permute.xlu1 %3860  ;;  %v9758_v24 = vpop.permute.xlu2 %3764  ;;  %v11084_v30 = vld [vmem:[#allocation73_spill] sm:$0xff] }
 0x3c7   : > { %v3236_v14 = vsub.f32 1.0, %v9721_v8  ;;  %v3072_v5 = vand.u32 2147483647, %v2912_v7  ;;  %v4479_v29 = vmax.f32 %v4319_v60, 0.0  ;;  %v4200_v49 = vand.u32 2147483647, %v4040_v26  ;;  %4829 = vmatpush.msrb.mxu2 %v11080_v62 }
 0x3c8   : > { %v4197_v35 = vand.u32 2147483647, %v4037_v48  ;;  %4888 = vmatpush.msra.mxu1 %v4684_v28  ;;  %v4041_v6 = vsub.f32 %v3861_v51, %v10866_v61  ;;  %v4042_v33 = vsub.f32 %v3861_v51, %v10867_v56  ;;  %v4643_v11 = vmul.f32 %v4483_v15, %v11081_v17  ;;  %v11082_v7 = vld [vmem:[#allocation16_spill] sm:$0xff]  ;;  %v11083_v48 = vld [vmem:[#allocation121_spill] sm:$0xff] }
 0x3c9   : > { %v3395_v9 = vmax.f32 %v3235_v59, 0.0  ;;  %v3231_v10 = vsub.f32 1.0, %v3071_v45  ;;  %v4198_v32 = vand.u32 2147483647, %v4038_v19  ;;  %v3995_v8 = vsub.f32 %v9742_v0, %v10866_v61  ;;  %4830 = vmatpush.msrb.mxu2 %v11082_v7  ;;  %v11086_v62 = vld [vmem:[#allocation84_spill] sm:$0xff]  ;;  %v3845_v17 = vpop.permute.xlu0 %3844 }
 0x3ca   : > { %v4359_v52 = vsub.f32 1.0, %v4199_v44  ;;  %v4201_v60 = vand.u32 2147483647, %v4041_v6  ;;  %v4202_v26 = vand.u32 2147483647, %v4042_v33  ;;  %4772 = vmatpush.msra.mxu3 %v4643_v11  ;;  %v4641_v50 = vmul.f32 %v4481_v13, %v11083_v48  ;;  %v11087_v13 = vld [vmem:[#allocation137_spill] sm:$0xff] }
 0x3cb   : > { %v3396_v40 = vmax.f32 %v3236_v14, 0.0  ;;  %v3232_v3 = vsub.f32 1.0, %v3072_v5  ;;  %v4360_v23 = vsub.f32 1.0, %v4200_v49  ;;  %4831 = vmatpush.msrb.mxu2 %v11084_v30  ;;  %v4639_v59 = vmul.f32 %v4479_v29, %v11085_v18  ;;  %v11088_v14 = vld [vmem:[#allocation139_spill] sm:$0xff]  ;;  %v11089_v29 = vld [vmem:[#allocation161_spill] sm:$0xff] }
 0x3cc   : > { %v4357_v45 = vsub.f32 1.0, %v4197_v35  ;;  %v3993_v19 = vsub.f32 %v9758_v24, %v10866_v61  ;;  %v4361_v37 = vsub.f32 1.0, %v4201_v60  ;;  %v4362_v15 = vsub.f32 1.0, %v4202_v26  ;;  %4773 = vmatpush.msra.mxu3 %v4641_v50  ;;  %v9775_v11 = vld [vmem:[%s9984_s2 + $0x10] sm:$0xff]  ;;  %v4697_v50 = vld [vmem:[%s9984_s2] sm:$0xff] }
 0x3cd   : > { %v3391_v44 = vmax.f32 %v3231_v10, 0.0  ;;  %v4358_v28 = vsub.f32 1.0, %v4198_v32  ;;  %v4155_v51 = vand.u32 2147483647, %v3995_v8  ;;  %4832 = vmatpush.msrb.mxu2 %v11086_v62  ;;  %v3553_v5 = vmul.f32 %v11088_v14, %v11087_v13  ;;  %v11090_v10 = vld [vmem:[#allocation129_spill] sm:$0xff]  ;;  %v11091_v8 = vld [vmem:[#allocation162_spill] sm:$0xff]  ;;  %4718 = vmatmul.f32.vlgmr.msra.gmra.mxu0 %v4697_v50 }
 0x3ce   : > { %v4519_v49 = vmax.f32 %v4359_v52, 0.0  ;;  %v4521_v6 = vmax.f32 %v4361_v37, 0.0  ;;  %v4522_v33 = vmax.f32 %v4362_v15, 0.0  ;;  %4774 = vmatpush.msra.mxu3 %v4639_v59  ;;  %v3555_v35 = vmul.f32 %v3395_v9, %v11089_v29  ;;  %v9779_v48 = vpop.permute.xlu1 %3772  ;;  %v11092_v52 = vld [vmem:[#allocation62_spill] sm:$0xff]  ;;  %4758 = vmatmul.f32.vlgmr.msra.gmra.mxu2 %v9775_v11  ;;  %v11094_v15 = vld [vmem:[#allocation155_spill] sm:$0xff] }
 0x3cf   : > { %v3229_v32 = vsub.f32 1.0, %v11090_v10  ;;  %v3556_v7 = vmul.f32 %v3396_v40, %v11091_v8  ;;  %v3392_v60 = vmax.f32 %v3232_v3, 0.0  ;;  %v4520_v26 = vmax.f32 %v4360_v23, 0.0  ;;  %4833 = vmatpush.msrb.mxu2 %v11092_v52  ;;  %v11093_v23 = vld [vmem:[#allocation39_spill] sm:$0xff]  ;;  %4818 = vmatmul.f32.vlgmr.msrb.gmra.mxu1 %v4697_v50  ;;  %v11097_v10 = vld [vmem:[#allocation100_spill] sm:$0xff] }
 0x3d0   : > { %v4517_v9 = vmax.f32 %v4357_v45, 0.0  ;;  %v4153_v30 = vand.u32 2147483647, %v3993_v19  ;;  %v3997_v18 = vsub.f32 %v9779_v48, %v10866_v61  ;;  %v4681_v59 = vmul.f32 %v4521_v6, %v3555_v35  ;;  %v11095_v29 = vld [vmem:[#allocation103_spill] sm:$0xff]  ;;  %v11099_v8 = vld [vmem:[#allocation136_spill] sm:$0xff] }
 0x3d1   : > { %v4518_v40 = vmax.f32 %v4358_v28, 0.0  ;;  %v4315_v3 = vsub.f32 1.0, %v4155_v51  ;;  %4834 = vmatpush.msrb.mxu2 %v11093_v23  ;;  %v4682_v37 = vmul.f32 %v4522_v33, %v3556_v7  ;;  %v3551_v62 = vmul.f32 %v3391_v44, %v11094_v15  ;;  %v11096_v28 = vld [vmem:[#allocation154_spill] sm:$0xff]  ;;  %v11102_v23 = vld [vmem:[#allocation33_spill] sm:$0xff] }
 0x3d2   : > { %v4033_v13 = vsub.f32 %v3845_v17, %v10866_v61  ;;  %v4034_v14 = vsub.f32 %v3845_v17, %v10867_v56  ;;  %v4157_v45 = vand.u32 2147483647, %v3997_v18  ;;  %4789 = vmatpush.msrb.mxu0 %v4681_v59  ;;  %v4679_v19 = vmul.f32 %v4519_v49, %v3553_v5  ;;  %v11098_v33 = vld [vmem:[#allocation50_spill] sm:$0xff]  ;;  %v11100_v5 = vld [vmem:[#allocation179_spill] sm:$0xff]  ;;  %v11101_v59 = vld [vmem:[#allocation56_spill] sm:$0xff] }
 0x3d3   : > { %v3230_v6 = vsub.f32 1.0, %v9748_v43  ;;  %v2905_v35 = vsub.f32 %v11095_v29, %v11050_v39  ;;  %v3552_v51 = vmul.f32 %v3392_v60, %v11096_v28  ;;  %4889 = vmatpush.msra.mxu1 %v4682_v37  ;;  %4835 = vmatpush.msrb.mxu2 %v11097_v10  ;;  %v4680_v44 = vmul.f32 %v4520_v26, %v11098_v33  ;;  %v3837_v26 = vpop.permute.xlu2 %3836 }
 0x3d4   : > { %v3223_v7 = vsub.f32 1.0, %v11099_v8  ;;  %v4313_v52 = vsub.f32 1.0, %v4153_v30  ;;  %v4317_v17 = vsub.f32 1.0, %v4157_v45  ;;  %4790 = vmatpush.msrb.mxu0 %v4679_v19  ;;  %v4677_v18 = vmul.f32 %v4517_v9, %v3551_v62 }
 0x3d5   : > { %v2906_v43 = vsub.f32 %v11095_v29, %v11054_v53  ;;  %v4475_v50 = vmax.f32 %v4315_v3, 0.0  ;;  %4890 = vmatpush.msra.mxu1 %v4680_v44  ;;  %4836 = vmatpush.msrb.mxu2 %v11101_v59  ;;  %v4678_v60 = vmul.f32 %v4518_v40, %v3552_v51  ;;  %v2899_v37 = vsub.f32 %v11102_v23, %v11050_v39  ;;  %v11103_v29 = vld [vmem:[#allocation68_spill] sm:$0xff]  ;;  %v3833_v40 = vpop.permute.xlu0 %3832 }
 0x3d6   : > { %v4193_v15 = vand.u32 2147483647, %v4033_v13  ;;  %v4194_v28 = vand.u32 2147483647, %v4034_v14  ;;  %v4477_v30 = vmax.f32 %v4317_v17, 0.0  ;;  %4791 = vmatpush.msrb.mxu0 %v4677_v18  ;;  %v2900_v9 = vsub.f32 %v11102_v23, %v11054_v53  ;;  %v3849_v3 = vpop.permute.xlu1 %3848  ;;  %v11104_v13 = vld [vmem:[#allocation95_spill] sm:$0xff] }
 0x3d7   : > { %v3389_v62 = vmax.f32 %v3229_v32, 0.0  ;;  %v3390_v45 = vmax.f32 %v3230_v6, 0.0  ;;  %v3065_v19 = vand.u32 2147483647, %v2905_v35  ;;  %4891 = vmatpush.msra.mxu1 %v4678_v60  ;;  %4837 = vmatpush.msrb.mxu2 %v11103_v29  ;;  %v4473_v10 = vmax.f32 %v4313_v52, 0.0  ;;  %v11105_v6 = vld [vmem:[#allocation122_spill] sm:$0xff] }
 0x3d8   : > { %v4035_v51 = vsub.f32 %v3849_v3, %v10866_v61  ;;  %v4036_v39 = vsub.f32 %v3849_v3, %v10867_v56  ;;  %v4637_v14 = vmul.f32 %v4477_v30, %v11104_v13  ;;  %4838 = vmatmul.f32.vlgmr.msrb.gmra.mxu2 %v9554_v4  ;;  %v3066_v33 = vand.u32 2147483647, %v2906_v43  ;;  %v11106_v23 = vld [vmem:[#allocation158_spill] sm:$0xff] }
 0x3d9   : > { %v4029_v44 = vsub.f32 %v3837_v26, %v10866_v61  ;;  %v4030_v32 = vsub.f32 %v3837_v26, %v10867_v56  ;;  %v4635_v35 = vmul.f32 %v4475_v50, %v11105_v6  ;;  %v4353_v17 = vsub.f32 1.0, %v4193_v15  ;;  %v11107_v26 = vld [vmem:[#allocation107_spill] sm:$0xff] }
 0x3da   : > { %v4354_v18 = vsub.f32 1.0, %v4194_v28  ;;  %v4195_v59 = vand.u32 2147483647, %v4035_v51  ;;  %v4196_v52 = vand.u32 2147483647, %v4036_v39  ;;  %4775 = vmatpush.msra.mxu3 %v4637_v14  ;;  %v3550_v3 = vmul.f32 %v3390_v45, %v11106_v23  ;;  %v11108_v51 = vld [vmem:[#allocation157_spill] sm:$0xff] }
 0x3db   : > { %v9815_v60 = vand.u32 2147483647, %v2899_v37  ;;  %v4027_v30 = vsub.f32 %v3833_v40, %v10866_v61  ;;  %v4028_v4 = vsub.f32 %v3833_v40, %v10867_v56  ;;  %v3225_v43 = vsub.f32 1.0, %v3065_v19  ;;  %v9825_v37 = vld [vmem:[%s9984_s2 + $0x18] sm:$0xff] }
 0x3dc   : > { %v4355_v29 = vsub.f32 1.0, %v4195_v59  ;;  %v4356_v13 = vsub.f32 1.0, %v4196_v52  ;;  %4776 = vmatpush.msra.mxu3 %v4635_v35  ;;  %v4633_v49 = vmul.f32 %v4473_v10, %v11107_v26  ;;  %v3226_v50 = vsub.f32 1.0, %v3066_v33  ;;  %v11109_v10 = vld [vmem:[#allocation131_spill] sm:$0xff]  ;;  %v11110_v33 = vld [vmem:[#allocation178_spill] sm:$0xff] }
 0x3dd   : > { %v4189_v15 = vand.u32 2147483647, %v4029_v44  ;;  %v4190_v28 = vand.u32 2147483647, %v4030_v32  ;;  %v3549_v39 = vmul.f32 %v3389_v62, %v11108_v51  ;;  %v4513_v45 = vmax.f32 %v4353_v17, 0.0 }
 0x3de   : > { %v4514_v14 = vmax.f32 %v4354_v18, 0.0  ;;  %v4515_v6 = vmax.f32 %v4355_v29, 0.0  ;;  %v4516_v40 = vmax.f32 %v4356_v13, 0.0  ;;  %4777 = vmatpush.msra.mxu3 %v4633_v49  ;;  %v3060_v19 = vand.u32 2147483647, %v2900_v9  ;;  %v3841_v52 = vpop.permute.xlu1 %3840  ;;  %v11111_v29 = vld [vmem:[#allocation132_spill] sm:$0xff] }
 0x3df   : > { %v4187_v59 = vand.u32 2147483647, %v4027_v30  ;;  %v4188_v35 = vand.u32 2147483647, %v4028_v4  ;;  %v3547_v44 = vmul.f32 %v11110_v33, %v11109_v10  ;;  %v4031_v62 = vsub.f32 %v3841_v52, %v10866_v61  ;;  %4778 = vmatmul.f32.vlgmr.msra.gmra.mxu3 %v9825_v37 }
 0x3e0   : > { %4842 = vmatpush.msrb.mxu3 %v9435_v38  ;;  %v4032_v32 = vsub.f32 %v3841_v52, %v10867_v56  ;;  %v4675_v23 = vmul.f32 %v4515_v6, %v3549_v39  ;;  %v4676_v26 = vmul.f32 %v4516_v40, %v3550_v3  ;;  %v3385_v17 = vmax.f32 %v3225_v43, 0.0 }
 0x3e1   : > { %v3386_v18 = vmax.f32 %v3226_v50, 0.0  ;;  %v4349_v49 = vsub.f32 1.0, %v4189_v15  ;;  %v4350_v9 = vsub.f32 1.0, %v4190_v28  ;;  %v4191_v30 = vand.u32 2147483647, %v4031_v62  ;;  %v11113_v50 = vld [vmem:[#allocation117_spill] sm:$0xff] }
 0x3e2   : > { %4843 = vmatpush.msrb.mxu3 %v9548_v36  ;;  %v4192_v4 = vand.u32 2147483647, %v4032_v32  ;;  %4792 = vmatpush.msrb.mxu0 %v4675_v23  ;;  %v4673_v38 = vmul.f32 %v4513_v45, %v3547_v44  ;;  %v4674_v13 = vmul.f32 %v4514_v14, %v11111_v29  ;;  %v3383_v51 = vmax.f32 %v3223_v7, 0.0  ;;  %v11115_v28 = vld [vmem:[#allocation176_spill] sm:$0xff]  ;;  %v11117_v14 = vld [vmem:[#allocation141_spill] sm:$0xff] }
 0x3e3   : > { %4892 = vmatpush.msra.mxu1 %v4676_v26  ;;  %v11112_v3 = vsub.f32 1.0, %v11100_v5  ;;  %v4347_v6 = vsub.f32 1.0, %v4187_v59  ;;  %v4348_v43 = vsub.f32 1.0, %v4188_v35  ;;  %v11114_v15 = vsub.f32 1.0, %v11113_v50  ;;  %v11118_v59 = vld [vmem:[#allocation156_spill] sm:$0xff] }
 0x3e4   : > { %4844 = vmatpush.msrb.mxu3 %v9469_v1  ;;  %v11116_v40 = vsub.f32 1.0, %v11115_v28  ;;  %v4351_v10 = vsub.f32 1.0, %v4191_v30  ;;  %v4352_v45 = vsub.f32 1.0, %v4192_v4  ;;  %4793 = vmatpush.msrb.mxu0 %v4673_v38  ;;  %v3219_v8 = vsub.f32 1.0, %v9815_v60  ;;  %v11119_v32 = vld [vmem:[#allocation152_spill] sm:$0xff]  ;;  %v11120_v38 = vld [vmem:[#allocation143_spill] sm:$0xff] }
 0x3e5   : > { %v3384_v39 = vmax.f32 %v11112_v3, 0.0  ;;  %v3381_v36 = vmax.f32 %v11114_v15, 0.0  ;;  %4893 = vmatpush.msra.mxu1 %v4674_v13  ;;  %v3220_v7 = vsub.f32 1.0, %v3060_v19  ;;  %v3546_v5 = vmul.f32 %v3386_v18, %v11117_v14  ;;  %v11122_v3 = vld [vmem:[#allocation133_spill] sm:$0xff]  ;;  %v11123_v50 = vld [vmem:[#allocation40_spill] sm:$0xff] }
 0x3e6   : > { %v3382_v52 = vmax.f32 %v11116_v40, 0.0  ;;  %4845 = vmatpush.msrb.mxu3 %v9479_v22  ;;  %v3545_v35 = vmul.f32 %v3385_v17, %v11118_v59  ;;  %v4509_v1 = vmax.f32 %v4349_v49, 0.0  ;;  %v4510_v33 = vmax.f32 %v4350_v9, 0.0  ;;  %v3829_v4 = vpop.permute.xlu1 %3828  ;;  %v11121_v17 = vld [vmem:[#allocation123_spill] sm:$0xff]  ;;  %v11125_v28 = vld [vmem:[#allocation44_spill] sm:$0xff] }
 0x3e7   : > { %v4511_v44 = vmax.f32 %v4351_v10, 0.0  ;;  %v4512_v62 = vmax.f32 %v4352_v45, 0.0  ;;  %v3544_v23 = vmul.f32 %v3384_v39, %v11119_v32  ;;  %v4507_v26 = vmax.f32 %v4347_v6, 0.0  ;;  %v11126_v40 = vld [vmem:[#allocation171_spill] sm:$0xff]  ;;  %v11127_v45 = vld [vmem:[#allocation150_spill] sm:$0xff] }
 0x3e8   : > { %v4508_v30 = vmax.f32 %v4348_v43, 0.0  ;;  %4846 = vmatpush.msrb.mxu3 %v9625_v63  ;;  %v3543_v60 = vmul.f32 %v3383_v51, %v11120_v38  ;;  %v4025_v19 = vsub.f32 %v3829_v4, %v10866_v61  ;;  %v4026_v18 = vsub.f32 %v3829_v4, %v10867_v56  ;;  %v11124_v61 = vld [vmem:[#allocation48_spill] sm:$0xff] }
 0x3e9   : > { %v4671_v22 = vmul.f32 %v4511_v44, %v3545_v35  ;;  %v4672_v29 = vmul.f32 %v4512_v62, %v3546_v5  ;;  %v3542_v49 = vmul.f32 %v3382_v52, %v11121_v17  ;;  %v3379_v9 = vmax.f32 %v3219_v8, 0.0  ;;  %v11128_v52 = vld [vmem:[#allocation144_spill] sm:$0xff]  ;;  %v11133_v62 = vld [vmem:[#allocation42_spill] sm:$0xff] }
 0x3ea   : > { %v3380_v13 = vmax.f32 %v3220_v7, 0.0  ;;  %4847 = vmatpush.msrb.mxu3 %v9557_v55  ;;  %v3541_v39 = vmul.f32 %v3381_v36, %v11122_v3  ;;  %v4185_v6 = vand.u32 2147483647, %v4025_v19  ;;  %v4186_v43 = vand.u32 2147483647, %v4026_v18  ;;  %v11129_v55 = vld [vmem:[#allocation149_spill] sm:$0xff] }
 0x3eb   : > { %4794 = vmatpush.msrb.mxu0 %v4671_v22  ;;  %4894 = vmatpush.msra.mxu1 %v4672_v29  ;;  %v4669_v63 = vmul.f32 %v4509_v1, %v3543_v60  ;;  %v4670_v51 = vmul.f32 %v4510_v33, %v3544_v23  ;;  %v781_v15 = vsub.f32 %v11124_v61, %v11123_v50  ;;  %v11130_v7 = vld [vmem:[#allocation135_spill] sm:$0xff]  ;;  %v11131_v1 = vld [vmem:[#allocation34_spill] sm:$0xff] }
 0x3ec   : > { %v1752_v10 = vsub.f32 %v11126_v40, %v11125_v28  ;;  %v2414_v8 = vmul.f32 %v11128_v52, %v11127_v45  ;;  %4848 = vmatpush.msrb.mxu3 %v9402_v20  ;;  %v2413_v36 = vmul.f32 %v11130_v7, %v11129_v55  ;;  %v4345_v14 = vsub.f32 1.0, %v4185_v6  ;;  %v11134_v23 = vld [vmem:[#allocation170_spill] sm:$0xff]  ;;  %v11136_v18 = vld [vmem:[#allocation47_spill] sm:$0xff] }
 0x3ed   : > { %v4346_v5 = vsub.f32 1.0, %v4186_v43  ;;  %4795 = vmatpush.msrb.mxu0 %v4669_v63  ;;  %4895 = vmatpush.msra.mxu1 %v4670_v51  ;;  %v4667_v59 = vmul.f32 %v4507_v26, %v3541_v39  ;;  %v4668_v35 = vmul.f32 %v4508_v30, %v3542_v49  ;;  %v11132_v33 = vsub.f32 %v11131_v1, %v11123_v50  ;;  %v11135_v26 = vld [vmem:[#allocation43_spill] sm:$0xff]  ;;  %v11138_v49 = vld [vmem:[#allocation106_spill] sm:$0xff]  ;;  %v11139_v63 = vld [vmem:[#allocation8_spill] sm:$0xff] }
 0x3ee   : > { %v777_v32 = vsub.f32 %v11133_v62, %v11123_v50  ;;  %v1746_v4 = vsub.f32 %v11134_v23, %v11125_v28  ;;  %4849 = vmatpush.msrb.mxu3 %v9515_v47  ;;  %v3540_v20 = vmul.f32 %v3380_v13, %v2414_v8  ;;  %v4505_v38 = vmax.f32 %v4345_v14, 0.0  ;;  %v11142_v55 = vld [vmem:[#allocation174_spill] sm:$0xff]  ;;  %v11144_v1 = vld [vmem:[#allocation60_spill] sm:$0xff] }
 0x3ef   : > { %v945_v44 = vand.u32 2147483647, %v11132_v33  ;;  %v4506_v60 = vmax.f32 %v4346_v5, 0.0  ;;  %4796 = vmatpush.msrb.mxu0 %v4667_v59  ;;  %4896 = vmatpush.msra.mxu1 %v4668_v35  ;;  %v3539_v19 = vmul.f32 %v3379_v9, %v2413_v36  ;;  %v775_v30 = vsub.f32 %v11135_v26, %v11123_v50  ;;  %v4701_v9 = vld [vmem:[%s9984_s2 + $0x20] sm:$0xff]  ;;  %v11143_v5 = vld [vmem:[#allocation14_spill] sm:$0xff]  ;;  %v11148_v26 = vld [vmem:[#allocation76_spill] sm:$0xff] }
 0x3f0   : > { %v11137_v22 = vsub.f32 %v11136_v18, %v11123_v50  ;;  %v1912_v17 = vand.u32 2147483647, %v1752_v10  ;;  %4850 = vmatpush.msrb.mxu3 %v9408_v2  ;;  %v1099_v3 = vsub.f32 1.0, %v11138_v49  ;;  %v941_v39 = vand.u32 2147483647, %v781_v15  ;;  %v11140_v50 = vld [vmem:[#allocation175_spill] sm:$0xff] }
 0x3f1   : > { %v4665_v47 = vmul.f32 %v4505_v38, %v3539_v19  ;;  %v4666_v13 = vmul.f32 %v4506_v60, %v3540_v20  ;;  %v1105_v6 = vsub.f32 1.0, %v945_v44  ;;  %v1906_v43 = vand.u32 2147483647, %v1746_v4  ;;  %v11141_v2 = vld [vmem:[#allocation7_spill] sm:$0xff]  ;;  %v11145_v44 = vld [vmem:[#allocation86_spill] sm:$0xff]  ;;  %v11146_v38 = vld [vmem:[#allocation101_spill] sm:$0xff] }
 0x3f2   : > { %v943_v29 = vand.u32 2147483647, %v11137_v22  ;;  %4851 = vmatpush.msrb.mxu3 %v11139_v63  ;;  %v9884_v51 = vand.u32 2147483647, %v777_v32  ;;  %v1750_v61 = vsub.f32 %v11140_v50, %v11125_v28  ;;  %v2878_v40 = vsub.f32 %v11141_v2, %v11054_v53  ;;  %v11150_v49 = vld [vmem:[#allocation31_spill] sm:$0xff] }
 0x3f3   : > { %4797 = vmatpush.msrb.mxu0 %v4665_v47  ;;  %4897 = vmatpush.msra.mxu1 %v4666_v13  ;;  %v9890_v15 = vand.u32 2147483647, %v775_v30  ;;  %v2072_v45 = vsub.f32 1.0, %v1912_v17  ;;  %v9894_v52 = vmax.f32 %v1099_v3, 0.0  ;;  %v1101_v8 = vsub.f32 1.0, %v941_v39 }
 0x3f4   : > { %v1103_v10 = vsub.f32 1.0, %v943_v29  ;;  %4852 = vmatpush.msrb.mxu3 %v9482_v54  ;;  %v1748_v7 = vsub.f32 %v11142_v55, %v11125_v28  ;;  %4798 = vmatmul.f32.vlgmr.msrb.gmra.mxu0 %v4701_v9  ;;  %v1265_v36 = vmax.f32 %v1105_v6, 0.0  ;;  %v2066_v14 = vsub.f32 1.0, %v1906_v43  ;;  %v11152_v43 = vld [vmem:[#allocation21_spill] sm:$0xff] }
 0x3f5   : > { %4862 = vmatpush.msra.mxu0 %v9423_v58  ;;  %4898 = vmatmul.f32.vlgmr.msra.gmra.mxu1 %v4701_v9  ;;  %v2876_v59 = vsub.f32 %v11143_v5, %v11054_v53  ;;  %v4004_v35 = vsub.f32 %v9724_v46, %v10867_v56  ;;  %v1097_v58 = vsub.f32 1.0, %v9884_v51  ;;  %v1910_v54 = vand.u32 2147483647, %v1750_v61 }
 0x3f6   : > { %4853 = vmatpush.msrb.mxu3 %v11144_v1  ;;  %v3038_v33 = vand.u32 2147483647, %v2878_v40  ;;  %v2874_v62 = vsub.f32 %v11145_v44, %v11054_v53  ;;  %v1095_v32 = vsub.f32 1.0, %v9890_v15  ;;  %v1263_v23 = vmax.f32 %v1103_v10, 0.0 }
 0x3f7   : > { %4863 = vmatpush.msra.mxu0 %v9578_v25  ;;  %v2232_v4 = vmax.f32 %v2072_v45, 0.0  ;;  %v4002_v20 = vsub.f32 %v9664_v31, %v10867_v56  ;;  %v1261_v46 = vmax.f32 %v1101_v8, 0.0  ;;  %v11147_v25 = vld [vmem:[#allocation173_spill] sm:$0xff]  ;;  %v1908_v19 = vand.u32 2147483647, %v1748_v7  ;;  %v11149_v31 = vld [vmem:[#allocation80_spill] sm:$0xff] }
 0x3f8   : > { %4854 = vmatpush.msrb.mxu3 %v11146_v38  ;;  %v1744_v60 = vsub.f32 %v11147_v25, %v11125_v28  ;;  %v2872_v30 = vsub.f32 %v11148_v26, %v11054_v53  ;;  %v9916_v18 = vmax.f32 %v2066_v14, 0.0  ;;  %v3036_v22 = vand.u32 2147483647, %v2876_v59 }
 0x3f9   : > { %4864 = vmatpush.msra.mxu0 %v9518_v12  ;;  %v4000_v29 = vsub.f32 %v9687_v57, %v10867_v56  ;;  %v4164_v17 = vand.u32 2147483647, %v4004_v35  ;;  %v11151_v12 = vld [vmem:[#allocation172_spill] sm:$0xff]  ;;  %v2070_v39 = vsub.f32 1.0, %v1910_v54  ;;  %v3198_v47 = vsub.f32 1.0, %v3038_v33  ;;  %v11153_v57 = vld [vmem:[#allocation66_spill] sm:$0xff] }
 0x3fa   : > { %4855 = vmatpush.msrb.mxu3 %v11149_v31  ;;  %v1742_v3 = vsub.f32 %v11151_v12, %v11125_v28  ;;  %v3034_v13 = vand.u32 2147483647, %v2874_v62  ;;  %v2392_v6 = vmul.f32 %v2232_v4, %v1265_v36  ;;  %v2870_v63 = vsub.f32 %v11152_v43, %v11054_v53  ;;  %v11154_v28 = vld [vmem:[#allocation85_spill] sm:$0xff]  ;;  %v11155_v36 = vld [vmem:[#allocation82_spill] sm:$0xff] }
 0x3fb   : > { %4865 = vmatpush.msra.mxu0 %v11150_v49  ;;  %v4162_v9 = vand.u32 2147483647, %v4002_v20  ;;  %v3998_v50 = vsub.f32 %v9779_v48, %v10867_v56  ;;  %v1904_v61 = vand.u32 2147483647, %v1744_v60  ;;  %v2068_v2 = vsub.f32 1.0, %v1908_v19 }
 0x3fc   : > { %4856 = vmatpush.msrb.mxu3 %v11153_v57  ;;  %v3032_v40 = vand.u32 2147483647, %v2872_v30  ;;  %v2868_v10 = vsub.f32 %v11154_v28, %v11054_v53  ;;  %v3196_v45 = vsub.f32 1.0, %v3036_v22  ;;  %v4160_v8 = vand.u32 2147483647, %v4000_v29 }
 0x3fd   : > { %4866 = vmatpush.msra.mxu0 %v9644_v41  ;;  %v4324_v55 = vsub.f32 1.0, %v4164_v17  ;;  %v3996_v7 = vsub.f32 %v9742_v0, %v10867_v56  ;;  %v1902_v48 = vand.u32 2147483647, %v1742_v3  ;;  %v2230_v14 = vmax.f32 %v2070_v39, 0.0 }
 0x3fe   : > { %4857 = vmatpush.msrb.mxu3 %v11155_v36  ;;  %v3358_v5 = vmax.f32 %v3198_v47, 0.0  ;;  %v3194_v41 = vsub.f32 1.0, %v3034_v13  ;;  %v3030_v59 = vand.u32 2147483647, %v2870_v63  ;;  %v4322_v35 = vsub.f32 1.0, %v4162_v9 }
 0x3ff   : > { %4867 = vmatpush.msra.mxu0 %v9585_v34  ;;  %4858 = vmatmul.f32.vlgmr.msrb.gmra.mxu3 %v9775_v11  ;;  %v3994_v53 = vsub.f32 %v9758_v24, %v10867_v56  ;;  %v4158_v1 = vand.u32 2147483647, %v3998_v50  ;;  %v2064_v54 = vsub.f32 1.0, %v1904_v61  ;;  %v2228_v0 = vmax.f32 %v2068_v2, 0.0 }
 0x400   : > { %v3192_v33 = vsub.f32 1.0, %v3032_v40  ;;  %v3028_v44 = vand.u32 2147483647, %v2868_v10  ;;  %v3356_v62 = vmax.f32 %v3196_v45, 0.0  ;;  %v4320_v34 = vsub.f32 1.0, %v4160_v8 }
 0x401   : > { %4868 = vmatpush.msra.mxu0 %v9590_v27  ;;  %v4484_v4 = vmax.f32 %v4324_v55, 0.0  ;;  %v4156_v20 = vand.u32 2147483647, %v3996_v7  ;;  %v2062_v38 = vsub.f32 1.0, %v1902_v48  ;;  %v2390_v11 = vmul.f32 %v2230_v14, %v1263_v23 }
 0x402   : > { %v3518_v25 = vmul.f32 %v3358_v5, %v2392_v6  ;;  %v3354_v60 = vmax.f32 %v3194_v41, 0.0  ;;  %v3190_v19 = vsub.f32 1.0, %v3030_v59  ;;  %v4482_v26 = vmax.f32 %v4322_v35, 0.0 }
 0x403   : > { %4869 = vmatpush.msra.mxu0 %v9712_v42  ;;  %v4154_v56 = vand.u32 2147483647, %v3994_v53  ;;  %v4318_v24 = vsub.f32 1.0, %v4158_v1  ;;  %v2224_v27 = vmax.f32 %v2064_v54, 0.0  ;;  %v2388_v30 = vmul.f32 %v2228_v0, %v1261_v46 }
 0x404   : > { %v3352_v22 = vmax.f32 %v3192_v33, 0.0  ;;  %v3188_v29 = vsub.f32 1.0, %v3028_v44  ;;  %v3516_v17 = vmul.f32 %v3356_v62, %v2390_v11  ;;  %v4480_v31 = vmax.f32 %v4320_v34, 0.0 }
 0x405   : > { %4870 = vmatpush.msra.mxu0 %v9649_v16  ;;  %v4316_v49 = vsub.f32 1.0, %v4156_v20  ;;  %v4644_v42 = vmul.f32 %v4484_v4, %v3518_v25  ;;  %v1257_v23 = vmax.f32 %v1097_v58, 0.0  ;;  %v2386_v12 = vmul.f32 %v9916_v18, %v9894_v52 }
 0x406   : > { %v2222_v3 = vmax.f32 %v2062_v38, 0.0  ;;  %v3514_v39 = vmul.f32 %v3354_v60, %v2388_v30  ;;  %v3350_v47 = vmax.f32 %v3190_v19, 0.0  ;;  %v4314_v16 = vsub.f32 1.0, %v4154_v56 }
 0x407   : > { %4871 = vmatpush.msra.mxu0 %v9653_v21  ;;  %v4478_v13 = vmax.f32 %v4318_v24, 0.0  ;;  %v4642_v46 = vmul.f32 %v4482_v26, %v3516_v17  ;;  %v1255_v6 = vmax.f32 %v1095_v32, 0.0  ;;  %v2384_v43 = vmul.f32 %v2224_v27, %v1257_v23 }
 0x408   : > { %v3512_v63 = vmul.f32 %v3352_v22, %v2386_v12  ;;  %v3348_v21 = vmax.f32 %v3188_v29, 0.0  ;;  %v4476_v9 = vmax.f32 %v4316_v49, 0.0  ;;  %v4640_v51 = vmul.f32 %v4480_v31, %v3514_v39 }
 0x409   : > { %4872 = vmatpush.msra.mxu0 %v4644_v42  ;;  %v2382_v58 = vmul.f32 %v2222_v3, %v1255_v6  ;;  %v3510_v50 = vmul.f32 %v3350_v47, %v2384_v43  ;;  %v4474_v57 = vmax.f32 %v4314_v16, 0.0 }
 0x40a   : > { %v4638_v52 = vmul.f32 %v4478_v13, %v3512_v63 }
 0x40b   : > { %4873 = vmatpush.msra.mxu0 %v4642_v46  ;;  %v3508_v18 = vmul.f32 %v3348_v21, %v2382_v58  ;;  %v4636_v61 = vmul.f32 %v4476_v9, %v3510_v50 }
 0x40d   : > { %4874 = vmatpush.msra.mxu0 %v4640_v51  ;;  %v4634_v2 = vmul.f32 %v4474_v57, %v3508_v18 }
 0x40f   : > { %4875 = vmatpush.msra.mxu0 %v4638_v52  ;;  %v4739_v15 = vpop.f32.mrf.mxu1 }
 0x411   : > { %4876 = vmatpush.msra.mxu0 %v4636_v61 }
 0x413   : > { %4877 = vmatpush.msra.mxu0 %v4634_v2 }
 0x414   : > { %4878 = vmatmul.f32.vlgmr.msra.gmra.mxu0 %v9825_v37 }
 0x44a   : > { %v4719_v32 = vpop.f32.mrf.mxu0 }
 0x44b   : > { %v4740_v40 = vadd.f32 %v4739_v15, %v4719_v32 }
 0x44c   : > { %v4819_v36 = vpop.f32.mrf.mxu1 }
 0x451   : > { %v4759_v28 = vpop.f32.mrf.mxu2 }
 0x452   : > { %v4760_v10 = vadd.f32 %v4759_v28, %v4740_v40 }
 0x45b   : > { %v4839_v48 = vpop.f32.mrf.mxu2 }
 0x45c   : > { %v4840_v14 = vadd.f32 %v4839_v48, %v4819_v36 }
 0x462   : > { %v4779_v45 = vpop.f32.mrf.mxu3 }
 0x463   : > { %v4780_v8 = vadd.f32 %v4779_v45, %v4760_v10 }
 0x471   : > { %v4799_v55 = vpop.f32.mrf.mxu0 }
 0x472   : > { %v4800_v7 = vadd.f32 %v4799_v55, %v4780_v8  ;;  %v4899_v59 = vpop.f32.mrf.mxu1 }
 0x474   : > { %4902 = vst [vmem:[%s164_s27] sm:$0xff] %v4800_v7 }
 0x482   : > { %v4859_v5 = vpop.f32.mrf.mxu3 }
 0x483   : > { %v4860_v37 = vadd.f32 %v4859_v5, %v4840_v14 }
 0x491   : > { %v4879_v41 = vpop.f32.mrf.mxu0 }
 0x492   : > { %v4880_v35 = vadd.f32 %v4879_v41, %v4860_v37 }
 0x494   : > { %v4900_v53 = vadd.f32 %v4899_v59, %v4880_v35 }
 0x496   : > { %4903 = vst [vmem:[%s164_s27 + $0x8] sm:$0xff] %v4900_v53 }
 0x497   : > { %5279 = shalt.err (!%p5276_p3)
}
 0x498   : > { %4996 = dma.vmem_to_hbm [thread:$0]  (%p5378_p5), %s4919_s5, 256, %s4921_s6, %s4905_s7  }
 0x499 PF: > { %p5002_p4 = scmp.ge.s32.totalorder %s5314_s15, 2  ;;  %s4932_s20 = sand.u32 1, %s5302_s12  }
 0x49a   : > { %s4933_s25 = scalar_lea.sflag [#allocation3], %s4932_s20 }
 0x49b   : > { %p4999_p7 = pnand %p5002_p4, %p5382_p6 }
 0x49d   : > { %p5000_p8 = pneg %p4999_p7 }
 0x49f   : > { %5297 = dma.done.wait (%p5000_p8), %s4933_s25, 256  }
 0x4a0   : > { %5299 = vsyncadd (%p5000_p8), %s4933_s25, 4294967040  ;;  %p13_p9 = scmp.ge.s32.totalorder %s5365_s18, 4   ;;  %s11156_s12 = smov %s5306_s13 }
 0x4a1   : > { %s11157_s13 = smov %s5310_s14  ;;  %s11158_s14 = smov %s5376_s21 }
 0x4a2   : > { %s11159_s15 = smov %s5365_s18  ;;  %15 = sbr.rel (!%p13_p9) target bundleno = 3 (0x3), region = 67 }
 0x4a7   :  { %4939 = vsyncpa [#allocation3], 1 }
 0x4a8   :  { %4941 = vsyncpa [#allocation3 + $0x1], 1 }

</bundles_post_ra>
